<compile_context>
chip_gen: v7x
topology: tpu7x:2x2x1
jax: 0.10.0
libtpu: 0.0.40
codegen_flags: <defaults>
</compile_context>

<pallas_src>
import functools

import jax
import jax.numpy as jnp
from jax.experimental import pallas as pl
from jax.experimental.pallas import tpu as pltpu

EPS = 1e-5


def _round_up(x, m):
    return (x + m - 1) // m * m


def _pick_tile(dim, candidates):
    for c in candidates:
        if dim % c == 0:
            return c
    return candidates[-1]


@functools.lru_cache(maxsize=None)
def _vmem_limit_bytes():
    # Portable VMEM budget: ~75% of the physical per-core VMEM (v7x has 64 MiB).
    cap = 64 * 1024 * 1024
    try:
        info = pltpu.get_tpu_info()
        c = getattr(info, "vmem_capacity_bytes", None)
        if c:
            cap = int(c)
    except Exception:
        pass
    return int(cap * 3 // 4)


# --------------------------------------------------------------------------
# Pallas fused matmul kernel:
#   out_bf16 = act( f32_acc(X_bf16 @ W_bf16) + bias_f32 [+ residual_bf16] )
# Accumulation in an f32 VMEM scratch; bf16 written only in the last-k step.
# --------------------------------------------------------------------------
def _make_matmul_kernel(has_residual, relu):
    def kernel(x_ref, w_ref, b_ref, *rest):
        if has_residual:
            r_ref, o_ref, acc_ref = rest
        else:
            o_ref, acc_ref = rest
        k = pl.program_id(2)

        @pl.when(k == 0)
        def _():
            acc_ref[...] = jnp.zeros_like(acc_ref)

        acc_ref[...] += jnp.dot(
            x_ref[...], w_ref[...], preferred_element_type=jnp.float32
        )

        @pl.when(k == pl.num_programs(2) - 1)
        def _():
            # Epilogue stays in f32 (v5e has no bf16 VPU path); cast at store.
            y = acc_ref[...] + b_ref[...]
            if has_residual:
                y = y + r_ref[...].astype(jnp.float32)
            if relu:
                y = jnp.maximum(y, 0.0)
            o_ref[...] = y.astype(o_ref.dtype)

    return kernel


@functools.lru_cache(maxsize=None)
def _build_matmul_call(M_pad, N_pad, K_pad, TM, TN, TK, has_res, relu):
    in_specs = [
        pl.BlockSpec((TM, TK), lambda i, j, k: (i, k)),   # X patches (bf16)
        pl.BlockSpec((TK, TN), lambda i, j, k: (k, j)),   # packed W  (bf16)
        pl.BlockSpec((1, TN), lambda i, j, k: (0, j)),    # folded bias (f32)
    ]
    if has_res:
        in_specs.append(pl.BlockSpec((TM, TN), lambda i, j, k: (i, j)))  # residual (bf16)

    flops = 2 * M_pad * N_pad * K_pad
    bytes_accessed = (
        M_pad * K_pad * 2 + K_pad * N_pad * 2 + M_pad * N_pad * 2 + N_pad * 4
        + (M_pad * N_pad * 2 if has_res else 0)
    )

    return pl.pallas_call(
        _make_matmul_kernel(has_res, relu),
        out_shape=jax.ShapeDtypeStruct((M_pad, N_pad), jnp.bfloat16),
        grid_spec=pltpu.PrefetchScalarGridSpec(
            num_scalar_prefetch=0,
            grid=(M_pad // TM, N_pad // TN, K_pad // TK),
            in_specs=in_specs,
            out_specs=pl.BlockSpec((TM, TN), lambda i, j, k: (i, j)),
            scratch_shapes=[pltpu.VMEM((TM, TN), jnp.float32)],
        ),
        compiler_params=pltpu.CompilerParams(
            dimension_semantics=("parallel", "parallel", "arbitrary"),
            vmem_limit_bytes=_vmem_limit_bytes(),
        ),
        cost_estimate=pl.CostEstimate(
            flops=flops, transcendentals=0, bytes_accessed=bytes_accessed
        ),
    )


def _select_tiles(M_pad, N_pad, K_pad, has_res):
    budget = int(_vmem_limit_bytes() * 0.8)  # headroom for compiler internals

    def vmem_bytes(tm, tn, tk):
        b = (2 * tm * tk * 2        # X bf16, double-buffered
             + 2 * tk * tn * 2      # W bf16, double-buffered
             + 2 * tm * tn * 2      # bf16 out, double-buffered
             + tm * tn * 4          # f32 accumulator scratch
             + 2 * tn * 4)          # bias f32
        if has_res:
            b += 2 * tm * tn * 2
        return b

    TM = _pick_tile(M_pad, (512, 256, 128, 64, 32, 16))
    TN = _pick_tile(N_pad, (512, 256, 128))
    TK = 128
    for tk in (1024, 768, 512, 384, 256, 128):
        if K_pad % tk == 0 and vmem_bytes(TM, TN, tk) <= budget:
            TK = tk
            break
    # If still over budget (large tiles on v7x's 64 MiB), shrink TM next.
    while vmem_bytes(TM, TN, TK) > budget and TM > 16 and M_pad % (TM // 2) == 0:
        TM //= 2
    # Megacore (v7x): expose >=2 parallel output blocks so the 2nd TensorCore
    # has work. Costs only a tiny extra X/W re-read on 1-TC chips.
    if (M_pad // TM) * (N_pad // TN) < 2:
        if N_pad >= 256:
            TN = max(128, N_pad // 2)
        elif TM >= 32 and M_pad % (TM // 2) == 0:
            TM //= 2
    return TM, TN, TK


# --------------------------------------------------------------------------
# Conv2d (+ folded BN + optional residual + optional ReLU) via im2col + Pallas.
# `meta` is static Python (ints), `packed` holds the prepacked bf16 weights.
# --------------------------------------------------------------------------
def conv2d_fused(x, packed, meta, stride, pad, relu, residual=None):
    N, H, W, Cin = x.shape                      # x: NHWC bf16
    KH, KW = meta["KH"], meta["KW"]
    K, K_pad = meta["K"], meta["K_pad"]
    Nc, N_pad = meta["N"], meta["N_pad"]
    Ho = (H + 2 * pad - KH) // stride + 1
    Wo = (W + 2 * pad - KW) // stride + 1

    xp = jnp.pad(x, ((0, 0), (pad, pad), (pad, pad), (0, 0)))
    cols = []
    for dy in range(KH):
        for dx in range(KW):
            cols.append(
                xp[:, dy: dy + stride * (Ho - 1) + 1: stride,
                   dx: dx + stride * (Wo - 1) + 1: stride, :]
            )
    patches = jnp.concatenate(cols, axis=-1)    # (N, Ho, Wo, KH*KW*Cin) bf16
    M = N * Ho * Wo
    M_pad = _round_up(M, 16)                    # bf16 sublane multiple

    xm = patches.reshape(M, K)
    xm = jnp.pad(xm, ((0, M_pad - M), (0, K_pad - K)))

    has_res = residual is not None
    inputs = [xm, packed["w"], packed["b"]]
    if has_res:
        rm = residual.reshape(M, Nc).astype(jnp.bfloat16)
        inputs.append(jnp.pad(rm, ((0, M_pad - M), (0, N_pad - Nc))))

    TM, TN, TK = _select_tiles(M_pad, N_pad, K_pad, has_res)
    out = _build_matmul_call(M_pad, N_pad, K_pad, TM, TN, TK, has_res, relu)(*inputs)
    return out[:M, :Nc].reshape(N, Ho, Wo, Nc)


# --------------------------------------------------------------------------
# MaxPool 3x3 / stride 2 / pad 1 — tiny tensor, plain XLA (no Pallas launch).
# --------------------------------------------------------------------------
def maxpool_3x3_s2_p1(x):  # x: NHWC bf16
    N, H, W, C = x.shape
    Ho = (H + 2 - 3) // 2 + 1
    Wo = (W + 2 - 3) // 2 + 1
    xp = jnp.pad(x, ((0, 0), (1, 1), (1, 1), (0, 0)), constant_values=-jnp.inf)
    out = None
    for dy in range(3):
        for dx in range(3):
            win = xp[:, dy: dy + 2 * (Ho - 1) + 1: 2,
                     dx: dx + 2 * (Wo - 1) + 1: 2, :]
            out = win if out is None else jnp.maximum(out, win)
    return out


# --------------------------------------------------------------------------
# Parameter init (deterministic, matches the PyTorch module's shapes)
# --------------------------------------------------------------------------
class KeyGen:
    def __init__(self, seed):
        self._key = jax.random.PRNGKey(seed)

    def __call__(self):
        self._key, sub = jax.random.split(self._key)
        return sub


def _conv_init(kg, cout, cin, kh, kw):
    fan_in = cin * kh * kw
    w = jax.random.normal(kg(), (cout, cin, kh, kw), jnp.float32) * (2.0 / fan_in) ** 0.5
    b = jax.random.normal(kg(), (cout,), jnp.float32) * 0.01
    return w, b


def _bn_init(kg, c):
    gamma = 1.0 + 0.1 * jax.random.normal(kg(), (c,), jnp.float32)
    beta = 0.1 * jax.random.normal(kg(), (c,), jnp.float32)
    return gamma, beta


def _res_params(kg, cin, cout, use_1x1, strides):
    p = {"use_1x1": use_1x1, "strides": strides}
    p["w1"], p["b1"] = _conv_init(kg, cout, cin, 3, 3)
    p["w2"], p["b2"] = _conv_init(kg, cout, cout, 3, 3)
    if use_1x1:
        p["w3"], p["b3"] = _conv_init(kg, cout, cin, 1, 1)
    p["g1"], p["be1"] = _bn_init(kg, cout)
    p["g2"], p["be2"] = _bn_init(kg, cout)
    return p


def build_params(seed=0):
    kg = KeyGen(seed)
    params = {}
    w, b = _conv_init(kg, 64, 3, 7, 7)
    g, be = _bn_init(kg, 64)
    params["stem"] = dict(w=w, b=b, g=g, be=be)

    blocks = []
    # (in_channel, out_channel, num_residuals, first_block) as in __ResNet_34
    for cin, cout, n, first in [(64, 64, 3, True), (64, 128, 4, False),
                                (128, 256, 6, False), (256, 512, 3, False)]:
        for i in range(n):
            if i == 0 and not first:
                blocks.append(_res_params(kg, cin, cout, True, 2))
            else:
                blocks.append(_res_params(kg, cout, cout, False, 1))
    params["blocks"] = blocks

    params["fc_w"] = jax.random.normal(kg(), (512, 84), jnp.float32) * (1.0 / 512) ** 0.5
    params["fc_b"] = jax.random.normal(kg(), (84,), jnp.float32) * 0.01
    return params


# --------------------------------------------------------------------------
# One-time weight prepack: fold eval-mode BN, transpose OIHW -> (KH*KW*Cin,
# Cout), pad to (K_pad, N_pad), cast to bf16.  Static metadata goes to `arch`.
# --------------------------------------------------------------------------
def _prep_conv(w_oihw, conv_b, gamma=None, beta=None):
    Cout, Cin, KH, KW = map(int, w_oihw.shape)
    if gamma is None:            # conv without BN (the 1x1 shortcut)
        scale = jnp.ones((Cout,), jnp.float32)
        bias = conv_b
    else:                        # eval-mode BN: running_mean=0, running_var=1
        scale = gamma / jnp.sqrt(1.0 + EPS)
        bias = scale * conv_b + beta
    K, N = KH * KW * Cin, Cout
    K_pad, N_pad = _round_up(K, 128), _round_up(N, 128)
    wm = jnp.transpose(w_oihw, (2, 3, 1, 0)).reshape(K, N) * scale[None, :]
    wp = jnp.pad(wm, ((0, K_pad - K), (0, N_pad - N))).astype(jnp.bfloat16)
    bp = jnp.pad(bias.reshape(1, N), ((0, 0), (0, N_pad - N))).astype(jnp.float32)
    meta = dict(KH=KH, KW=KW, K=K, N=N, K_pad=K_pad, N_pad=N_pad)
    return dict(w=wp, b=bp), meta


def prepare_params(raw):
    packed, arch = {}, {}
    st = raw["stem"]
    packed["stem"], stem_meta = _prep_conv(st["w"], st["b"], st["g"], st["be"])
    arch["stem"] = dict(meta=stem_meta, stride=2, pad=3)

    pblocks, ablocks = [], []
    for b in raw["blocks"]:
        pb = {}
        ab = {"strides": int(b["strides"]), "use_1x1": bool(b["use_1x1"])}
        pb["c1"], ab["c1"] = _prep_conv(b["w1"], b["b1"], b["g1"], b["be1"])
        pb["c2"], ab["c2"] = _prep_conv(b["w2"], b["b2"], b["g2"], b["be2"])
        if ab["use_1x1"]:
            pb["c3"], ab["c3"] = _prep_conv(b["w3"], b["b3"])
        pblocks.append(pb)
        ablocks.append(ab)
    packed["blocks"], arch["blocks"] = pblocks, ablocks

    packed["fc_w"] = raw["fc_w"]
    packed["fc_b"] = raw["fc_b"]
    return packed, arch


# --------------------------------------------------------------------------
# Forward pass: `arch` (static Python) is closed over, `packed` is the jit arg.
# --------------------------------------------------------------------------
def residual_forward(x, pb, ab):
    s = ab["strides"]
    y = conv2d_fused(x, pb["c1"], ab["c1"], stride=s, pad=1, relu=True)
    if ab["use_1x1"]:
        identity = conv2d_fused(x, pb["c3"], ab["c3"], stride=s, pad=0, relu=False)
    else:
        identity = x
    # bn_2(conv_2(y)) + identity, then ReLU -- fused in the Pallas epilogue.
    return conv2d_fused(y, pb["c2"], ab["c2"], stride=1, pad=1, relu=True,
                        residual=identity)


def make_forward(arch):
    @jax.jit
    def forward(x_nchw, packed):
        x = jnp.transpose(x_nchw, (0, 2, 3, 1)).astype(jnp.bfloat16)  # NCHW->NHWC bf16
        st = arch["stem"]
        x = conv2d_fused(x, packed["stem"], st["meta"],
                         stride=st["stride"], pad=st["pad"], relu=True)
        x = maxpool_3x3_s2_p1(x)
        for pb, ab in zip(packed["blocks"], arch["blocks"]):
            x = residual_forward(x, pb, ab)
        # AdaptiveAvgPool2d((1,1)) + Flatten + Linear(512, 84): tiny, plain XLA.
        x = jnp.mean(x.astype(jnp.float32), axis=(1, 2))          # (N, 512)
        return jnp.dot(x, packed["fc_w"]) + packed["fc_b"]         # (N, 84)

    return forward


if __name__ == "__main__":
    raw = build_params(seed=0)
    packed, arch = prepare_params(raw)
    forward = make_forward(arch)

    x = jax.random.normal(jax.random.PRNGKey(0), (2, 3, 32, 32), jnp.float32)
    out = forward(x, packed)
    out = jax.block_until_ready(out)
    assert out.shape == (2, 84), out.shape
    assert bool(jnp.all(jnp.isfinite(out)))
    print("KERNEL_OK")
</pallas_src>

<mosaic_0001>
module attributes {stable_mosaic.version = 11 : i64} {
  func.func @kernel(%arg0: i32, %arg1: i32, %arg2: i32, %arg3: memref<256x256xbf16, #tpu.memory_space<vmem>>, %arg4: memref<256x128xbf16, #tpu.memory_space<vmem>>, %arg5: memref<1x128xf32, #tpu.memory_space<vmem>>, %arg6: memref<256x128xbf16, #tpu.memory_space<vmem>>, %arg7: memref<256x128xf32, #tpu.memory_space<vmem>>) attributes {dimension_semantics = [#tpu.dimension_semantics<parallel>, #tpu.dimension_semantics<parallel>, #tpu.dimension_semantics<arbitrary>], iteration_bounds = array<i64: 2, 1, 1>, scalar_prefetch = 0 : i64, scratch_operands = 1 : i64, tpu.core_type = #tpu.core_type<tc>, window_params = [{transform_indices = @transform_0, window_bounds = array<i64: 256, 256>}, {transform_indices = @transform_1, window_bounds = array<i64: 256, 128>}, {transform_indices = @transform_2, window_bounds = array<i64: 1, 128>}, {transform_indices = @transform_3, window_bounds = array<i64: 256, 128>}]} {
    %c0_i32 = arith.constant 0 : i32
    %0 = arith.cmpi eq, %arg2, %c0_i32 : i32
    %1 = arith.extui %0 : i1 to i32
    %c0_i32_0 = arith.constant 0 : i32
    %2 = arith.cmpi ne, %1, %c0_i32_0 : i32
    scf.if %2 {
      %cst_10 = arith.constant 0.000000e+00 : f32
      %12 = vector.broadcast %cst_10 : f32 to vector<256x128xf32>
      %c0_11 = arith.constant 0 : index
      %c0_12 = arith.constant 0 : index
      %13 = vector.load %arg7[%c0_11, %c0_12] : memref<256x128xf32, #tpu.memory_space<vmem>>, vector<256x128xf32>
      tpu.vector_store %arg7[%c0_11, %c0_12], %12 {strides = array<i32>} : memref<256x128xf32, #tpu.memory_space<vmem>>, vector<256x128xf32>,
    } else {
    }
    %c0 = arith.constant 0 : index
    %c0_1 = arith.constant 0 : index
    %3 = vector.load %arg7[%c0, %c0_1] : memref<256x128xf32, #tpu.memory_space<vmem>>, vector<256x128xf32>
    %c0_2 = arith.constant 0 : index
    %c0_3 = arith.constant 0 : index
    %4 = vector.load %arg3[%c0_2, %c0_3] : memref<256x256xbf16, #tpu.memory_space<vmem>>, vector<256x256xbf16>
    %c0_4 = arith.constant 0 : index
    %c0_5 = arith.constant 0 : index
    %5 = vector.load %arg4[%c0_4, %c0_5] : memref<256x128xbf16, #tpu.memory_space<vmem>>, vector<256x128xbf16>
    %cst = arith.constant dense<0.000000e+00> : vector<256x128xf32>
    %6 = tpu.matmul %4, %5, %cst {dimension_numbers = #tpu.dot_dimension_numbers<[1], [0], [0], [1], [0, 0, 1, 1], [], []>} : vector<256x256xbf16>, vector<256x128xbf16>, vector<256x128xf32> -> vector<256x128xf32>
    %7 = arith.addf %3, %6 : vector<256x128xf32>
    %c0_6 = arith.constant 0 : index
    %c0_7 = arith.constant 0 : index
    %8 = vector.load %arg7[%c0_6, %c0_7] : memref<256x128xf32, #tpu.memory_space<vmem>>, vector<256x128xf32>
    tpu.vector_store %arg7[%c0_6, %c0_7], %7 {strides = array<i32>} : memref<256x128xf32, #tpu.memory_space<vmem>>, vector<256x128xf32>,
    %c0_i32_8 = arith.constant 0 : i32
    %9 = arith.cmpi eq, %arg2, %c0_i32_8 : i32
    %10 = arith.extui %9 : i1 to i32
    %c0_i32_9 = arith.constant 0 : i32
    %11 = arith.cmpi ne, %10, %c0_i32_9 : i32
    scf.if %11 {
      %c0_10 = arith.constant 0 : index
      %c0_11 = arith.constant 0 : index
      %12 = vector.load %arg7[%c0_10, %c0_11] : memref<256x128xf32, #tpu.memory_space<vmem>>, vector<256x128xf32>
      %c0_12 = arith.constant 0 : index
      %c0_13 = arith.constant 0 : index
      %13 = vector.load %arg5[%c0_12, %c0_13] : memref<1x128xf32, #tpu.memory_space<vmem>>, vector<1x128xf32>
      %14 = vector.broadcast %13 : vector<1x128xf32> to vector<256x128xf32>
      %15 = arith.addf %12, %14 : vector<256x128xf32>
      %cst_14 = arith.constant 0.000000e+00 : f32
      %16 = vector.broadcast %cst_14 : f32 to vector<256x128xf32>
      %17 = arith.maximumf %15, %16 : vector<256x128xf32>
      %18 = arith.truncf %17 : vector<256x128xf32> to vector<256x128xbf16>
      %c0_15 = arith.constant 0 : index
      %c0_16 = arith.constant 0 : index
      %19 = vector.load %arg6[%c0_15, %c0_16] : memref<256x128xbf16, #tpu.memory_space<vmem>>, vector<256x128xbf16>
      tpu.vector_store %arg6[%c0_15, %c0_16], %18 {strides = array<i32>} : memref<256x128xbf16, #tpu.memory_space<vmem>>, vector<256x128xbf16>,
    } else {
    }
    return
  }
  func.func @transform_0(%arg0: i32, %arg1: i32, %arg2: i32) -> (i32, i32) {
    %c0_i32 = arith.constant 0 : i32
    return %arg0, %arg2 : i32, i32
  }
  func.func @transform_1(%arg0: i32, %arg1: i32, %arg2: i32) -> (i32, i32) {
    %c0_i32 = arith.constant 0 : i32
    return %arg2, %arg1 : i32, i32
  }
  func.func @transform_2(%arg0: i32, %arg1: i32, %arg2: i32) -> (i32, i32) {
    %c0_i32 = arith.constant 0 : i32
    %c0_i32_0 = arith.constant 0 : i32
    return %c0_i32, %arg1 : i32, i32
  }
  func.func @transform_3(%arg0: i32, %arg1: i32, %arg2: i32) -> (i32, i32) {
    %c0_i32 = arith.constant 0 : i32
    return %arg0, %arg1 : i32, i32
  }
}

module attributes {stable_mosaic.version = 11 : i64} {
  func.func @kernel(%arg0: i32, %arg1: i32, %arg2: i32, %arg3: memref<64x128xbf16, #tpu.memory_space<vmem>>, %arg4: memref<128x128xbf16, #tpu.memory_space<vmem>>, %arg5: memref<1x128xf32, #tpu.memory_space<vmem>>, %arg6: memref<64x128xbf16, #tpu.memory_space<vmem>>, %arg7: memref<64x128xf32, #tpu.memory_space<vmem>>) attributes {dimension_semantics = [#tpu.dimension_semantics<parallel>, #tpu.dimension_semantics<parallel>, #tpu.dimension_semantics<arbitrary>], iteration_bounds = array<i64: 2, 1, 5>, scalar_prefetch = 0 : i64, scratch_operands = 1 : i64, tpu.core_type = #tpu.core_type<tc>, window_params = [{transform_indices = @transform_0, window_bounds = array<i64: 64, 128>}, {transform_indices = @transform_1, window_bounds = array<i64: 128, 128>}, {transform_indices = @transform_2, window_bounds = array<i64: 1, 128>}, {transform_indices = @transform_3, window_bounds = array<i64: 64, 128>}]} {
    %c0_i32 = arith.constant 0 : i32
    %0 = arith.cmpi eq, %arg2, %c0_i32 : i32
    %1 = arith.extui %0 : i1 to i32
    %c0_i32_0 = arith.constant 0 : i32
    %2 = arith.cmpi ne, %1, %c0_i32_0 : i32
    scf.if %2 {
      %cst_9 = arith.constant 0.000000e+00 : f32
      %12 = vector.broadcast %cst_9 : f32 to vector<64x128xf32>
      %c0_10 = arith.constant 0 : index
      %c0_11 = arith.constant 0 : index
      %13 = vector.load %arg7[%c0_10, %c0_11] : memref<64x128xf32, #tpu.memory_space<vmem>>, vector<64x128xf32>
      tpu.vector_store %arg7[%c0_10, %c0_11], %12 {strides = array<i32>} : memref<64x128xf32, #tpu.memory_space<vmem>>, vector<64x128xf32>,
    } else {
    }
    %c0 = arith.constant 0 : index
    %c0_1 = arith.constant 0 : index
    %3 = vector.load %arg7[%c0, %c0_1] : memref<64x128xf32, #tpu.memory_space<vmem>>, vector<64x128xf32>
    %c0_2 = arith.constant 0 : index
    %c0_3 = arith.constant 0 : index
    %4 = vector.load %arg3[%c0_2, %c0_3] : memref<64x128xbf16, #tpu.memory_space<vmem>>, vector<64x128xbf16>
    %c0_4 = arith.constant 0 : index
    %c0_5 = arith.constant 0 : index
    %5 = vector.load %arg4[%c0_4, %c0_5] : memref<128x128xbf16, #tpu.memory_space<vmem>>, vector<128x128xbf16>
    %cst = arith.constant dense<0.000000e+00> : vector<64x128xf32>
    %6 = tpu.matmul %4, %5, %cst {dimension_numbers = #tpu.dot_dimension_numbers<[1], [0], [0], [1], [0, 0, 1, 1], [], []>} : vector<64x128xbf16>, vector<128x128xbf16>, vector<64x128xf32> -> vector<64x128xf32>
    %7 = arith.addf %3, %6 : vector<64x128xf32>
    %c0_6 = arith.constant 0 : index
    %c0_7 = arith.constant 0 : index
    %8 = vector.load %arg7[%c0_6, %c0_7] : memref<64x128xf32, #tpu.memory_space<vmem>>, vector<64x128xf32>
    tpu.vector_store %arg7[%c0_6, %c0_7], %7 {strides = array<i32>} : memref<64x128xf32, #tpu.memory_space<vmem>>, vector<64x128xf32>,
    %c4_i32 = arith.constant 4 : i32
    %9 = arith.cmpi eq, %arg2, %c4_i32 : i32
    %10 = arith.extui %9 : i1 to i32
    %c0_i32_8 = arith.constant 0 : i32
    %11 = arith.cmpi ne, %10, %c0_i32_8 : i32
    scf.if %11 {
      %c0_9 = arith.constant 0 : index
      %c0_10 = arith.constant 0 : index
      %12 = vector.load %arg7[%c0_9, %c0_10] : memref<64x128xf32, #tpu.memory_space<vmem>>, vector<64x128xf32>
      %c0_11 = arith.constant 0 : index
      %c0_12 = arith.constant 0 : index
      %13 = vector.load %arg5[%c0_11, %c0_12] : memref<1x128xf32, #tpu.memory_space<vmem>>, vector<1x128xf32>
      %14 = vector.broadcast %13 : vector<1x128xf32> to vector<64x128xf32>
      %15 = arith.addf %12, %14 : vector<64x128xf32>
      %cst_13 = arith.constant 0.000000e+00 : f32
      %16 = vector.broadcast %cst_13 : f32 to vector<64x128xf32>
      %17 = arith.maximumf %15, %16 : vector<64x128xf32>
      %18 = arith.truncf %17 : vector<64x128xf32> to vector<64x128xbf16>
      %c0_14 = arith.constant 0 : index
      %c0_15 = arith.constant 0 : index
      %19 = vector.load %arg6[%c0_14, %c0_15] : memref<64x128xbf16, #tpu.memory_space<vmem>>, vector<64x128xbf16>
      tpu.vector_store %arg6[%c0_14, %c0_15], %18 {strides = array<i32>} : memref<64x128xbf16, #tpu.memory_space<vmem>>, vector<64x128xbf16>,
    } else {
    }
    return
  }
  func.func @transform_0(%arg0: i32, %arg1: i32, %arg2: i32) -> (i32, i32) {
    %c0_i32 = arith.constant 0 : i32
    return %arg0, %arg2 : i32, i32
  }
  func.func @transform_1(%arg0: i32, %arg1: i32, %arg2: i32) -> (i32, i32) {
    %c0_i32 = arith.constant 0 : i32
    return %arg2, %arg1 : i32, i32
  }
  func.func @transform_2(%arg0: i32, %arg1: i32, %arg2: i32) -> (i32, i32) {
    %c0_i32 = arith.constant 0 : i32
    %c0_i32_0 = arith.constant 0 : i32
    return %c0_i32, %arg1 : i32, i32
  }
  func.func @transform_3(%arg0: i32, %arg1: i32, %arg2: i32) -> (i32, i32) {
    %c0_i32 = arith.constant 0 : i32
    return %arg0, %arg1 : i32, i32
  }
}

module attributes {stable_mosaic.version = 11 : i64} {
  func.func @kernel(%arg0: i32, %arg1: i32, %arg2: i32, %arg3: memref<64x128xbf16, #tpu.memory_space<vmem>>, %arg4: memref<128x128xbf16, #tpu.memory_space<vmem>>, %arg5: memref<1x128xf32, #tpu.memory_space<vmem>>, %arg6: memref<64x128xbf16, #tpu.memory_space<vmem>>, %arg7: memref<64x128xbf16, #tpu.memory_space<vmem>>, %arg8: memref<64x128xf32, #tpu.memory_space<vmem>>) attributes {dimension_semantics = [#tpu.dimension_semantics<parallel>, #tpu.dimension_semantics<parallel>, #tpu.dimension_semantics<arbitrary>], iteration_bounds = array<i64: 2, 1, 5>, scalar_prefetch = 0 : i64, scratch_operands = 1 : i64, tpu.core_type = #tpu.core_type<tc>, window_params = [{transform_indices = @transform_0, window_bounds = array<i64: 64, 128>}, {transform_indices = @transform_1, window_bounds = array<i64: 128, 128>}, {transform_indices = @transform_2, window_bounds = array<i64: 1, 128>}, {transform_indices = @transform_3, window_bounds = array<i64: 64, 128>}, {transform_indices = @transform_4, window_bounds = array<i64: 64, 128>}]} {
    %c0_i32 = arith.constant 0 : i32
    %0 = arith.cmpi eq, %arg2, %c0_i32 : i32
    %1 = arith.extui %0 : i1 to i32
    %c0_i32_0 = arith.constant 0 : i32
    %2 = arith.cmpi ne, %1, %c0_i32_0 : i32
    scf.if %2 {
      %cst_9 = arith.constant 0.000000e+00 : f32
      %12 = vector.broadcast %cst_9 : f32 to vector<64x128xf32>
      %c0_10 = arith.constant 0 : index
      %c0_11 = arith.constant 0 : index
      %13 = vector.load %arg8[%c0_10, %c0_11] : memref<64x128xf32, #tpu.memory_space<vmem>>, vector<64x128xf32>
      tpu.vector_store %arg8[%c0_10, %c0_11], %12 {strides = array<i32>} : memref<64x128xf32, #tpu.memory_space<vmem>>, vector<64x128xf32>,
    } else {
    }
    %c0 = arith.constant 0 : index
    %c0_1 = arith.constant 0 : index
    %3 = vector.load %arg8[%c0, %c0_1] : memref<64x128xf32, #tpu.memory_space<vmem>>, vector<64x128xf32>
    %c0_2 = arith.constant 0 : index
    %c0_3 = arith.constant 0 : index
    %4 = vector.load %arg3[%c0_2, %c0_3] : memref<64x128xbf16, #tpu.memory_space<vmem>>, vector<64x128xbf16>
    %c0_4 = arith.constant 0 : index
    %c0_5 = arith.constant 0 : index
    %5 = vector.load %arg4[%c0_4, %c0_5] : memref<128x128xbf16, #tpu.memory_space<vmem>>, vector<128x128xbf16>
    %cst = arith.constant dense<0.000000e+00> : vector<64x128xf32>
    %6 = tpu.matmul %4, %5, %cst {dimension_numbers = #tpu.dot_dimension_numbers<[1], [0], [0], [1], [0, 0, 1, 1], [], []>} : vector<64x128xbf16>, vector<128x128xbf16>, vector<64x128xf32> -> vector<64x128xf32>
    %7 = arith.addf %3, %6 : vector<64x128xf32>
    %c0_6 = arith.constant 0 : index
    %c0_7 = arith.constant 0 : index
    %8 = vector.load %arg8[%c0_6, %c0_7] : memref<64x128xf32, #tpu.memory_space<vmem>>, vector<64x128xf32>
    tpu.vector_store %arg8[%c0_6, %c0_7], %7 {strides = array<i32>} : memref<64x128xf32, #tpu.memory_space<vmem>>, vector<64x128xf32>,
    %c4_i32 = arith.constant 4 : i32
    %9 = arith.cmpi eq, %arg2, %c4_i32 : i32
    %10 = arith.extui %9 : i1 to i32
    %c0_i32_8 = arith.constant 0 : i32
    %11 = arith.cmpi ne, %10, %c0_i32_8 : i32
    scf.if %11 {
      %c0_9 = arith.constant 0 : index
      %c0_10 = arith.constant 0 : index
      %12 = vector.load %arg8[%c0_9, %c0_10] : memref<64x128xf32, #tpu.memory_space<vmem>>, vector<64x128xf32>
      %c0_11 = arith.constant 0 : index
      %c0_12 = arith.constant 0 : index
      %13 = vector.load %arg5[%c0_11, %c0_12] : memref<1x128xf32, #tpu.memory_space<vmem>>, vector<1x128xf32>
      %14 = vector.broadcast %13 : vector<1x128xf32> to vector<64x128xf32>
      %15 = arith.addf %12, %14 : vector<64x128xf32>
      %c0_13 = arith.constant 0 : index
      %c0_14 = arith.constant 0 : index
      %16 = vector.load %arg6[%c0_13, %c0_14] : memref<64x128xbf16, #tpu.memory_space<vmem>>, vector<64x128xbf16>
      %17 = arith.extf %16 : vector<64x128xbf16> to vector<64x128xf32>
      %18 = arith.addf %15, %17 : vector<64x128xf32>
      %cst_15 = arith.constant 0.000000e+00 : f32
      %19 = vector.broadcast %cst_15 : f32 to vector<64x128xf32>
      %20 = arith.maximumf %18, %19 : vector<64x128xf32>
      %21 = arith.truncf %20 : vector<64x128xf32> to vector<64x128xbf16>
      %c0_16 = arith.constant 0 : index
      %c0_17 = arith.constant 0 : index
      %22 = vector.load %arg7[%c0_16, %c0_17] : memref<64x128xbf16, #tpu.memory_space<vmem>>, vector<64x128xbf16>
      tpu.vector_store %arg7[%c0_16, %c0_17], %21 {strides = array<i32>} : memref<64x128xbf16, #tpu.memory_space<vmem>>, vector<64x128xbf16>,
    } else {
    }
    return
  }
  func.func @transform_0(%arg0: i32, %arg1: i32, %arg2: i32) -> (i32, i32) {
    %c0_i32 = arith.constant 0 : i32
    return %arg0, %arg2 : i32, i32
  }
  func.func @transform_1(%arg0: i32, %arg1: i32, %arg2: i32) -> (i32, i32) {
    %c0_i32 = arith.constant 0 : i32
    return %arg2, %arg1 : i32, i32
  }
  func.func @transform_2(%arg0: i32, %arg1: i32, %arg2: i32) -> (i32, i32) {
    %c0_i32 = arith.constant 0 : i32
    %c0_i32_0 = arith.constant 0 : i32
    return %c0_i32, %arg1 : i32, i32
  }
  func.func @transform_3(%arg0: i32, %arg1: i32, %arg2: i32) -> (i32, i32) {
    %c0_i32 = arith.constant 0 : i32
    return %arg0, %arg1 : i32, i32
  }
  func.func @transform_4(%arg0: i32, %arg1: i32, %arg2: i32) -> (i32, i32) {
    %c0_i32 = arith.constant 0 : i32
    return %arg0, %arg1 : i32, i32
  }
}

module attributes {stable_mosaic.version = 11 : i64} {
  func.func @kernel(%arg0: i32, %arg1: i32, %arg2: i32, %arg3: memref<16x128xbf16, #tpu.memory_space<vmem>>, %arg4: memref<128x128xbf16, #tpu.memory_space<vmem>>, %arg5: memref<1x128xf32, #tpu.memory_space<vmem>>, %arg6: memref<16x128xbf16, #tpu.memory_space<vmem>>, %arg7: memref<16x128xf32, #tpu.memory_space<vmem>>) attributes {dimension_semantics = [#tpu.dimension_semantics<parallel>, #tpu.dimension_semantics<parallel>, #tpu.dimension_semantics<arbitrary>], iteration_bounds = array<i64: 2, 1, 5>, scalar_prefetch = 0 : i64, scratch_operands = 1 : i64, tpu.core_type = #tpu.core_type<tc>, window_params = [{transform_indices = @transform_0, window_bounds = array<i64: 16, 128>}, {transform_indices = @transform_1, window_bounds = array<i64: 128, 128>}, {transform_indices = @transform_2, window_bounds = array<i64: 1, 128>}, {transform_indices = @transform_3, window_bounds = array<i64: 16, 128>}]} {
    %c0_i32 = arith.constant 0 : i32
    %0 = arith.cmpi eq, %arg2, %c0_i32 : i32
    %1 = arith.extui %0 : i1 to i32
    %c0_i32_0 = arith.constant 0 : i32
    %2 = arith.cmpi ne, %1, %c0_i32_0 : i32
    scf.if %2 {
      %cst_9 = arith.constant 0.000000e+00 : f32
      %12 = vector.broadcast %cst_9 : f32 to vector<16x128xf32>
      %c0_10 = arith.constant 0 : index
      %c0_11 = arith.constant 0 : index
      %13 = vector.load %arg7[%c0_10, %c0_11] : memref<16x128xf32, #tpu.memory_space<vmem>>, vector<16x128xf32>
      tpu.vector_store %arg7[%c0_10, %c0_11], %12 {strides = array<i32>} : memref<16x128xf32, #tpu.memory_space<vmem>>, vector<16x128xf32>,
    } else {
    }
    %c0 = arith.constant 0 : index
    %c0_1 = arith.constant 0 : index
    %3 = vector.load %arg7[%c0, %c0_1] : memref<16x128xf32, #tpu.memory_space<vmem>>, vector<16x128xf32>
    %c0_2 = arith.constant 0 : index
    %c0_3 = arith.constant 0 : index
    %4 = vector.load %arg3[%c0_2, %c0_3] : memref<16x128xbf16, #tpu.memory_space<vmem>>, vector<16x128xbf16>
    %c0_4 = arith.constant 0 : index
    %c0_5 = arith.constant 0 : index
    %5 = vector.load %arg4[%c0_4, %c0_5] : memref<128x128xbf16, #tpu.memory_space<vmem>>, vector<128x128xbf16>
    %cst = arith.constant dense<0.000000e+00> : vector<16x128xf32>
    %6 = tpu.matmul %4, %5, %cst {dimension_numbers = #tpu.dot_dimension_numbers<[1], [0], [0], [1], [0, 0, 1, 1], [], []>} : vector<16x128xbf16>, vector<128x128xbf16>, vector<16x128xf32> -> vector<16x128xf32>
    %7 = arith.addf %3, %6 : vector<16x128xf32>
    %c0_6 = arith.constant 0 : index
    %c0_7 = arith.constant 0 : index
    %8 = vector.load %arg7[%c0_6, %c0_7] : memref<16x128xf32, #tpu.memory_space<vmem>>, vector<16x128xf32>
    tpu.vector_store %arg7[%c0_6, %c0_7], %7 {strides = array<i32>} : memref<16x128xf32, #tpu.memory_space<vmem>>, vector<16x128xf32>,
    %c4_i32 = arith.constant 4 : i32
    %9 = arith.cmpi eq, %arg2, %c4_i32 : i32
    %10 = arith.extui %9 : i1 to i32
    %c0_i32_8 = arith.constant 0 : i32
    %11 = arith.cmpi ne, %10, %c0_i32_8 : i32
    scf.if %11 {
      %c0_9 = arith.constant 0 : index
      %c0_10 = arith.constant 0 : index
      %12 = vector.load %arg7[%c0_9, %c0_10] : memref<16x128xf32, #tpu.memory_space<vmem>>, vector<16x128xf32>
      %c0_11 = arith.constant 0 : index
      %c0_12 = arith.constant 0 : index
      %13 = vector.load %arg5[%c0_11, %c0_12] : memref<1x128xf32, #tpu.memory_space<vmem>>, vector<1x128xf32>
      %14 = vector.broadcast %13 : vector<1x128xf32> to vector<16x128xf32>
      %15 = arith.addf %12, %14 : vector<16x128xf32>
      %cst_13 = arith.constant 0.000000e+00 : f32
      %16 = vector.broadcast %cst_13 : f32 to vector<16x128xf32>
      %17 = arith.maximumf %15, %16 : vector<16x128xf32>
      %18 = arith.truncf %17 : vector<16x128xf32> to vector<16x128xbf16>
      %c0_14 = arith.constant 0 : index
      %c0_15 = arith.constant 0 : index
      %19 = vector.load %arg6[%c0_14, %c0_15] : memref<16x128xbf16, #tpu.memory_space<vmem>>, vector<16x128xbf16>
      tpu.vector_store %arg6[%c0_14, %c0_15], %18 {strides = array<i32>} : memref<16x128xbf16, #tpu.memory_space<vmem>>, vector<16x128xbf16>,
    } else {
    }
    return
  }
  func.func @transform_0(%arg0: i32, %arg1: i32, %arg2: i32) -> (i32, i32) {
    %c0_i32 = arith.constant 0 : i32
    return %arg0, %arg2 : i32, i32
  }
  func.func @transform_1(%arg0: i32, %arg1: i32, %arg2: i32) -> (i32, i32) {
    %c0_i32 = arith.constant 0 : i32
    return %arg2, %arg1 : i32, i32
  }
  func.func @transform_2(%arg0: i32, %arg1: i32, %arg2: i32) -> (i32, i32) {
    %c0_i32 = arith.constant 0 : i32
    %c0_i32_0 = arith.constant 0 : i32
    return %c0_i32, %arg1 : i32, i32
  }
  func.func @transform_3(%arg0: i32, %arg1: i32, %arg2: i32) -> (i32, i32) {
    %c0_i32 = arith.constant 0 : i32
    return %arg0, %arg1 : i32, i32
  }
}

module attributes {stable_mosaic.version = 11 : i64} {
  func.func @kernel(%arg0: i32, %arg1: i32, %arg2: i32, %arg3: memref<16x384xbf16, #tpu.memory_space<vmem>>, %arg4: memref<384x128xbf16, #tpu.memory_space<vmem>>, %arg5: memref<1x128xf32, #tpu.memory_space<vmem>>, %arg6: memref<16x128xbf16, #tpu.memory_space<vmem>>, %arg7: memref<16x128xbf16, #tpu.memory_space<vmem>>, %arg8: memref<16x128xf32, #tpu.memory_space<vmem>>) attributes {dimension_semantics = [#tpu.dimension_semantics<parallel>, #tpu.dimension_semantics<parallel>, #tpu.dimension_semantics<arbitrary>], iteration_bounds = array<i64: 2, 1, 3>, scalar_prefetch = 0 : i64, scratch_operands = 1 : i64, tpu.core_type = #tpu.core_type<tc>, window_params = [{transform_indices = @transform_0, window_bounds = array<i64: 16, 384>}, {transform_indices = @transform_1, window_bounds = array<i64: 384, 128>}, {transform_indices = @transform_2, window_bounds = array<i64: 1, 128>}, {transform_indices = @transform_3, window_bounds = array<i64: 16, 128>}, {transform_indices = @transform_4, window_bounds = array<i64: 16, 128>}]} {
    %c0_i32 = arith.constant 0 : i32
    %0 = arith.cmpi eq, %arg2, %c0_i32 : i32
    %1 = arith.extui %0 : i1 to i32
    %c0_i32_0 = arith.constant 0 : i32
    %2 = arith.cmpi ne, %1, %c0_i32_0 : i32
    scf.if %2 {
      %cst_9 = arith.constant 0.000000e+00 : f32
      %12 = vector.broadcast %cst_9 : f32 to vector<16x128xf32>
      %c0_10 = arith.constant 0 : index
      %c0_11 = arith.constant 0 : index
      %13 = vector.load %arg8[%c0_10, %c0_11] : memref<16x128xf32, #tpu.memory_space<vmem>>, vector<16x128xf32>
      tpu.vector_store %arg8[%c0_10, %c0_11], %12 {strides = array<i32>} : memref<16x128xf32, #tpu.memory_space<vmem>>, vector<16x128xf32>,
    } else {
    }
    %c0 = arith.constant 0 : index
    %c0_1 = arith.constant 0 : index
    %3 = vector.load %arg8[%c0, %c0_1] : memref<16x128xf32, #tpu.memory_space<vmem>>, vector<16x128xf32>
    %c0_2 = arith.constant 0 : index
    %c0_3 = arith.constant 0 : index
    %4 = vector.load %arg3[%c0_2, %c0_3] : memref<16x384xbf16, #tpu.memory_space<vmem>>, vector<16x384xbf16>
    %c0_4 = arith.constant 0 : index
    %c0_5 = arith.constant 0 : index
    %5 = vector.load %arg4[%c0_4, %c0_5] : memref<384x128xbf16, #tpu.memory_space<vmem>>, vector<384x128xbf16>
    %cst = arith.constant dense<0.000000e+00> : vector<16x128xf32>
    %6 = tpu.matmul %4, %5, %cst {dimension_numbers = #tpu.dot_dimension_numbers<[1], [0], [0], [1], [0, 0, 1, 1], [], []>} : vector<16x384xbf16>, vector<384x128xbf16>, vector<16x128xf32> -> vector<16x128xf32>
    %7 = arith.addf %3, %6 : vector<16x128xf32>
    %c0_6 = arith.constant 0 : index
    %c0_7 = arith.constant 0 : index
    %8 = vector.load %arg8[%c0_6, %c0_7] : memref<16x128xf32, #tpu.memory_space<vmem>>, vector<16x128xf32>
    tpu.vector_store %arg8[%c0_6, %c0_7], %7 {strides = array<i32>} : memref<16x128xf32, #tpu.memory_space<vmem>>, vector<16x128xf32>,
    %c2_i32 = arith.constant 2 : i32
    %9 = arith.cmpi eq, %arg2, %c2_i32 : i32
    %10 = arith.extui %9 : i1 to i32
    %c0_i32_8 = arith.constant 0 : i32
    %11 = arith.cmpi ne, %10, %c0_i32_8 : i32
    scf.if %11 {
      %c0_9 = arith.constant 0 : index
      %c0_10 = arith.constant 0 : index
      %12 = vector.load %arg8[%c0_9, %c0_10] : memref<16x128xf32, #tpu.memory_space<vmem>>, vector<16x128xf32>
      %c0_11 = arith.constant 0 : index
      %c0_12 = arith.constant 0 : index
      %13 = vector.load %arg5[%c0_11, %c0_12] : memref<1x128xf32, #tpu.memory_space<vmem>>, vector<1x128xf32>
      %14 = vector.broadcast %13 : vector<1x128xf32> to vector<16x128xf32>
      %15 = arith.addf %12, %14 : vector<16x128xf32>
      %c0_13 = arith.constant 0 : index
      %c0_14 = arith.constant 0 : index
      %16 = vector.load %arg6[%c0_13, %c0_14] : memref<16x128xbf16, #tpu.memory_space<vmem>>, vector<16x128xbf16>
      %17 = arith.extf %16 : vector<16x128xbf16> to vector<16x128xf32>
      %18 = arith.addf %15, %17 : vector<16x128xf32>
      %cst_15 = arith.constant 0.000000e+00 : f32
      %19 = vector.broadcast %cst_15 : f32 to vector<16x128xf32>
      %20 = arith.maximumf %18, %19 : vector<16x128xf32>
      %21 = arith.truncf %20 : vector<16x128xf32> to vector<16x128xbf16>
      %c0_16 = arith.constant 0 : index
      %c0_17 = arith.constant 0 : index
      %22 = vector.load %arg7[%c0_16, %c0_17] : memref<16x128xbf16, #tpu.memory_space<vmem>>, vector<16x128xbf16>
      tpu.vector_store %arg7[%c0_16, %c0_17], %21 {strides = array<i32>} : memref<16x128xbf16, #tpu.memory_space<vmem>>, vector<16x128xbf16>,
    } else {
    }
    return
  }
  func.func @transform_0(%arg0: i32, %arg1: i32, %arg2: i32) -> (i32, i32) {
    %c0_i32 = arith.constant 0 : i32
    return %arg0, %arg2 : i32, i32
  }
  func.func @transform_1(%arg0: i32, %arg1: i32, %arg2: i32) -> (i32, i32) {
    %c0_i32 = arith.constant 0 : i32
    return %arg2, %arg1 : i32, i32
  }
  func.func @transform_2(%arg0: i32, %arg1: i32, %arg2: i32) -> (i32, i32) {
    %c0_i32 = arith.constant 0 : i32
    %c0_i32_0 = arith.constant 0 : i32
    return %c0_i32, %arg1 : i32, i32
  }
  func.func @transform_3(%arg0: i32, %arg1: i32, %arg2: i32) -> (i32, i32) {
    %c0_i32 = arith.constant 0 : i32
    return %arg0, %arg1 : i32, i32
  }
  func.func @transform_4(%arg0: i32, %arg1: i32, %arg2: i32) -> (i32, i32) {
    %c0_i32 = arith.constant 0 : i32
    return %arg0, %arg1 : i32, i32
  }
}

module attributes {stable_mosaic.version = 11 : i64} {
  func.func @kernel(%arg0: i32, %arg1: i32, %arg2: i32, %arg3: memref<16x384xbf16, #tpu.memory_space<vmem>>, %arg4: memref<384x128xbf16, #tpu.memory_space<vmem>>, %arg5: memref<1x128xf32, #tpu.memory_space<vmem>>, %arg6: memref<16x128xbf16, #tpu.memory_space<vmem>>, %arg7: memref<16x128xf32, #tpu.memory_space<vmem>>) attributes {dimension_semantics = [#tpu.dimension_semantics<parallel>, #tpu.dimension_semantics<parallel>, #tpu.dimension_semantics<arbitrary>], iteration_bounds = array<i64: 2, 1, 3>, scalar_prefetch = 0 : i64, scratch_operands = 1 : i64, tpu.core_type = #tpu.core_type<tc>, window_params = [{transform_indices = @transform_0, window_bounds = array<i64: 16, 384>}, {transform_indices = @transform_1, window_bounds = array<i64: 384, 128>}, {transform_indices = @transform_2, window_bounds = array<i64: 1, 128>}, {transform_indices = @transform_3, window_bounds = array<i64: 16, 128>}]} {
    %c0_i32 = arith.constant 0 : i32
    %0 = arith.cmpi eq, %arg2, %c0_i32 : i32
    %1 = arith.extui %0 : i1 to i32
    %c0_i32_0 = arith.constant 0 : i32
    %2 = arith.cmpi ne, %1, %c0_i32_0 : i32
    scf.if %2 {
      %cst_9 = arith.constant 0.000000e+00 : f32
      %12 = vector.broadcast %cst_9 : f32 to vector<16x128xf32>
      %c0_10 = arith.constant 0 : index
      %c0_11 = arith.constant 0 : index
      %13 = vector.load %arg7[%c0_10, %c0_11] : memref<16x128xf32, #tpu.memory_space<vmem>>, vector<16x128xf32>
      tpu.vector_store %arg7[%c0_10, %c0_11], %12 {strides = array<i32>} : memref<16x128xf32, #tpu.memory_space<vmem>>, vector<16x128xf32>,
    } else {
    }
    %c0 = arith.constant 0 : index
    %c0_1 = arith.constant 0 : index
    %3 = vector.load %arg7[%c0, %c0_1] : memref<16x128xf32, #tpu.memory_space<vmem>>, vector<16x128xf32>
    %c0_2 = arith.constant 0 : index
    %c0_3 = arith.constant 0 : index
    %4 = vector.load %arg3[%c0_2, %c0_3] : memref<16x384xbf16, #tpu.memory_space<vmem>>, vector<16x384xbf16>
    %c0_4 = arith.constant 0 : index
    %c0_5 = arith.constant 0 : index
    %5 = vector.load %arg4[%c0_4, %c0_5] : memref<384x128xbf16, #tpu.memory_space<vmem>>, vector<384x128xbf16>
    %cst = arith.constant dense<0.000000e+00> : vector<16x128xf32>
    %6 = tpu.matmul %4, %5, %cst {dimension_numbers = #tpu.dot_dimension_numbers<[1], [0], [0], [1], [0, 0, 1, 1], [], []>} : vector<16x384xbf16>, vector<384x128xbf16>, vector<16x128xf32> -> vector<16x128xf32>
    %7 = arith.addf %3, %6 : vector<16x128xf32>
    %c0_6 = arith.constant 0 : index
    %c0_7 = arith.constant 0 : index
    %8 = vector.load %arg7[%c0_6, %c0_7] : memref<16x128xf32, #tpu.memory_space<vmem>>, vector<16x128xf32>
    tpu.vector_store %arg7[%c0_6, %c0_7], %7 {strides = array<i32>} : memref<16x128xf32, #tpu.memory_space<vmem>>, vector<16x128xf32>,
    %c2_i32 = arith.constant 2 : i32
    %9 = arith.cmpi eq, %arg2, %c2_i32 : i32
    %10 = arith.extui %9 : i1 to i32
    %c0_i32_8 = arith.constant 0 : i32
    %11 = arith.cmpi ne, %10, %c0_i32_8 : i32
    scf.if %11 {
      %c0_9 = arith.constant 0 : index
      %c0_10 = arith.constant 0 : index
      %12 = vector.load %arg7[%c0_9, %c0_10] : memref<16x128xf32, #tpu.memory_space<vmem>>, vector<16x128xf32>
      %c0_11 = arith.constant 0 : index
      %c0_12 = arith.constant 0 : index
      %13 = vector.load %arg5[%c0_11, %c0_12] : memref<1x128xf32, #tpu.memory_space<vmem>>, vector<1x128xf32>
      %14 = vector.broadcast %13 : vector<1x128xf32> to vector<16x128xf32>
      %15 = arith.addf %12, %14 : vector<16x128xf32>
      %cst_13 = arith.constant 0.000000e+00 : f32
      %16 = vector.broadcast %cst_13 : f32 to vector<16x128xf32>
      %17 = arith.maximumf %15, %16 : vector<16x128xf32>
      %18 = arith.truncf %17 : vector<16x128xf32> to vector<16x128xbf16>
      %c0_14 = arith.constant 0 : index
      %c0_15 = arith.constant 0 : index
      %19 = vector.load %arg6[%c0_14, %c0_15] : memref<16x128xbf16, #tpu.memory_space<vmem>>, vector<16x128xbf16>
      tpu.vector_store %arg6[%c0_14, %c0_15], %18 {strides = array<i32>} : memref<16x128xbf16, #tpu.memory_space<vmem>>, vector<16x128xbf16>,
    } else {
    }
    return
  }
  func.func @transform_0(%arg0: i32, %arg1: i32, %arg2: i32) -> (i32, i32) {
    %c0_i32 = arith.constant 0 : i32
    return %arg0, %arg2 : i32, i32
  }
  func.func @transform_1(%arg0: i32, %arg1: i32, %arg2: i32) -> (i32, i32) {
    %c0_i32 = arith.constant 0 : i32
    return %arg2, %arg1 : i32, i32
  }
  func.func @transform_2(%arg0: i32, %arg1: i32, %arg2: i32) -> (i32, i32) {
    %c0_i32 = arith.constant 0 : i32
    %c0_i32_0 = arith.constant 0 : i32
    return %c0_i32, %arg1 : i32, i32
  }
  func.func @transform_3(%arg0: i32, %arg1: i32, %arg2: i32) -> (i32, i32) {
    %c0_i32 = arith.constant 0 : i32
    return %arg0, %arg1 : i32, i32
  }
}

module attributes {stable_mosaic.version = 11 : i64} {
  func.func @kernel(%arg0: i32, %arg1: i32, %arg2: i32, %arg3: memref<16x128xbf16, #tpu.memory_space<vmem>>, %arg4: memref<128x128xbf16, #tpu.memory_space<vmem>>, %arg5: memref<1x128xf32, #tpu.memory_space<vmem>>, %arg6: memref<16x128xbf16, #tpu.memory_space<vmem>>, %arg7: memref<16x128xf32, #tpu.memory_space<vmem>>) attributes {dimension_semantics = [#tpu.dimension_semantics<parallel>, #tpu.dimension_semantics<parallel>, #tpu.dimension_semantics<arbitrary>], iteration_bounds = array<i64: 2, 1, 1>, scalar_prefetch = 0 : i64, scratch_operands = 1 : i64, tpu.core_type = #tpu.core_type<tc>, window_params = [{transform_indices = @transform_0, window_bounds = array<i64: 16, 128>}, {transform_indices = @transform_1, window_bounds = array<i64: 128, 128>}, {transform_indices = @transform_2, window_bounds = array<i64: 1, 128>}, {transform_indices = @transform_3, window_bounds = array<i64: 16, 128>}]} {
    %c0_i32 = arith.constant 0 : i32
    %0 = arith.cmpi eq, %arg2, %c0_i32 : i32
    %1 = arith.extui %0 : i1 to i32
    %c0_i32_0 = arith.constant 0 : i32
    %2 = arith.cmpi ne, %1, %c0_i32_0 : i32
    scf.if %2 {
      %cst_10 = arith.constant 0.000000e+00 : f32
      %12 = vector.broadcast %cst_10 : f32 to vector<16x128xf32>
      %c0_11 = arith.constant 0 : index
      %c0_12 = arith.constant 0 : index
      %13 = vector.load %arg7[%c0_11, %c0_12] : memref<16x128xf32, #tpu.memory_space<vmem>>, vector<16x128xf32>
      tpu.vector_store %arg7[%c0_11, %c0_12], %12 {strides = array<i32>} : memref<16x128xf32, #tpu.memory_space<vmem>>, vector<16x128xf32>,
    } else {
    }
    %c0 = arith.constant 0 : index
    %c0_1 = arith.constant 0 : index
    %3 = vector.load %arg7[%c0, %c0_1] : memref<16x128xf32, #tpu.memory_space<vmem>>, vector<16x128xf32>
    %c0_2 = arith.constant 0 : index
    %c0_3 = arith.constant 0 : index
    %4 = vector.load %arg3[%c0_2, %c0_3] : memref<16x128xbf16, #tpu.memory_space<vmem>>, vector<16x128xbf16>
    %c0_4 = arith.constant 0 : index
    %c0_5 = arith.constant 0 : index
    %5 = vector.load %arg4[%c0_4, %c0_5] : memref<128x128xbf16, #tpu.memory_space<vmem>>, vector<128x128xbf16>
    %cst = arith.constant dense<0.000000e+00> : vector<16x128xf32>
    %6 = tpu.matmul %4, %5, %cst {dimension_numbers = #tpu.dot_dimension_numbers<[1], [0], [0], [1], [0, 0, 1, 1], [], []>} : vector<16x128xbf16>, vector<128x128xbf16>, vector<16x128xf32> -> vector<16x128xf32>
    %7 = arith.addf %3, %6 : vector<16x128xf32>
    %c0_6 = arith.constant 0 : index
    %c0_7 = arith.constant 0 : index
    %8 = vector.load %arg7[%c0_6, %c0_7] : memref<16x128xf32, #tpu.memory_space<vmem>>, vector<16x128xf32>
    tpu.vector_store %arg7[%c0_6, %c0_7], %7 {strides = array<i32>} : memref<16x128xf32, #tpu.memory_space<vmem>>, vector<16x128xf32>,
    %c0_i32_8 = arith.constant 0 : i32
    %9 = arith.cmpi eq, %arg2, %c0_i32_8 : i32
    %10 = arith.extui %9 : i1 to i32
    %c0_i32_9 = arith.constant 0 : i32
    %11 = arith.cmpi ne, %10, %c0_i32_9 : i32
    scf.if %11 {
      %c0_10 = arith.constant 0 : index
      %c0_11 = arith.constant 0 : index
      %12 = vector.load %arg7[%c0_10, %c0_11] : memref<16x128xf32, #tpu.memory_space<vmem>>, vector<16x128xf32>
      %c0_12 = arith.constant 0 : index
      %c0_13 = arith.constant 0 : index
      %13 = vector.load %arg5[%c0_12, %c0_13] : memref<1x128xf32, #tpu.memory_space<vmem>>, vector<1x128xf32>
      %14 = vector.broadcast %13 : vector<1x128xf32> to vector<16x128xf32>
      %15 = arith.addf %12, %14 : vector<16x128xf32>
      %16 = arith.truncf %15 : vector<16x128xf32> to vector<16x128xbf16>
      %c0_14 = arith.constant 0 : index
      %c0_15 = arith.constant 0 : index
      %17 = vector.load %arg6[%c0_14, %c0_15] : memref<16x128xbf16, #tpu.memory_space<vmem>>, vector<16x128xbf16>
      tpu.vector_store %arg6[%c0_14, %c0_15], %16 {strides = array<i32>} : memref<16x128xbf16, #tpu.memory_space<vmem>>, vector<16x128xbf16>,
    } else {
    }
    return
  }
  func.func @transform_0(%arg0: i32, %arg1: i32, %arg2: i32) -> (i32, i32) {
    %c0_i32 = arith.constant 0 : i32
    return %arg0, %arg2 : i32, i32
  }
  func.func @transform_1(%arg0: i32, %arg1: i32, %arg2: i32) -> (i32, i32) {
    %c0_i32 = arith.constant 0 : i32
    return %arg2, %arg1 : i32, i32
  }
  func.func @transform_2(%arg0: i32, %arg1: i32, %arg2: i32) -> (i32, i32) {
    %c0_i32 = arith.constant 0 : i32
    %c0_i32_0 = arith.constant 0 : i32
    return %c0_i32, %arg1 : i32, i32
  }
  func.func @transform_3(%arg0: i32, %arg1: i32, %arg2: i32) -> (i32, i32) {
    %c0_i32 = arith.constant 0 : i32
    return %arg0, %arg1 : i32, i32
  }
}

module attributes {stable_mosaic.version = 11 : i64} {
  func.func @kernel(%arg0: i32, %arg1: i32, %arg2: i32, %arg3: memref<16x384xbf16, #tpu.memory_space<vmem>>, %arg4: memref<384x128xbf16, #tpu.memory_space<vmem>>, %arg5: memref<1x128xf32, #tpu.memory_space<vmem>>, %arg6: memref<16x128xbf16, #tpu.memory_space<vmem>>, %arg7: memref<16x128xf32, #tpu.memory_space<vmem>>) attributes {dimension_semantics = [#tpu.dimension_semantics<parallel>, #tpu.dimension_semantics<parallel>, #tpu.dimension_semantics<arbitrary>], iteration_bounds = array<i64: 1, 2, 3>, scalar_prefetch = 0 : i64, scratch_operands = 1 : i64, tpu.core_type = #tpu.core_type<tc>, window_params = [{transform_indices = @transform_0, window_bounds = array<i64: 16, 384>}, {transform_indices = @transform_1, window_bounds = array<i64: 384, 128>}, {transform_indices = @transform_2, window_bounds = array<i64: 1, 128>}, {transform_indices = @transform_3, window_bounds = array<i64: 16, 128>}]} {
    %c0_i32 = arith.constant 0 : i32
    %0 = arith.cmpi eq, %arg2, %c0_i32 : i32
    %1 = arith.extui %0 : i1 to i32
    %c0_i32_0 = arith.constant 0 : i32
    %2 = arith.cmpi ne, %1, %c0_i32_0 : i32
    scf.if %2 {
      %cst_9 = arith.constant 0.000000e+00 : f32
      %12 = vector.broadcast %cst_9 : f32 to vector<16x128xf32>
      %c0_10 = arith.constant 0 : index
      %c0_11 = arith.constant 0 : index
      %13 = vector.load %arg7[%c0_10, %c0_11] : memref<16x128xf32, #tpu.memory_space<vmem>>, vector<16x128xf32>
      tpu.vector_store %arg7[%c0_10, %c0_11], %12 {strides = array<i32>} : memref<16x128xf32, #tpu.memory_space<vmem>>, vector<16x128xf32>,
    } else {
    }
    %c0 = arith.constant 0 : index
    %c0_1 = arith.constant 0 : index
    %3 = vector.load %arg7[%c0, %c0_1] : memref<16x128xf32, #tpu.memory_space<vmem>>, vector<16x128xf32>
    %c0_2 = arith.constant 0 : index
    %c0_3 = arith.constant 0 : index
    %4 = vector.load %arg3[%c0_2, %c0_3] : memref<16x384xbf16, #tpu.memory_space<vmem>>, vector<16x384xbf16>
    %c0_4 = arith.constant 0 : index
    %c0_5 = arith.constant 0 : index
    %5 = vector.load %arg4[%c0_4, %c0_5] : memref<384x128xbf16, #tpu.memory_space<vmem>>, vector<384x128xbf16>
    %cst = arith.constant dense<0.000000e+00> : vector<16x128xf32>
    %6 = tpu.matmul %4, %5, %cst {dimension_numbers = #tpu.dot_dimension_numbers<[1], [0], [0], [1], [0, 0, 1, 1], [], []>} : vector<16x384xbf16>, vector<384x128xbf16>, vector<16x128xf32> -> vector<16x128xf32>
    %7 = arith.addf %3, %6 : vector<16x128xf32>
    %c0_6 = arith.constant 0 : index
    %c0_7 = arith.constant 0 : index
    %8 = vector.load %arg7[%c0_6, %c0_7] : memref<16x128xf32, #tpu.memory_space<vmem>>, vector<16x128xf32>
    tpu.vector_store %arg7[%c0_6, %c0_7], %7 {strides = array<i32>} : memref<16x128xf32, #tpu.memory_space<vmem>>, vector<16x128xf32>,
    %c2_i32 = arith.constant 2 : i32
    %9 = arith.cmpi eq, %arg2, %c2_i32 : i32
    %10 = arith.extui %9 : i1 to i32
    %c0_i32_8 = arith.constant 0 : i32
    %11 = arith.cmpi ne, %10, %c0_i32_8 : i32
    scf.if %11 {
      %c0_9 = arith.constant 0 : index
      %c0_10 = arith.constant 0 : index
      %12 = vector.load %arg7[%c0_9, %c0_10] : memref<16x128xf32, #tpu.memory_space<vmem>>, vector<16x128xf32>
      %c0_11 = arith.constant 0 : index
      %c0_12 = arith.constant 0 : index
      %13 = vector.load %arg5[%c0_11, %c0_12] : memref<1x128xf32, #tpu.memory_space<vmem>>, vector<1x128xf32>
      %14 = vector.broadcast %13 : vector<1x128xf32> to vector<16x128xf32>
      %15 = arith.addf %12, %14 : vector<16x128xf32>
      %cst_13 = arith.constant 0.000000e+00 : f32
      %16 = vector.broadcast %cst_13 : f32 to vector<16x128xf32>
      %17 = arith.maximumf %15, %16 : vector<16x128xf32>
      %18 = arith.truncf %17 : vector<16x128xf32> to vector<16x128xbf16>
      %c0_14 = arith.constant 0 : index
      %c0_15 = arith.constant 0 : index
      %19 = vector.load %arg6[%c0_14, %c0_15] : memref<16x128xbf16, #tpu.memory_space<vmem>>, vector<16x128xbf16>
      tpu.vector_store %arg6[%c0_14, %c0_15], %18 {strides = array<i32>} : memref<16x128xbf16, #tpu.memory_space<vmem>>, vector<16x128xbf16>,
    } else {
    }
    return
  }
  func.func @transform_0(%arg0: i32, %arg1: i32, %arg2: i32) -> (i32, i32) {
    %c0_i32 = arith.constant 0 : i32
    return %arg0, %arg2 : i32, i32
  }
  func.func @transform_1(%arg0: i32, %arg1: i32, %arg2: i32) -> (i32, i32) {
    %c0_i32 = arith.constant 0 : i32
    return %arg2, %arg1 : i32, i32
  }
  func.func @transform_2(%arg0: i32, %arg1: i32, %arg2: i32) -> (i32, i32) {
    %c0_i32 = arith.constant 0 : i32
    %c0_i32_0 = arith.constant 0 : i32
    return %c0_i32, %arg1 : i32, i32
  }
  func.func @transform_3(%arg0: i32, %arg1: i32, %arg2: i32) -> (i32, i32) {
    %c0_i32 = arith.constant 0 : i32
    return %arg0, %arg1 : i32, i32
  }
}

module attributes {stable_mosaic.version = 11 : i64} {
  func.func @kernel(%arg0: i32, %arg1: i32, %arg2: i32, %arg3: memref<16x768xbf16, #tpu.memory_space<vmem>>, %arg4: memref<768x128xbf16, #tpu.memory_space<vmem>>, %arg5: memref<1x128xf32, #tpu.memory_space<vmem>>, %arg6: memref<16x128xbf16, #tpu.memory_space<vmem>>, %arg7: memref<16x128xf32, #tpu.memory_space<vmem>>) attributes {dimension_semantics = [#tpu.dimension_semantics<parallel>, #tpu.dimension_semantics<parallel>, #tpu.dimension_semantics<arbitrary>], iteration_bounds = array<i64: 1, 2, 3>, scalar_prefetch = 0 : i64, scratch_operands = 1 : i64, tpu.core_type = #tpu.core_type<tc>, window_params = [{transform_indices = @transform_0, window_bounds = array<i64: 16, 768>}, {transform_indices = @transform_1, window_bounds = array<i64: 768, 128>}, {transform_indices = @transform_2, window_bounds = array<i64: 1, 128>}, {transform_indices = @transform_3, window_bounds = array<i64: 16, 128>}]} {
    %c0_i32 = arith.constant 0 : i32
    %0 = arith.cmpi eq, %arg2, %c0_i32 : i32
    %1 = arith.extui %0 : i1 to i32
    %c0_i32_0 = arith.constant 0 : i32
    %2 = arith.cmpi ne, %1, %c0_i32_0 : i32
    scf.if %2 {
      %cst_9 = arith.constant 0.000000e+00 : f32
      %12 = vector.broadcast %cst_9 : f32 to vector<16x128xf32>
      %c0_10 = arith.constant 0 : index
      %c0_11 = arith.constant 0 : index
      %13 = vector.load %arg7[%c0_10, %c0_11] : memref<16x128xf32, #tpu.memory_space<vmem>>, vector<16x128xf32>
      tpu.vector_store %arg7[%c0_10, %c0_11], %12 {strides = array<i32>} : memref<16x128xf32, #tpu.memory_space<vmem>>, vector<16x128xf32>,
    } else {
    }
    %c0 = arith.constant 0 : index
    %c0_1 = arith.constant 0 : index
    %3 = vector.load %arg7[%c0, %c0_1] : memref<16x128xf32, #tpu.memory_space<vmem>>, vector<16x128xf32>
    %c0_2 = arith.constant 0 : index
    %c0_3 = arith.constant 0 : index
    %4 = vector.load %arg3[%c0_2, %c0_3] : memref<16x768xbf16, #tpu.memory_space<vmem>>, vector<16x768xbf16>
    %c0_4 = arith.constant 0 : index
    %c0_5 = arith.constant 0 : index
    %5 = vector.load %arg4[%c0_4, %c0_5] : memref<768x128xbf16, #tpu.memory_space<vmem>>, vector<768x128xbf16>
    %cst = arith.constant dense<0.000000e+00> : vector<16x128xf32>
    %6 = tpu.matmul %4, %5, %cst {dimension_numbers = #tpu.dot_dimension_numbers<[1], [0], [0], [1], [0, 0, 1, 1], [], []>} : vector<16x768xbf16>, vector<768x128xbf16>, vector<16x128xf32> -> vector<16x128xf32>
    %7 = arith.addf %3, %6 : vector<16x128xf32>
    %c0_6 = arith.constant 0 : index
    %c0_7 = arith.constant 0 : index
    %8 = vector.load %arg7[%c0_6, %c0_7] : memref<16x128xf32, #tpu.memory_space<vmem>>, vector<16x128xf32>
    tpu.vector_store %arg7[%c0_6, %c0_7], %7 {strides = array<i32>} : memref<16x128xf32, #tpu.memory_space<vmem>>, vector<16x128xf32>,
    %c2_i32 = arith.constant 2 : i32
    %9 = arith.cmpi eq, %arg2, %c2_i32 : i32
    %10 = arith.extui %9 : i1 to i32
    %c0_i32_8 = arith.constant 0 : i32
    %11 = arith.cmpi ne, %10, %c0_i32_8 : i32
    scf.if %11 {
      %c0_9 = arith.constant 0 : index
      %c0_10 = arith.constant 0 : index
      %12 = vector.load %arg7[%c0_9, %c0_10] : memref<16x128xf32, #tpu.memory_space<vmem>>, vector<16x128xf32>
      %c0_11 = arith.constant 0 : index
      %c0_12 = arith.constant 0 : index
      %13 = vector.load %arg5[%c0_11, %c0_12] : memref<1x128xf32, #tpu.memory_space<vmem>>, vector<1x128xf32>
      %14 = vector.broadcast %13 : vector<1x128xf32> to vector<16x128xf32>
      %15 = arith.addf %12, %14 : vector<16x128xf32>
      %cst_13 = arith.constant 0.000000e+00 : f32
      %16 = vector.broadcast %cst_13 : f32 to vector<16x128xf32>
      %17 = arith.maximumf %15, %16 : vector<16x128xf32>
      %18 = arith.truncf %17 : vector<16x128xf32> to vector<16x128xbf16>
      %c0_14 = arith.constant 0 : index
      %c0_15 = arith.constant 0 : index
      %19 = vector.load %arg6[%c0_14, %c0_15] : memref<16x128xbf16, #tpu.memory_space<vmem>>, vector<16x128xbf16>
      tpu.vector_store %arg6[%c0_14, %c0_15], %18 {strides = array<i32>} : memref<16x128xbf16, #tpu.memory_space<vmem>>, vector<16x128xbf16>,
    } else {
    }
    return
  }
  func.func @transform_0(%arg0: i32, %arg1: i32, %arg2: i32) -> (i32, i32) {
    %c0_i32 = arith.constant 0 : i32
    return %arg0, %arg2 : i32, i32
  }
  func.func @transform_1(%arg0: i32, %arg1: i32, %arg2: i32) -> (i32, i32) {
    %c0_i32 = arith.constant 0 : i32
    return %arg2, %arg1 : i32, i32
  }
  func.func @transform_2(%arg0: i32, %arg1: i32, %arg2: i32) -> (i32, i32) {
    %c0_i32 = arith.constant 0 : i32
    %c0_i32_0 = arith.constant 0 : i32
    return %c0_i32, %arg1 : i32, i32
  }
  func.func @transform_3(%arg0: i32, %arg1: i32, %arg2: i32) -> (i32, i32) {
    %c0_i32 = arith.constant 0 : i32
    return %arg0, %arg1 : i32, i32
  }
}

module attributes {stable_mosaic.version = 11 : i64} {
  func.func @kernel(%arg0: i32, %arg1: i32, %arg2: i32, %arg3: memref<16x768xbf16, #tpu.memory_space<vmem>>, %arg4: memref<768x128xbf16, #tpu.memory_space<vmem>>, %arg5: memref<1x128xf32, #tpu.memory_space<vmem>>, %arg6: memref<16x128xbf16, #tpu.memory_space<vmem>>, %arg7: memref<16x128xbf16, #tpu.memory_space<vmem>>, %arg8: memref<16x128xf32, #tpu.memory_space<vmem>>) attributes {dimension_semantics = [#tpu.dimension_semantics<parallel>, #tpu.dimension_semantics<parallel>, #tpu.dimension_semantics<arbitrary>], iteration_bounds = array<i64: 1, 2, 3>, scalar_prefetch = 0 : i64, scratch_operands = 1 : i64, tpu.core_type = #tpu.core_type<tc>, window_params = [{transform_indices = @transform_0, window_bounds = array<i64: 16, 768>}, {transform_indices = @transform_1, window_bounds = array<i64: 768, 128>}, {transform_indices = @transform_2, window_bounds = array<i64: 1, 128>}, {transform_indices = @transform_3, window_bounds = array<i64: 16, 128>}, {transform_indices = @transform_4, window_bounds = array<i64: 16, 128>}]} {
    %c0_i32 = arith.constant 0 : i32
    %0 = arith.cmpi eq, %arg2, %c0_i32 : i32
    %1 = arith.extui %0 : i1 to i32
    %c0_i32_0 = arith.constant 0 : i32
    %2 = arith.cmpi ne, %1, %c0_i32_0 : i32
    scf.if %2 {
      %cst_9 = arith.constant 0.000000e+00 : f32
      %12 = vector.broadcast %cst_9 : f32 to vector<16x128xf32>
      %c0_10 = arith.constant 0 : index
      %c0_11 = arith.constant 0 : index
      %13 = vector.load %arg8[%c0_10, %c0_11] : memref<16x128xf32, #tpu.memory_space<vmem>>, vector<16x128xf32>
      tpu.vector_store %arg8[%c0_10, %c0_11], %12 {strides = array<i32>} : memref<16x128xf32, #tpu.memory_space<vmem>>, vector<16x128xf32>,
    } else {
    }
    %c0 = arith.constant 0 : index
    %c0_1 = arith.constant 0 : index
    %3 = vector.load %arg8[%c0, %c0_1] : memref<16x128xf32, #tpu.memory_space<vmem>>, vector<16x128xf32>
    %c0_2 = arith.constant 0 : index
    %c0_3 = arith.constant 0 : index
    %4 = vector.load %arg3[%c0_2, %c0_3] : memref<16x768xbf16, #tpu.memory_space<vmem>>, vector<16x768xbf16>
    %c0_4 = arith.constant 0 : index
    %c0_5 = arith.constant 0 : index
    %5 = vector.load %arg4[%c0_4, %c0_5] : memref<768x128xbf16, #tpu.memory_space<vmem>>, vector<768x128xbf16>
    %cst = arith.constant dense<0.000000e+00> : vector<16x128xf32>
    %6 = tpu.matmul %4, %5, %cst {dimension_numbers = #tpu.dot_dimension_numbers<[1], [0], [0], [1], [0, 0, 1, 1], [], []>} : vector<16x768xbf16>, vector<768x128xbf16>, vector<16x128xf32> -> vector<16x128xf32>
    %7 = arith.addf %3, %6 : vector<16x128xf32>
    %c0_6 = arith.constant 0 : index
    %c0_7 = arith.constant 0 : index
    %8 = vector.load %arg8[%c0_6, %c0_7] : memref<16x128xf32, #tpu.memory_space<vmem>>, vector<16x128xf32>
    tpu.vector_store %arg8[%c0_6, %c0_7], %7 {strides = array<i32>} : memref<16x128xf32, #tpu.memory_space<vmem>>, vector<16x128xf32>,
    %c2_i32 = arith.constant 2 : i32
    %9 = arith.cmpi eq, %arg2, %c2_i32 : i32
    %10 = arith.extui %9 : i1 to i32
    %c0_i32_8 = arith.constant 0 : i32
    %11 = arith.cmpi ne, %10, %c0_i32_8 : i32
    scf.if %11 {
      %c0_9 = arith.constant 0 : index
      %c0_10 = arith.constant 0 : index
      %12 = vector.load %arg8[%c0_9, %c0_10] : memref<16x128xf32, #tpu.memory_space<vmem>>, vector<16x128xf32>
      %c0_11 = arith.constant 0 : index
      %c0_12 = arith.constant 0 : index
      %13 = vector.load %arg5[%c0_11, %c0_12] : memref<1x128xf32, #tpu.memory_space<vmem>>, vector<1x128xf32>
      %14 = vector.broadcast %13 : vector<1x128xf32> to vector<16x128xf32>
      %15 = arith.addf %12, %14 : vector<16x128xf32>
      %c0_13 = arith.constant 0 : index
      %c0_14 = arith.constant 0 : index
      %16 = vector.load %arg6[%c0_13, %c0_14] : memref<16x128xbf16, #tpu.memory_space<vmem>>, vector<16x128xbf16>
      %17 = arith.extf %16 : vector<16x128xbf16> to vector<16x128xf32>
      %18 = arith.addf %15, %17 : vector<16x128xf32>
      %cst_15 = arith.constant 0.000000e+00 : f32
      %19 = vector.broadcast %cst_15 : f32 to vector<16x128xf32>
      %20 = arith.maximumf %18, %19 : vector<16x128xf32>
      %21 = arith.truncf %20 : vector<16x128xf32> to vector<16x128xbf16>
      %c0_16 = arith.constant 0 : index
      %c0_17 = arith.constant 0 : index
      %22 = vector.load %arg7[%c0_16, %c0_17] : memref<16x128xbf16, #tpu.memory_space<vmem>>, vector<16x128xbf16>
      tpu.vector_store %arg7[%c0_16, %c0_17], %21 {strides = array<i32>} : memref<16x128xbf16, #tpu.memory_space<vmem>>, vector<16x128xbf16>,
    } else {
    }
    return
  }
  func.func @transform_0(%arg0: i32, %arg1: i32, %arg2: i32) -> (i32, i32) {
    %c0_i32 = arith.constant 0 : i32
    return %arg0, %arg2 : i32, i32
  }
  func.func @transform_1(%arg0: i32, %arg1: i32, %arg2: i32) -> (i32, i32) {
    %c0_i32 = arith.constant 0 : i32
    return %arg2, %arg1 : i32, i32
  }
  func.func @transform_2(%arg0: i32, %arg1: i32, %arg2: i32) -> (i32, i32) {
    %c0_i32 = arith.constant 0 : i32
    %c0_i32_0 = arith.constant 0 : i32
    return %c0_i32, %arg1 : i32, i32
  }
  func.func @transform_3(%arg0: i32, %arg1: i32, %arg2: i32) -> (i32, i32) {
    %c0_i32 = arith.constant 0 : i32
    return %arg0, %arg1 : i32, i32
  }
  func.func @transform_4(%arg0: i32, %arg1: i32, %arg2: i32) -> (i32, i32) {
    %c0_i32 = arith.constant 0 : i32
    return %arg0, %arg1 : i32, i32
  }
}

module attributes {stable_mosaic.version = 11 : i64} {
  func.func @kernel(%arg0: i32, %arg1: i32, %arg2: i32, %arg3: memref<16x128xbf16, #tpu.memory_space<vmem>>, %arg4: memref<128x128xbf16, #tpu.memory_space<vmem>>, %arg5: memref<1x128xf32, #tpu.memory_space<vmem>>, %arg6: memref<16x128xbf16, #tpu.memory_space<vmem>>, %arg7: memref<16x128xf32, #tpu.memory_space<vmem>>) attributes {dimension_semantics = [#tpu.dimension_semantics<parallel>, #tpu.dimension_semantics<parallel>, #tpu.dimension_semantics<arbitrary>], iteration_bounds = array<i64: 1, 2, 1>, scalar_prefetch = 0 : i64, scratch_operands = 1 : i64, tpu.core_type = #tpu.core_type<tc>, window_params = [{transform_indices = @transform_0, window_bounds = array<i64: 16, 128>}, {transform_indices = @transform_1, window_bounds = array<i64: 128, 128>}, {transform_indices = @transform_2, window_bounds = array<i64: 1, 128>}, {transform_indices = @transform_3, window_bounds = array<i64: 16, 128>}]} {
    %c0_i32 = arith.constant 0 : i32
    %0 = arith.cmpi eq, %arg2, %c0_i32 : i32
    %1 = arith.extui %0 : i1 to i32
    %c0_i32_0 = arith.constant 0 : i32
    %2 = arith.cmpi ne, %1, %c0_i32_0 : i32
    scf.if %2 {
      %cst_10 = arith.constant 0.000000e+00 : f32
      %12 = vector.broadcast %cst_10 : f32 to vector<16x128xf32>
      %c0_11 = arith.constant 0 : index
      %c0_12 = arith.constant 0 : index
      %13 = vector.load %arg7[%c0_11, %c0_12] : memref<16x128xf32, #tpu.memory_space<vmem>>, vector<16x128xf32>
      tpu.vector_store %arg7[%c0_11, %c0_12], %12 {strides = array<i32>} : memref<16x128xf32, #tpu.memory_space<vmem>>, vector<16x128xf32>,
    } else {
    }
    %c0 = arith.constant 0 : index
    %c0_1 = arith.constant 0 : index
    %3 = vector.load %arg7[%c0, %c0_1] : memref<16x128xf32, #tpu.memory_space<vmem>>, vector<16x128xf32>
    %c0_2 = arith.constant 0 : index
    %c0_3 = arith.constant 0 : index
    %4 = vector.load %arg3[%c0_2, %c0_3] : memref<16x128xbf16, #tpu.memory_space<vmem>>, vector<16x128xbf16>
    %c0_4 = arith.constant 0 : index
    %c0_5 = arith.constant 0 : index
    %5 = vector.load %arg4[%c0_4, %c0_5] : memref<128x128xbf16, #tpu.memory_space<vmem>>, vector<128x128xbf16>
    %cst = arith.constant dense<0.000000e+00> : vector<16x128xf32>
    %6 = tpu.matmul %4, %5, %cst {dimension_numbers = #tpu.dot_dimension_numbers<[1], [0], [0], [1], [0, 0, 1, 1], [], []>} : vector<16x128xbf16>, vector<128x128xbf16>, vector<16x128xf32> -> vector<16x128xf32>
    %7 = arith.addf %3, %6 : vector<16x128xf32>
    %c0_6 = arith.constant 0 : index
    %c0_7 = arith.constant 0 : index
    %8 = vector.load %arg7[%c0_6, %c0_7] : memref<16x128xf32, #tpu.memory_space<vmem>>, vector<16x128xf32>
    tpu.vector_store %arg7[%c0_6, %c0_7], %7 {strides = array<i32>} : memref<16x128xf32, #tpu.memory_space<vmem>>, vector<16x128xf32>,
    %c0_i32_8 = arith.constant 0 : i32
    %9 = arith.cmpi eq, %arg2, %c0_i32_8 : i32
    %10 = arith.extui %9 : i1 to i32
    %c0_i32_9 = arith.constant 0 : i32
    %11 = arith.cmpi ne, %10, %c0_i32_9 : i32
    scf.if %11 {
      %c0_10 = arith.constant 0 : index
      %c0_11 = arith.constant 0 : index
      %12 = vector.load %arg7[%c0_10, %c0_11] : memref<16x128xf32, #tpu.memory_space<vmem>>, vector<16x128xf32>
      %c0_12 = arith.constant 0 : index
      %c0_13 = arith.constant 0 : index
      %13 = vector.load %arg5[%c0_12, %c0_13] : memref<1x128xf32, #tpu.memory_space<vmem>>, vector<1x128xf32>
      %14 = vector.broadcast %13 : vector<1x128xf32> to vector<16x128xf32>
      %15 = arith.addf %12, %14 : vector<16x128xf32>
      %16 = arith.truncf %15 : vector<16x128xf32> to vector<16x128xbf16>
      %c0_14 = arith.constant 0 : index
      %c0_15 = arith.constant 0 : index
      %17 = vector.load %arg6[%c0_14, %c0_15] : memref<16x128xbf16, #tpu.memory_space<vmem>>, vector<16x128xbf16>
      tpu.vector_store %arg6[%c0_14, %c0_15], %16 {strides = array<i32>} : memref<16x128xbf16, #tpu.memory_space<vmem>>, vector<16x128xbf16>,
    } else {
    }
    return
  }
  func.func @transform_0(%arg0: i32, %arg1: i32, %arg2: i32) -> (i32, i32) {
    %c0_i32 = arith.constant 0 : i32
    return %arg0, %arg2 : i32, i32
  }
  func.func @transform_1(%arg0: i32, %arg1: i32, %arg2: i32) -> (i32, i32) {
    %c0_i32 = arith.constant 0 : i32
    return %arg2, %arg1 : i32, i32
  }
  func.func @transform_2(%arg0: i32, %arg1: i32, %arg2: i32) -> (i32, i32) {
    %c0_i32 = arith.constant 0 : i32
    %c0_i32_0 = arith.constant 0 : i32
    return %c0_i32, %arg1 : i32, i32
  }
  func.func @transform_3(%arg0: i32, %arg1: i32, %arg2: i32) -> (i32, i32) {
    %c0_i32 = arith.constant 0 : i32
    return %arg0, %arg1 : i32, i32
  }
}

module attributes {stable_mosaic.version = 11 : i64} {
  func.func @kernel(%arg0: i32, %arg1: i32, %arg2: i32, %arg3: memref<16x768xbf16, #tpu.memory_space<vmem>>, %arg4: memref<768x256xbf16, #tpu.memory_space<vmem>>, %arg5: memref<1x256xf32, #tpu.memory_space<vmem>>, %arg6: memref<16x256xbf16, #tpu.memory_space<vmem>>, %arg7: memref<16x256xf32, #tpu.memory_space<vmem>>) attributes {dimension_semantics = [#tpu.dimension_semantics<parallel>, #tpu.dimension_semantics<parallel>, #tpu.dimension_semantics<arbitrary>], iteration_bounds = array<i64: 1, 2, 3>, scalar_prefetch = 0 : i64, scratch_operands = 1 : i64, tpu.core_type = #tpu.core_type<tc>, window_params = [{transform_indices = @transform_0, window_bounds = array<i64: 16, 768>}, {transform_indices = @transform_1, window_bounds = array<i64: 768, 256>}, {transform_indices = @transform_2, window_bounds = array<i64: 1, 256>}, {transform_indices = @transform_3, window_bounds = array<i64: 16, 256>}]} {
    %c0_i32 = arith.constant 0 : i32
    %0 = arith.cmpi eq, %arg2, %c0_i32 : i32
    %1 = arith.extui %0 : i1 to i32
    %c0_i32_0 = arith.constant 0 : i32
    %2 = arith.cmpi ne, %1, %c0_i32_0 : i32
    scf.if %2 {
      %cst_9 = arith.constant 0.000000e+00 : f32
      %12 = vector.broadcast %cst_9 : f32 to vector<16x256xf32>
      %c0_10 = arith.constant 0 : index
      %c0_11 = arith.constant 0 : index
      %13 = vector.load %arg7[%c0_10, %c0_11] : memref<16x256xf32, #tpu.memory_space<vmem>>, vector<16x256xf32>
      tpu.vector_store %arg7[%c0_10, %c0_11], %12 {strides = array<i32>} : memref<16x256xf32, #tpu.memory_space<vmem>>, vector<16x256xf32>,
    } else {
    }
    %c0 = arith.constant 0 : index
    %c0_1 = arith.constant 0 : index
    %3 = vector.load %arg7[%c0, %c0_1] : memref<16x256xf32, #tpu.memory_space<vmem>>, vector<16x256xf32>
    %c0_2 = arith.constant 0 : index
    %c0_3 = arith.constant 0 : index
    %4 = vector.load %arg3[%c0_2, %c0_3] : memref<16x768xbf16, #tpu.memory_space<vmem>>, vector<16x768xbf16>
    %c0_4 = arith.constant 0 : index
    %c0_5 = arith.constant 0 : index
    %5 = vector.load %arg4[%c0_4, %c0_5] : memref<768x256xbf16, #tpu.memory_space<vmem>>, vector<768x256xbf16>
    %cst = arith.constant dense<0.000000e+00> : vector<16x256xf32>
    %6 = tpu.matmul %4, %5, %cst {dimension_numbers = #tpu.dot_dimension_numbers<[1], [0], [0], [1], [0, 0, 1, 1], [], []>} : vector<16x768xbf16>, vector<768x256xbf16>, vector<16x256xf32> -> vector<16x256xf32>
    %7 = arith.addf %3, %6 : vector<16x256xf32>
    %c0_6 = arith.constant 0 : index
    %c0_7 = arith.constant 0 : index
    %8 = vector.load %arg7[%c0_6, %c0_7] : memref<16x256xf32, #tpu.memory_space<vmem>>, vector<16x256xf32>
    tpu.vector_store %arg7[%c0_6, %c0_7], %7 {strides = array<i32>} : memref<16x256xf32, #tpu.memory_space<vmem>>, vector<16x256xf32>,
    %c2_i32 = arith.constant 2 : i32
    %9 = arith.cmpi eq, %arg2, %c2_i32 : i32
    %10 = arith.extui %9 : i1 to i32
    %c0_i32_8 = arith.constant 0 : i32
    %11 = arith.cmpi ne, %10, %c0_i32_8 : i32
    scf.if %11 {
      %c0_9 = arith.constant 0 : index
      %c0_10 = arith.constant 0 : index
      %12 = vector.load %arg7[%c0_9, %c0_10] : memref<16x256xf32, #tpu.memory_space<vmem>>, vector<16x256xf32>
      %c0_11 = arith.constant 0 : index
      %c0_12 = arith.constant 0 : index
      %13 = vector.load %arg5[%c0_11, %c0_12] : memref<1x256xf32, #tpu.memory_space<vmem>>, vector<1x256xf32>
      %14 = vector.broadcast %13 : vector<1x256xf32> to vector<16x256xf32>
      %15 = arith.addf %12, %14 : vector<16x256xf32>
      %cst_13 = arith.constant 0.000000e+00 : f32
      %16 = vector.broadcast %cst_13 : f32 to vector<16x256xf32>
      %17 = arith.maximumf %15, %16 : vector<16x256xf32>
      %18 = arith.truncf %17 : vector<16x256xf32> to vector<16x256xbf16>
      %c0_14 = arith.constant 0 : index
      %c0_15 = arith.constant 0 : index
      %19 = vector.load %arg6[%c0_14, %c0_15] : memref<16x256xbf16, #tpu.memory_space<vmem>>, vector<16x256xbf16>
      tpu.vector_store %arg6[%c0_14, %c0_15], %18 {strides = array<i32>} : memref<16x256xbf16, #tpu.memory_space<vmem>>, vector<16x256xbf16>,
    } else {
    }
    return
  }
  func.func @transform_0(%arg0: i32, %arg1: i32, %arg2: i32) -> (i32, i32) {
    %c0_i32 = arith.constant 0 : i32
    return %arg0, %arg2 : i32, i32
  }
  func.func @transform_1(%arg0: i32, %arg1: i32, %arg2: i32) -> (i32, i32) {
    %c0_i32 = arith.constant 0 : i32
    return %arg2, %arg1 : i32, i32
  }
  func.func @transform_2(%arg0: i32, %arg1: i32, %arg2: i32) -> (i32, i32) {
    %c0_i32 = arith.constant 0 : i32
    %c0_i32_0 = arith.constant 0 : i32
    return %c0_i32, %arg1 : i32, i32
  }
  func.func @transform_3(%arg0: i32, %arg1: i32, %arg2: i32) -> (i32, i32) {
    %c0_i32 = arith.constant 0 : i32
    return %arg0, %arg1 : i32, i32
  }
}

module attributes {stable_mosaic.version = 11 : i64} {
  func.func @kernel(%arg0: i32, %arg1: i32, %arg2: i32, %arg3: memref<16x256xbf16, #tpu.memory_space<vmem>>, %arg4: memref<256x256xbf16, #tpu.memory_space<vmem>>, %arg5: memref<1x256xf32, #tpu.memory_space<vmem>>, %arg6: memref<16x256xbf16, #tpu.memory_space<vmem>>, %arg7: memref<16x256xf32, #tpu.memory_space<vmem>>) attributes {dimension_semantics = [#tpu.dimension_semantics<parallel>, #tpu.dimension_semantics<parallel>, #tpu.dimension_semantics<arbitrary>], iteration_bounds = array<i64: 1, 2, 1>, scalar_prefetch = 0 : i64, scratch_operands = 1 : i64, tpu.core_type = #tpu.core_type<tc>, window_params = [{transform_indices = @transform_0, window_bounds = array<i64: 16, 256>}, {transform_indices = @transform_1, window_bounds = array<i64: 256, 256>}, {transform_indices = @transform_2, window_bounds = array<i64: 1, 256>}, {transform_indices = @transform_3, window_bounds = array<i64: 16, 256>}]} {
    %c0_i32 = arith.constant 0 : i32
    %0 = arith.cmpi eq, %arg2, %c0_i32 : i32
    %1 = arith.extui %0 : i1 to i32
    %c0_i32_0 = arith.constant 0 : i32
    %2 = arith.cmpi ne, %1, %c0_i32_0 : i32
    scf.if %2 {
      %cst_10 = arith.constant 0.000000e+00 : f32
      %12 = vector.broadcast %cst_10 : f32 to vector<16x256xf32>
      %c0_11 = arith.constant 0 : index
      %c0_12 = arith.constant 0 : index
      %13 = vector.load %arg7[%c0_11, %c0_12] : memref<16x256xf32, #tpu.memory_space<vmem>>, vector<16x256xf32>
      tpu.vector_store %arg7[%c0_11, %c0_12], %12 {strides = array<i32>} : memref<16x256xf32, #tpu.memory_space<vmem>>, vector<16x256xf32>,
    } else {
    }
    %c0 = arith.constant 0 : index
    %c0_1 = arith.constant 0 : index
    %3 = vector.load %arg7[%c0, %c0_1] : memref<16x256xf32, #tpu.memory_space<vmem>>, vector<16x256xf32>
    %c0_2 = arith.constant 0 : index
    %c0_3 = arith.constant 0 : index
    %4 = vector.load %arg3[%c0_2, %c0_3] : memref<16x256xbf16, #tpu.memory_space<vmem>>, vector<16x256xbf16>
    %c0_4 = arith.constant 0 : index
    %c0_5 = arith.constant 0 : index
    %5 = vector.load %arg4[%c0_4, %c0_5] : memref<256x256xbf16, #tpu.memory_space<vmem>>, vector<256x256xbf16>
    %cst = arith.constant dense<0.000000e+00> : vector<16x256xf32>
    %6 = tpu.matmul %4, %5, %cst {dimension_numbers = #tpu.dot_dimension_numbers<[1], [0], [0], [1], [0, 0, 1, 1], [], []>} : vector<16x256xbf16>, vector<256x256xbf16>, vector<16x256xf32> -> vector<16x256xf32>
    %7 = arith.addf %3, %6 : vector<16x256xf32>
    %c0_6 = arith.constant 0 : index
    %c0_7 = arith.constant 0 : index
    %8 = vector.load %arg7[%c0_6, %c0_7] : memref<16x256xf32, #tpu.memory_space<vmem>>, vector<16x256xf32>
    tpu.vector_store %arg7[%c0_6, %c0_7], %7 {strides = array<i32>} : memref<16x256xf32, #tpu.memory_space<vmem>>, vector<16x256xf32>,
    %c0_i32_8 = arith.constant 0 : i32
    %9 = arith.cmpi eq, %arg2, %c0_i32_8 : i32
    %10 = arith.extui %9 : i1 to i32
    %c0_i32_9 = arith.constant 0 : i32
    %11 = arith.cmpi ne, %10, %c0_i32_9 : i32
    scf.if %11 {
      %c0_10 = arith.constant 0 : index
      %c0_11 = arith.constant 0 : index
      %12 = vector.load %arg7[%c0_10, %c0_11] : memref<16x256xf32, #tpu.memory_space<vmem>>, vector<16x256xf32>
      %c0_12 = arith.constant 0 : index
      %c0_13 = arith.constant 0 : index
      %13 = vector.load %arg5[%c0_12, %c0_13] : memref<1x256xf32, #tpu.memory_space<vmem>>, vector<1x256xf32>
      %14 = vector.broadcast %13 : vector<1x256xf32> to vector<16x256xf32>
      %15 = arith.addf %12, %14 : vector<16x256xf32>
      %16 = arith.truncf %15 : vector<16x256xf32> to vector<16x256xbf16>
      %c0_14 = arith.constant 0 : index
      %c0_15 = arith.constant 0 : index
      %17 = vector.load %arg6[%c0_14, %c0_15] : memref<16x256xbf16, #tpu.memory_space<vmem>>, vector<16x256xbf16>
      tpu.vector_store %arg6[%c0_14, %c0_15], %16 {strides = array<i32>} : memref<16x256xbf16, #tpu.memory_space<vmem>>, vector<16x256xbf16>,
    } else {
    }
    return
  }
  func.func @transform_0(%arg0: i32, %arg1: i32, %arg2: i32) -> (i32, i32) {
    %c0_i32 = arith.constant 0 : i32
    return %arg0, %arg2 : i32, i32
  }
  func.func @transform_1(%arg0: i32, %arg1: i32, %arg2: i32) -> (i32, i32) {
    %c0_i32 = arith.constant 0 : i32
    return %arg2, %arg1 : i32, i32
  }
  func.func @transform_2(%arg0: i32, %arg1: i32, %arg2: i32) -> (i32, i32) {
    %c0_i32 = arith.constant 0 : i32
    %c0_i32_0 = arith.constant 0 : i32
    return %c0_i32, %arg1 : i32, i32
  }
  func.func @transform_3(%arg0: i32, %arg1: i32, %arg2: i32) -> (i32, i32) {
    %c0_i32 = arith.constant 0 : i32
    return %arg0, %arg1 : i32, i32
  }
}

module attributes {stable_mosaic.version = 11 : i64} {
  func.func @kernel(%arg0: i32, %arg1: i32, %arg2: i32, %arg3: memref<16x768xbf16, #tpu.memory_space<vmem>>, %arg4: memref<768x256xbf16, #tpu.memory_space<vmem>>, %arg5: memref<1x256xf32, #tpu.memory_space<vmem>>, %arg6: memref<16x256xbf16, #tpu.memory_space<vmem>>, %arg7: memref<16x256xbf16, #tpu.memory_space<vmem>>, %arg8: memref<16x256xf32, #tpu.memory_space<vmem>>) attributes {dimension_semantics = [#tpu.dimension_semantics<parallel>, #tpu.dimension_semantics<parallel>, #tpu.dimension_semantics<arbitrary>], iteration_bounds = array<i64: 1, 2, 6>, scalar_prefetch = 0 : i64, scratch_operands = 1 : i64, tpu.core_type = #tpu.core_type<tc>, window_params = [{transform_indices = @transform_0, window_bounds = array<i64: 16, 768>}, {transform_indices = @transform_1, window_bounds = array<i64: 768, 256>}, {transform_indices = @transform_2, window_bounds = array<i64: 1, 256>}, {transform_indices = @transform_3, window_bounds = array<i64: 16, 256>}, {transform_indices = @transform_4, window_bounds = array<i64: 16, 256>}]} {
    %c0_i32 = arith.constant 0 : i32
    %0 = arith.cmpi eq, %arg2, %c0_i32 : i32
    %1 = arith.extui %0 : i1 to i32
    %c0_i32_0 = arith.constant 0 : i32
    %2 = arith.cmpi ne, %1, %c0_i32_0 : i32
    scf.if %2 {
      %cst_9 = arith.constant 0.000000e+00 : f32
      %12 = vector.broadcast %cst_9 : f32 to vector<16x256xf32>
      %c0_10 = arith.constant 0 : index
      %c0_11 = arith.constant 0 : index
      %13 = vector.load %arg8[%c0_10, %c0_11] : memref<16x256xf32, #tpu.memory_space<vmem>>, vector<16x256xf32>
      tpu.vector_store %arg8[%c0_10, %c0_11], %12 {strides = array<i32>} : memref<16x256xf32, #tpu.memory_space<vmem>>, vector<16x256xf32>,
    } else {
    }
    %c0 = arith.constant 0 : index
    %c0_1 = arith.constant 0 : index
    %3 = vector.load %arg8[%c0, %c0_1] : memref<16x256xf32, #tpu.memory_space<vmem>>, vector<16x256xf32>
    %c0_2 = arith.constant 0 : index
    %c0_3 = arith.constant 0 : index
    %4 = vector.load %arg3[%c0_2, %c0_3] : memref<16x768xbf16, #tpu.memory_space<vmem>>, vector<16x768xbf16>
    %c0_4 = arith.constant 0 : index
    %c0_5 = arith.constant 0 : index
    %5 = vector.load %arg4[%c0_4, %c0_5] : memref<768x256xbf16, #tpu.memory_space<vmem>>, vector<768x256xbf16>
    %cst = arith.constant dense<0.000000e+00> : vector<16x256xf32>
    %6 = tpu.matmul %4, %5, %cst {dimension_numbers = #tpu.dot_dimension_numbers<[1], [0], [0], [1], [0, 0, 1, 1], [], []>} : vector<16x768xbf16>, vector<768x256xbf16>, vector<16x256xf32> -> vector<16x256xf32>
    %7 = arith.addf %3, %6 : vector<16x256xf32>
    %c0_6 = arith.constant 0 : index
    %c0_7 = arith.constant 0 : index
    %8 = vector.load %arg8[%c0_6, %c0_7] : memref<16x256xf32, #tpu.memory_space<vmem>>, vector<16x256xf32>
    tpu.vector_store %arg8[%c0_6, %c0_7], %7 {strides = array<i32>} : memref<16x256xf32, #tpu.memory_space<vmem>>, vector<16x256xf32>,
    %c5_i32 = arith.constant 5 : i32
    %9 = arith.cmpi eq, %arg2, %c5_i32 : i32
    %10 = arith.extui %9 : i1 to i32
    %c0_i32_8 = arith.constant 0 : i32
    %11 = arith.cmpi ne, %10, %c0_i32_8 : i32
    scf.if %11 {
      %c0_9 = arith.constant 0 : index
      %c0_10 = arith.constant 0 : index
      %12 = vector.load %arg8[%c0_9, %c0_10] : memref<16x256xf32, #tpu.memory_space<vmem>>, vector<16x256xf32>
      %c0_11 = arith.constant 0 : index
      %c0_12 = arith.constant 0 : index
      %13 = vector.load %arg5[%c0_11, %c0_12] : memref<1x256xf32, #tpu.memory_space<vmem>>, vector<1x256xf32>
      %14 = vector.broadcast %13 : vector<1x256xf32> to vector<16x256xf32>
      %15 = arith.addf %12, %14 : vector<16x256xf32>
      %c0_13 = arith.constant 0 : index
      %c0_14 = arith.constant 0 : index
      %16 = vector.load %arg6[%c0_13, %c0_14] : memref<16x256xbf16, #tpu.memory_space<vmem>>, vector<16x256xbf16>
      %17 = arith.extf %16 : vector<16x256xbf16> to vector<16x256xf32>
      %18 = arith.addf %15, %17 : vector<16x256xf32>
      %cst_15 = arith.constant 0.000000e+00 : f32
      %19 = vector.broadcast %cst_15 : f32 to vector<16x256xf32>
      %20 = arith.maximumf %18, %19 : vector<16x256xf32>
      %21 = arith.truncf %20 : vector<16x256xf32> to vector<16x256xbf16>
      %c0_16 = arith.constant 0 : index
      %c0_17 = arith.constant 0 : index
      %22 = vector.load %arg7[%c0_16, %c0_17] : memref<16x256xbf16, #tpu.memory_space<vmem>>, vector<16x256xbf16>
      tpu.vector_store %arg7[%c0_16, %c0_17], %21 {strides = array<i32>} : memref<16x256xbf16, #tpu.memory_space<vmem>>, vector<16x256xbf16>,
    } else {
    }
    return
  }
  func.func @transform_0(%arg0: i32, %arg1: i32, %arg2: i32) -> (i32, i32) {
    %c0_i32 = arith.constant 0 : i32
    return %arg0, %arg2 : i32, i32
  }
  func.func @transform_1(%arg0: i32, %arg1: i32, %arg2: i32) -> (i32, i32) {
    %c0_i32 = arith.constant 0 : i32
    return %arg2, %arg1 : i32, i32
  }
  func.func @transform_2(%arg0: i32, %arg1: i32, %arg2: i32) -> (i32, i32) {
    %c0_i32 = arith.constant 0 : i32
    %c0_i32_0 = arith.constant 0 : i32
    return %c0_i32, %arg1 : i32, i32
  }
  func.func @transform_3(%arg0: i32, %arg1: i32, %arg2: i32) -> (i32, i32) {
    %c0_i32 = arith.constant 0 : i32
    return %arg0, %arg1 : i32, i32
  }
  func.func @transform_4(%arg0: i32, %arg1: i32, %arg2: i32) -> (i32, i32) {
    %c0_i32 = arith.constant 0 : i32
    return %arg0, %arg1 : i32, i32
  }
}

module attributes {stable_mosaic.version = 11 : i64} {
  func.func @kernel(%arg0: i32, %arg1: i32, %arg2: i32, %arg3: memref<16x768xbf16, #tpu.memory_space<vmem>>, %arg4: memref<768x256xbf16, #tpu.memory_space<vmem>>, %arg5: memref<1x256xf32, #tpu.memory_space<vmem>>, %arg6: memref<16x256xbf16, #tpu.memory_space<vmem>>, %arg7: memref<16x256xf32, #tpu.memory_space<vmem>>) attributes {dimension_semantics = [#tpu.dimension_semantics<parallel>, #tpu.dimension_semantics<parallel>, #tpu.dimension_semantics<arbitrary>], iteration_bounds = array<i64: 1, 2, 6>, scalar_prefetch = 0 : i64, scratch_operands = 1 : i64, tpu.core_type = #tpu.core_type<tc>, window_params = [{transform_indices = @transform_0, window_bounds = array<i64: 16, 768>}, {transform_indices = @transform_1, window_bounds = array<i64: 768, 256>}, {transform_indices = @transform_2, window_bounds = array<i64: 1, 256>}, {transform_indices = @transform_3, window_bounds = array<i64: 16, 256>}]} {
    %c0_i32 = arith.constant 0 : i32
    %0 = arith.cmpi eq, %arg2, %c0_i32 : i32
    %1 = arith.extui %0 : i1 to i32
    %c0_i32_0 = arith.constant 0 : i32
    %2 = arith.cmpi ne, %1, %c0_i32_0 : i32
    scf.if %2 {
      %cst_9 = arith.constant 0.000000e+00 : f32
      %12 = vector.broadcast %cst_9 : f32 to vector<16x256xf32>
      %c0_10 = arith.constant 0 : index
      %c0_11 = arith.constant 0 : index
      %13 = vector.load %arg7[%c0_10, %c0_11] : memref<16x256xf32, #tpu.memory_space<vmem>>, vector<16x256xf32>
      tpu.vector_store %arg7[%c0_10, %c0_11], %12 {strides = array<i32>} : memref<16x256xf32, #tpu.memory_space<vmem>>, vector<16x256xf32>,
    } else {
    }
    %c0 = arith.constant 0 : index
    %c0_1 = arith.constant 0 : index
    %3 = vector.load %arg7[%c0, %c0_1] : memref<16x256xf32, #tpu.memory_space<vmem>>, vector<16x256xf32>
    %c0_2 = arith.constant 0 : index
    %c0_3 = arith.constant 0 : index
    %4 = vector.load %arg3[%c0_2, %c0_3] : memref<16x768xbf16, #tpu.memory_space<vmem>>, vector<16x768xbf16>
    %c0_4 = arith.constant 0 : index
    %c0_5 = arith.constant 0 : index
    %5 = vector.load %arg4[%c0_4, %c0_5] : memref<768x256xbf16, #tpu.memory_space<vmem>>, vector<768x256xbf16>
    %cst = arith.constant dense<0.000000e+00> : vector<16x256xf32>
    %6 = tpu.matmul %4, %5, %cst {dimension_numbers = #tpu.dot_dimension_numbers<[1], [0], [0], [1], [0, 0, 1, 1], [], []>} : vector<16x768xbf16>, vector<768x256xbf16>, vector<16x256xf32> -> vector<16x256xf32>
    %7 = arith.addf %3, %6 : vector<16x256xf32>
    %c0_6 = arith.constant 0 : index
    %c0_7 = arith.constant 0 : index
    %8 = vector.load %arg7[%c0_6, %c0_7] : memref<16x256xf32, #tpu.memory_space<vmem>>, vector<16x256xf32>
    tpu.vector_store %arg7[%c0_6, %c0_7], %7 {strides = array<i32>} : memref<16x256xf32, #tpu.memory_space<vmem>>, vector<16x256xf32>,
    %c5_i32 = arith.constant 5 : i32
    %9 = arith.cmpi eq, %arg2, %c5_i32 : i32
    %10 = arith.extui %9 : i1 to i32
    %c0_i32_8 = arith.constant 0 : i32
    %11 = arith.cmpi ne, %10, %c0_i32_8 : i32
    scf.if %11 {
      %c0_9 = arith.constant 0 : index
      %c0_10 = arith.constant 0 : index
      %12 = vector.load %arg7[%c0_9, %c0_10] : memref<16x256xf32, #tpu.memory_space<vmem>>, vector<16x256xf32>
      %c0_11 = arith.constant 0 : index
      %c0_12 = arith.constant 0 : index
      %13 = vector.load %arg5[%c0_11, %c0_12] : memref<1x256xf32, #tpu.memory_space<vmem>>, vector<1x256xf32>
      %14 = vector.broadcast %13 : vector<1x256xf32> to vector<16x256xf32>
      %15 = arith.addf %12, %14 : vector<16x256xf32>
      %cst_13 = arith.constant 0.000000e+00 : f32
      %16 = vector.broadcast %cst_13 : f32 to vector<16x256xf32>
      %17 = arith.maximumf %15, %16 : vector<16x256xf32>
      %18 = arith.truncf %17 : vector<16x256xf32> to vector<16x256xbf16>
      %c0_14 = arith.constant 0 : index
      %c0_15 = arith.constant 0 : index
      %19 = vector.load %arg6[%c0_14, %c0_15] : memref<16x256xbf16, #tpu.memory_space<vmem>>, vector<16x256xbf16>
      tpu.vector_store %arg6[%c0_14, %c0_15], %18 {strides = array<i32>} : memref<16x256xbf16, #tpu.memory_space<vmem>>, vector<16x256xbf16>,
    } else {
    }
    return
  }
  func.func @transform_0(%arg0: i32, %arg1: i32, %arg2: i32) -> (i32, i32) {
    %c0_i32 = arith.constant 0 : i32
    return %arg0, %arg2 : i32, i32
  }
  func.func @transform_1(%arg0: i32, %arg1: i32, %arg2: i32) -> (i32, i32) {
    %c0_i32 = arith.constant 0 : i32
    return %arg2, %arg1 : i32, i32
  }
  func.func @transform_2(%arg0: i32, %arg1: i32, %arg2: i32) -> (i32, i32) {
    %c0_i32 = arith.constant 0 : i32
    %c0_i32_0 = arith.constant 0 : i32
    return %c0_i32, %arg1 : i32, i32
  }
  func.func @transform_3(%arg0: i32, %arg1: i32, %arg2: i32) -> (i32, i32) {
    %c0_i32 = arith.constant 0 : i32
    return %arg0, %arg1 : i32, i32
  }
}

module attributes {stable_mosaic.version = 11 : i64} {
  func.func @kernel(%arg0: i32, %arg1: i32, %arg2: i32, %arg3: memref<16x768xbf16, #tpu.memory_space<vmem>>, %arg4: memref<768x256xbf16, #tpu.memory_space<vmem>>, %arg5: memref<1x256xf32, #tpu.memory_space<vmem>>, %arg6: memref<16x256xbf16, #tpu.memory_space<vmem>>, %arg7: memref<16x256xf32, #tpu.memory_space<vmem>>) attributes {dimension_semantics = [#tpu.dimension_semantics<parallel>, #tpu.dimension_semantics<parallel>, #tpu.dimension_semantics<arbitrary>], iteration_bounds = array<i64: 1, 2, 6>, scalar_prefetch = 0 : i64, scratch_operands = 1 : i64, tpu.core_type = #tpu.core_type<tc>, window_params = [{transform_indices = @transform_0, window_bounds = array<i64: 16, 768>}, {transform_indices = @transform_1, window_bounds = array<i64: 768, 256>}, {transform_indices = @transform_2, window_bounds = array<i64: 1, 256>}, {transform_indices = @transform_3, window_bounds = array<i64: 16, 256>}]} {
    %c0_i32 = arith.constant 0 : i32
    %0 = arith.cmpi eq, %arg2, %c0_i32 : i32
    %1 = arith.extui %0 : i1 to i32
    %c0_i32_0 = arith.constant 0 : i32
    %2 = arith.cmpi ne, %1, %c0_i32_0 : i32
    scf.if %2 {
      %cst_9 = arith.constant 0.000000e+00 : f32
      %12 = vector.broadcast %cst_9 : f32 to vector<16x256xf32>
      %c0_10 = arith.constant 0 : index
      %c0_11 = arith.constant 0 : index
      %13 = vector.load %arg7[%c0_10, %c0_11] : memref<16x256xf32, #tpu.memory_space<vmem>>, vector<16x256xf32>
      tpu.vector_store %arg7[%c0_10, %c0_11], %12 {strides = array<i32>} : memref<16x256xf32, #tpu.memory_space<vmem>>, vector<16x256xf32>,
    } else {
    }
    %c0 = arith.constant 0 : index
    %c0_1 = arith.constant 0 : index
    %3 = vector.load %arg7[%c0, %c0_1] : memref<16x256xf32, #tpu.memory_space<vmem>>, vector<16x256xf32>
    %c0_2 = arith.constant 0 : index
    %c0_3 = arith.constant 0 : index
    %4 = vector.load %arg3[%c0_2, %c0_3] : memref<16x768xbf16, #tpu.memory_space<vmem>>, vector<16x768xbf16>
    %c0_4 = arith.constant 0 : index
    %c0_5 = arith.constant 0 : index
    %5 = vector.load %arg4[%c0_4, %c0_5] : memref<768x256xbf16, #tpu.memory_space<vmem>>, vector<768x256xbf16>
    %cst = arith.constant dense<0.000000e+00> : vector<16x256xf32>
    %6 = tpu.matmul %4, %5, %cst {dimension_numbers = #tpu.dot_dimension_numbers<[1], [0], [0], [1], [0, 0, 1, 1], [], []>} : vector<16x768xbf16>, vector<768x256xbf16>, vector<16x256xf32> -> vector<16x256xf32>
    %7 = arith.addf %3, %6 : vector<16x256xf32>
    %c0_6 = arith.constant 0 : index
    %c0_7 = arith.constant 0 : index
    %8 = vector.load %arg7[%c0_6, %c0_7] : memref<16x256xf32, #tpu.memory_space<vmem>>, vector<16x256xf32>
    tpu.vector_store %arg7[%c0_6, %c0_7], %7 {strides = array<i32>} : memref<16x256xf32, #tpu.memory_space<vmem>>, vector<16x256xf32>,
    %c5_i32 = arith.constant 5 : i32
    %9 = arith.cmpi eq, %arg2, %c5_i32 : i32
    %10 = arith.extui %9 : i1 to i32
    %c0_i32_8 = arith.constant 0 : i32
    %11 = arith.cmpi ne, %10, %c0_i32_8 : i32
    scf.if %11 {
      %c0_9 = arith.constant 0 : index
      %c0_10 = arith.constant 0 : index
      %12 = vector.load %arg7[%c0_9, %c0_10] : memref<16x256xf32, #tpu.memory_space<vmem>>, vector<16x256xf32>
      %c0_11 = arith.constant 0 : index
      %c0_12 = arith.constant 0 : index
      %13 = vector.load %arg5[%c0_11, %c0_12] : memref<1x256xf32, #tpu.memory_space<vmem>>, vector<1x256xf32>
      %14 = vector.broadcast %13 : vector<1x256xf32> to vector<16x256xf32>
      %15 = arith.addf %12, %14 : vector<16x256xf32>
      %cst_13 = arith.constant 0.000000e+00 : f32
      %16 = vector.broadcast %cst_13 : f32 to vector<16x256xf32>
      %17 = arith.maximumf %15, %16 : vector<16x256xf32>
      %18 = arith.truncf %17 : vector<16x256xf32> to vector<16x256xbf16>
      %c0_14 = arith.constant 0 : index
      %c0_15 = arith.constant 0 : index
      %19 = vector.load %arg6[%c0_14, %c0_15] : memref<16x256xbf16, #tpu.memory_space<vmem>>, vector<16x256xbf16>
      tpu.vector_store %arg6[%c0_14, %c0_15], %18 {strides = array<i32>} : memref<16x256xbf16, #tpu.memory_space<vmem>>, vector<16x256xbf16>,
    } else {
    }
    return
  }
  func.func @transform_0(%arg0: i32, %arg1: i32, %arg2: i32) -> (i32, i32) {
    %c0_i32 = arith.constant 0 : i32
    return %arg0, %arg2 : i32, i32
  }
  func.func @transform_1(%arg0: i32, %arg1: i32, %arg2: i32) -> (i32, i32) {
    %c0_i32 = arith.constant 0 : i32
    return %arg2, %arg1 : i32, i32
  }
  func.func @transform_2(%arg0: i32, %arg1: i32, %arg2: i32) -> (i32, i32) {
    %c0_i32 = arith.constant 0 : i32
    %c0_i32_0 = arith.constant 0 : i32
    return %c0_i32, %arg1 : i32, i32
  }
  func.func @transform_3(%arg0: i32, %arg1: i32, %arg2: i32) -> (i32, i32) {
    %c0_i32 = arith.constant 0 : i32
    return %arg0, %arg1 : i32, i32
  }
}

</mosaic_0001>

<bundles_post_ra>
// kernel: forward.37
= control target key start
LH: loop header
LB: loop body
LE: loop exit
PB: predicated region body
PF: predicated region fallthrough
CT: control target
= control target key end

     0   :  { %s980_s12 = smov 0   ;;  %s982_s13 = smov 0   ;;  %s1099_s0 = inlined_call_operand.vmem [shape: bf16[128,640], index: 0, kind: input, shape index: {}]   ;;  %s1100_s1 = inlined_call_operand.vmem [shape: bf16[640,128], index: 1, kind: input, shape index: {}]   ;;  %s1101_s2 = inlined_call_operand.vmem [shape: f32[1,128], index: 2, kind: input, shape index: {}]   ;;  %s1102_s3 = inlined_call_operand.vmem [shape: bf16[128,128], index: 3, kind: output, shape index: {}]  }
   0x1   :  { %s984_s14 = smov 0   ;;  %s986_s15 = smov 0  }
   0x2   :  { %s988_s16 = smov 0   ;;  %s990_s17 = smov 0  }
   0x3   :  { %s992_s18 = smov 0  }
   0x4 LB: > { %s25_s19 = sadd.s32 1, %s949_s16  ;;  %s32_s20 = sadd.s32 1, %s953_s17  ;;  %s957_s18 = sphi %s992_s18, %s13_s18   ;;  %s953_s17 = sphi %s990_s17, %s1108_s17   ;;  %s949_s16 = sphi %s988_s16, %s1107_s16   ;;  %s945_s15 = sphi %s986_s15, %s1106_s15   ;;  %s941_s14 = sphi %s984_s14, %s1105_s14   ;;  %s937_s13 = sphi %s982_s13, %s1104_s13   ;;  %s933_s12 = sphi %s980_s12, %s1103_s12  }
   0x5   : > { %p26_p0 = scmp.ge.s32.totalorder %s25_s19, 5  ;;  %p48_p1 = scmp.ne.s32.totalorder %s937_s13, %s933_s12 }
   0x6   : > { %p49_p2 = scmp.eq.s32.totalorder %s957_s18, 0  ;;  %s41_s24 = sadd.s32 1, %s937_s13 }
   0x7   : > { %s1110_s19 = smov (%p26_p0, %s25_s19), 0  ;;  %s1112_s20 = smov (!%p26_p0, %s32_s20), %s953_s17 }
   0x8   : > { %p50_p3 = por %p49_p2, %p48_p1  ;;  %p34_p4 = scmp.ge.s32.totalorder %s1112_s20, 2 }
   0x9   : > { %s37_s21 = ssub.s32 %s949_s16, %s1110_s19  ;;  %p714_p6 = scmp.ge.s32.totalorder %s957_s18, 10 }
   0xa   : > { %s1114_s20 = smov (%p34_p4, %s1112_s20), 0 }
   0xb   : > { %s36_s22 = ssub.s32 %s953_s17, %s1114_s20  ;;  %162 = sbr.rel (%p714_p6) target bundleno = 30 (0x1e), region = 20 }
   0xc   : > { %s38_s23 = sor.u32 %s37_s21, %s36_s22 }
   0xd   : > { %p39_p5 = scmp.eq.s32.totalorder %s38_s23, 0 }
   0xf   : > { %s1031_s25 = scalar_select %p39_p5, %s937_s13, %s41_s24  }
  0x12   : > { %165 = sbr.rel (!%p50_p3) target bundleno = 30 (0x1e), region = 24  ;;  %s167_s26 = sand.u32 (%p50_p3), 1, %s937_s13  }
  0x13   : > { %s833_s27 = smul.u32 (%p50_p3), 40, %s953_s17  ;;  %s715_s28 = sshll.u32 (%p50_p3), %s167_s26, 5 }
  0x14   : > { %s169_s7 = scalar_lea.vmem (%p50_p3), [#allocation3], %s715_s28 }
  0x15   : > { %s172_s29 = sadd.s32 (%p50_p3), %s949_s16, %s833_s27 }
  0x16   : > { %s718_s30 = sshll.u32 (%p50_p3), %s172_s29, 2 }
  0x17   : > { %s174_s6 = scalar_lea.vmem (%p50_p3), %s1099_s0, %s718_s30 }
  0x18   : > { %v190_v0 = vld [vmem:[%s174_s6] sm:$0xf] (%p50_p3)  ;;  %v192_v1 = vld [vmem:[%s174_s6 + $0x14] sm:$0xf] (%p50_p3)  ;;  %v194_v2 = vld [vmem:[%s174_s6 + $0x28] sm:$0xf] (%p50_p3) }
  0x19   : > { %191 = vst [vmem:[%s169_s7] sm:$0xf] %v190_v0  ;;  %193 = vst [vmem:[%s169_s7 + $0x4] sm:$0xf] %v192_v1  ;;  %v196_v3 = vld [vmem:[%s174_s6 + $0x3c] sm:$0xf] }
  0x1a   : > { %195 = vst [vmem:[%s169_s7 + $0x8] sm:$0xf] %v194_v2  ;;  %v198_v4 = vld [vmem:[%s174_s6 + $0x50] sm:$0xf]  ;;  %v200_v5 = vld [vmem:[%s174_s6 + $0x64] sm:$0xf] }
  0x1b   : > { %197 = vst [vmem:[%s169_s7 + $0xc] sm:$0xf] %v196_v3  ;;  %199 = vst [vmem:[%s169_s7 + $0x10] sm:$0xf] %v198_v4  ;;  %v202_v6 = vld [vmem:[%s174_s6 + $0x78] sm:$0xf] }
  0x1c   : > { %201 = vst [vmem:[%s169_s7 + $0x14] sm:$0xf] %v200_v5  ;;  %v204_v7 = vld [vmem:[%s174_s6 + $0x8c] sm:$0xf]  ;;  %203 = vst [vmem:[%s169_s7 + $0x18] sm:$0xf] %v202_v6 }
  0x1d   : > { %205 = vst [vmem:[%s169_s7 + $0x1c] sm:$0xf] %v204_v7 }
  0x1e PF: > { %p719_p7 = scmp.ge.s32.totalorder %s957_s18, 1  ;;  %p255_p8 = scmp.lt.s32.totalorder %s957_s18, 11 }
  0x20   : > { %p256_p9 = pnand %p719_p7, %p255_p8 }
  0x21   : > { %s262_s8 = sand.u32 (!%p256_p9), 1, %s933_s12   ;;  %s721_s9 = sshll.u32 (!%p256_p9), %s941_s14, 4 }
  0x22   : > { %259 = sbr.rel (%p256_p9) target bundleno = 317 (0x13d), region = 69  ;;  %s720_s10 = sshll.u32 (!%p256_p9), %s262_s8, 5 }
  0x23   : > { %p301_p10 = scmp.lt.s32.totalorder (!%p256_p9), %s721_s9, 79  ;;  %s723_s11 = sshll.u32 (!%p256_p9), %s945_s15, 3 }
  0x24   : > { %p313_p11 = scmp.lt.s32.totalorder (!%p256_p9), %s723_s11, 15  ;;  %s1055_s12 = scalar_lea.vmem (!%p256_p9), [#allocation3], %s720_s10 }
  0x25   : > { %p725_p12 = scmp.ne.s32.totalorder (!%p256_p9), %s941_s14, 0 }
  0x29   : > { %s1116_s9 = smov (!%p301_p10, %s721_s9), 79  ;;  %s1118_s11 = smov (!%p313_p11, %s723_s11), 15 }
  0x2a   : > { %s722_s21 = sshll.u32 %s1116_s9, 2  ;;  %s724_s26 = sshll.u32 %s1118_s11, 2  ;;  %v959_v8 = vmov (!%p725_p12), 0.0  }
  0x2b   : > { %s1048_s24 = scalar_lea.vmem %s1100_s1, %s722_s21  ;;  %s1053_s29 = scalar_lea.vmem %s1102_s3, %s724_s26  ;;  %326 = vst [vmem:[#allocation2] sm:$0xff] (!%p725_p12), %v959_v8  ;;  %327 = vst [vmem:[#allocation2 + $0x8] sm:$0xff] (!%p725_p12), %v959_v8 }
  0x2c   : > { %325 = sbr.rel (%p725_p12) target bundleno = 51 (0x33), region = 77  ;;  %328 = vst [vmem:[#allocation2 + $0x10] sm:$0xff] (!%p725_p12), %v959_v8  ;;  %329 = vst [vmem:[#allocation2 + $0x18] sm:$0xff] (!%p725_p12), %v959_v8 }
  0x2d   : > { %330 = vst [vmem:[#allocation2 + $0x20] sm:$0xff] (!%p725_p12), %v959_v8  ;;  %331 = vst [vmem:[#allocation2 + $0x28] sm:$0xff] (!%p725_p12), %v959_v8 }
  0x2e   : > { %332 = vst [vmem:[#allocation2 + $0x30] sm:$0xff] (!%p725_p12), %v959_v8  ;;  %333 = vst [vmem:[#allocation2 + $0x38] sm:$0xff] (!%p725_p12), %v959_v8 }
  0x33 PF: > { %v891_v9 = vld [vmem:[%s1048_s24] sm:$0xff]   ;;  %v892_v10 = vld [vmem:[%s1048_s24 + $0x8] sm:$0xff]   ;;  %v893_v11 = vld [vmem:[%s1048_s24 + $0x10] sm:$0xff]   ;;  %p738_p13 = scmp.ne.s32.totalorder %s941_s14, 4 }
  0x34   : > { %793 = vmatprep.subr.bf16.mxu0 %v891_v9  ;;  %817 = vmatprep.subr.bf16.mxu1 %v891_v9  ;;  %v894_v12 = vld [vmem:[%s1048_s24 + $0x18] sm:$0xff]   ;;  %v899_v13 = vld [vmem:[%s1055_s12] sm:$0xff]   ;;  %v900_v14 = vld [vmem:[%s1055_s12 + $0x10] sm:$0xff]  }
  0x35   : > { %794 = vmatpush3.bf16.msra.mxu0 %v891_v9  ;;  %825 = vmatpush3.bf16.msra.mxu1 %v891_v9  ;;  %v895_v15 = vld [vmem:[%s1048_s24 + $0x20] sm:$0xff]   ;;  %v896_v16 = vld [vmem:[%s1048_s24 + $0x28] sm:$0xff]   ;;  %v897_v17 = vld [vmem:[%s1048_s24 + $0x30] sm:$0xff]  }
  0x36   : > { %795 = vmatprep.subr.bf16.mxu0 %v892_v10  ;;  %818 = vmatprep.subr.bf16.mxu1 %v892_v10  ;;  %v898_v18 = vld [vmem:[%s1048_s24 + $0x38] sm:$0xff]   ;;  %v901_v19 = vld [vmem:[%s1055_s12 + $0x8] sm:$0xff]   ;;  %v336_v21 = vld [vmem:[#allocation2 + $0x10] sm:$0xff] }
  0x37   : > { %809 = vmatprep.mubr.bf16.mxu0 %v899_v13  ;;  %813 = vmatprep.mubr.bf16.mxu1 %v900_v14  ;;  %v902_v20 = vld [vmem:[%s1055_s12 + $0x18] sm:$0xff]   ;;  %v340_v22 = vld [vmem:[#allocation2 + $0x30] sm:$0xff]  ;;  %v334_v23 = vld [vmem:[#allocation2] sm:$0xff] }
  0x38   : > { %v338_v24 = vld [vmem:[#allocation2 + $0x20] sm:$0xff]  ;;  %v337_v27 = vld [vmem:[#allocation2 + $0x18] sm:$0xff]  ;;  %v335_v33 = vld [vmem:[#allocation2 + $0x8] sm:$0xff] }
  0x39   : > { %796 = vmatpush3.bf16.msra.mxu0 %v892_v10  ;;  %826 = vmatpush3.bf16.msra.mxu1 %v892_v10  ;;  %v341_v28 = vld [vmem:[#allocation2 + $0x38] sm:$0xff]  ;;  %v339_v34 = vld [vmem:[#allocation2 + $0x28] sm:$0xff]  ;;  %v739_v47 = vld [vmem:[%s1101_s2] ss:$0 sm:$0xff] (!%p738_p13) }
  0x3a   : > { %797 = vmatprep.subr.bf16.mxu0 %v893_v11  ;;  %819 = vmatprep.subr.bf16.mxu1 %v893_v11 }
  0x3d   : > { %798 = vmatpush3.bf16.msra.mxu0 %v893_v11  ;;  %827 = vmatpush3.bf16.msra.mxu1 %v893_v11 }
  0x3e   : > { %799 = vmatprep.subr.bf16.mxu0 %v894_v12  ;;  %820 = vmatprep.subr.bf16.mxu1 %v894_v12 }
  0x41   : > { %800 = vmatpush3.bf16.msra.mxu0 %v894_v12  ;;  %828 = vmatpush3.bf16.msra.mxu1 %v894_v12 }
  0x42   : > { %801 = vmatprep.subr.bf16.mxu0 %v895_v15  ;;  %821 = vmatprep.subr.bf16.mxu1 %v895_v15 }
  0x45   : > { %802 = vmatpush3.bf16.msra.mxu0 %v895_v15  ;;  %829 = vmatpush3.bf16.msra.mxu1 %v895_v15 }
  0x46   : > { %803 = vmatprep.subr.bf16.mxu0 %v896_v16  ;;  %822 = vmatprep.subr.bf16.mxu1 %v896_v16 }
  0x49   : > { %804 = vmatpush3.bf16.msra.mxu0 %v896_v16  ;;  %830 = vmatpush3.bf16.msra.mxu1 %v896_v16 }
  0x4a   : > { %805 = vmatprep.subr.bf16.mxu0 %v897_v17  ;;  %823 = vmatprep.subr.bf16.mxu1 %v897_v17 }
  0x4d   : > { %806 = vmatpush3.bf16.msra.mxu0 %v897_v17  ;;  %831 = vmatpush3.bf16.msra.mxu1 %v897_v17 }
  0x4e   : > { %807 = vmatprep.subr.bf16.mxu0 %v898_v18  ;;  %824 = vmatprep.subr.bf16.mxu1 %v898_v18 }
  0x51   : > { %808 = vmatpush3.bf16.msra.mxu0 %v898_v18  ;;  %832 = vmatpush3.bf16.msra.mxu1 %v898_v18 }
  0x54   : > { %810 = vmatmul.mubr.bf16.vlgmr.msra.gmra.mrb[0].mxu0 %v901_v19  ;;  %814 = vmatmul.mubr.bf16.vlgmr.msra.gmra.mrb[0].mxu1 %v902_v20 }
 0x127   : > { %v811_v25 = vpop.f32.mrb[0].mxu0  ;;  %v815_v26 = vpop.f32.mrb[0].mxu1  ;;  %522 = sbr.rel (%p738_p13) target bundleno = 317 (0x13d), region = 81 }
 0x128   : > { %v505_v29 = vadd.f32 %v811_v25, %v336_v21  ;;  %v509_v30 = vadd.f32 %v815_v26, %v340_v22  ;;  %v472_v31 = vpop.f32.mrb[1].mxu0  ;;  %v488_v32 = vpop.f32.mrb[1].mxu1 }
 0x129   : > { %v503_v35 = vadd.f32 %v472_v31, %v334_v23  ;;  %v507_v36 = vadd.f32 %v488_v32, %v338_v24  ;;  %v812_v37 = vpop.f32.mrb[2].mxu0  ;;  %v816_v38 = vpop.f32.mrb[2].mxu1 }
 0x12a   : > { %513 = vst [vmem:[#allocation2 + $0x10] sm:$0xff] %v505_v29  ;;  %517 = vst [vmem:[#allocation2 + $0x30] sm:$0xff] %v509_v30  ;;  %v506_v39 = vadd.f32 %v812_v37, %v337_v27  ;;  %v510_v40 = vadd.f32 %v816_v38, %v341_v28  ;;  %v475_v41 = vpop.f32.mrb[3].mxu0  ;;  %v491_v42 = vpop.f32.mrb[3].mxu1 }
 0x12b   : > { %511 = vst [vmem:[#allocation2] sm:$0xff] %v503_v35  ;;  %515 = vst [vmem:[#allocation2 + $0x20] sm:$0xff] %v507_v36  ;;  %v504_v43 = vadd.f32 %v475_v41, %v335_v33  ;;  %v508_v44 = vadd.f32 %v491_v42, %v339_v34 }
 0x12c   : > { %514 = vst [vmem:[#allocation2 + $0x18] sm:$0xff] %v506_v39  ;;  %518 = vst [vmem:[#allocation2 + $0x38] sm:$0xff] %v510_v40 }
 0x12d   : > { %512 = vst [vmem:[#allocation2 + $0x8] sm:$0xff] %v504_v43  ;;  %516 = vst [vmem:[#allocation2 + $0x28] sm:$0xff] %v508_v44 }
 0x131   : > { %v525_v50 = vld [vmem:[#allocation2 + $0x10] sm:$0xff] }
 0x132   : > { %v523_v45 = vld [vmem:[#allocation2] sm:$0xff]  ;;  %v540_v53 = vadd.f32 %v739_v47, %v525_v50  ;;  %v529_v57 = vld [vmem:[#allocation2 + $0x30] sm:$0xff] }
 0x133   : > { %v538_v48 = vadd.f32 %v739_v47, %v523_v45  ;;  %v526_v51 = vld [vmem:[#allocation2 + $0x18] sm:$0xff]  ;;  %v527_v52 = vld [vmem:[#allocation2 + $0x20] sm:$0xff]  ;;  %v544_v62 = vadd.f32 %v739_v47, %v529_v57 }
 0x134   : > { %v524_v46 = vld [vmem:[#allocation2 + $0x8] sm:$0xff]  ;;  %v541_v54 = vadd.f32 %v739_v47, %v526_v51  ;;  %v542_v56 = vadd.f32 %v739_v47, %v527_v52  ;;  %v530_v58 = vld [vmem:[#allocation2 + $0x38] sm:$0xff]  ;;  %v548_v63 = vmax.f32 %v540_v53, 0.0 }
 0x135   : > { %v539_v49 = vadd.f32 %v739_v47, %v524_v46  ;;  %v528_v55 = vld [vmem:[#allocation2 + $0x28] sm:$0xff]  ;;  %v546_v59 = vmax.f32 %v538_v48, 0.0  ;;  %v545_v2 = vadd.f32 %v739_v47, %v530_v58  ;;  %v552_v5 = vmax.f32 %v544_v62, 0.0 }
 0x136   : > { %v543_v61 = vadd.f32 %v739_v47, %v528_v55  ;;  %v549_v0 = vmax.f32 %v541_v54, 0.0  ;;  %v550_v1 = vmax.f32 %v542_v56, 0.0 }
 0x137   : > { %v547_v60 = vmax.f32 %v539_v49, 0.0  ;;  %v553_v7 = vmax.f32 %v545_v2, 0.0 }
 0x138   : > { %v551_v4 = vmax.f32 %v543_v61, 0.0  ;;  %v766_v6 = vpack.c.bf16 %v549_v0, %v548_v63 }
 0x139   : > { %v761_v3 = vpack.c.bf16 %v547_v60, %v546_v59  ;;  %v776_v9 = vpack.c.bf16 %v553_v7, %v552_v5 }
 0x13a   : > { %v771_v8 = vpack.c.bf16 %v551_v4, %v550_v1  ;;  %778 = vst [vmem:[%s1053_s29 + $0x8] sm:$0xff] %v766_v6  }
 0x13b   : > { %762 = vst [vmem:[%s1053_s29] sm:$0xff] %v761_v3   ;;  %780 = vst [vmem:[%s1053_s29 + $0x18] sm:$0xff] %v776_v9  }
 0x13c   : > { %779 = vst [vmem:[%s1053_s29 + $0x10] sm:$0xff] %v771_v8  }
 0x13d PF: > { %s13_s18 = sadd.s32 1, %s957_s18   ;;  %s1103_s12 = smov %s937_s13 }
 0x13e   : > { %p10_p0 = scmp.ge.s32.totalorder %s13_s18, 12   ;;  %s1104_s13 = smov %s1031_s25 }
 0x13f   : > { %s1105_s14 = smov %s949_s16  ;;  %s1106_s15 = smov %s953_s17 }
 0x140   : > { %s1107_s16 = smov %s1110_s19  ;;  %s1108_s17 = smov %s1114_s20 }
 0x141   :  { %12 = sbr.rel (!%p10_p0) target bundleno = 4 (0x4), region = 122 }

// kernel: forward.36
= control target key start
LH: loop header
LB: loop body
LE: loop exit
PB: predicated region body
PF: predicated region fallthrough
CT: control target
= control target key end

     0   :  { %s1744_s12 = smov 0   ;;  %s1746_s13 = smov 0   ;;  %s1918_s0 = inlined_call_operand.vmem [shape: bf16[512,256], index: 0, kind: input, shape index: {}]   ;;  %s1919_s1 = inlined_call_operand.vmem [shape: bf16[256,128], index: 1, kind: input, shape index: {}]   ;;  %s1920_s2 = inlined_call_operand.vmem [shape: f32[1,128], index: 2, kind: input, shape index: {}]   ;;  %s1921_s3 = inlined_call_operand.vmem [shape: bf16[512,128], index: 3, kind: output, shape index: {}]  }
   0x1   :  { %s1748_s14 = smov 0  }
   0x2 LB: > { %s32_s15 = sadd.s32 1, %s1718_s13  ;;  %p1267_p0 = scmp.ge.s32.totalorder %s1722_s14, 1  ;;  %s1722_s14 = sphi %s1748_s14, %s13_s14   ;;  %s1718_s13 = sphi %s1746_s13, %s1923_s13   ;;  %s1714_s12 = sphi %s1744_s12, %s1922_s12  }
   0x3   : > { %p34_p1 = scmp.ge.s32.totalorder %s32_s15, 2  ;;  %p191_p2 = scmp.lt.s32.totalorder %s1722_s14, 3 }
   0x5   : > { %s1925_s15 = smov (%p34_p1, %s32_s15), 0  ;;  %p192_p3 = pnand %p1267_p0, %p191_p2 }
   0x6   : > { %v1636_v0 = vld [vmem:[%s1919_s1 + $0x40] sm:$0xff] (!%p192_p3)   ;;  %s1268_s18 = sshll.u32 (!%p192_p3), %s1714_s12, 5  ;;  %v1638_v2 = vld [vmem:[%s1919_s1 + $0x48] sm:$0xff] (!%p192_p3)   ;;  %v1640_v4 = vld [vmem:[%s1919_s1 + $0x50] sm:$0xff] (!%p192_p3)  }
   0x7   : > { %195 = sbr.rel (%p192_p3) target bundleno = 320 (0x140), region = 32  ;;  %v1637_v1 = vld [vmem:[%s1919_s1] sm:$0xff] (!%p192_p3)   ;;  %1484 = vmatprep.subr.bf16.mxu0 (!%p192_p3), %v1636_v0  ;;  %1596 = vmatprep.subr.bf16.mxu1 (!%p192_p3), %v1636_v0  ;;  %v1639_v3 = vld [vmem:[%s1919_s1 + $0x8] sm:$0xff] (!%p192_p3)   ;;  %p236_p4 = scmp.lt.s32.totalorder (!%p192_p3), %s1268_s18, 63  ;;  %v1641_v5 = vld [vmem:[%s1919_s1 + $0x10] sm:$0xff] (!%p192_p3)  }
   0x8   : > { %1485 = vmatpush3.bf16.msra.mxu0 (!%p192_p3), %v1637_v1  ;;  %1604 = vmatpush3.bf16.msra.mxu1 (!%p192_p3), %v1637_v1  ;;  %v1642_v6 = vld [vmem:[%s1919_s1 + $0x58] sm:$0xff] (!%p192_p3)   ;;  %v1644_v8 = vld [vmem:[%s1919_s1 + $0x60] sm:$0xff] (!%p192_p3)   ;;  %v1646_v10 = vld [vmem:[%s1919_s1 + $0x68] sm:$0xff] (!%p192_p3)  }
   0x9   : > { %1486 = vmatprep.subr.bf16.mxu0 (!%p192_p3), %v1638_v2  ;;  %1597 = vmatprep.subr.bf16.mxu1 (!%p192_p3), %v1638_v2  ;;  %v1643_v7 = vld [vmem:[%s1919_s1 + $0x18] sm:$0xff] (!%p192_p3)   ;;  %v1645_v9 = vld [vmem:[%s1919_s1 + $0x20] sm:$0xff] (!%p192_p3)   ;;  %v1647_v13 = vld [vmem:[%s1919_s1 + $0x28] sm:$0xff] (!%p192_p3)  }
   0xa   : > { %v1648_v14 = vld [vmem:[%s1919_s1 + $0x70] sm:$0xff] (!%p192_p3)   ;;  %v1650_v16 = vld [vmem:[%s1919_s1 + $0x78] sm:$0xff] (!%p192_p3)   ;;  %v1853_v51 = vld [vmem:[%s1920_s2] ss:$0 sm:$0xff] (!%p192_p3) }
   0xb   : > { %v1649_v15 = vld [vmem:[%s1919_s1 + $0x30] sm:$0xff] (!%p192_p3)   ;;  %v1651_v17 = vld [vmem:[%s1919_s1 + $0x38] sm:$0xff] (!%p192_p3)  }
   0xc   : > { %1487 = vmatpush3.bf16.msra.mxu0 (!%p192_p3), %v1639_v3  ;;  %1605 = vmatpush3.bf16.msra.mxu1 (!%p192_p3), %v1639_v3 }
   0xd   : > { %1488 = vmatprep.subr.bf16.mxu0 (!%p192_p3), %v1640_v4  ;;  %1598 = vmatprep.subr.bf16.mxu1 (!%p192_p3), %v1640_v4 }
   0xe   : > { %s1927_s18 = smov (!%p236_p4, %s1268_s18), 63 }
   0xf   : > { %s1356_s6 = sshll.u32 %s1927_s18, 3  ;;  %s1272_s5 = sshll.u32 %s1927_s18, 2 }
  0x10   : > { %1489 = vmatpush3.bf16.msra.mxu0 %v1641_v5  ;;  %1606 = vmatpush3.bf16.msra.mxu1 %v1641_v5  ;;  %s1795_s11 = scalar_lea.vmem %s1918_s0, %s1356_s6  ;;  %s1863_s8 = scalar_lea.vmem %s1921_s3, %s1272_s5 }
  0x11   : > { %1490 = vmatprep.subr.bf16.mxu0 %v1642_v6  ;;  %1599 = vmatprep.subr.bf16.mxu1 %v1642_v6  ;;  %v1654_v11 = vld [vmem:[%s1795_s11 + $0x4] ss:$8 sps:$4 sm:$0xff]   ;;  %v1652_v18 = vld [vmem:[%s1795_s11] ss:$8 sps:$4 sm:$0xff]   ;;  %v1658_v20 = vld [vmem:[%s1795_s11 + $0x14] ss:$8 sps:$4 sm:$0xff]  }
  0x12   : > { %v1657_v12 = vld [vmem:[%s1795_s11 + $0x84] ss:$8 sps:$4 sm:$0xff]   ;;  %688 = vmatprep.mubr.bf16.mxu0 %v1654_v11  ;;  %v1655_v19 = vld [vmem:[%s1795_s11 + $0x80] ss:$8 sps:$4 sm:$0xff]   ;;  %v1660_v21 = vld [vmem:[%s1795_s11 + $0x94] ss:$8 sps:$4 sm:$0xff]  }
  0x13   : > { %752 = vmatprep.mubr.bf16.mxu1 %v1657_v12  ;;  %v1662_v22 = vld [vmem:[%s1795_s11 + $0x10] ss:$8 sps:$4 sm:$0xff]   ;;  %v1664_v24 = vld [vmem:[%s1795_s11 + $0x24] ss:$8 sps:$4 sm:$0xff]   ;;  %v1668_v26 = vld [vmem:[%s1795_s11 + $0x20] ss:$8 sps:$4 sm:$0xff]  }
  0x14   : > { %1491 = vmatpush3.bf16.msra.mxu0 %v1643_v7  ;;  %1607 = vmatpush3.bf16.msra.mxu1 %v1643_v7  ;;  %v1663_v23 = vld [vmem:[%s1795_s11 + $0x90] ss:$8 sps:$4 sm:$0xff]   ;;  %v1666_v25 = vld [vmem:[%s1795_s11 + $0xa4] ss:$8 sps:$4 sm:$0xff]   ;;  %v1669_v27 = vld [vmem:[%s1795_s11 + $0xa0] ss:$8 sps:$4 sm:$0xff]  }
  0x15   : > { %1492 = vmatprep.subr.bf16.mxu0 %v1644_v8  ;;  %1600 = vmatprep.subr.bf16.mxu1 %v1644_v8  ;;  %v1670_v28 = vld [vmem:[%s1795_s11 + $0x34] ss:$8 sps:$4 sm:$0xff]   ;;  %v1674_v30 = vld [vmem:[%s1795_s11 + $0x30] ss:$8 sps:$4 sm:$0xff]   ;;  %v1676_v32 = vld [vmem:[%s1795_s11 + $0x44] ss:$8 sps:$4 sm:$0xff]  }
  0x16   : > { %v1672_v29 = vld [vmem:[%s1795_s11 + $0xb4] ss:$8 sps:$4 sm:$0xff]   ;;  %v1675_v31 = vld [vmem:[%s1795_s11 + $0xb0] ss:$8 sps:$4 sm:$0xff]   ;;  %v1678_v33 = vld [vmem:[%s1795_s11 + $0xc4] ss:$8 sps:$4 sm:$0xff]  }
  0x17   : > { %v1680_v34 = vld [vmem:[%s1795_s11 + $0x40] ss:$8 sps:$4 sm:$0xff]   ;;  %v1682_v36 = vld [vmem:[%s1795_s11 + $0x54] ss:$8 sps:$4 sm:$0xff]   ;;  %v1686_v38 = vld [vmem:[%s1795_s11 + $0x50] ss:$8 sps:$4 sm:$0xff]  }
  0x18   : > { %1493 = vmatpush3.bf16.msra.mxu0 %v1645_v9  ;;  %1608 = vmatpush3.bf16.msra.mxu1 %v1645_v9  ;;  %v1681_v35 = vld [vmem:[%s1795_s11 + $0xc0] ss:$8 sps:$4 sm:$0xff]   ;;  %v1684_v37 = vld [vmem:[%s1795_s11 + $0xd4] ss:$8 sps:$4 sm:$0xff]   ;;  %v1687_v39 = vld [vmem:[%s1795_s11 + $0xd0] ss:$8 sps:$4 sm:$0xff]  }
  0x19   : > { %1494 = vmatprep.subr.bf16.mxu0 %v1646_v10  ;;  %1601 = vmatprep.subr.bf16.mxu1 %v1646_v10  ;;  %v1688_v40 = vld [vmem:[%s1795_s11 + $0x64] ss:$8 sps:$4 sm:$0xff]   ;;  %v1692_v42 = vld [vmem:[%s1795_s11 + $0x60] ss:$8 sps:$4 sm:$0xff]   ;;  %v1694_v44 = vld [vmem:[%s1795_s11 + $0x74] ss:$8 sps:$4 sm:$0xff]  }
  0x1a   : > { %v1690_v41 = vld [vmem:[%s1795_s11 + $0xe4] ss:$8 sps:$4 sm:$0xff]   ;;  %v1693_v43 = vld [vmem:[%s1795_s11 + $0xe0] ss:$8 sps:$4 sm:$0xff]   ;;  %v1696_v45 = vld [vmem:[%s1795_s11 + $0xf4] ss:$8 sps:$4 sm:$0xff]  }
  0x1b   : > { %v1698_v46 = vld [vmem:[%s1795_s11 + $0x70] ss:$8 sps:$4 sm:$0xff]  }
  0x1c   : > { %1495 = vmatpush3.bf16.msra.mxu0 %v1647_v13  ;;  %1609 = vmatpush3.bf16.msra.mxu1 %v1647_v13  ;;  %v1699_v47 = vld [vmem:[%s1795_s11 + $0xf0] ss:$8 sps:$4 sm:$0xff]  }
  0x1d   : > { %1496 = vmatprep.subr.bf16.mxu0 %v1648_v14  ;;  %1602 = vmatprep.subr.bf16.mxu1 %v1648_v14 }
  0x20   : > { %1497 = vmatpush3.bf16.msra.mxu0 %v1649_v15  ;;  %1610 = vmatpush3.bf16.msra.mxu1 %v1649_v15 }
  0x21   : > { %1498 = vmatprep.subr.bf16.mxu0 %v1650_v16  ;;  %1603 = vmatprep.subr.bf16.mxu1 %v1650_v16 }
  0x24   : > { %1499 = vmatpush3.bf16.msra.mxu0 %v1651_v17  ;;  %1611 = vmatpush3.bf16.msra.mxu1 %v1651_v17 }
  0x27   : > { %689 = vmatmul.mubr.bf16.vlgmr.msra.gmra.mrb[0].mxu0 %v1652_v18  ;;  %753 = vmatmul.mubr.bf16.vlgmr.msra.gmra.mrb[0].mxu1 %v1655_v19 }
  0x28   : > { %696 = vmatprep.mubr.bf16.mxu0 %v1658_v20  ;;  %760 = vmatprep.mubr.bf16.mxu1 %v1660_v21 }
  0x2f   : > { %697 = vmatmul.mubr.bf16.gmra.mrb[4].mxu0 %v1662_v22  ;;  %761 = vmatmul.mubr.bf16.gmra.mrb[4].mxu1 %v1663_v23 }
  0x30   : > { %704 = vmatprep.mubr.bf16.mxu0 %v1664_v24  ;;  %768 = vmatprep.mubr.bf16.mxu1 %v1666_v25 }
  0x37   : > { %705 = vmatmul.mubr.bf16.gmra.mrb[8].mxu0 %v1668_v26  ;;  %769 = vmatmul.mubr.bf16.gmra.mrb[8].mxu1 %v1669_v27 }
  0x38   : > { %712 = vmatprep.mubr.bf16.mxu0 %v1670_v28  ;;  %776 = vmatprep.mubr.bf16.mxu1 %v1672_v29 }
  0x3f   : > { %713 = vmatmul.mubr.bf16.gmra.mrb[12].mxu0 %v1674_v30  ;;  %777 = vmatmul.mubr.bf16.gmra.mrb[12].mxu1 %v1675_v31 }
  0x40   : > { %720 = vmatprep.mubr.bf16.mxu0 %v1676_v32  ;;  %784 = vmatprep.mubr.bf16.mxu1 %v1678_v33 }
  0x47   : > { %721 = vmatmul.mubr.bf16.gmra.mrb[16].mxu0 %v1680_v34  ;;  %785 = vmatmul.mubr.bf16.gmra.mrb[16].mxu1 %v1681_v35 }
  0x48   : > { %728 = vmatprep.mubr.bf16.mxu0 %v1682_v36  ;;  %792 = vmatprep.mubr.bf16.mxu1 %v1684_v37 }
  0x4f   : > { %729 = vmatmul.mubr.bf16.gmra.mrb[20].mxu0 %v1686_v38  ;;  %793 = vmatmul.mubr.bf16.gmra.mrb[20].mxu1 %v1687_v39 }
  0x50   : > { %736 = vmatprep.mubr.bf16.mxu0 %v1688_v40  ;;  %800 = vmatprep.mubr.bf16.mxu1 %v1690_v41 }
  0x57   : > { %737 = vmatmul.mubr.bf16.gmra.mrb[24].mxu0 %v1692_v42  ;;  %801 = vmatmul.mubr.bf16.gmra.mrb[24].mxu1 %v1693_v43 }
  0x58   : > { %744 = vmatprep.mubr.bf16.mxu0 %v1694_v44  ;;  %808 = vmatprep.mubr.bf16.mxu1 %v1696_v45 }
  0x5f   : > { %745 = vmatmul.mubr.bf16.gmra.mrb[28].mxu0 %v1698_v46  ;;  %809 = vmatmul.mubr.bf16.gmra.mrb[28].mxu1 %v1699_v47 }
  0xfa   : > { %v1500_v48 = vpop.f32.mrb[0].mxu0  ;;  %v1548_v49 = vpop.f32.mrb[0].mxu1 }
  0xfb   : > { %v1501_v50 = vpop.f32.mrb[1].mxu0  ;;  %v1549_v52 = vpop.f32.mrb[1].mxu1 }
  0xfc   : > { %v1502_v53 = vadd.f32 %v1501_v50, %v1500_v48  ;;  %v1550_v54 = vadd.f32 %v1549_v52, %v1548_v49  ;;  %v1503_v55 = vpop.f32.mrb[2].mxu0  ;;  %v1551_v56 = vpop.f32.mrb[2].mxu1 }
  0xfd   : > { %v1504_v57 = vpop.f32.mrb[3].mxu0  ;;  %v1552_v58 = vpop.f32.mrb[3].mxu1 }
  0xfe   : > { %v923_v59 = vadd.f32 %v1502_v53, %v1853_v51  ;;  %v939_v60 = vadd.f32 %v1550_v54, %v1853_v51  ;;  %v1505_v61 = vadd.f32 %v1504_v57, %v1503_v55  ;;  %v1553_v62 = vadd.f32 %v1552_v58, %v1551_v56 }
 0x100   : > { %v924_v63 = vadd.f32 %v1505_v61, %v1853_v51  ;;  %v940_v0 = vadd.f32 %v1553_v62, %v1853_v51  ;;  %v955_v1 = vmax.f32 %v923_v59, 0.0  ;;  %v971_v2 = vmax.f32 %v939_v60, 0.0 }
 0x102   : > { %v956_v3 = vmax.f32 %v924_v63, 0.0  ;;  %v972_v4 = vmax.f32 %v940_v0, 0.0  ;;  %v1506_v5 = vpop.f32.mrb[4].mxu0  ;;  %v1554_v6 = vpop.f32.mrb[4].mxu1 }
 0x103   : > { %v1507_v7 = vpop.f32.mrb[5].mxu0  ;;  %v1555_v8 = vpop.f32.mrb[5].mxu1 }
 0x104   : > { %v1392_v9 = vpack.c.bf16 %v956_v3, %v955_v1  ;;  %v1432_v10 = vpack.c.bf16 %v972_v4, %v971_v2  ;;  %v1508_v11 = vadd.f32 %v1507_v7, %v1506_v5  ;;  %v1556_v12 = vadd.f32 %v1555_v8, %v1554_v6  ;;  %v1509_v13 = vpop.f32.mrb[6].mxu0  ;;  %v1557_v14 = vpop.f32.mrb[6].mxu1 }
 0x105   : > { %v1510_v15 = vpop.f32.mrb[7].mxu0  ;;  %v1558_v16 = vpop.f32.mrb[7].mxu1 }
 0x106   : > { %1393 = vst [vmem:[%s1863_s8] sm:$0xff] %v1392_v9   ;;  %1476 = vst [vmem:[%s1863_s8 + $0x40] sm:$0xff] %v1432_v10   ;;  %v925_v17 = vadd.f32 %v1508_v11, %v1853_v51  ;;  %v941_v18 = vadd.f32 %v1556_v12, %v1853_v51  ;;  %v1511_v19 = vadd.f32 %v1510_v15, %v1509_v13 }
 0x107   : > { %v1559_v20 = vadd.f32 %v1558_v16, %v1557_v14 }
 0x108   : > { %v926_v21 = vadd.f32 %v1511_v19, %v1853_v51  ;;  %v957_v23 = vmax.f32 %v925_v17, 0.0  ;;  %v973_v24 = vmax.f32 %v941_v18, 0.0 }
 0x109   : > { %v942_v22 = vadd.f32 %v1559_v20, %v1853_v51 }
 0x10a   : > { %v958_v25 = vmax.f32 %v926_v21, 0.0  ;;  %v1512_v27 = vpop.f32.mrb[8].mxu0  ;;  %v1560_v28 = vpop.f32.mrb[8].mxu1 }
 0x10b   : > { %v974_v26 = vmax.f32 %v942_v22, 0.0  ;;  %v1513_v29 = vpop.f32.mrb[9].mxu0  ;;  %v1561_v30 = vpop.f32.mrb[9].mxu1 }
 0x10c   : > { %v1397_v31 = vpack.c.bf16 %v958_v25, %v957_v23  ;;  %v1514_v33 = vadd.f32 %v1513_v29, %v1512_v27  ;;  %v1562_v34 = vadd.f32 %v1561_v30, %v1560_v28  ;;  %v1515_v35 = vpop.f32.mrb[10].mxu0  ;;  %v1563_v36 = vpop.f32.mrb[10].mxu1 }
 0x10d   : > { %v1437_v32 = vpack.c.bf16 %v974_v26, %v973_v24  ;;  %v1516_v37 = vpop.f32.mrb[11].mxu0  ;;  %v1564_v38 = vpop.f32.mrb[11].mxu1 }
 0x10e   : > { %1469 = vst [vmem:[%s1863_s8 + $0x8] sm:$0xff] %v1397_v31   ;;  %v927_v39 = vadd.f32 %v1514_v33, %v1853_v51  ;;  %v943_v40 = vadd.f32 %v1562_v34, %v1853_v51  ;;  %v1517_v41 = vadd.f32 %v1516_v37, %v1515_v35  ;;  %v1565_v42 = vadd.f32 %v1564_v38, %v1563_v36 }
 0x10f   : > { %1477 = vst [vmem:[%s1863_s8 + $0x48] sm:$0xff] %v1437_v32  }
 0x110   : > { %v928_v43 = vadd.f32 %v1517_v41, %v1853_v51  ;;  %v944_v44 = vadd.f32 %v1565_v42, %v1853_v51  ;;  %v959_v45 = vmax.f32 %v927_v39, 0.0  ;;  %v975_v46 = vmax.f32 %v943_v40, 0.0 }
 0x112   : > { %v960_v47 = vmax.f32 %v928_v43, 0.0  ;;  %v976_v48 = vmax.f32 %v944_v44, 0.0  ;;  %v1518_v49 = vpop.f32.mrb[12].mxu0  ;;  %v1566_v50 = vpop.f32.mrb[12].mxu1 }
 0x113   : > { %v1519_v52 = vpop.f32.mrb[13].mxu0  ;;  %v1567_v53 = vpop.f32.mrb[13].mxu1 }
 0x114   : > { %v1402_v54 = vpack.c.bf16 %v960_v47, %v959_v45  ;;  %v1442_v55 = vpack.c.bf16 %v976_v48, %v975_v46  ;;  %v1520_v56 = vadd.f32 %v1519_v52, %v1518_v49  ;;  %v1568_v57 = vadd.f32 %v1567_v53, %v1566_v50  ;;  %v1521_v58 = vpop.f32.mrb[14].mxu0  ;;  %v1569_v59 = vpop.f32.mrb[14].mxu1 }
 0x115   : > { %v1522_v60 = vpop.f32.mrb[15].mxu0  ;;  %v1570_v61 = vpop.f32.mrb[15].mxu1 }
 0x116   : > { %1470 = vst [vmem:[%s1863_s8 + $0x10] sm:$0xff] %v1402_v54   ;;  %1478 = vst [vmem:[%s1863_s8 + $0x50] sm:$0xff] %v1442_v55   ;;  %v929_v62 = vadd.f32 %v1520_v56, %v1853_v51  ;;  %v945_v63 = vadd.f32 %v1568_v57, %v1853_v51  ;;  %v1523_v0 = vadd.f32 %v1522_v60, %v1521_v58 }
 0x117   : > { %v1571_v1 = vadd.f32 %v1570_v61, %v1569_v59 }
 0x118   : > { %v930_v2 = vadd.f32 %v1523_v0, %v1853_v51  ;;  %v961_v4 = vmax.f32 %v929_v62, 0.0  ;;  %v977_v5 = vmax.f32 %v945_v63, 0.0 }
 0x119   : > { %v946_v3 = vadd.f32 %v1571_v1, %v1853_v51 }
 0x11a   : > { %v962_v6 = vmax.f32 %v930_v2, 0.0  ;;  %v1524_v8 = vpop.f32.mrb[16].mxu0  ;;  %v1572_v9 = vpop.f32.mrb[16].mxu1 }
 0x11b   : > { %v978_v7 = vmax.f32 %v946_v3, 0.0  ;;  %v1525_v10 = vpop.f32.mrb[17].mxu0  ;;  %v1573_v11 = vpop.f32.mrb[17].mxu1 }
 0x11c   : > { %v1407_v12 = vpack.c.bf16 %v962_v6, %v961_v4  ;;  %v1526_v14 = vadd.f32 %v1525_v10, %v1524_v8  ;;  %v1574_v15 = vadd.f32 %v1573_v11, %v1572_v9  ;;  %v1527_v16 = vpop.f32.mrb[18].mxu0  ;;  %v1575_v17 = vpop.f32.mrb[18].mxu1 }
 0x11d   : > { %v1447_v13 = vpack.c.bf16 %v978_v7, %v977_v5  ;;  %v1528_v18 = vpop.f32.mrb[19].mxu0  ;;  %v1576_v19 = vpop.f32.mrb[19].mxu1 }
 0x11e   : > { %1471 = vst [vmem:[%s1863_s8 + $0x18] sm:$0xff] %v1407_v12   ;;  %v931_v20 = vadd.f32 %v1526_v14, %v1853_v51  ;;  %v947_v21 = vadd.f32 %v1574_v15, %v1853_v51  ;;  %v1529_v22 = vadd.f32 %v1528_v18, %v1527_v16  ;;  %v1577_v23 = vadd.f32 %v1576_v19, %v1575_v17 }
 0x11f   : > { %1479 = vst [vmem:[%s1863_s8 + $0x58] sm:$0xff] %v1447_v13  }
 0x120   : > { %v932_v24 = vadd.f32 %v1529_v22, %v1853_v51  ;;  %v948_v25 = vadd.f32 %v1577_v23, %v1853_v51  ;;  %v963_v26 = vmax.f32 %v931_v20, 0.0  ;;  %v979_v27 = vmax.f32 %v947_v21, 0.0 }
 0x122   : > { %v964_v28 = vmax.f32 %v932_v24, 0.0  ;;  %v980_v29 = vmax.f32 %v948_v25, 0.0  ;;  %v1530_v30 = vpop.f32.mrb[20].mxu0  ;;  %v1578_v31 = vpop.f32.mrb[20].mxu1 }
 0x123   : > { %v1531_v32 = vpop.f32.mrb[21].mxu0  ;;  %v1579_v33 = vpop.f32.mrb[21].mxu1 }
 0x124   : > { %v1412_v34 = vpack.c.bf16 %v964_v28, %v963_v26  ;;  %v1452_v35 = vpack.c.bf16 %v980_v29, %v979_v27  ;;  %v1532_v36 = vadd.f32 %v1531_v32, %v1530_v30  ;;  %v1580_v37 = vadd.f32 %v1579_v33, %v1578_v31  ;;  %v1533_v38 = vpop.f32.mrb[22].mxu0  ;;  %v1581_v39 = vpop.f32.mrb[22].mxu1 }
 0x125   : > { %v1534_v40 = vpop.f32.mrb[23].mxu0  ;;  %v1582_v41 = vpop.f32.mrb[23].mxu1 }
 0x126   : > { %1472 = vst [vmem:[%s1863_s8 + $0x20] sm:$0xff] %v1412_v34   ;;  %1480 = vst [vmem:[%s1863_s8 + $0x60] sm:$0xff] %v1452_v35   ;;  %v933_v42 = vadd.f32 %v1532_v36, %v1853_v51  ;;  %v949_v43 = vadd.f32 %v1580_v37, %v1853_v51  ;;  %v1535_v44 = vadd.f32 %v1534_v40, %v1533_v38 }
 0x127   : > { %v1583_v45 = vadd.f32 %v1582_v41, %v1581_v39 }
 0x128   : > { %v934_v46 = vadd.f32 %v1535_v44, %v1853_v51  ;;  %v965_v48 = vmax.f32 %v933_v42, 0.0  ;;  %v981_v49 = vmax.f32 %v949_v43, 0.0 }
 0x129   : > { %v950_v47 = vadd.f32 %v1583_v45, %v1853_v51 }
 0x12a   : > { %v966_v50 = vmax.f32 %v934_v46, 0.0  ;;  %v1536_v53 = vpop.f32.mrb[24].mxu0  ;;  %v1584_v54 = vpop.f32.mrb[24].mxu1 }
 0x12b   : > { %v982_v52 = vmax.f32 %v950_v47, 0.0  ;;  %v1537_v55 = vpop.f32.mrb[25].mxu0  ;;  %v1585_v56 = vpop.f32.mrb[25].mxu1 }
 0x12c   : > { %v1417_v57 = vpack.c.bf16 %v966_v50, %v965_v48  ;;  %v1538_v59 = vadd.f32 %v1537_v55, %v1536_v53  ;;  %v1586_v60 = vadd.f32 %v1585_v56, %v1584_v54  ;;  %v1539_v61 = vpop.f32.mrb[26].mxu0  ;;  %v1587_v62 = vpop.f32.mrb[26].mxu1 }
 0x12d   : > { %v1457_v58 = vpack.c.bf16 %v982_v52, %v981_v49  ;;  %v1540_v63 = vpop.f32.mrb[27].mxu0  ;;  %v1588_v0 = vpop.f32.mrb[27].mxu1 }
 0x12e   : > { %1473 = vst [vmem:[%s1863_s8 + $0x28] sm:$0xff] %v1417_v57   ;;  %v935_v1 = vadd.f32 %v1538_v59, %v1853_v51  ;;  %v951_v2 = vadd.f32 %v1586_v60, %v1853_v51  ;;  %v1541_v3 = vadd.f32 %v1540_v63, %v1539_v61  ;;  %v1589_v4 = vadd.f32 %v1588_v0, %v1587_v62 }
 0x12f   : > { %1481 = vst [vmem:[%s1863_s8 + $0x68] sm:$0xff] %v1457_v58  }
 0x130   : > { %v936_v5 = vadd.f32 %v1541_v3, %v1853_v51  ;;  %v952_v6 = vadd.f32 %v1589_v4, %v1853_v51  ;;  %v967_v7 = vmax.f32 %v935_v1, 0.0  ;;  %v983_v8 = vmax.f32 %v951_v2, 0.0 }
 0x132   : > { %v968_v9 = vmax.f32 %v936_v5, 0.0  ;;  %v984_v10 = vmax.f32 %v952_v6, 0.0  ;;  %v1542_v11 = vpop.f32.mrb[28].mxu0  ;;  %v1590_v12 = vpop.f32.mrb[28].mxu1 }
 0x133   : > { %v1543_v13 = vpop.f32.mrb[29].mxu0  ;;  %v1591_v14 = vpop.f32.mrb[29].mxu1 }
 0x134   : > { %v1422_v15 = vpack.c.bf16 %v968_v9, %v967_v7  ;;  %v1462_v16 = vpack.c.bf16 %v984_v10, %v983_v8  ;;  %v1544_v17 = vadd.f32 %v1543_v13, %v1542_v11  ;;  %v1592_v18 = vadd.f32 %v1591_v14, %v1590_v12  ;;  %v1545_v19 = vpop.f32.mrb[30].mxu0  ;;  %v1593_v20 = vpop.f32.mrb[30].mxu1 }
 0x135   : > { %v1546_v21 = vpop.f32.mrb[31].mxu0  ;;  %v1594_v22 = vpop.f32.mrb[31].mxu1 }
 0x136   : > { %1474 = vst [vmem:[%s1863_s8 + $0x30] sm:$0xff] %v1422_v15   ;;  %1482 = vst [vmem:[%s1863_s8 + $0x70] sm:$0xff] %v1462_v16   ;;  %v937_v23 = vadd.f32 %v1544_v17, %v1853_v51  ;;  %v953_v24 = vadd.f32 %v1592_v18, %v1853_v51  ;;  %v1547_v25 = vadd.f32 %v1546_v21, %v1545_v19 }
 0x137   : > { %v1595_v26 = vadd.f32 %v1594_v22, %v1593_v20 }
 0x138   : > { %v938_v27 = vadd.f32 %v1547_v25, %v1853_v51  ;;  %v969_v29 = vmax.f32 %v937_v23, 0.0  ;;  %v985_v30 = vmax.f32 %v953_v24, 0.0 }
 0x139   : > { %v954_v28 = vadd.f32 %v1595_v26, %v1853_v51 }
 0x13a   : > { %v970_v31 = vmax.f32 %v938_v27, 0.0 }
 0x13b   : > { %v986_v32 = vmax.f32 %v954_v28, 0.0 }
 0x13c   : > { %v1427_v33 = vpack.c.bf16 %v970_v31, %v969_v29 }
 0x13d   : > { %v1467_v34 = vpack.c.bf16 %v986_v32, %v985_v30 }
 0x13e   : > { %1475 = vst [vmem:[%s1863_s8 + $0x38] sm:$0xff] %v1427_v33  }
 0x13f   : > { %1483 = vst [vmem:[%s1863_s8 + $0x78] sm:$0xff] %v1467_v34  }
 0x140 PF: > { %s13_s14 = sadd.s32 1, %s1722_s14   ;;  %s1922_s12 = smov %s1718_s13 }
 0x141   : > { %p10_p5 = scmp.ge.s32.totalorder %s13_s14, 4   ;;  %s1923_s13 = smov %s1925_s15 }
 0x143   :  { %12 = sbr.rel (!%p10_p5) target bundleno = 2 (0x2), region = 76 }

// kernel: forward.38
= control target key start
LH: loop header
LB: loop body
LE: loop exit
PB: predicated region body
PF: predicated region fallthrough
CT: control target
= control target key end

     0   :  { %s1105_s15 = smov 0   ;;  %s1107_s16 = smov 0   ;;  %s1233_s0 = inlined_call_operand.vmem [shape: bf16[128,640], index: 0, kind: input, shape index: {}]   ;;  %s1234_s1 = inlined_call_operand.vmem [shape: bf16[640,128], index: 1, kind: input, shape index: {}]   ;;  %s1235_s2 = inlined_call_operand.vmem [shape: f32[1,128], index: 2, kind: input, shape index: {}]   ;;  %s1236_s3 = inlined_call_operand.vmem [shape: bf16[128,128], index: 3, kind: input, shape index: {}]   ;;  %s1237_s4 = inlined_call_operand.vmem [shape: bf16[128,128], index: 4, kind: output, shape index: {}]  }
   0x1   :  { %s1109_s17 = smov 0   ;;  %s1111_s18 = smov 0  }
   0x2   :  { %s1113_s19 = smov 0   ;;  %s1115_s20 = smov 0  }
   0x3   :  { %s1117_s21 = smov 0  }
   0x4 LB: > { %s26_s22 = sadd.s32 1, %s1069_s19  ;;  %s33_s23 = sadd.s32 1, %s1073_s20  ;;  %s1077_s21 = sphi %s1117_s21, %s14_s21   ;;  %s1073_s20 = sphi %s1115_s20, %s1243_s20   ;;  %s1069_s19 = sphi %s1113_s19, %s1242_s19   ;;  %s1065_s18 = sphi %s1111_s18, %s1241_s18   ;;  %s1061_s17 = sphi %s1109_s17, %s1240_s17   ;;  %s1057_s16 = sphi %s1107_s16, %s1239_s16   ;;  %s1053_s15 = sphi %s1105_s15, %s1238_s15  }
   0x5   : > { %p27_p0 = scmp.ge.s32.totalorder %s26_s22, 5  ;;  %p49_p1 = scmp.ne.s32.totalorder %s1057_s16, %s1053_s15 }
   0x6   : > { %p50_p2 = scmp.eq.s32.totalorder %s1077_s21, 0  ;;  %s42_s27 = sadd.s32 1, %s1057_s16 }
   0x7   : > { %s1245_s22 = smov (%p27_p0, %s26_s22), 0  ;;  %s1247_s23 = smov (!%p27_p0, %s33_s23), %s1073_s20 }
   0x8   : > { %p51_p3 = por %p50_p2, %p49_p1  ;;  %p35_p4 = scmp.ge.s32.totalorder %s1247_s23, 2 }
   0x9   : > { %s38_s24 = ssub.s32 %s1069_s19, %s1245_s22  ;;  %p813_p6 = scmp.ge.s32.totalorder %s1077_s21, 10 }
   0xa   : > { %s1249_s23 = smov (%p35_p4, %s1247_s23), 0 }
   0xb   : > { %s37_s25 = ssub.s32 %s1073_s20, %s1249_s23  ;;  %191 = sbr.rel (%p813_p6) target bundleno = 30 (0x1e), region = 20 }
   0xc   : > { %s39_s26 = sor.u32 %s38_s24, %s37_s25 }
   0xd   : > { %p40_p5 = scmp.eq.s32.totalorder %s39_s26, 0 }
   0xf   : > { %s1156_s28 = scalar_select %p40_p5, %s1057_s16, %s42_s27  }
  0x12   : > { %194 = sbr.rel (!%p51_p3) target bundleno = 30 (0x1e), region = 24  ;;  %s196_s29 = sand.u32 (%p51_p3), 1, %s1057_s16  }
  0x13   : > { %s953_s30 = smul.u32 (%p51_p3), 40, %s1073_s20  ;;  %s814_s5 = sshll.u32 (%p51_p3), %s196_s29, 5 }
  0x14   : > { %s198_s11 = scalar_lea.vmem (%p51_p3), [#allocation3], %s814_s5 }
  0x15   : > { %s201_s6 = sadd.s32 (%p51_p3), %s1069_s19, %s953_s30 }
  0x16   : > { %s817_s7 = sshll.u32 (%p51_p3), %s201_s6, 2 }
  0x17   : > { %s203_s10 = scalar_lea.vmem (%p51_p3), %s1233_s0, %s817_s7 }
  0x18   : > { %v219_v0 = vld [vmem:[%s203_s10] sm:$0xf] (%p51_p3)  ;;  %v221_v1 = vld [vmem:[%s203_s10 + $0x14] sm:$0xf] (%p51_p3)  ;;  %v223_v2 = vld [vmem:[%s203_s10 + $0x28] sm:$0xf] (%p51_p3) }
  0x19   : > { %220 = vst [vmem:[%s198_s11] sm:$0xf] %v219_v0  ;;  %222 = vst [vmem:[%s198_s11 + $0x4] sm:$0xf] %v221_v1  ;;  %v225_v3 = vld [vmem:[%s203_s10 + $0x3c] sm:$0xf] }
  0x1a   : > { %224 = vst [vmem:[%s198_s11 + $0x8] sm:$0xf] %v223_v2  ;;  %v227_v4 = vld [vmem:[%s203_s10 + $0x50] sm:$0xf]  ;;  %v229_v5 = vld [vmem:[%s203_s10 + $0x64] sm:$0xf] }
  0x1b   : > { %226 = vst [vmem:[%s198_s11 + $0xc] sm:$0xf] %v225_v3  ;;  %228 = vst [vmem:[%s198_s11 + $0x10] sm:$0xf] %v227_v4  ;;  %v231_v6 = vld [vmem:[%s203_s10 + $0x78] sm:$0xf] }
  0x1c   : > { %230 = vst [vmem:[%s198_s11 + $0x14] sm:$0xf] %v229_v5  ;;  %v233_v7 = vld [vmem:[%s203_s10 + $0x8c] sm:$0xf]  ;;  %232 = vst [vmem:[%s198_s11 + $0x18] sm:$0xf] %v231_v6 }
  0x1d   : > { %234 = vst [vmem:[%s198_s11 + $0x1c] sm:$0xf] %v233_v7 }
  0x1e PF: > { %p818_p7 = scmp.ge.s32.totalorder %s1077_s21, 1  ;;  %p296_p8 = scmp.lt.s32.totalorder %s1077_s21, 11 }
  0x20   : > { %p297_p9 = pnand %p818_p7, %p296_p8 }
  0x21   : > { %s303_s12 = sand.u32 (!%p297_p9), 1, %s1053_s15   ;;  %s820_s13 = sshll.u32 (!%p297_p9), %s1061_s17, 4 }
  0x22   : > { %300 = sbr.rel (%p297_p9) target bundleno = 319 (0x13f), region = 73  ;;  %s819_s14 = sshll.u32 (!%p297_p9), %s303_s12, 5 }
  0x23   : > { %p352_p10 = scmp.lt.s32.totalorder (!%p297_p9), %s820_s13, 79  ;;  %s822_s24 = sshll.u32 (!%p297_p9), %s1065_s18, 3 }
  0x24   : > { %p364_p11 = scmp.lt.s32.totalorder (!%p297_p9), %s822_s24, 15  ;;  %s1185_s18 = scalar_lea.vmem (!%p297_p9), [#allocation3], %s819_s14 }
  0x25   : > { %p826_p12 = scmp.ne.s32.totalorder (!%p297_p9), %s1061_s17, 0 }
  0x29   : > { %s1251_s13 = smov (!%p352_p10, %s820_s13), 79  ;;  %s1253_s24 = smov (!%p364_p11, %s822_s24), 15 }
  0x2a   : > { %s821_s25 = sshll.u32 %s1251_s13, 2  ;;  %s823_s30 = sshll.u32 %s1253_s24, 2  ;;  %v1079_v8 = vmov (!%p826_p12), 0.0  }
  0x2b   : > { %s1173_s29 = scalar_lea.vmem %s1234_s1, %s821_s25  ;;  %s1178_s7 = scalar_lea.vmem %s1236_s3, %s823_s30  ;;  %386 = vst [vmem:[#allocation2] sm:$0xff] (!%p826_p12), %v1079_v8  ;;  %387 = vst [vmem:[#allocation2 + $0x8] sm:$0xff] (!%p826_p12), %v1079_v8 }
  0x2c   : > { %s1183_s9 = scalar_lea.vmem %s1237_s4, %s823_s30  ;;  %385 = sbr.rel (%p826_p12) target bundleno = 51 (0x33), region = 81  ;;  %388 = vst [vmem:[#allocation2 + $0x10] sm:$0xff] (!%p826_p12), %v1079_v8  ;;  %389 = vst [vmem:[#allocation2 + $0x18] sm:$0xff] (!%p826_p12), %v1079_v8 }
  0x2d   : > { %390 = vst [vmem:[#allocation2 + $0x20] sm:$0xff] (!%p826_p12), %v1079_v8  ;;  %391 = vst [vmem:[#allocation2 + $0x28] sm:$0xff] (!%p826_p12), %v1079_v8 }
  0x2e   : > { %392 = vst [vmem:[#allocation2 + $0x30] sm:$0xff] (!%p826_p12), %v1079_v8  ;;  %393 = vst [vmem:[#allocation2 + $0x38] sm:$0xff] (!%p826_p12), %v1079_v8 }
  0x33 PF: > { %v1011_v9 = vld [vmem:[%s1173_s29] sm:$0xff]   ;;  %v1012_v10 = vld [vmem:[%s1173_s29 + $0x8] sm:$0xff]   ;;  %v1013_v11 = vld [vmem:[%s1173_s29 + $0x10] sm:$0xff]   ;;  %p839_p13 = scmp.ne.s32.totalorder %s1061_s17, 4 }
  0x34   : > { %913 = vmatprep.subr.bf16.mxu0 %v1011_v9  ;;  %937 = vmatprep.subr.bf16.mxu1 %v1011_v9  ;;  %v1014_v12 = vld [vmem:[%s1173_s29 + $0x18] sm:$0xff]   ;;  %v1019_v13 = vld [vmem:[%s1185_s18] sm:$0xff]   ;;  %v1020_v14 = vld [vmem:[%s1185_s18 + $0x10] sm:$0xff]  }
  0x35   : > { %914 = vmatpush3.bf16.msra.mxu0 %v1011_v9  ;;  %945 = vmatpush3.bf16.msra.mxu1 %v1011_v9  ;;  %v1015_v15 = vld [vmem:[%s1173_s29 + $0x20] sm:$0xff]   ;;  %v1016_v16 = vld [vmem:[%s1173_s29 + $0x28] sm:$0xff]   ;;  %v1017_v17 = vld [vmem:[%s1173_s29 + $0x30] sm:$0xff]  }
  0x36   : > { %915 = vmatprep.subr.bf16.mxu0 %v1012_v10  ;;  %938 = vmatprep.subr.bf16.mxu1 %v1012_v10  ;;  %v1018_v18 = vld [vmem:[%s1173_s29 + $0x38] sm:$0xff]   ;;  %v1021_v19 = vld [vmem:[%s1185_s18 + $0x8] sm:$0xff]   ;;  %v396_v21 = vld [vmem:[#allocation2 + $0x10] sm:$0xff] }
  0x37   : > { %929 = vmatprep.mubr.bf16.mxu0 %v1019_v13  ;;  %933 = vmatprep.mubr.bf16.mxu1 %v1020_v14  ;;  %v1022_v20 = vld [vmem:[%s1185_s18 + $0x18] sm:$0xff]   ;;  %v400_v22 = vld [vmem:[#allocation2 + $0x30] sm:$0xff]  ;;  %v394_v23 = vld [vmem:[#allocation2] sm:$0xff] }
  0x38   : > { %v398_v24 = vld [vmem:[#allocation2 + $0x20] sm:$0xff]  ;;  %v397_v27 = vld [vmem:[#allocation2 + $0x18] sm:$0xff]  ;;  %v395_v33 = vld [vmem:[#allocation2 + $0x8] sm:$0xff] }
  0x39   : > { %916 = vmatpush3.bf16.msra.mxu0 %v1012_v10  ;;  %946 = vmatpush3.bf16.msra.mxu1 %v1012_v10  ;;  %v401_v28 = vld [vmem:[#allocation2 + $0x38] sm:$0xff]  ;;  %v399_v34 = vld [vmem:[#allocation2 + $0x28] sm:$0xff]  ;;  %v840_v47 = vld [vmem:[%s1235_s2] ss:$0 sm:$0xff] (!%p839_p13) }
  0x3a   : > { %917 = vmatprep.subr.bf16.mxu0 %v1013_v11  ;;  %939 = vmatprep.subr.bf16.mxu1 %v1013_v11  ;;  %v860_v50 = vld [vmem:[%s1178_s7] sm:$0xff] (!%p839_p13)   ;;  %v895_v57 = vld [vmem:[%s1178_s7 + $0x8] sm:$0xff] (!%p839_p13)   ;;  %v896_v0 = vld [vmem:[%s1178_s7 + $0x10] sm:$0xff] (!%p839_p13)  }
  0x3b   : > { %v861_v53 = vunpack.c.l.bf16 (!%p839_p13), %v860_v50  ;;  %v862_v54 = vunpack.c.h.bf16 (!%p839_p13), %v860_v50  ;;  %v865_v60 = vunpack.c.l.bf16 (!%p839_p13), %v895_v57  ;;  %v866_v61 = vunpack.c.h.bf16 (!%p839_p13), %v895_v57  ;;  %v897_v7 = vld [vmem:[%s1178_s7 + $0x18] sm:$0xff] (!%p839_p13)  }
  0x3c   : > { %v869_v5 = vunpack.c.l.bf16 (!%p839_p13), %v896_v0  ;;  %v870_v6 = vunpack.c.h.bf16 (!%p839_p13), %v896_v0 }
  0x3d   : > { %918 = vmatpush3.bf16.msra.mxu0 %v1013_v11  ;;  %947 = vmatpush3.bf16.msra.mxu1 %v1013_v11 }
  0x3e   : > { %919 = vmatprep.subr.bf16.mxu0 %v1014_v12  ;;  %940 = vmatprep.subr.bf16.mxu1 %v1014_v12 }
  0x41   : > { %920 = vmatpush3.bf16.msra.mxu0 %v1014_v12  ;;  %948 = vmatpush3.bf16.msra.mxu1 %v1014_v12 }
  0x42   : > { %921 = vmatprep.subr.bf16.mxu0 %v1015_v15  ;;  %941 = vmatprep.subr.bf16.mxu1 %v1015_v15 }
  0x45   : > { %922 = vmatpush3.bf16.msra.mxu0 %v1015_v15  ;;  %949 = vmatpush3.bf16.msra.mxu1 %v1015_v15 }
  0x46   : > { %923 = vmatprep.subr.bf16.mxu0 %v1016_v16  ;;  %942 = vmatprep.subr.bf16.mxu1 %v1016_v16 }
  0x49   : > { %924 = vmatpush3.bf16.msra.mxu0 %v1016_v16  ;;  %950 = vmatpush3.bf16.msra.mxu1 %v1016_v16 }
  0x4a   : > { %925 = vmatprep.subr.bf16.mxu0 %v1017_v17  ;;  %943 = vmatprep.subr.bf16.mxu1 %v1017_v17 }
  0x4d   : > { %926 = vmatpush3.bf16.msra.mxu0 %v1017_v17  ;;  %951 = vmatpush3.bf16.msra.mxu1 %v1017_v17 }
  0x4e   : > { %927 = vmatprep.subr.bf16.mxu0 %v1018_v18  ;;  %944 = vmatprep.subr.bf16.mxu1 %v1018_v18 }
  0x51   : > { %928 = vmatpush3.bf16.msra.mxu0 %v1018_v18  ;;  %952 = vmatpush3.bf16.msra.mxu1 %v1018_v18  ;;  %v873_v18 = vunpack.c.l.bf16 (!%p839_p13), %v897_v7 }
  0x54   : > { %930 = vmatmul.mubr.bf16.vlgmr.msra.gmra.mrb[0].mxu0 %v1021_v19  ;;  %934 = vmatmul.mubr.bf16.vlgmr.msra.gmra.mrb[0].mxu1 %v1022_v20  ;;  %v874_v19 = vunpack.c.h.bf16 (!%p839_p13), %v897_v7 }
 0x127   : > { %v931_v25 = vpop.f32.mrb[0].mxu0  ;;  %v935_v26 = vpop.f32.mrb[0].mxu1  ;;  %582 = sbr.rel (%p839_p13) target bundleno = 319 (0x13f), region = 85 }
 0x128   : > { %v565_v29 = vadd.f32 %v931_v25, %v396_v21  ;;  %v569_v30 = vadd.f32 %v935_v26, %v400_v22  ;;  %v532_v31 = vpop.f32.mrb[1].mxu0  ;;  %v548_v32 = vpop.f32.mrb[1].mxu1 }
 0x129   : > { %v563_v35 = vadd.f32 %v532_v31, %v394_v23  ;;  %v567_v36 = vadd.f32 %v548_v32, %v398_v24  ;;  %v932_v37 = vpop.f32.mrb[2].mxu0  ;;  %v936_v38 = vpop.f32.mrb[2].mxu1 }
 0x12a   : > { %573 = vst [vmem:[#allocation2 + $0x10] sm:$0xff] %v565_v29  ;;  %577 = vst [vmem:[#allocation2 + $0x30] sm:$0xff] %v569_v30  ;;  %v566_v39 = vadd.f32 %v932_v37, %v397_v27  ;;  %v570_v40 = vadd.f32 %v936_v38, %v401_v28  ;;  %v535_v41 = vpop.f32.mrb[3].mxu0  ;;  %v551_v42 = vpop.f32.mrb[3].mxu1 }
 0x12b   : > { %571 = vst [vmem:[#allocation2] sm:$0xff] %v563_v35  ;;  %575 = vst [vmem:[#allocation2 + $0x20] sm:$0xff] %v567_v36  ;;  %v564_v43 = vadd.f32 %v535_v41, %v395_v33  ;;  %v568_v44 = vadd.f32 %v551_v42, %v399_v34 }
 0x12c   : > { %574 = vst [vmem:[#allocation2 + $0x18] sm:$0xff] %v566_v39  ;;  %578 = vst [vmem:[#allocation2 + $0x38] sm:$0xff] %v570_v40 }
 0x12d   : > { %572 = vst [vmem:[#allocation2 + $0x8] sm:$0xff] %v564_v43  ;;  %576 = vst [vmem:[#allocation2 + $0x28] sm:$0xff] %v568_v44 }
 0x131   : > { %v585_v51 = vld [vmem:[#allocation2 + $0x10] sm:$0xff] }
 0x132   : > { %v583_v45 = vld [vmem:[#allocation2] sm:$0xff]  ;;  %v600_v55 = vadd.f32 %v840_v47, %v585_v51  ;;  %v589_v1 = vld [vmem:[#allocation2 + $0x30] sm:$0xff] }
 0x133   : > { %v598_v48 = vadd.f32 %v840_v47, %v583_v45  ;;  %v586_v52 = vld [vmem:[#allocation2 + $0x18] sm:$0xff]  ;;  %v587_v58 = vld [vmem:[#allocation2 + $0x20] sm:$0xff]  ;;  %v604_v10 = vadd.f32 %v840_v47, %v589_v1 }
 0x134   : > { %v584_v46 = vld [vmem:[#allocation2 + $0x8] sm:$0xff]  ;;  %v601_v56 = vadd.f32 %v840_v47, %v586_v52  ;;  %v602_v62 = vadd.f32 %v840_v47, %v587_v58  ;;  %v590_v2 = vld [vmem:[#allocation2 + $0x38] sm:$0xff]  ;;  %v624_v8 = vadd.f32 %v865_v60, %v600_v55 }
 0x135   : > { %v599_v49 = vadd.f32 %v840_v47, %v584_v46  ;;  %v588_v59 = vld [vmem:[#allocation2 + $0x28] sm:$0xff]  ;;  %v622_v3 = vadd.f32 %v861_v53, %v598_v48  ;;  %v605_v11 = vadd.f32 %v840_v47, %v590_v2  ;;  %v628_v24 = vadd.f32 %v873_v18, %v604_v10 }
 0x136   : > { %v603_v63 = vadd.f32 %v840_v47, %v588_v59  ;;  %v625_v9 = vadd.f32 %v866_v61, %v601_v56  ;;  %v626_v14 = vadd.f32 %v869_v5, %v602_v62  ;;  %v632_v16 = vmax.f32 %v624_v8, 0.0 }
 0x137   : > { %v623_v4 = vadd.f32 %v862_v54, %v599_v49  ;;  %v630_v12 = vmax.f32 %v622_v3, 0.0  ;;  %v629_v25 = vadd.f32 %v874_v19, %v605_v11  ;;  %v636_v27 = vmax.f32 %v628_v24, 0.0 }
 0x138   : > { %v627_v15 = vadd.f32 %v870_v6, %v603_v63  ;;  %v633_v17 = vmax.f32 %v625_v9, 0.0  ;;  %v634_v21 = vmax.f32 %v626_v14, 0.0 }
 0x139   : > { %v631_v13 = vmax.f32 %v623_v4, 0.0  ;;  %v637_v28 = vmax.f32 %v629_v25, 0.0 }
 0x13a   : > { %v635_v22 = vmax.f32 %v627_v15, 0.0  ;;  %v883_v23 = vpack.c.bf16 %v633_v17, %v632_v16 }
 0x13b   : > { %v878_v20 = vpack.c.bf16 %v631_v13, %v630_v12  ;;  %v893_v29 = vpack.c.bf16 %v637_v28, %v636_v27 }
 0x13c   : > { %v888_v26 = vpack.c.bf16 %v635_v22, %v634_v21  ;;  %898 = vst [vmem:[%s1183_s9 + $0x8] sm:$0xff] %v883_v23  }
 0x13d   : > { %879 = vst [vmem:[%s1183_s9] sm:$0xff] %v878_v20   ;;  %900 = vst [vmem:[%s1183_s9 + $0x18] sm:$0xff] %v893_v29  }
 0x13e   : > { %899 = vst [vmem:[%s1183_s9 + $0x10] sm:$0xff] %v888_v26  }
 0x13f PF: > { %s14_s21 = sadd.s32 1, %s1077_s21   ;;  %s1238_s15 = smov %s1057_s16 }
 0x140   : > { %p11_p0 = scmp.ge.s32.totalorder %s14_s21, 12   ;;  %s1239_s16 = smov %s1156_s28 }
 0x141   : > { %s1240_s17 = smov %s1069_s19  ;;  %s1241_s18 = smov %s1073_s20 }
 0x142   : > { %s1242_s19 = smov %s1245_s22  ;;  %s1243_s20 = smov %s1249_s23 }
 0x143   :  { %13 = sbr.rel (!%p11_p0) target bundleno = 4 (0x4), region = 129 }

// kernel: forward.43
= control target key start
LH: loop header
LB: loop body
LE: loop exit
PB: predicated region body
PF: predicated region fallthrough
CT: control target
= control target key end

     0   :  { %s781_s12 = smov 0   ;;  %s783_s13 = smov 0   ;;  %s896_s0 = inlined_call_operand.vmem [shape: bf16[32,640], index: 0, kind: input, shape index: {}]   ;;  %s897_s1 = inlined_call_operand.vmem [shape: bf16[640,128], index: 1, kind: input, shape index: {}]   ;;  %s898_s2 = inlined_call_operand.vmem [shape: f32[1,128], index: 2, kind: input, shape index: {}]   ;;  %s899_s3 = inlined_call_operand.vmem [shape: bf16[32,128], index: 3, kind: output, shape index: {}]  }
   0x1   :  { %s785_s14 = smov 0   ;;  %s787_s15 = smov 0  }
   0x2   :  { %s789_s16 = smov 0   ;;  %s791_s17 = smov 0  }
   0x3   :  { %s793_s18 = smov 0  }
   0x4 LB: > { %s25_s19 = sadd.s32 1, %s748_s16  ;;  %s32_s20 = sadd.s32 1, %s752_s17  ;;  %s756_s18 = sphi %s793_s18, %s13_s18   ;;  %s752_s17 = sphi %s791_s17, %s905_s17   ;;  %s748_s16 = sphi %s789_s16, %s904_s16   ;;  %s744_s15 = sphi %s787_s15, %s903_s15   ;;  %s740_s14 = sphi %s785_s14, %s902_s14   ;;  %s736_s13 = sphi %s783_s13, %s901_s13   ;;  %s732_s12 = sphi %s781_s12, %s900_s12  }
   0x5   : > { %p26_p0 = scmp.ge.s32.totalorder %s25_s19, 5  ;;  %p48_p1 = scmp.ne.s32.totalorder %s736_s13, %s732_s12 }
   0x6   : > { %p49_p2 = scmp.eq.s32.totalorder %s756_s18, 0  ;;  %s41_s24 = sadd.s32 1, %s736_s13 }
   0x7   : > { %s907_s19 = smov (%p26_p0, %s25_s19), 0  ;;  %s909_s20 = smov (!%p26_p0, %s32_s20), %s752_s17 }
   0x8   : > { %p50_p3 = por %p49_p2, %p48_p1  ;;  %p34_p4 = scmp.ge.s32.totalorder %s909_s20, 2 }
   0x9   : > { %s37_s21 = ssub.s32 %s748_s16, %s907_s19  ;;  %p570_p6 = scmp.ge.s32.totalorder %s756_s18, 10 }
   0xa   : > { %s911_s20 = smov (%p34_p4, %s909_s20), 0 }
   0xb   : > { %s36_s22 = ssub.s32 %s752_s17, %s911_s20  ;;  %162 = sbr.rel (%p570_p6) target bundleno = 26 (0x1a), region = 20 }
   0xc   : > { %s38_s23 = sor.u32 %s37_s21, %s36_s22 }
   0xd   : > { %p39_p5 = scmp.eq.s32.totalorder %s38_s23, 0 }
   0xf   : > { %s832_s25 = scalar_select %p39_p5, %s736_s13, %s41_s24  }
  0x12   : > { %165 = sbr.rel (!%p50_p3) target bundleno = 26 (0x1a), region = 24  ;;  %s167_s26 = sand.u32 (%p50_p3), 1, %s736_s13  }
  0x13   : > { %s633_s27 = smul.u32 (%p50_p3), 10, %s752_s17  ;;  %s571_s28 = sshll.u32 (%p50_p3), %s167_s26, 3 }
  0x14   : > { %s169_s7 = scalar_lea.vmem (%p50_p3), [#allocation3], %s571_s28 }
  0x15   : > { %s172_s29 = sadd.s32 (%p50_p3), %s748_s16, %s633_s27 }
  0x16   : > { %s574_s30 = sshll.u32 (%p50_p3), %s172_s29, 2 }
  0x17   : > { %s174_s6 = scalar_lea.vmem (%p50_p3), %s896_s0, %s574_s30 }
  0x18   : > { %v190_v0 = vld [vmem:[%s174_s6] sm:$0xf] (%p50_p3)  ;;  %v192_v1 = vld [vmem:[%s174_s6 + $0x14] sm:$0xf] (%p50_p3) }
  0x19   : > { %191 = vst [vmem:[%s169_s7] sm:$0xf] %v190_v0  ;;  %193 = vst [vmem:[%s169_s7 + $0x4] sm:$0xf] %v192_v1 }
  0x1a PF: > { %p575_p7 = scmp.ge.s32.totalorder %s756_s18, 1  ;;  %p231_p8 = scmp.lt.s32.totalorder %s756_s18, 11 }
  0x1c   : > { %p232_p9 = pnand %p575_p7, %p231_p8 }
  0x1d   : > { %s238_s8 = sand.u32 (!%p232_p9), 1, %s732_s12   ;;  %s577_s9 = sshll.u32 (!%p232_p9), %s740_s14, 4 }
  0x1e   : > { %235 = sbr.rel (%p232_p9) target bundleno = 311 (0x137), region = 69  ;;  %s845_s10 = sshll.u32 (!%p232_p9), %s238_s8, 3 }
  0x1f   : > { %p277_p10 = scmp.lt.s32.totalorder (!%p232_p9), %s577_s9, 79  ;;  %s579_s11 = sshll.u32 (!%p232_p9), %s744_s15, 1 }
  0x20   : > { %p289_p11 = scmp.lt.s32.totalorder (!%p232_p9), %s579_s11, 3  ;;  %s240_s29 = scalar_lea.vmem (!%p232_p9), [#allocation3], %s845_s10 }
  0x21   : > { %p581_p12 = scmp.ne.s32.totalorder (!%p232_p9), %s740_s14, 0 }
  0x25   : > { %s913_s9 = smov (!%p277_p10, %s577_s9), 79  ;;  %s915_s11 = smov (!%p289_p11, %s579_s11), 3 }
  0x26   : > { %s578_s21 = sshll.u32 %s913_s9, 2  ;;  %s580_s26 = sshll.u32 %s915_s11, 2  ;;  %v758_v2 = vmov (!%p581_p12), 0.0  }
  0x27   : > { %s851_s24 = scalar_lea.vmem %s897_s1, %s578_s21  ;;  %s856_s12 = scalar_lea.vmem %s899_s3, %s580_s26  ;;  %302 = vst [vmem:[#allocation2] sm:$0xff] (!%p581_p12), %v758_v2  ;;  %303 = vst [vmem:[#allocation2 + $0x8] sm:$0xff] (!%p581_p12), %v758_v2 }
  0x28   : > { %301 = sbr.rel (%p581_p12) target bundleno = 47 (0x2f), region = 77 }
  0x2f PF: > { %v693_v3 = vld [vmem:[%s851_s24] sm:$0xff]   ;;  %v759_v4 = vmov 0.0   ;;  %v694_v5 = vld [vmem:[%s851_s24 + $0x8] sm:$0xff]   ;;  %vm760_vm0 = vmmov 0   ;;  %v695_v6 = vld [vmem:[%s851_s24 + $0x10] sm:$0xff]   ;;  %p591_p13 = scmp.ne.s32.totalorder %s740_s14, 4 }
  0x30   : > { %613 = vmatprep.subr.bf16.mxu0 %v759_v4  ;;  %629 = vmatprep.mubr.msk.bf16.mxu0 %vm760_vm0, %v759_v4  ;;  %v696_v7 = vld [vmem:[%s851_s24 + $0x18] sm:$0xff]   ;;  %v697_v8 = vld [vmem:[%s851_s24 + $0x20] sm:$0xff]   ;;  %v698_v9 = vld [vmem:[%s851_s24 + $0x28] sm:$0xff]  }
  0x31   : > { %614 = vmatpush3.bf16.msra.mxu0 %v693_v3  ;;  %v699_v10 = vld [vmem:[%s851_s24 + $0x30] sm:$0xff]   ;;  %v700_v11 = vld [vmem:[%s851_s24 + $0x38] sm:$0xff]   ;;  %v304_v13 = vld [vmem:[#allocation2] sm:$0xff] }
  0x32   : > { %615 = vmatprep.subr.bf16.mxu0 %v759_v4  ;;  %v701_v12 = vld [vmem:[%s240_s29] sm:$0xff]   ;;  %v305_v15 = vld [vmem:[#allocation2 + $0x8] sm:$0xff]  ;;  %v592_v23 = vld [vmem:[%s898_s2] ss:$0 sm:$0xff] (!%p591_p13) }
  0x35   : > { %616 = vmatpush3.bf16.msra.mxu0 %v694_v5 }
  0x36   : > { %617 = vmatprep.subr.bf16.mxu0 %v759_v4 }
  0x39   : > { %618 = vmatpush3.bf16.msra.mxu0 %v695_v6 }
  0x3a   : > { %619 = vmatprep.subr.bf16.mxu0 %v759_v4 }
  0x3d   : > { %620 = vmatpush3.bf16.msra.mxu0 %v696_v7 }
  0x3e   : > { %621 = vmatprep.subr.bf16.mxu0 %v759_v4 }
  0x41   : > { %622 = vmatpush3.bf16.msra.mxu0 %v697_v8 }
  0x42   : > { %623 = vmatprep.subr.bf16.mxu0 %v759_v4 }
  0x45   : > { %624 = vmatpush3.bf16.msra.mxu0 %v698_v9 }
  0x46   : > { %625 = vmatprep.subr.bf16.mxu0 %v759_v4 }
  0x49   : > { %626 = vmatpush3.bf16.msra.mxu0 %v699_v10 }
  0x4a   : > { %627 = vmatprep.subr.bf16.mxu0 %v759_v4 }
  0x4d   : > { %628 = vmatpush3.bf16.msra.mxu0 %v700_v11 }
  0x50   : > { %630 = vmatmul.mubr.bf16.vlgmr.msra.gmra.mrb[0].mxu0 %v701_v12 }
 0x122   : > { %426 = sbr.rel (%p591_p13) target bundleno = 311 (0x137), region = 81 }
 0x123   : > { %v412_v14 = vpop.f32.mrb[0].mxu0 }
 0x124   : > { %v419_v16 = vadd.f32 %v412_v14, %v304_v13  ;;  %v631_v17 = vpop.f32.mrb[1].mxu0 }
 0x125   : > { %v415_v18 = vpop.f32.mrb[2].mxu0 }
 0x126   : > { %421 = vst [vmem:[#allocation2] sm:$0xff] %v419_v16  ;;  %v420_v19 = vadd.f32 %v415_v18, %v305_v15  ;;  %v632_v20 = vpop.f32.mrb[3].mxu0 }
 0x128   : > { %422 = vst [vmem:[#allocation2 + $0x8] sm:$0xff] %v420_v19 }
 0x12d   : > { %v427_v21 = vld [vmem:[#allocation2] sm:$0xff] }
 0x12e   : > { %v436_v24 = vadd.f32 %v592_v23, %v427_v21 }
 0x12f   : > { %v428_v22 = vld [vmem:[#allocation2 + $0x8] sm:$0xff] }
 0x130   : > { %v437_v25 = vadd.f32 %v592_v23, %v428_v22  ;;  %v438_v26 = vmax.f32 %v436_v24, 0.0 }
 0x132   : > { %v439_v27 = vmax.f32 %v437_v25, 0.0 }
 0x134   : > { %v602_v28 = vpack.c.bf16 %v439_v27, %v438_v26 }
 0x136   : > { %603 = vst [vmem:[%s856_s12] sm:$0xff] %v602_v28  }
 0x137 PF: > { %s13_s18 = sadd.s32 1, %s756_s18   ;;  %s900_s12 = smov %s736_s13 }
 0x138   : > { %p10_p0 = scmp.ge.s32.totalorder %s13_s18, 12   ;;  %s901_s13 = smov %s832_s25 }
 0x139   : > { %s902_s14 = smov %s748_s16  ;;  %s903_s15 = smov %s752_s17 }
 0x13a   : > { %s904_s16 = smov %s907_s19  ;;  %s905_s17 = smov %s911_s20 }
 0x13b   :  { %12 = sbr.rel (!%p10_p0) target bundleno = 4 (0x4), region = 122 }

// kernel: forward.44
= control target key start
LH: loop header
LB: loop body
LE: loop exit
PB: predicated region body
PF: predicated region fallthrough
CT: control target
= control target key end

     0   :  { %s662_s12 = smov 0   ;;  %s664_s13 = smov 0   ;;  %s725_s0 = inlined_call_operand.vmem [shape: bf16[32,128], index: 0, kind: input, shape index: {}]   ;;  %s726_s1 = inlined_call_operand.vmem [shape: bf16[128,128], index: 1, kind: input, shape index: {}]   ;;  %s727_s2 = inlined_call_operand.vmem [shape: f32[1,128], index: 2, kind: input, shape index: {}]   ;;  %s728_s3 = inlined_call_operand.vmem [shape: bf16[32,128], index: 3, kind: output, shape index: {}]  }
   0x1   :  { %s666_s14 = smov 0  }
   0x2 LB: > { %s32_s15 = sadd.s32 1, %s634_s13  ;;  %p526_p0 = scmp.ge.s32.totalorder %s638_s14, 1  ;;  %s638_s14 = sphi %s666_s14, %s13_s14   ;;  %s634_s13 = sphi %s664_s13, %s730_s13   ;;  %s630_s12 = sphi %s662_s12, %s729_s12  }
   0x3   : > { %p34_p1 = scmp.ge.s32.totalorder %s32_s15, 2  ;;  %p188_p2 = scmp.lt.s32.totalorder %s638_s14, 3 }
   0x5   : > { %s732_s15 = smov (%p34_p1, %s32_s15), 0  ;;  %p189_p3 = pnand %p526_p0, %p188_p2 }
   0x6   : > { %v607_v0 = vld [vmem:[%s726_s1] sm:$0xff] (!%p189_p3)   ;;  %v640_v1 = vmov (!%p189_p3), 0.0   ;;  %v608_v2 = vld [vmem:[%s726_s1 + $0x8] sm:$0xff] (!%p189_p3)   ;;  %vm641_vm0 = vmmov (!%p189_p3), 0   ;;  %s527_s20 = sshll.u32 (!%p189_p3), %s630_s12, 1  ;;  %v609_v3 = vld [vmem:[%s726_s1 + $0x10] sm:$0xff] (!%p189_p3)  }
   0x7   : > { %192 = sbr.rel (%p189_p3) target bundleno = 258 (0x102), region = 32  ;;  %561 = vmatprep.subr.bf16.mxu0 (!%p189_p3), %v640_v1  ;;  %577 = vmatprep.mubr.msk.bf16.mxu0 (!%p189_p3), %vm641_vm0, %v640_v1  ;;  %p230_p4 = scmp.lt.s32.totalorder (!%p189_p3), %s527_s20, 3  ;;  %v610_v4 = vld [vmem:[%s726_s1 + $0x18] sm:$0xff] (!%p189_p3)   ;;  %v611_v5 = vld [vmem:[%s726_s1 + $0x20] sm:$0xff] (!%p189_p3)   ;;  %v612_v6 = vld [vmem:[%s726_s1 + $0x28] sm:$0xff] (!%p189_p3)  }
   0x8   : > { %562 = vmatpush3.bf16.msra.mxu0 (!%p189_p3), %v607_v0  ;;  %v613_v7 = vld [vmem:[%s726_s1 + $0x30] sm:$0xff] (!%p189_p3)   ;;  %v614_v8 = vld [vmem:[%s726_s1 + $0x38] sm:$0xff] (!%p189_p3)   ;;  %v540_v11 = vld [vmem:[%s727_s2] ss:$0 sm:$0xff] (!%p189_p3) }
   0x9   : > { %563 = vmatprep.subr.bf16.mxu0 (!%p189_p3), %v640_v1 }
   0xc   : > { %564 = vmatpush3.bf16.msra.mxu0 (!%p189_p3), %v608_v2 }
   0xd   : > { %565 = vmatprep.subr.bf16.mxu0 (!%p189_p3), %v640_v1 }
   0xe   : > { %s734_s20 = smov (!%p230_p4, %s527_s20), 3 }
   0xf   : > { %s528_s23 = sshll.u32 %s734_s20, 2 }
  0x10   : > { %s236_s26 = scalar_lea.vmem %s725_s0, %s528_s23  ;;  %566 = vmatpush3.bf16.msra.mxu0 %v609_v3  ;;  %s257_s17 = scalar_lea.vmem %s728_s3, %s528_s23 }
  0x11   : > { %567 = vmatprep.subr.bf16.mxu0 %v640_v1  ;;  %v615_v9 = vld [vmem:[%s236_s26] sm:$0xff]  }
  0x14   : > { %568 = vmatpush3.bf16.msra.mxu0 %v610_v4 }
  0x15   : > { %569 = vmatprep.subr.bf16.mxu0 %v640_v1 }
  0x18   : > { %570 = vmatpush3.bf16.msra.mxu0 %v611_v5 }
  0x19   : > { %571 = vmatprep.subr.bf16.mxu0 %v640_v1 }
  0x1c   : > { %572 = vmatpush3.bf16.msra.mxu0 %v612_v6 }
  0x1d   : > { %573 = vmatprep.subr.bf16.mxu0 %v640_v1 }
  0x20   : > { %574 = vmatpush3.bf16.msra.mxu0 %v613_v7 }
  0x21   : > { %575 = vmatprep.subr.bf16.mxu0 %v640_v1 }
  0x24   : > { %576 = vmatpush3.bf16.msra.mxu0 %v614_v8 }
  0x27   : > { %578 = vmatmul.mubr.bf16.vlgmr.msra.gmra.mrb[0].mxu0 %v615_v9 }
  0xfa   : > { %v374_v10 = vpop.f32.mrb[0].mxu0 }
  0xfb   : > { %v579_v12 = vpop.f32.mrb[1].mxu0  ;;  %v397_v14 = vadd.f32 %v540_v11, %v374_v10 }
  0xfc   : > { %v377_v13 = vpop.f32.mrb[2].mxu0 }
  0xfd   : > { %v398_v15 = vadd.f32 %v540_v11, %v377_v13  ;;  %v580_v16 = vpop.f32.mrb[3].mxu0 }
  0xff   : > { %v550_v17 = vpack.c.bf16 %v398_v15, %v397_v14 }
 0x101   : > { %551 = vst [vmem:[%s257_s17] sm:$0xff] %v550_v17  }
 0x102 PF: > { %s13_s14 = sadd.s32 1, %s638_s14   ;;  %s729_s12 = smov %s634_s13 }
 0x103   : > { %p10_p5 = scmp.ge.s32.totalorder %s13_s14, 4   ;;  %s730_s13 = smov %s732_s15 }
 0x105   :  { %12 = sbr.rel (!%p10_p5) target bundleno = 2 (0x2), region = 76 }

// kernel: forward.45
= control target key start
LH: loop header
LB: loop body
LE: loop exit
PB: predicated region body
PF: predicated region fallthrough
CT: control target
= control target key end

     0   :  { %s1112_s15 = smov 0   ;;  %s1114_s16 = smov 0   ;;  %s1249_s0 = inlined_call_operand.vmem [shape: bf16[32,1152], index: 0, kind: input, shape index: {}]   ;;  %s1250_s1 = inlined_call_operand.vmem [shape: bf16[1152,128], index: 1, kind: input, shape index: {}]   ;;  %s1251_s2 = inlined_call_operand.vmem [shape: f32[1,128], index: 2, kind: input, shape index: {}]   ;;  %s1252_s3 = inlined_call_operand.vmem [shape: bf16[32,128], index: 3, kind: input, shape index: {}]   ;;  %s1253_s4 = inlined_call_operand.vmem [shape: bf16[32,128], index: 4, kind: output, shape index: {}]  }
   0x1   :  { %s1116_s17 = smov 0   ;;  %s1118_s18 = smov 0  }
   0x2   :  { %s1120_s19 = smov 0   ;;  %s1122_s20 = smov 0  }
   0x3   :  { %s1124_s21 = smov 0  }
   0x4 LB: > { %s26_s22 = sadd.s32 1, %s1074_s19  ;;  %s33_s23 = sadd.s32 1, %s1078_s20  ;;  %s1082_s21 = sphi %s1124_s21, %s14_s21   ;;  %s1078_s20 = sphi %s1122_s20, %s1259_s20   ;;  %s1074_s19 = sphi %s1120_s19, %s1258_s19   ;;  %s1070_s18 = sphi %s1118_s18, %s1257_s18   ;;  %s1066_s17 = sphi %s1116_s17, %s1256_s17   ;;  %s1062_s16 = sphi %s1114_s16, %s1255_s16   ;;  %s1058_s15 = sphi %s1112_s15, %s1254_s15  }
   0x5   : > { %p27_p0 = scmp.ge.s32.totalorder %s26_s22, 3  ;;  %p49_p1 = scmp.ne.s32.totalorder %s1062_s16, %s1058_s15 }
   0x6   : > { %p50_p2 = scmp.eq.s32.totalorder %s1082_s21, 0  ;;  %s42_s27 = sadd.s32 1, %s1062_s16 }
   0x7   : > { %s1261_s22 = smov (%p27_p0, %s26_s22), 0  ;;  %s1263_s23 = smov (!%p27_p0, %s33_s23), %s1078_s20 }
   0x8   : > { %p51_p3 = por %p50_p2, %p49_p1  ;;  %p35_p4 = scmp.ge.s32.totalorder %s1263_s23, 2 }
   0x9   : > { %s38_s24 = ssub.s32 %s1074_s19, %s1261_s22  ;;  %p828_p6 = scmp.ge.s32.totalorder %s1082_s21, 6 }
   0xa   : > { %s1265_s23 = smov (%p35_p4, %s1263_s23), 0 }
   0xb   : > { %s37_s25 = ssub.s32 %s1078_s20, %s1265_s23  ;;  %191 = sbr.rel (%p828_p6) target bundleno = 29 (0x1d), region = 20 }
   0xc   : > { %s39_s26 = sor.u32 %s38_s24, %s37_s25 }
   0xd   : > { %p40_p5 = scmp.eq.s32.totalorder %s39_s26, 0 }
   0xf   : > { %s1163_s28 = scalar_select %p40_p5, %s1062_s16, %s42_s27  }
  0x12   : > { %194 = sbr.rel (!%p51_p3) target bundleno = 29 (0x1d), region = 24  ;;  %s196_s29 = sand.u32 (%p51_p3), 1, %s1062_s16  }
  0x13   : > { %s200_s30 = smul.u32 (%p51_p3), 3, %s1074_s19 }
  0x14   : > { %s938_s5 = smul.u32 (%p51_p3), 24, %s196_s29 }
  0x15   : > { %s939_s6 = smul.u32 (%p51_p3), 18, %s1078_s20 }
  0x16   : > { %s198_s12 = scalar_lea.vmem (%p51_p3), [#allocation3], %s938_s5 }
  0x17   : > { %s202_s7 = sadd.s32 (%p51_p3), %s939_s6, %s200_s30 }
  0x18   : > { %s831_s8 = sshll.u32 (%p51_p3), %s202_s7, 2 }
  0x19   : > { %s204_s11 = scalar_lea.vmem %s1249_s0, %s831_s8 }
  0x1a   : > { %v219_v0 = vld [vmem:[%s204_s11] sm:$0xff]  ;;  %v832_v2 = vld [vmem:[%s204_s11 + $0x8] sm:$0xf]  ;;  %v834_v3 = vld [vmem:[%s204_s11 + $0x2c] sm:$0xf] }
  0x1b   : > { %v221_v1 = vld [vmem:[%s204_s11 + $0x24] sm:$0xff]  ;;  %220 = vst [vmem:[%s198_s12] sm:$0xff] %v219_v0  ;;  %833 = vst [vmem:[%s198_s12 + $0x8] sm:$0xf] %v832_v2 }
  0x1c   : > { %222 = vst [vmem:[%s198_s12 + $0xc] sm:$0xff] %v221_v1  ;;  %835 = vst [vmem:[%s198_s12 + $0x14] sm:$0xf] %v834_v3 }
  0x1d PF: > { %p836_p7 = scmp.ge.s32.totalorder %s1082_s21, 1  ;;  %p262_p8 = scmp.lt.s32.totalorder %s1082_s21, 7 }
  0x1f   : > { %p263_p9 = pnand %p836_p7, %p262_p8 }
  0x20   : > { %s269_s13 = sand.u32 (!%p263_p9), 1, %s1058_s15   ;;  %s318_s14 = smul.u32 (!%p263_p9), 48, %s1066_s17 }
  0x21   : > { %266 = sbr.rel (%p263_p9) target bundleno = 321 (0x141), region = 58  ;;  %s838_s25 = sshll.u32 (!%p263_p9), %s1070_s18, 1 }
  0x22   : > { %s940_s24 = smul.u32 (!%p263_p9), 24, %s269_s13  ;;  %p319_p10 = scmp.lt.s32.totalorder (!%p263_p9), %s318_s14, 143 }
  0x23   : > { %p331_p11 = scmp.lt.s32.totalorder (!%p263_p9), %s838_s25, 3  ;;  %p842_p12 = scmp.ne.s32.totalorder (!%p263_p9), %s1066_s17, 0 }
  0x24   : > { %s1192_s10 = scalar_lea.vmem (!%p263_p9), [#allocation3], %s940_s24 }
  0x28   : > { %s1267_s14 = smov (!%p319_p10, %s318_s14), 143  ;;  %s1269_s25 = smov (!%p331_p11, %s838_s25), 3 }
  0x29   : > { %s837_s26 = sshll.u32 %s1267_s14, 2  ;;  %s839_s5 = sshll.u32 %s1269_s25, 2  ;;  %v1084_v4 = vmov (!%p842_p12), 0.0  }
  0x2a   : > { %s1180_s30 = scalar_lea.vmem %s1250_s1, %s837_s26  ;;  %s1185_s8 = scalar_lea.vmem %s1252_s3, %s839_s5  ;;  %353 = vst [vmem:[#allocation2] sm:$0xff] (!%p842_p12), %v1084_v4  ;;  %354 = vst [vmem:[#allocation2 + $0x8] sm:$0xff] (!%p842_p12), %v1084_v4 }
  0x2b   : > { %s1190_s18 = scalar_lea.vmem %s1253_s4, %s839_s5  ;;  %352 = sbr.rel (%p842_p12) target bundleno = 50 (0x32), region = 66 }
  0x32 PF: > { %v1000_v5 = vld [vmem:[%s1180_s30 + $0x40] sm:$0xff]   ;;  %v1085_v6 = vmov 0.0   ;;  %vm1086_vm0 = vmmov 0   ;;  %v1003_v9 = vld [vmem:[%s1180_s30 + $0x48] sm:$0xff]   ;;  %v1006_v12 = vld [vmem:[%s1180_s30 + $0x50] sm:$0xff]   ;;  %p870_p13 = scmp.ne.s32.totalorder %s1066_s17, 2 }
  0x33   : > { %918 = vmatprep.subr.bf16.mxu1 %v1085_v6  ;;  %v1001_v7 = vld [vmem:[%s1180_s30] sm:$0xff]   ;;  %887 = vmatprep.subr.bf16.mxu0 %v1000_v5  ;;  %v1004_v10 = vld [vmem:[%s1180_s30 + $0x8] sm:$0xff]   ;;  %v1007_v13 = vld [vmem:[%s1180_s30 + $0x10] sm:$0xff]  }
  0x34   : > { %v1002_v8 = vld [vmem:[%s1180_s30 + $0x80] sm:$0xff]   ;;  %934 = vmatprep.mubr.msk.bf16.mxu1 %vm1086_vm0, %v1085_v6  ;;  %888 = vmatpush3.bf16.msra.mxu0 %v1001_v7  ;;  %v1005_v11 = vld [vmem:[%s1180_s30 + $0x88] sm:$0xff]   ;;  %v1008_v14 = vld [vmem:[%s1180_s30 + $0x90] sm:$0xff]  }
  0x35   : > { %919 = vmatpush3.bf16.msra.mxu1 %v1002_v8  ;;  %889 = vmatprep.subr.bf16.mxu0 %v1003_v9  ;;  %v1009_v15 = vld [vmem:[%s1180_s30 + $0x58] sm:$0xff]   ;;  %v1012_v18 = vld [vmem:[%s1180_s30 + $0x60] sm:$0xff]   ;;  %v1015_v21 = vld [vmem:[%s1180_s30 + $0x68] sm:$0xff]  }
  0x36   : > { %920 = vmatprep.subr.bf16.mxu1 %v1085_v6  ;;  %v1010_v16 = vld [vmem:[%s1180_s30 + $0x18] sm:$0xff]   ;;  %v1013_v19 = vld [vmem:[%s1180_s30 + $0x20] sm:$0xff]   ;;  %v1016_v22 = vld [vmem:[%s1180_s30 + $0x28] sm:$0xff]  }
  0x37   : > { %v1011_v17 = vld [vmem:[%s1180_s30 + $0x98] sm:$0xff]   ;;  %v1014_v20 = vld [vmem:[%s1180_s30 + $0xa0] sm:$0xff]   ;;  %v1017_v23 = vld [vmem:[%s1180_s30 + $0xa8] sm:$0xff]  }
  0x38   : > { %890 = vmatpush3.bf16.msra.mxu0 %v1004_v10  ;;  %v1018_v24 = vld [vmem:[%s1180_s30 + $0x70] sm:$0xff]   ;;  %v1021_v27 = vld [vmem:[%s1180_s30 + $0x78] sm:$0xff]   ;;  %v355_v39 = vld [vmem:[#allocation2] sm:$0xff] }
  0x39   : > { %921 = vmatpush3.bf16.msra.mxu1 %v1005_v11  ;;  %891 = vmatprep.subr.bf16.mxu0 %v1006_v12  ;;  %v1019_v25 = vld [vmem:[%s1180_s30 + $0x30] sm:$0xff]   ;;  %v1022_v29 = vld [vmem:[%s1180_s30 + $0x38] sm:$0xff]   ;;  %v356_v45 = vld [vmem:[#allocation2 + $0x8] sm:$0xff] }
  0x3a   : > { %922 = vmatprep.subr.bf16.mxu1 %v1085_v6  ;;  %v1020_v26 = vld [vmem:[%s1180_s30 + $0xb0] sm:$0xff]   ;;  %v1023_v30 = vld [vmem:[%s1180_s30 + $0xb8] sm:$0xff]   ;;  %v871_v51 = vld [vmem:[%s1251_s2] ss:$0 sm:$0xff] (!%p870_p13) }
  0x3b   : > { %v1026_v28 = vld [vmem:[%s1192_s10 + $0x4] ss:$12 sps:$4 sm:$0xff]   ;;  %v1024_v31 = vld [vmem:[%s1192_s10] ss:$12 sps:$4 sm:$0xff]   ;;  %v1027_v32 = vld [vmem:[%s1192_s10 + $0x8] ss:$12 sps:$4 sm:$0xff]  }
  0x3c   : > { %892 = vmatpush3.bf16.msra.mxu0 %v1007_v13  ;;  %601 = vmatprep.mubr.bf16.mxu0 %v1026_v28  ;;  %v879_v54 = vld [vmem:[%s1185_s8] sm:$0xff] (!%p870_p13)  }
  0x3d   : > { %923 = vmatpush3.bf16.msra.mxu1 %v1008_v14  ;;  %893 = vmatprep.subr.bf16.mxu0 %v1009_v15  ;;  %v880_v55 = vunpack.c.l.bf16 (!%p870_p13), %v879_v54  ;;  %v881_v56 = vunpack.c.h.bf16 (!%p870_p13), %v879_v54 }
  0x3e   : > { %924 = vmatprep.subr.bf16.mxu1 %v1085_v6 }
  0x40   : > { %894 = vmatpush3.bf16.msra.mxu0 %v1010_v16 }
  0x41   : > { %925 = vmatpush3.bf16.msra.mxu1 %v1011_v17  ;;  %895 = vmatprep.subr.bf16.mxu0 %v1012_v18 }
  0x42   : > { %926 = vmatprep.subr.bf16.mxu1 %v1085_v6 }
  0x44   : > { %896 = vmatpush3.bf16.msra.mxu0 %v1013_v19 }
  0x45   : > { %927 = vmatpush3.bf16.msra.mxu1 %v1014_v20  ;;  %897 = vmatprep.subr.bf16.mxu0 %v1015_v21 }
  0x46   : > { %928 = vmatprep.subr.bf16.mxu1 %v1085_v6 }
  0x48   : > { %898 = vmatpush3.bf16.msra.mxu0 %v1016_v22 }
  0x49   : > { %929 = vmatpush3.bf16.msra.mxu1 %v1017_v23  ;;  %899 = vmatprep.subr.bf16.mxu0 %v1018_v24 }
  0x4a   : > { %930 = vmatprep.subr.bf16.mxu1 %v1085_v6 }
  0x4c   : > { %900 = vmatpush3.bf16.msra.mxu0 %v1019_v25 }
  0x4d   : > { %931 = vmatpush3.bf16.msra.mxu1 %v1020_v26  ;;  %901 = vmatprep.subr.bf16.mxu0 %v1021_v27 }
  0x4e   : > { %932 = vmatprep.subr.bf16.mxu1 %v1085_v6 }
  0x50   : > { %902 = vmatpush3.bf16.msra.mxu0 %v1022_v29 }
  0x51   : > { %933 = vmatpush3.bf16.msra.mxu1 %v1023_v30 }
  0x53   : > { %602 = vmatmul.mubr.bf16.vlgmr.msra.gmra.mrb[0].mxu0 %v1024_v31 }
  0x54   : > { %935 = vmatmul.mubr.bf16.vlgmr.msra.gmra.mrb[0].mxu1 %v1027_v32 }
 0x126   : > { %v903_v33 = vpop.f32.mrb[0].mxu0 }
 0x127   : > { %v644_v34 = vpop.f32.mrb[0].mxu1  ;;  %v904_v35 = vpop.f32.mrb[1].mxu0 }
 0x128   : > { %v905_v36 = vadd.f32 %v904_v35, %v903_v33  ;;  %v936_v37 = vpop.f32.mrb[1].mxu1  ;;  %v906_v38 = vpop.f32.mrb[2].mxu0 }
 0x129   : > { %v647_v40 = vpop.f32.mrb[2].mxu1  ;;  %v907_v41 = vpop.f32.mrb[3].mxu0 }
 0x12a   : > { %v645_v42 = vadd.f32 %v905_v36, %v644_v34  ;;  %v908_v43 = vadd.f32 %v907_v41, %v906_v38  ;;  %v937_v44 = vpop.f32.mrb[3].mxu1  ;;  %658 = sbr.rel (%p870_p13) target bundleno = 321 (0x141), region = 70 }
 0x12c   : > { %v651_v46 = vadd.f32 %v645_v42, %v355_v39  ;;  %v648_v47 = vadd.f32 %v908_v43, %v647_v40 }
 0x12e   : > { %653 = vst [vmem:[#allocation2] sm:$0xff] %v651_v46  ;;  %v652_v48 = vadd.f32 %v648_v47, %v356_v45 }
 0x130   : > { %654 = vst [vmem:[#allocation2 + $0x8] sm:$0xff] %v652_v48 }
 0x135   : > { %v659_v49 = vld [vmem:[#allocation2] sm:$0xff] }
 0x136   : > { %v668_v52 = vadd.f32 %v871_v51, %v659_v49 }
 0x137   : > { %v660_v50 = vld [vmem:[#allocation2 + $0x8] sm:$0xff] }
 0x138   : > { %v669_v53 = vadd.f32 %v871_v51, %v660_v50  ;;  %v674_v57 = vadd.f32 %v880_v55, %v668_v52 }
 0x13a   : > { %v675_v58 = vadd.f32 %v881_v56, %v669_v53  ;;  %v676_v59 = vmax.f32 %v674_v57, 0.0 }
 0x13c   : > { %v677_v60 = vmax.f32 %v675_v58, 0.0 }
 0x13e   : > { %v885_v61 = vpack.c.bf16 %v677_v60, %v676_v59 }
 0x140   : > { %886 = vst [vmem:[%s1190_s18] sm:$0xff] %v885_v61  }
 0x141 PF: > { %s14_s21 = sadd.s32 1, %s1082_s21   ;;  %s1254_s15 = smov %s1062_s16 }
 0x142   : > { %p11_p0 = scmp.ge.s32.totalorder %s14_s21, 8   ;;  %s1255_s16 = smov %s1163_s28 }
 0x143   : > { %s1256_s17 = smov %s1074_s19  ;;  %s1257_s18 = smov %s1078_s20 }
 0x144   : > { %s1258_s19 = smov %s1261_s22  ;;  %s1259_s20 = smov %s1265_s23 }
 0x145   :  { %13 = sbr.rel (!%p11_p0) target bundleno = 4 (0x4), region = 120 }

// kernel: forward.46
= control target key start
LH: loop header
LB: loop body
LE: loop exit
PB: predicated region body
PF: predicated region fallthrough
CT: control target
= control target key end

     0   :  { %s1020_s12 = smov 0   ;;  %s1022_s13 = smov 0   ;;  %s1151_s0 = inlined_call_operand.vmem [shape: bf16[32,1152], index: 0, kind: input, shape index: {}]   ;;  %s1152_s1 = inlined_call_operand.vmem [shape: bf16[1152,128], index: 1, kind: input, shape index: {}]   ;;  %s1153_s2 = inlined_call_operand.vmem [shape: f32[1,128], index: 2, kind: input, shape index: {}]   ;;  %s1154_s3 = inlined_call_operand.vmem [shape: bf16[32,128], index: 3, kind: output, shape index: {}]  }
   0x1   :  { %s1024_s14 = smov 0   ;;  %s1026_s15 = smov 0  }
   0x2   :  { %s1028_s16 = smov 0   ;;  %s1030_s17 = smov 0  }
   0x3   :  { %s1032_s18 = smov 0  }
   0x4 LB: > { %s25_s19 = sadd.s32 1, %s987_s16  ;;  %s32_s20 = sadd.s32 1, %s991_s17  ;;  %s995_s18 = sphi %s1032_s18, %s13_s18   ;;  %s991_s17 = sphi %s1030_s17, %s1160_s17   ;;  %s987_s16 = sphi %s1028_s16, %s1159_s16   ;;  %s983_s15 = sphi %s1026_s15, %s1158_s15   ;;  %s979_s14 = sphi %s1024_s14, %s1157_s14   ;;  %s975_s13 = sphi %s1022_s13, %s1156_s13   ;;  %s971_s12 = sphi %s1020_s12, %s1155_s12  }
   0x5   : > { %p26_p0 = scmp.ge.s32.totalorder %s25_s19, 3  ;;  %p48_p1 = scmp.ne.s32.totalorder %s975_s13, %s971_s12 }
   0x6   : > { %p49_p2 = scmp.eq.s32.totalorder %s995_s18, 0  ;;  %s41_s24 = sadd.s32 1, %s975_s13 }
   0x7   : > { %s1162_s19 = smov (%p26_p0, %s25_s19), 0  ;;  %s1164_s20 = smov (!%p26_p0, %s32_s20), %s991_s17 }
   0x8   : > { %p50_p3 = por %p49_p2, %p48_p1  ;;  %p34_p4 = scmp.ge.s32.totalorder %s1164_s20, 2 }
   0x9   : > { %s37_s21 = ssub.s32 %s987_s16, %s1162_s19  ;;  %p747_p6 = scmp.ge.s32.totalorder %s995_s18, 6 }
   0xa   : > { %s1166_s20 = smov (%p34_p4, %s1164_s20), 0 }
   0xb   : > { %s36_s22 = ssub.s32 %s991_s17, %s1166_s20  ;;  %162 = sbr.rel (%p747_p6) target bundleno = 29 (0x1d), region = 20 }
   0xc   : > { %s38_s23 = sor.u32 %s37_s21, %s36_s22 }
   0xd   : > { %p39_p5 = scmp.eq.s32.totalorder %s38_s23, 0 }
   0xf   : > { %s1071_s25 = scalar_select %p39_p5, %s975_s13, %s41_s24  }
  0x12   : > { %165 = sbr.rel (!%p50_p3) target bundleno = 29 (0x1d), region = 24  ;;  %s167_s26 = sand.u32 (%p50_p3), 1, %s975_s13  }
  0x13   : > { %s171_s27 = smul.u32 (%p50_p3), 3, %s987_s16 }
  0x14   : > { %s851_s28 = smul.u32 (%p50_p3), 24, %s167_s26 }
  0x15   : > { %s852_s29 = smul.u32 (%p50_p3), 18, %s991_s17 }
  0x16   : > { %s169_s8 = scalar_lea.vmem (%p50_p3), [#allocation3], %s851_s28 }
  0x17   : > { %s173_s30 = sadd.s32 (%p50_p3), %s852_s29, %s171_s27 }
  0x18   : > { %s750_s4 = sshll.u32 (%p50_p3), %s173_s30, 2 }
  0x19   : > { %s175_s7 = scalar_lea.vmem %s1151_s0, %s750_s4 }
  0x1a   : > { %v190_v0 = vld [vmem:[%s175_s7] sm:$0xff]  ;;  %v751_v2 = vld [vmem:[%s175_s7 + $0x8] sm:$0xf]  ;;  %v753_v3 = vld [vmem:[%s175_s7 + $0x2c] sm:$0xf] }
  0x1b   : > { %v192_v1 = vld [vmem:[%s175_s7 + $0x24] sm:$0xff]  ;;  %191 = vst [vmem:[%s169_s8] sm:$0xff] %v190_v0  ;;  %752 = vst [vmem:[%s169_s8 + $0x8] sm:$0xf] %v751_v2 }
  0x1c   : > { %193 = vst [vmem:[%s169_s8 + $0xc] sm:$0xff] %v192_v1  ;;  %754 = vst [vmem:[%s169_s8 + $0x14] sm:$0xf] %v753_v3 }
  0x1d PF: > { %p755_p7 = scmp.ge.s32.totalorder %s995_s18, 1  ;;  %p221_p8 = scmp.lt.s32.totalorder %s995_s18, 7 }
  0x1f   : > { %p222_p9 = pnand %p755_p7, %p221_p8 }
  0x20   : > { %s228_s9 = sand.u32 (!%p222_p9), 1, %s971_s12   ;;  %s267_s10 = smul.u32 (!%p222_p9), 48, %s979_s14 }
  0x21   : > { %225 = sbr.rel (%p222_p9) target bundleno = 319 (0x13f), region = 54  ;;  %s757_s21 = sshll.u32 (!%p222_p9), %s983_s15, 1 }
  0x22   : > { %s853_s11 = smul.u32 (!%p222_p9), 24, %s228_s9  ;;  %p268_p10 = scmp.lt.s32.totalorder (!%p222_p9), %s267_s10, 143 }
  0x23   : > { %p280_p11 = scmp.lt.s32.totalorder (!%p222_p9), %s757_s21, 3  ;;  %p759_p12 = scmp.ne.s32.totalorder (!%p222_p9), %s979_s14, 0 }
  0x24   : > { %s1095_s12 = scalar_lea.vmem (!%p222_p9), [#allocation3], %s853_s11 }
  0x28   : > { %s1168_s10 = smov (!%p268_p10, %s267_s10), 143  ;;  %s1170_s21 = smov (!%p280_p11, %s757_s21), 3 }
  0x29   : > { %s756_s22 = sshll.u32 %s1168_s10, 2  ;;  %s758_s27 = sshll.u32 %s1170_s21, 2  ;;  %v997_v4 = vmov (!%p759_p12), 0.0  }
  0x2a   : > { %s1088_s26 = scalar_lea.vmem %s1152_s1, %s756_s22  ;;  %s1093_s30 = scalar_lea.vmem %s1154_s3, %s758_s27  ;;  %293 = vst [vmem:[#allocation2] sm:$0xff] (!%p759_p12), %v997_v4  ;;  %294 = vst [vmem:[#allocation2 + $0x8] sm:$0xff] (!%p759_p12), %v997_v4 }
  0x2b   : > { %292 = sbr.rel (%p759_p12) target bundleno = 50 (0x32), region = 62 }
  0x32 PF: > { %v913_v5 = vld [vmem:[%s1088_s26 + $0x40] sm:$0xff]   ;;  %v998_v6 = vmov 0.0   ;;  %vm999_vm0 = vmmov 0   ;;  %v916_v9 = vld [vmem:[%s1088_s26 + $0x48] sm:$0xff]   ;;  %v919_v12 = vld [vmem:[%s1088_s26 + $0x50] sm:$0xff]   ;;  %p787_p13 = scmp.ne.s32.totalorder %s979_s14, 2 }
  0x33   : > { %831 = vmatprep.subr.bf16.mxu1 %v998_v6  ;;  %v914_v7 = vld [vmem:[%s1088_s26] sm:$0xff]   ;;  %800 = vmatprep.subr.bf16.mxu0 %v913_v5  ;;  %v917_v10 = vld [vmem:[%s1088_s26 + $0x8] sm:$0xff]   ;;  %v920_v13 = vld [vmem:[%s1088_s26 + $0x10] sm:$0xff]  }
  0x34   : > { %v915_v8 = vld [vmem:[%s1088_s26 + $0x80] sm:$0xff]   ;;  %847 = vmatprep.mubr.msk.bf16.mxu1 %vm999_vm0, %v998_v6  ;;  %801 = vmatpush3.bf16.msra.mxu0 %v914_v7  ;;  %v918_v11 = vld [vmem:[%s1088_s26 + $0x88] sm:$0xff]   ;;  %v921_v14 = vld [vmem:[%s1088_s26 + $0x90] sm:$0xff]  }
  0x35   : > { %832 = vmatpush3.bf16.msra.mxu1 %v915_v8  ;;  %802 = vmatprep.subr.bf16.mxu0 %v916_v9  ;;  %v922_v15 = vld [vmem:[%s1088_s26 + $0x58] sm:$0xff]   ;;  %v925_v18 = vld [vmem:[%s1088_s26 + $0x60] sm:$0xff]   ;;  %v928_v21 = vld [vmem:[%s1088_s26 + $0x68] sm:$0xff]  }
  0x36   : > { %833 = vmatprep.subr.bf16.mxu1 %v998_v6  ;;  %v923_v16 = vld [vmem:[%s1088_s26 + $0x18] sm:$0xff]   ;;  %v926_v19 = vld [vmem:[%s1088_s26 + $0x20] sm:$0xff]   ;;  %v929_v22 = vld [vmem:[%s1088_s26 + $0x28] sm:$0xff]  }
  0x37   : > { %v924_v17 = vld [vmem:[%s1088_s26 + $0x98] sm:$0xff]   ;;  %v927_v20 = vld [vmem:[%s1088_s26 + $0xa0] sm:$0xff]   ;;  %v930_v23 = vld [vmem:[%s1088_s26 + $0xa8] sm:$0xff]  }
  0x38   : > { %803 = vmatpush3.bf16.msra.mxu0 %v917_v10  ;;  %v931_v24 = vld [vmem:[%s1088_s26 + $0x70] sm:$0xff]   ;;  %v934_v27 = vld [vmem:[%s1088_s26 + $0x78] sm:$0xff]   ;;  %v295_v39 = vld [vmem:[#allocation2] sm:$0xff] }
  0x39   : > { %834 = vmatpush3.bf16.msra.mxu1 %v918_v11  ;;  %804 = vmatprep.subr.bf16.mxu0 %v919_v12  ;;  %v932_v25 = vld [vmem:[%s1088_s26 + $0x30] sm:$0xff]   ;;  %v935_v29 = vld [vmem:[%s1088_s26 + $0x38] sm:$0xff]   ;;  %v296_v45 = vld [vmem:[#allocation2 + $0x8] sm:$0xff] }
  0x3a   : > { %835 = vmatprep.subr.bf16.mxu1 %v998_v6  ;;  %v933_v26 = vld [vmem:[%s1088_s26 + $0xb0] sm:$0xff]   ;;  %v936_v30 = vld [vmem:[%s1088_s26 + $0xb8] sm:$0xff]   ;;  %v788_v51 = vld [vmem:[%s1153_s2] ss:$0 sm:$0xff] (!%p787_p13) }
  0x3b   : > { %v939_v28 = vld [vmem:[%s1095_s12 + $0x4] ss:$12 sps:$4 sm:$0xff]   ;;  %v937_v31 = vld [vmem:[%s1095_s12] ss:$12 sps:$4 sm:$0xff]   ;;  %v940_v32 = vld [vmem:[%s1095_s12 + $0x8] ss:$12 sps:$4 sm:$0xff]  }
  0x3c   : > { %805 = vmatpush3.bf16.msra.mxu0 %v920_v13  ;;  %541 = vmatprep.mubr.bf16.mxu0 %v939_v28 }
  0x3d   : > { %836 = vmatpush3.bf16.msra.mxu1 %v921_v14  ;;  %806 = vmatprep.subr.bf16.mxu0 %v922_v15 }
  0x3e   : > { %837 = vmatprep.subr.bf16.mxu1 %v998_v6 }
  0x40   : > { %807 = vmatpush3.bf16.msra.mxu0 %v923_v16 }
  0x41   : > { %838 = vmatpush3.bf16.msra.mxu1 %v924_v17  ;;  %808 = vmatprep.subr.bf16.mxu0 %v925_v18 }
  0x42   : > { %839 = vmatprep.subr.bf16.mxu1 %v998_v6 }
  0x44   : > { %809 = vmatpush3.bf16.msra.mxu0 %v926_v19 }
  0x45   : > { %840 = vmatpush3.bf16.msra.mxu1 %v927_v20  ;;  %810 = vmatprep.subr.bf16.mxu0 %v928_v21 }
  0x46   : > { %841 = vmatprep.subr.bf16.mxu1 %v998_v6 }
  0x48   : > { %811 = vmatpush3.bf16.msra.mxu0 %v929_v22 }
  0x49   : > { %842 = vmatpush3.bf16.msra.mxu1 %v930_v23  ;;  %812 = vmatprep.subr.bf16.mxu0 %v931_v24 }
  0x4a   : > { %843 = vmatprep.subr.bf16.mxu1 %v998_v6 }
  0x4c   : > { %813 = vmatpush3.bf16.msra.mxu0 %v932_v25 }
  0x4d   : > { %844 = vmatpush3.bf16.msra.mxu1 %v933_v26  ;;  %814 = vmatprep.subr.bf16.mxu0 %v934_v27 }
  0x4e   : > { %845 = vmatprep.subr.bf16.mxu1 %v998_v6 }
  0x50   : > { %815 = vmatpush3.bf16.msra.mxu0 %v935_v29 }
  0x51   : > { %846 = vmatpush3.bf16.msra.mxu1 %v936_v30 }
  0x53   : > { %542 = vmatmul.mubr.bf16.vlgmr.msra.gmra.mrb[0].mxu0 %v937_v31 }
  0x54   : > { %848 = vmatmul.mubr.bf16.vlgmr.msra.gmra.mrb[0].mxu1 %v940_v32 }
 0x126   : > { %v816_v33 = vpop.f32.mrb[0].mxu0 }
 0x127   : > { %v584_v34 = vpop.f32.mrb[0].mxu1  ;;  %v817_v35 = vpop.f32.mrb[1].mxu0 }
 0x128   : > { %v818_v36 = vadd.f32 %v817_v35, %v816_v33  ;;  %v849_v37 = vpop.f32.mrb[1].mxu1  ;;  %v819_v38 = vpop.f32.mrb[2].mxu0 }
 0x129   : > { %v587_v40 = vpop.f32.mrb[2].mxu1  ;;  %v820_v41 = vpop.f32.mrb[3].mxu0 }
 0x12a   : > { %v585_v42 = vadd.f32 %v818_v36, %v584_v34  ;;  %v821_v43 = vadd.f32 %v820_v41, %v819_v38  ;;  %v850_v44 = vpop.f32.mrb[3].mxu1  ;;  %598 = sbr.rel (%p787_p13) target bundleno = 319 (0x13f), region = 66 }
 0x12c   : > { %v591_v46 = vadd.f32 %v585_v42, %v295_v39  ;;  %v588_v47 = vadd.f32 %v821_v43, %v587_v40 }
 0x12e   : > { %593 = vst [vmem:[#allocation2] sm:$0xff] %v591_v46  ;;  %v592_v48 = vadd.f32 %v588_v47, %v296_v45 }
 0x130   : > { %594 = vst [vmem:[#allocation2 + $0x8] sm:$0xff] %v592_v48 }
 0x135   : > { %v599_v49 = vld [vmem:[#allocation2] sm:$0xff] }
 0x136   : > { %v608_v52 = vadd.f32 %v788_v51, %v599_v49 }
 0x137   : > { %v600_v50 = vld [vmem:[#allocation2 + $0x8] sm:$0xff] }
 0x138   : > { %v609_v53 = vadd.f32 %v788_v51, %v600_v50  ;;  %v610_v54 = vmax.f32 %v608_v52, 0.0 }
 0x13a   : > { %v611_v55 = vmax.f32 %v609_v53, 0.0 }
 0x13c   : > { %v798_v56 = vpack.c.bf16 %v611_v55, %v610_v54 }
 0x13e   : > { %799 = vst [vmem:[%s1093_s30] sm:$0xff] %v798_v56  }
 0x13f PF: > { %s13_s18 = sadd.s32 1, %s995_s18   ;;  %s1155_s12 = smov %s975_s13 }
 0x140   : > { %p10_p0 = scmp.ge.s32.totalorder %s13_s18, 8   ;;  %s1156_s13 = smov %s1071_s25 }
 0x141   : > { %s1157_s14 = smov %s987_s16  ;;  %s1158_s15 = smov %s991_s17 }
 0x142   : > { %s1159_s16 = smov %s1162_s19  ;;  %s1160_s17 = smov %s1166_s20 }
 0x143   :  { %12 = sbr.rel (!%p10_p0) target bundleno = 4 (0x4), region = 113 }

// kernel: forward.52
= control target key start
LH: loop header
LB: loop body
LE: loop exit
PB: predicated region body
PF: predicated region fallthrough
CT: control target
= control target key end

     0   :  { %s1648_s0 = inlined_call_operand.vmem [shape: bf16[16,1152], index: 0, kind: input, shape index: {}]   ;;  %s1649_s1 = inlined_call_operand.vmem [shape: bf16[1152,256], index: 1, kind: input, shape index: {}]   ;;  %s1650_s2 = inlined_call_operand.vmem [shape: f32[1,256], index: 2, kind: input, shape index: {}]   ;;  %s1651_s3 = inlined_call_operand.vmem [shape: bf16[16,256], index: 3, kind: output, shape index: {}]  }
   0x1   :  { %1653 = sst [smem:[#allocation7_spill]] %s1648_s0 }
   0x2   :  { %1654 = sst [smem:[#allocation8_spill]] %s1649_s1 }
   0x3   :  { %s1339_s12 = smov 0   ;;  %s1341_s13 = smov 0  }
   0x4   :  { %s1343_s14 = smov 0   ;;  %s1345_s15 = smov 0  }
   0x5   :  { %s1347_s16 = smov 0   ;;  %s1349_s17 = smov 0  }
   0x6   :  { %s1351_s18 = smov 0   ;;  %s1353_s19 = smov 0  }
   0x7   :  { %s1355_s20 = smov 0   ;;  %s1357_s21 = smov 0  }
   0x8   :  { %s1359_s22 = smov 0  }
   0x9 LB: > { %s996_s23 = sadd.s32 4294967295, %s1314_s22   ;;  %s25_s24 = sadd.s32 1, %s1306_s20  ;;  %s1314_s22 = sphi %s1359_s22, %s13_s22   ;;  %s1310_s21 = sphi %s1357_s21, %s1671_s21   ;;  %s1306_s20 = sphi %s1355_s20, %s1670_s20   ;;  %s1302_s19 = sphi %s1353_s19, %s1669_s19   ;;  %s1298_s18 = sphi %s1351_s18, %s1668_s18   ;;  %s1294_s17 = sphi %s1349_s17, %s1667_s17   ;;  %s1290_s16 = sphi %s1347_s16, %s1666_s16   ;;  %s1286_s15 = sphi %s1345_s15, %s1665_s15   ;;  %s1282_s14 = sphi %s1343_s14, %s1664_s14   ;;  %s1278_s13 = sphi %s1341_s13, %s1663_s13   ;;  %s1274_s12 = sphi %s1339_s12, %s1662_s12  }
   0xa   : > { %p26_p0 = scmp.ge.s32.totalorder %s25_s24, 3  ;;  %s28_s25 = sadd.s32 1, %s1310_s21 }
   0xb   : > { %s41_s26 = sadd.s32 1, %s1294_s17  ;;  %p48_p1 = scmp.ne.s32.totalorder %s1294_s17, %s1290_s16 }
   0xc   : > { %s1673_s24 = smov (%p26_p0, %s25_s24), 0  ;;  %s1675_s25 = smov (!%p26_p0, %s28_s25), %s1310_s21 }
   0xd   : > { %s37_s27 = ssub.s32 %s1306_s20, %s1673_s24  ;;  %p49_p2 = scmp.eq.s32.totalorder %s1314_s22, 0 }
   0xe   : > { %p30_p3 = scmp.ge.s32.totalorder %s1675_s25, 2  ;;  %p39_p4 = scmp.eq.s32.totalorder %s37_s27, 0 }
   0xf   : > { %p1406_p5 = por %p49_p2, %p48_p1  ;;  %s69_s29 = sadd.s32 1, %s1286_s15 }
  0x10   : > { %s1677_s25 = smov (%p30_p3, %s1675_s25), 0  ;;  %p76_p6 = scmp.ne.s32.totalorder %s1286_s15, %s1282_s14 }
  0x11   : > { %1656 = sst [smem:[#allocation6_spill]] %s1677_s25  ;;  %s65_s4 = ssub.s32 %s1310_s21, %s1677_s25 }
  0x12   : > { %s1414_s30 = scalar_select %p39_p4, %s1294_s17, %s41_s26  }
  0x13   : > { %s66_s5 = sor.u32 %s65_s4, %s37_s27  ;;  %p121_p7 = scmp.eq.s32.totalorder %s65_s4, 0 }
  0x14   : > { %p67_p8 = scmp.eq.s32.totalorder %s66_s5, 0  ;;  %p1420_p9 = por %p76_p6, %p49_p2 }
  0x15   : > { %s123_s7 = sadd.s32 1, %s1278_s13  ;;  %p133_p10 = scmp.ne.s32.totalorder %s1278_s13, %s1274_s12 }
  0x16   : > { %s1428_s8 = scalar_select %p67_p8, %s1286_s15, %s69_s29  }
  0x17   : > { %s1431_s9 = scalar_select %p121_p7, %s1278_s13, %s123_s7  }
  0x18   : > { %p134_p11 = scmp.eq.s32.totalorder %s996_s23, 5  ;;  %p999_p13 = scmp.ge.s32.totalorder %s1314_s22, 6 }
  0x1a   : > { %p1433_p12 = por %p134_p11, %p133_p10  ;;  %156 = sbr.rel (%p999_p13) target bundleno = 85 (0x55), region = 16 }
  0x21   : > { %159 = sbr.rel (!%p1406_p5) target bundleno = 44 (0x2c), region = 20  ;;  %s161_s11 = sand.u32 (%p1406_p5), 1, %s1294_s17  }
  0x22   : > { %s1045_s26 = smul.u32 (%p1406_p5), 12, %s1306_s20  ;;  %s1659_s0 = sld [smem:[#allocation7_spill]] (%p1406_p5) }
  0x23   : > { %s1105_s27 = smul.u32 (%p1406_p5), 24, %s161_s11 }
  0x25   : > { %s163_s23 = scalar_lea.vmem (%p1406_p5), [#allocation3], %s1105_s27 }
  0x28   : > { %s169_s5 = scalar_lea.vmem %s1659_s0, %s1045_s26 }
  0x29   : > { %v184_v0 = vld [vmem:[%s169_s5] sm:$0xff]  ;;  %v1001_v2 = vld [vmem:[%s169_s5 + $0x8] sm:$0xf]  ;;  %v1003_v3 = vld [vmem:[%s169_s5 + $0x2c] sm:$0xf] }
  0x2a   : > { %v186_v1 = vld [vmem:[%s169_s5 + $0x24] sm:$0xff]  ;;  %185 = vst [vmem:[%s163_s23] sm:$0xff] %v184_v0  ;;  %1002 = vst [vmem:[%s163_s23 + $0x8] sm:$0xf] %v1001_v2 }
  0x2b   : > { %187 = vst [vmem:[%s163_s23 + $0xc] sm:$0xff] %v186_v1  ;;  %1004 = vst [vmem:[%s163_s23 + $0x14] sm:$0xf] %v1003_v3 }
  0x2c PF: > { %204 = sbr.rel (!%p1420_p9) target bundleno = 85 (0x55), region = 46  ;;  %s206_s28 = sand.u32 (%p1420_p9), 1, %s1286_s15  }
  0x2d   : > { %s1046_s7 = smul.u32 (%p1420_p9), 96, %s1306_s20  ;;  %s1660_s1 = sld [smem:[#allocation8_spill]] (%p1420_p9) }
  0x2e   : > { %s1106_s11 = smul.u32 (%p1420_p9), 192, %s206_s28 }
  0x2f   : > { %s211_s26 = sadd.s32 (%p1420_p9), %s1310_s21, %s1046_s7 }
  0x30   : > { %s1006_s29 = sshll.u32 (%p1420_p9), %s211_s26, 2  ;;  %s1458_s6 = scalar_lea.vmem (%p1420_p9), [#allocation4], %s1106_s11 }
  0x33   : > { %s1453_s27 = scalar_lea.vmem %s1660_s1, %s1006_s29 }
  0x34   : > { %v229_v4 = vld [vmem:[%s1453_s27] sm:$0xf]  ;;  %v231_v5 = vld [vmem:[%s1453_s27 + $0x8] sm:$0xf]  ;;  %v233_v6 = vld [vmem:[%s1453_s27 + $0x10] sm:$0xf] }
  0x35   : > { %230 = vst [vmem:[%s1458_s6] sm:$0xf] %v229_v4  ;;  %232 = vst [vmem:[%s1458_s6 + $0x4] sm:$0xf] %v231_v5  ;;  %v235_v7 = vld [vmem:[%s1453_s27 + $0x18] sm:$0xf] }
  0x36   : > { %234 = vst [vmem:[%s1458_s6 + $0x8] sm:$0xf] %v233_v6  ;;  %v237_v8 = vld [vmem:[%s1453_s27 + $0x20] sm:$0xf]  ;;  %v239_v9 = vld [vmem:[%s1453_s27 + $0x28] sm:$0xf] }
  0x37   : > { %236 = vst [vmem:[%s1458_s6 + $0xc] sm:$0xf] %v235_v7  ;;  %238 = vst [vmem:[%s1458_s6 + $0x10] sm:$0xf] %v237_v8  ;;  %v241_v10 = vld [vmem:[%s1453_s27 + $0x30] sm:$0xf] }
  0x38   : > { %240 = vst [vmem:[%s1458_s6 + $0x14] sm:$0xf] %v239_v9  ;;  %v243_v11 = vld [vmem:[%s1453_s27 + $0x38] sm:$0xf]  ;;  %v245_v12 = vld [vmem:[%s1453_s27 + $0x40] sm:$0xf] }
  0x39   : > { %242 = vst [vmem:[%s1458_s6 + $0x18] sm:$0xf] %v241_v10  ;;  %244 = vst [vmem:[%s1458_s6 + $0x1c] sm:$0xf] %v243_v11  ;;  %v247_v13 = vld [vmem:[%s1453_s27 + $0x48] sm:$0xf] }
  0x3a   : > { %246 = vst [vmem:[%s1458_s6 + $0x20] sm:$0xf] %v245_v12  ;;  %v249_v14 = vld [vmem:[%s1453_s27 + $0x50] sm:$0xf]  ;;  %v251_v15 = vld [vmem:[%s1453_s27 + $0x58] sm:$0xf] }
  0x3b   : > { %248 = vst [vmem:[%s1458_s6 + $0x24] sm:$0xf] %v247_v13  ;;  %250 = vst [vmem:[%s1458_s6 + $0x28] sm:$0xf] %v249_v14  ;;  %v253_v16 = vld [vmem:[%s1453_s27 + $0x60] sm:$0xf] }
  0x3c   : > { %252 = vst [vmem:[%s1458_s6 + $0x2c] sm:$0xf] %v251_v15  ;;  %v255_v17 = vld [vmem:[%s1453_s27 + $0x68] sm:$0xf]  ;;  %v257_v18 = vld [vmem:[%s1453_s27 + $0x70] sm:$0xf] }
  0x3d   : > { %254 = vst [vmem:[%s1458_s6 + $0x30] sm:$0xf] %v253_v16  ;;  %256 = vst [vmem:[%s1458_s6 + $0x34] sm:$0xf] %v255_v17  ;;  %v259_v19 = vld [vmem:[%s1453_s27 + $0x78] sm:$0xf] }
  0x3e   : > { %258 = vst [vmem:[%s1458_s6 + $0x38] sm:$0xf] %v257_v18  ;;  %v261_v20 = vld [vmem:[%s1453_s27 + $0x80] sm:$0xf]  ;;  %v263_v21 = vld [vmem:[%s1453_s27 + $0x88] sm:$0xf] }
  0x3f   : > { %260 = vst [vmem:[%s1458_s6 + $0x3c] sm:$0xf] %v259_v19  ;;  %262 = vst [vmem:[%s1458_s6 + $0x40] sm:$0xf] %v261_v20  ;;  %v265_v22 = vld [vmem:[%s1453_s27 + $0x90] sm:$0xf] }
  0x40   : > { %264 = vst [vmem:[%s1458_s6 + $0x44] sm:$0xf] %v263_v21  ;;  %v267_v23 = vld [vmem:[%s1453_s27 + $0x98] sm:$0xf]  ;;  %v269_v24 = vld [vmem:[%s1453_s27 + $0xa0] sm:$0xf] }
  0x41   : > { %266 = vst [vmem:[%s1458_s6 + $0x48] sm:$0xf] %v265_v22  ;;  %268 = vst [vmem:[%s1458_s6 + $0x4c] sm:$0xf] %v267_v23  ;;  %v271_v25 = vld [vmem:[%s1453_s27 + $0xa8] sm:$0xf] }
  0x42   : > { %270 = vst [vmem:[%s1458_s6 + $0x50] sm:$0xf] %v269_v24  ;;  %v273_v26 = vld [vmem:[%s1453_s27 + $0xb0] sm:$0xf]  ;;  %v275_v27 = vld [vmem:[%s1453_s27 + $0xb8] sm:$0xf] }
  0x43   : > { %272 = vst [vmem:[%s1458_s6 + $0x54] sm:$0xf] %v271_v25  ;;  %274 = vst [vmem:[%s1458_s6 + $0x58] sm:$0xf] %v273_v26  ;;  %v277_v28 = vld [vmem:[%s1453_s27 + $0xc0] sm:$0xf] }
  0x44   : > { %276 = vst [vmem:[%s1458_s6 + $0x5c] sm:$0xf] %v275_v27  ;;  %v279_v29 = vld [vmem:[%s1453_s27 + $0xc8] sm:$0xf]  ;;  %v281_v30 = vld [vmem:[%s1453_s27 + $0xd0] sm:$0xf] }
  0x45   : > { %278 = vst [vmem:[%s1458_s6 + $0x60] sm:$0xf] %v277_v28  ;;  %280 = vst [vmem:[%s1458_s6 + $0x64] sm:$0xf] %v279_v29  ;;  %v283_v31 = vld [vmem:[%s1453_s27 + $0xd8] sm:$0xf] }
  0x46   : > { %282 = vst [vmem:[%s1458_s6 + $0x68] sm:$0xf] %v281_v30  ;;  %v285_v32 = vld [vmem:[%s1453_s27 + $0xe0] sm:$0xf]  ;;  %v287_v33 = vld [vmem:[%s1453_s27 + $0xe8] sm:$0xf] }
  0x47   : > { %284 = vst [vmem:[%s1458_s6 + $0x6c] sm:$0xf] %v283_v31  ;;  %286 = vst [vmem:[%s1458_s6 + $0x70] sm:$0xf] %v285_v32  ;;  %v289_v34 = vld [vmem:[%s1453_s27 + $0xf0] sm:$0xf] }
  0x48   : > { %288 = vst [vmem:[%s1458_s6 + $0x74] sm:$0xf] %v287_v33  ;;  %v291_v35 = vld [vmem:[%s1453_s27 + $0xf8] sm:$0xf]  ;;  %v293_v36 = vld [vmem:[%s1453_s27 + $0x100] sm:$0xf] }
  0x49   : > { %290 = vst [vmem:[%s1458_s6 + $0x78] sm:$0xf] %v289_v34  ;;  %292 = vst [vmem:[%s1458_s6 + $0x7c] sm:$0xf] %v291_v35  ;;  %v295_v37 = vld [vmem:[%s1453_s27 + $0x108] sm:$0xf] }
  0x4a   : > { %294 = vst [vmem:[%s1458_s6 + $0x80] sm:$0xf] %v293_v36  ;;  %v297_v38 = vld [vmem:[%s1453_s27 + $0x110] sm:$0xf]  ;;  %v299_v39 = vld [vmem:[%s1453_s27 + $0x118] sm:$0xf] }
  0x4b   : > { %296 = vst [vmem:[%s1458_s6 + $0x84] sm:$0xf] %v295_v37  ;;  %298 = vst [vmem:[%s1458_s6 + $0x88] sm:$0xf] %v297_v38  ;;  %v301_v40 = vld [vmem:[%s1453_s27 + $0x120] sm:$0xf] }
  0x4c   : > { %300 = vst [vmem:[%s1458_s6 + $0x8c] sm:$0xf] %v299_v39  ;;  %v303_v41 = vld [vmem:[%s1453_s27 + $0x128] sm:$0xf]  ;;  %v305_v42 = vld [vmem:[%s1453_s27 + $0x130] sm:$0xf] }
  0x4d   : > { %302 = vst [vmem:[%s1458_s6 + $0x90] sm:$0xf] %v301_v40  ;;  %304 = vst [vmem:[%s1458_s6 + $0x94] sm:$0xf] %v303_v41  ;;  %v307_v43 = vld [vmem:[%s1453_s27 + $0x138] sm:$0xf] }
  0x4e   : > { %306 = vst [vmem:[%s1458_s6 + $0x98] sm:$0xf] %v305_v42  ;;  %v309_v44 = vld [vmem:[%s1453_s27 + $0x140] sm:$0xf]  ;;  %v311_v45 = vld [vmem:[%s1453_s27 + $0x148] sm:$0xf] }
  0x4f   : > { %308 = vst [vmem:[%s1458_s6 + $0x9c] sm:$0xf] %v307_v43  ;;  %310 = vst [vmem:[%s1458_s6 + $0xa0] sm:$0xf] %v309_v44  ;;  %v313_v46 = vld [vmem:[%s1453_s27 + $0x150] sm:$0xf] }
  0x50   : > { %312 = vst [vmem:[%s1458_s6 + $0xa4] sm:$0xf] %v311_v45  ;;  %v315_v47 = vld [vmem:[%s1453_s27 + $0x158] sm:$0xf]  ;;  %v317_v48 = vld [vmem:[%s1453_s27 + $0x160] sm:$0xf] }
  0x51   : > { %314 = vst [vmem:[%s1458_s6 + $0xa8] sm:$0xf] %v313_v46  ;;  %316 = vst [vmem:[%s1458_s6 + $0xac] sm:$0xf] %v315_v47  ;;  %v319_v49 = vld [vmem:[%s1453_s27 + $0x168] sm:$0xf] }
  0x52   : > { %318 = vst [vmem:[%s1458_s6 + $0xb0] sm:$0xf] %v317_v48  ;;  %v321_v50 = vld [vmem:[%s1453_s27 + $0x170] sm:$0xf]  ;;  %v323_v51 = vld [vmem:[%s1453_s27 + $0x178] sm:$0xf] }
  0x53   : > { %320 = vst [vmem:[%s1458_s6 + $0xb4] sm:$0xf] %v319_v49  ;;  %322 = vst [vmem:[%s1458_s6 + $0xb8] sm:$0xf] %v321_v50 }
  0x54   : > { %324 = vst [vmem:[%s1458_s6 + $0xbc] sm:$0xf] %v323_v51 }
  0x55 PF: > { %p1007_p0 = scmp.ge.s32.totalorder %s1314_s22, 1  ;;  %p448_p1 = scmp.lt.s32.totalorder %s1314_s22, 7 }
  0x57   : > { %p449_p2 = pnand %p1007_p0, %p448_p1 }
  0x58   : > { %s455_s0 = sand.u32 (!%p449_p2), 1, %s1290_s16   ;;  %s462_s5 = sand.u32 (!%p449_p2), 1, %s1282_s14  }
  0x59   : > { %452 = sbr.rel (%p449_p2) target bundleno = 381 (0x17d), region = 91  ;;  %s488_s28 = sand.u32 (!%p449_p2), 1, %s1274_s12  }
  0x5a   : > { %s1107_s23 = smul.u32 (!%p449_p2), 24, %s455_s0  ;;  %s1008_s11 = sshll.u32 (!%p449_p2), %s488_s28, 3 }
  0x5b   : > { %s1108_s7 = smul.u32 (!%p449_p2), 192, %s462_s5  ;;  %p494_p3 = scmp.lt.s32.totalorder (!%p449_p2), %s1302_s19, 1 }
  0x5c   : > { %s1566_s6 = scalar_lea.vmem (!%p449_p2), [#allocation3], %s1107_s23  ;;  %s1570_s25 = scalar_lea.vmem (!%p449_p2), [#allocation5], %s1008_s11 }
  0x5d   : > { %s1568_s1 = scalar_lea.vmem (!%p449_p2), [#allocation4], %s1108_s7  ;;  %p1009_p4 = scmp.ne.s32.totalorder (!%p449_p2), %s1298_s18, 0 }
  0x60   : > { %s1560_s26 = scalar_select %p494_p3, %s1302_s19, 1 }
  0x61   : > { %502 = sbr.rel (%p1009_p4) target bundleno = 104 (0x68), region = 103  ;;  %v1316_v52 = vmov (!%p1009_p4), 0.0  }
  0x62   : > { %s496_s27 = scalar_lea.vmem %s1650_s2, %s1560_s26  ;;  %503 = vst [vmem:[#allocation2] sm:$0xff] (!%p1009_p4), %v1316_v52  ;;  %504 = vst [vmem:[#allocation2 + $0x8] sm:$0xff] (!%p1009_p4), %v1316_v52 }
  0x68 PF: > { %v1200_v53 = vld [vmem:[%s1568_s1 + $0x40] sm:$0xff]   ;;  %v1317_v54 = vmov 0.0   ;;  %vm1318_vm0 = vmmov 0   ;;  %v1203_v57 = vld [vmem:[%s1568_s1 + $0x48] sm:$0xff]   ;;  %v1206_v60 = vld [vmem:[%s1568_s1 + $0x50] sm:$0xff]   ;;  %p1037_p5 = scmp.ne.s32.totalorder %s1298_s18, 2 }
  0x69   : > { %1085 = vmatprep.subr.bf16.mxu1 %v1317_v54  ;;  %v1201_v55 = vld [vmem:[%s1568_s1] sm:$0xff]   ;;  %1054 = vmatprep.subr.bf16.mxu0 %v1200_v53  ;;  %v1204_v58 = vld [vmem:[%s1568_s1 + $0x8] sm:$0xff]   ;;  %v1207_v61 = vld [vmem:[%s1568_s1 + $0x10] sm:$0xff]  }
  0x6a   : > { %v1202_v56 = vld [vmem:[%s1568_s1 + $0x80] sm:$0xff]   ;;  %1101 = vmatprep.mubr.msk.bf16.mxu1 %vm1318_vm0, %v1317_v54  ;;  %1055 = vmatpush3.bf16.msra.mxu0 %v1201_v55  ;;  %v1205_v59 = vld [vmem:[%s1568_s1 + $0x88] sm:$0xff]   ;;  %v1208_v62 = vld [vmem:[%s1568_s1 + $0x90] sm:$0xff]  }
  0x6b   : > { %1086 = vmatpush3.bf16.msra.mxu1 %v1202_v56  ;;  %1056 = vmatprep.subr.bf16.mxu0 %v1203_v57  ;;  %v1209_v63 = vld [vmem:[%s1568_s1 + $0x58] sm:$0xff]   ;;  %v1212_v2 = vld [vmem:[%s1568_s1 + $0x60] sm:$0xff]   ;;  %v1215_v5 = vld [vmem:[%s1568_s1 + $0x68] sm:$0xff]  }
  0x6c   : > { %1087 = vmatprep.subr.bf16.mxu1 %v1317_v54  ;;  %v1210_v0 = vld [vmem:[%s1568_s1 + $0x18] sm:$0xff]   ;;  %v1213_v3 = vld [vmem:[%s1568_s1 + $0x20] sm:$0xff]   ;;  %v1216_v6 = vld [vmem:[%s1568_s1 + $0x28] sm:$0xff]  }
  0x6d   : > { %v1211_v1 = vld [vmem:[%s1568_s1 + $0x98] sm:$0xff]   ;;  %v1214_v4 = vld [vmem:[%s1568_s1 + $0xa0] sm:$0xff]   ;;  %v1217_v7 = vld [vmem:[%s1568_s1 + $0xa8] sm:$0xff]  }
  0x6e   : > { %1057 = vmatpush3.bf16.msra.mxu0 %v1204_v58  ;;  %v1218_v8 = vld [vmem:[%s1568_s1 + $0x70] sm:$0xff]   ;;  %v1221_v11 = vld [vmem:[%s1568_s1 + $0x78] sm:$0xff]   ;;  %v505_v23 = vld [vmem:[#allocation2] sm:$0xff] }
  0x6f   : > { %1088 = vmatpush3.bf16.msra.mxu1 %v1205_v59  ;;  %1058 = vmatprep.subr.bf16.mxu0 %v1206_v60  ;;  %v1219_v9 = vld [vmem:[%s1568_s1 + $0x30] sm:$0xff]   ;;  %v1222_v13 = vld [vmem:[%s1568_s1 + $0x38] sm:$0xff]   ;;  %v506_v29 = vld [vmem:[#allocation2 + $0x8] sm:$0xff] }
  0x70   : > { %1089 = vmatprep.subr.bf16.mxu1 %v1317_v54  ;;  %v1220_v10 = vld [vmem:[%s1568_s1 + $0xb0] sm:$0xff]   ;;  %v1223_v14 = vld [vmem:[%s1568_s1 + $0xb8] sm:$0xff]   ;;  %v1038_v35 = vld [vmem:[%s496_s27] ss:$0 sm:$0xff] (!%p1037_p5) }
  0x71   : > { %v1226_v12 = vld [vmem:[%s1566_s6 + $0x4] ss:$12 sps:$4 sm:$0xff]   ;;  %v1224_v15 = vld [vmem:[%s1566_s6] ss:$12 sps:$4 sm:$0xff]   ;;  %v1227_v16 = vld [vmem:[%s1566_s6 + $0x8] ss:$12 sps:$4 sm:$0xff]  }
  0x72   : > { %1059 = vmatpush3.bf16.msra.mxu0 %v1207_v61  ;;  %751 = vmatprep.mubr.bf16.mxu0 %v1226_v12 }
  0x73   : > { %1090 = vmatpush3.bf16.msra.mxu1 %v1208_v62  ;;  %1060 = vmatprep.subr.bf16.mxu0 %v1209_v63 }
  0x74   : > { %1091 = vmatprep.subr.bf16.mxu1 %v1317_v54 }
  0x76   : > { %1061 = vmatpush3.bf16.msra.mxu0 %v1210_v0 }
  0x77   : > { %1092 = vmatpush3.bf16.msra.mxu1 %v1211_v1  ;;  %1062 = vmatprep.subr.bf16.mxu0 %v1212_v2 }
  0x78   : > { %1093 = vmatprep.subr.bf16.mxu1 %v1317_v54 }
  0x7a   : > { %1063 = vmatpush3.bf16.msra.mxu0 %v1213_v3 }
  0x7b   : > { %1094 = vmatpush3.bf16.msra.mxu1 %v1214_v4  ;;  %1064 = vmatprep.subr.bf16.mxu0 %v1215_v5 }
  0x7c   : > { %1095 = vmatprep.subr.bf16.mxu1 %v1317_v54 }
  0x7e   : > { %1065 = vmatpush3.bf16.msra.mxu0 %v1216_v6 }
  0x7f   : > { %1096 = vmatpush3.bf16.msra.mxu1 %v1217_v7  ;;  %1066 = vmatprep.subr.bf16.mxu0 %v1218_v8 }
  0x80   : > { %1097 = vmatprep.subr.bf16.mxu1 %v1317_v54 }
  0x82   : > { %1067 = vmatpush3.bf16.msra.mxu0 %v1219_v9 }
  0x83   : > { %1098 = vmatpush3.bf16.msra.mxu1 %v1220_v10  ;;  %1068 = vmatprep.subr.bf16.mxu0 %v1221_v11 }
  0x84   : > { %1099 = vmatprep.subr.bf16.mxu1 %v1317_v54 }
  0x86   : > { %1069 = vmatpush3.bf16.msra.mxu0 %v1222_v13 }
  0x87   : > { %1100 = vmatpush3.bf16.msra.mxu1 %v1223_v14 }
  0x89   : > { %752 = vmatmul.mubr.bf16.vlgmr.msra.gmra.mrb[0].mxu0 %v1224_v15 }
  0x8a   : > { %1102 = vmatmul.mubr.bf16.vlgmr.msra.gmra.mrb[0].mxu1 %v1227_v16 }
 0x15c   : > { %v1070_v17 = vpop.f32.mrb[0].mxu0 }
 0x15d   : > { %v794_v18 = vpop.f32.mrb[0].mxu1  ;;  %v1071_v19 = vpop.f32.mrb[1].mxu0 }
 0x15e   : > { %v1072_v20 = vadd.f32 %v1071_v19, %v1070_v17  ;;  %v1103_v21 = vpop.f32.mrb[1].mxu1  ;;  %v1073_v22 = vpop.f32.mrb[2].mxu0 }
 0x15f   : > { %v797_v24 = vpop.f32.mrb[2].mxu1  ;;  %v1074_v25 = vpop.f32.mrb[3].mxu0 }
 0x160   : > { %v795_v26 = vadd.f32 %v1072_v20, %v794_v18  ;;  %v1075_v27 = vadd.f32 %v1074_v25, %v1073_v22  ;;  %v1104_v28 = vpop.f32.mrb[3].mxu1  ;;  %808 = sbr.rel (%p1037_p5) target bundleno = 373 (0x175), region = 107 }
 0x162   : > { %v801_v30 = vadd.f32 %v795_v26, %v505_v23  ;;  %v798_v31 = vadd.f32 %v1075_v27, %v797_v24 }
 0x164   : > { %803 = vst [vmem:[#allocation2] sm:$0xff] %v801_v30  ;;  %v802_v32 = vadd.f32 %v798_v31, %v506_v29 }
 0x166   : > { %804 = vst [vmem:[#allocation2 + $0x8] sm:$0xff] %v802_v32 }
 0x16b   : > { %v809_v33 = vld [vmem:[#allocation2] sm:$0xff] }
 0x16c   : > { %v818_v36 = vadd.f32 %v1038_v35, %v809_v33 }
 0x16d   : > { %v810_v34 = vld [vmem:[#allocation2 + $0x8] sm:$0xff] }
 0x16e   : > { %v819_v37 = vadd.f32 %v1038_v35, %v810_v34  ;;  %v820_v38 = vmax.f32 %v818_v36, 0.0 }
 0x170   : > { %v821_v39 = vmax.f32 %v819_v37, 0.0 }
 0x172   : > { %v1052_v40 = vpack.c.bf16 %v821_v39, %v820_v38 }
 0x174   : > { %1053 = vst [vmem:[%s1570_s25] sm:$0xff] %v1052_v40  }
 0x175 PF: > { %838 = sbr.rel (!%p1433_p12) target bundleno = 381 (0x17d), region = 111  ;;  %s1042_s14 = sshll.u32 (%p1433_p12), %s1302_s19, 2 }
 0x176   : > { %s843_s0 = scalar_lea.vmem (%p1433_p12), %s1651_s3, %s1042_s14 }
 0x17b   : > { %v859_v41 = vld [vmem:[%s1570_s25] sm:$0xf] (%p1433_p12)  ;;  %v861_v42 = vld [vmem:[%s1570_s25 + $0x4] sm:$0xf] (%p1433_p12) }
 0x17c   : > { %860 = vst [vmem:[%s843_s0] sm:$0xf] %v859_v41  ;;  %862 = vst [vmem:[%s843_s0 + $0x8] sm:$0xf] %v861_v42 }
 0x17d PF: > { %s13_s22 = sadd.s32 1, %s1314_s22   ;;  %s1661_s25 = sld [smem:[#allocation6_spill]] }
 0x17e   : > { %p10_p6 = scmp.ge.s32.totalorder %s13_s22, 8   ;;  %s1662_s12 = smov %s1278_s13 }
 0x17f   : > { %s1663_s13 = smov %s1431_s9  ;;  %s1664_s14 = smov %s1286_s15 }
 0x180   : > { %s1665_s15 = smov %s1428_s8  ;;  %s1666_s16 = smov %s1294_s17 }
 0x181   : > { %s1667_s17 = smov %s1414_s30  ;;  %s1668_s18 = smov %s1306_s20 }
 0x182   : > { %s1669_s19 = smov %s1310_s21  ;;  %s1670_s20 = smov %s1673_s24 }
 0x183   : > { %s1671_s21 = smov %s1661_s25  ;;  %12 = sbr.rel (!%p10_p6) target bundleno = 9 (0x9), region = 200 }

// kernel: forward.53
= control target key start
LH: loop header
LB: loop body
LE: loop exit
PB: predicated region body
PF: predicated region fallthrough
CT: control target
= control target key end

     0   :  { %s820_s12 = smov 0   ;;  %s822_s13 = smov 0   ;;  %s922_s0 = inlined_call_operand.vmem [shape: bf16[16,128], index: 0, kind: input, shape index: {}]   ;;  %s923_s1 = inlined_call_operand.vmem [shape: bf16[128,256], index: 1, kind: input, shape index: {}]   ;;  %s924_s2 = inlined_call_operand.vmem [shape: f32[1,256], index: 2, kind: input, shape index: {}]   ;;  %s925_s3 = inlined_call_operand.vmem [shape: bf16[16,256], index: 3, kind: output, shape index: {}]  }
   0x1   :  { %s824_s14 = smov 0   ;;  %s826_s15 = smov 0  }
   0x2   :  { %s828_s16 = smov 0  }
   0x3 LB: > { %s28_s17 = sadd.s32 1, %s792_s15  ;;  %s645_s18 = sadd.s32 4294967295, %s796_s16   ;;  %s796_s16 = sphi %s828_s16, %s13_s16   ;;  %s792_s15 = sphi %s826_s15, %s930_s15   ;;  %s788_s14 = sphi %s824_s14, %s929_s14   ;;  %s784_s13 = sphi %s822_s13, %s928_s13   ;;  %s780_s12 = sphi %s820_s12, %s927_s12  }
   0x4   : > { %p30_p0 = scmp.ge.s32.totalorder %s28_s17, 2  ;;  %p76_p1 = scmp.ne.s32.totalorder %s784_s13, %s780_s12 }
   0x5   : > { %p77_p2 = scmp.eq.s32.totalorder %s796_s16, 0  ;;  %p134_p4 = scmp.eq.s32.totalorder %s645_s18, 1 }
   0x6   : > { %s932_s17 = smov (%p30_p0, %s28_s17), 0  ;;  %s69_s20 = sadd.s32 1, %s784_s13 }
   0x7   : > { %p78_p3 = por %p77_p2, %p76_p1  ;;  %s65_s19 = ssub.s32 %s792_s15, %s932_s17 }
   0x8   : > { %p67_p5 = scmp.eq.s32.totalorder %s65_s19, 0  ;;  %p855_p6 = por %p134_p4, %p76_p1 }
   0x9   : > { %p649_p7 = scmp.ge.s32.totalorder %s796_s16, 2 }
   0xa   : > { %s860_s22 = scalar_select %p67_p5, %s784_s13, %s69_s20  }
   0xb   : > { %168 = sbr.rel (%p649_p7) target bundleno = 32 (0x20), region = 20 }
  0x12   : > { %171 = sbr.rel (!%p78_p3) target bundleno = 32 (0x20), region = 24  ;;  %s173_s23 = sand.u32 (%p78_p3), 1, %s784_s13  }
  0x13   : > { %s651_s24 = sshll.u32 (%p78_p3), %s792_s15, 2  ;;  %s650_s25 = sshll.u32 (%p78_p3), %s173_s23, 6 }
  0x14   : > { %s868_s28 = scalar_lea.vmem (%p78_p3), %s923_s1, %s651_s24  ;;  %s175_s29 = scalar_lea.vmem (%p78_p3), [#allocation3], %s650_s25 }
  0x15   : > { %v196_v0 = vld [vmem:[%s868_s28] sm:$0xf] (%p78_p3)  ;;  %v198_v1 = vld [vmem:[%s868_s28 + $0x8] sm:$0xf] (%p78_p3)  ;;  %v200_v2 = vld [vmem:[%s868_s28 + $0x10] sm:$0xf] (%p78_p3) }
  0x16   : > { %197 = vst [vmem:[%s175_s29] sm:$0xf] (%p78_p3), %v196_v0  ;;  %199 = vst [vmem:[%s175_s29 + $0x4] sm:$0xf] (%p78_p3), %v198_v1  ;;  %v202_v3 = vld [vmem:[%s868_s28 + $0x18] sm:$0xf] (%p78_p3) }
  0x17   : > { %v204_v4 = vld [vmem:[%s868_s28 + $0x20] sm:$0xf] (%p78_p3)  ;;  %201 = vst [vmem:[%s175_s29 + $0x8] sm:$0xf] (%p78_p3), %v200_v2  ;;  %203 = vst [vmem:[%s175_s29 + $0xc] sm:$0xf] (%p78_p3), %v202_v3 }
  0x18   : > { %205 = vst [vmem:[%s175_s29 + $0x10] sm:$0xf] (%p78_p3), %v204_v4  ;;  %v206_v5 = vld [vmem:[%s868_s28 + $0x28] sm:$0xf] (%p78_p3)  ;;  %v208_v6 = vld [vmem:[%s868_s28 + $0x30] sm:$0xf] (%p78_p3) }
  0x19   : > { %v210_v7 = vld [vmem:[%s868_s28 + $0x38] sm:$0xf]  ;;  %207 = vst [vmem:[%s175_s29 + $0x14] sm:$0xf] %v206_v5  ;;  %209 = vst [vmem:[%s175_s29 + $0x18] sm:$0xf] %v208_v6 }
  0x1a   : > { %211 = vst [vmem:[%s175_s29 + $0x1c] sm:$0xf] %v210_v7  ;;  %v212_v8 = vld [vmem:[%s868_s28 + $0x40] sm:$0xf]  ;;  %v214_v9 = vld [vmem:[%s868_s28 + $0x48] sm:$0xf] }
  0x1b   : > { %v216_v10 = vld [vmem:[%s868_s28 + $0x50] sm:$0xf]  ;;  %213 = vst [vmem:[%s175_s29 + $0x20] sm:$0xf] %v212_v8  ;;  %215 = vst [vmem:[%s175_s29 + $0x24] sm:$0xf] %v214_v9 }
  0x1c   : > { %217 = vst [vmem:[%s175_s29 + $0x28] sm:$0xf] %v216_v10  ;;  %v218_v11 = vld [vmem:[%s868_s28 + $0x58] sm:$0xf]  ;;  %v220_v12 = vld [vmem:[%s868_s28 + $0x60] sm:$0xf] }
  0x1d   : > { %v222_v13 = vld [vmem:[%s868_s28 + $0x68] sm:$0xf]  ;;  %219 = vst [vmem:[%s175_s29 + $0x2c] sm:$0xf] %v218_v11  ;;  %221 = vst [vmem:[%s175_s29 + $0x30] sm:$0xf] %v220_v12 }
  0x1e   : > { %223 = vst [vmem:[%s175_s29 + $0x34] sm:$0xf] %v222_v13  ;;  %v224_v14 = vld [vmem:[%s868_s28 + $0x70] sm:$0xf]  ;;  %v226_v15 = vld [vmem:[%s868_s28 + $0x78] sm:$0xf] }
  0x1f   : > { %225 = vst [vmem:[%s175_s29 + $0x38] sm:$0xf] %v224_v14  ;;  %227 = vst [vmem:[%s175_s29 + $0x3c] sm:$0xf] %v226_v15 }
  0x20 PF: > { %p652_p8 = scmp.ge.s32.totalorder %s796_s16, 1  ;;  %p287_p9 = scmp.lt.s32.totalorder %s796_s16, 3 }
  0x22   : > { %p288_p10 = pnand %p652_p8, %p287_p9 }
  0x23   : > { %s294_s30 = sand.u32 (!%p288_p10), 1, %s780_s12   ;;  %v798_v16 = vmov (!%p288_p10), 0.0   ;;  %vm799_vm0 = vmmov (!%p288_p10), 0   ;;  %v757_v25 = vld [vmem:[%s922_s0] sm:$0xff] (!%p288_p10)   ;;  %p337_p11 = scmp.lt.s32.totalorder (!%p288_p10), %s788_s14, 1 }
  0x24   : > { %291 = sbr.rel (%p288_p10) target bundleno = 297 (0x129), region = 69  ;;  %687 = vmatprep.subr.bf16.mxu0 (!%p288_p10), %v798_v16  ;;  %s653_s4 = sshll.u32 (!%p288_p10), %s294_s30, 6  ;;  %703 = vmatprep.mubr.msk.bf16.mxu0 (!%p288_p10), %vm799_vm0, %v798_v16 }
  0x25   : > { %s296_s5 = scalar_lea.vmem (!%p288_p10), [#allocation3], %s653_s4  ;;  %s654_s18 = sshll.u32 (!%p288_p10), %s294_s30, 3 }
  0x26   : > { %v749_v17 = vld [vmem:[%s296_s5] sm:$0xff] (!%p288_p10)   ;;  %v750_v18 = vld [vmem:[%s296_s5 + $0x8] sm:$0xff] (!%p288_p10)   ;;  %v751_v19 = vld [vmem:[%s296_s5 + $0x10] sm:$0xff] (!%p288_p10)   ;;  %s326_s19 = scalar_lea.vmem (!%p288_p10), [#allocation4], %s654_s18 }
  0x27   : > { %688 = vmatpush3.bf16.msra.mxu0 (!%p288_p10), %v749_v17  ;;  %v752_v20 = vld [vmem:[%s296_s5 + $0x18] sm:$0xff] (!%p288_p10)   ;;  %v753_v21 = vld [vmem:[%s296_s5 + $0x20] sm:$0xff] (!%p288_p10)   ;;  %v754_v22 = vld [vmem:[%s296_s5 + $0x28] sm:$0xff] (!%p288_p10)  }
  0x28   : > { %689 = vmatprep.subr.bf16.mxu0 (!%p288_p10), %v798_v16  ;;  %v755_v23 = vld [vmem:[%s296_s5 + $0x30] sm:$0xff] (!%p288_p10)   ;;  %v756_v24 = vld [vmem:[%s296_s5 + $0x38] sm:$0xff] (!%p288_p10)  }
  0x2b   : > { %690 = vmatpush3.bf16.msra.mxu0 %v750_v18  ;;  %s338_s8 = scalar_select %p337_p11, %s788_s14, 1 }
  0x2c   : > { %691 = vmatprep.subr.bf16.mxu0 %v798_v16  ;;  %s668_s20 = sshll.u32 (%p855_p6), %s788_s14, 2 }
  0x2d   : > { %s339_s11 = scalar_lea.vmem %s924_s2, %s338_s8  ;;  %s502_s25 = scalar_lea.vmem (%p855_p6), %s925_s3, %s668_s20 }
  0x2e   : > { %v664_v27 = vld [vmem:[%s339_s11] ss:$0 sm:$0xff] }
  0x2f   : > { %692 = vmatpush3.bf16.msra.mxu0 %v751_v19 }
  0x30   : > { %693 = vmatprep.subr.bf16.mxu0 %v798_v16 }
  0x33   : > { %694 = vmatpush3.bf16.msra.mxu0 %v752_v20 }
  0x34   : > { %695 = vmatprep.subr.bf16.mxu0 %v798_v16 }
  0x37   : > { %696 = vmatpush3.bf16.msra.mxu0 %v753_v21 }
  0x38   : > { %697 = vmatprep.subr.bf16.mxu0 %v798_v16 }
  0x3b   : > { %698 = vmatpush3.bf16.msra.mxu0 %v754_v22 }
  0x3c   : > { %699 = vmatprep.subr.bf16.mxu0 %v798_v16 }
  0x3f   : > { %700 = vmatpush3.bf16.msra.mxu0 %v755_v23 }
  0x40   : > { %701 = vmatprep.subr.bf16.mxu0 %v798_v16 }
  0x43   : > { %702 = vmatpush3.bf16.msra.mxu0 %v756_v24 }
  0x46   : > { %704 = vmatmul.mubr.bf16.vlgmr.msra.gmra.mrb[0].mxu0 %v757_v25 }
 0x119   : > { %v456_v26 = vpop.f32.mrb[0].mxu0 }
 0x11a   : > { %v705_v28 = vpop.f32.mrb[1].mxu0  ;;  %v479_v30 = vadd.f32 %v664_v27, %v456_v26  ;;  %497 = sbr.rel (!%p855_p6) target bundleno = 297 (0x129), region = 85 }
 0x11b   : > { %v459_v29 = vpop.f32.mrb[2].mxu0 }
 0x11c   : > { %v480_v31 = vadd.f32 %v664_v27, %v459_v29  ;;  %v706_v32 = vpop.f32.mrb[3].mxu0 }
 0x11e   : > { %v676_v33 = vpack.c.bf16 %v480_v31, %v479_v30 }
 0x120   : > { %677 = vst [vmem:[%s326_s19] sm:$0xff] %v676_v33  }
 0x127   : > { %v518_v34 = vld [vmem:[%s326_s19] sm:$0xf]  ;;  %v520_v35 = vld [vmem:[%s326_s19 + $0x4] sm:$0xf] }
 0x128   : > { %519 = vst [vmem:[%s502_s25] sm:$0xf] %v518_v34  ;;  %521 = vst [vmem:[%s502_s25 + $0x8] sm:$0xf] %v520_v35 }
 0x129 PF: > { %s13_s16 = sadd.s32 1, %s796_s16   ;;  %s927_s12 = smov %s784_s13 }
 0x12a   : > { %p10_p12 = scmp.ge.s32.totalorder %s13_s16, 4   ;;  %s928_s13 = smov %s860_s22 }
 0x12b   : > { %s929_s14 = smov %s792_s15  ;;  %s930_s15 = smov %s932_s17 }
 0x12c   :  { %12 = sbr.rel (!%p10_p12) target bundleno = 3 (0x3), region = 163 }

// kernel: forward.54
= control target key start
LH: loop header
LB: loop body
LE: loop exit
PB: predicated region body
PF: predicated region fallthrough
CT: control target
= control target key end

     0   :  { %s2425_s0 = inlined_call_operand.vmem [shape: bf16[16,2304], index: 0, kind: input, shape index: {}]   ;;  %s2426_s1 = inlined_call_operand.vmem [shape: bf16[2304,256], index: 1, kind: input, shape index: {}]   ;;  %s2427_s2 = inlined_call_operand.vmem [shape: f32[1,256], index: 2, kind: input, shape index: {}]   ;;  %s2428_s3 = inlined_call_operand.vmem [shape: bf16[16,256], index: 3, kind: input, shape index: {}]   ;;  %s2429_s4 = inlined_call_operand.vmem [shape: bf16[16,256], index: 4, kind: output, shape index: {}]  }
   0x1   :  { %2432 = sst [smem:[#allocation9_spill]] %s2425_s0 }
   0x2   :  { %s1970_s15 = smov 0   ;;  %s1972_s16 = smov 0  }
   0x3   :  { %s1974_s17 = smov 0   ;;  %s1976_s18 = smov 0  }
   0x4   :  { %s1978_s19 = smov 0   ;;  %s1980_s20 = smov 0  }
   0x5   :  { %s1982_s21 = smov 0   ;;  %s1984_s22 = smov 0  }
   0x6   :  { %s1986_s23 = smov 0   ;;  %s1988_s24 = smov 0  }
   0x7   :  { %s1990_s25 = smov 0  }
   0x8 LB: > { %s1552_s26 = sadd.s32 4294967295, %s1942_s25   ;;  %s26_s27 = sadd.s32 1, %s1934_s23  ;;  %s1942_s25 = sphi %s1990_s25, %s14_s25   ;;  %s1938_s24 = sphi %s1988_s24, %s2451_s24   ;;  %s1934_s23 = sphi %s1986_s23, %s2450_s23   ;;  %s1930_s22 = sphi %s1984_s22, %s2449_s22   ;;  %s1926_s21 = sphi %s1982_s21, %s2448_s21   ;;  %s1922_s20 = sphi %s1980_s20, %s2447_s20   ;;  %s1918_s19 = sphi %s1978_s19, %s2446_s19   ;;  %s1914_s18 = sphi %s1976_s18, %s2445_s18   ;;  %s1910_s17 = sphi %s1974_s17, %s2444_s17   ;;  %s1906_s16 = sphi %s1972_s16, %s2443_s16   ;;  %s1902_s15 = sphi %s1970_s15, %s2442_s15  }
   0x9   : > { %p27_p0 = scmp.ge.s32.totalorder %s26_s27, 3  ;;  %s29_s28 = sadd.s32 1, %s1938_s24 }
   0xa   : > { %s42_s29 = sadd.s32 1, %s1922_s20  ;;  %p49_p1 = scmp.ne.s32.totalorder %s1922_s20, %s1918_s19 }
   0xb   : > { %s2453_s27 = smov (%p27_p0, %s26_s27), 0  ;;  %s2455_s28 = smov (!%p27_p0, %s29_s28), %s1938_s24 }
   0xc   : > { %2433 = sst [smem:[#allocation7_spill]] %s2453_s27  ;;  %s38_s30 = ssub.s32 %s1934_s23, %s2453_s27 }
   0xd   : > { %p50_p2 = scmp.eq.s32.totalorder %s1942_s25, 0  ;;  %p31_p3 = scmp.ge.s32.totalorder %s2455_s28, 2 }
   0xe   : > { %p40_p4 = scmp.eq.s32.totalorder %s38_s30, 0  ;;  %s70_s6 = sadd.s32 1, %s1914_s18 }
   0xf   : > { %p2039_p5 = por %p50_p2, %p49_p1  ;;  %s2457_s28 = smov (%p31_p3, %s2455_s28), 0 }
  0x10   : > { %2435 = sst [smem:[#allocation8_spill]] %s2457_s28  ;;  %s66_s8 = ssub.s32 %s1938_s24, %s2457_s28 }
  0x11   : > { %s2047_s7 = scalar_select %p40_p4, %s1922_s20, %s42_s29  }
  0x12   : > { %p77_p6 = scmp.ne.s32.totalorder %s1914_s18, %s1910_s17  ;;  %s67_s9 = sor.u32 %s66_s8, %s38_s30 }
  0x13   : > { %p122_p7 = scmp.eq.s32.totalorder %s66_s8, 0  ;;  %p68_p8 = scmp.eq.s32.totalorder %s67_s9, 0 }
  0x14   : > { %p2055_p9 = por %p77_p6, %p50_p2  ;;  %s124_s11 = sadd.s32 1, %s1906_s16 }
  0x15   : > { %p131_p10 = scmp.ne.s32.totalorder %s1906_s16, %s1902_s15  ;;  %p163_p12 = scmp.eq.s32.totalorder %s1552_s26, 5 }
  0x16   : > { %s2063_s12 = scalar_select %p68_p8, %s1914_s18, %s70_s6  }
  0x17   : > { %s2066_s13 = scalar_select %p122_p7, %s1906_s16, %s124_s11  }
  0x18   : > { %p2070_p11 = por %p131_p10, %p50_p2  ;;  %p2074_p13 = por %p163_p12, %p131_p10 }
  0x19   : > { %p1555_p0 = scmp.ge.s32.totalorder %s1942_s25, 6 }
  0x1b   : > { %185 = sbr.rel (%p1555_p0) target bundleno = 124 (0x7c), region = 16 }
  0x22   : > { %188 = sbr.rel (!%p2039_p5) target bundleno = 46 (0x2e), region = 20  ;;  %s190_s30 = sand.u32 (%p2039_p5), 1, %s1922_s20  }
  0x23   : > { %s1627_s6 = smul.u32 (%p2039_p5), 24, %s1934_s23  ;;  %s2439_s0 = sld [smem:[#allocation9_spill]] (%p2039_p5) }
  0x24   : > { %s1706_s8 = smul.u32 (%p2039_p5), 48, %s190_s30 }
  0x26   : > { %s192_s26 = scalar_lea.vmem (%p2039_p5), [#allocation3], %s1706_s8 }
  0x29   : > { %s198_s28 = scalar_lea.vmem %s2439_s0, %s1627_s6 }
  0x2a   : > { %v211_v0 = vld [vmem:[%s198_s28] sm:$0xff]  ;;  %v213_v1 = vld [vmem:[%s198_s28 + $0x8] sm:$0xff]  ;;  %v215_v2 = vld [vmem:[%s198_s28 + $0x10] sm:$0xff] }
  0x2b   : > { %212 = vst [vmem:[%s192_s26] sm:$0xff] %v211_v0  ;;  %214 = vst [vmem:[%s192_s26 + $0x8] sm:$0xff] %v213_v1  ;;  %v217_v3 = vld [vmem:[%s198_s28 + $0x48] sm:$0xff]  ;;  %v219_v4 = vld [vmem:[%s198_s28 + $0x50] sm:$0xff] }
  0x2c   : > { %216 = vst [vmem:[%s192_s26 + $0x10] sm:$0xff] %v215_v2  ;;  %v221_v5 = vld [vmem:[%s198_s28 + $0x58] sm:$0xff]  ;;  %218 = vst [vmem:[%s192_s26 + $0x18] sm:$0xff] %v217_v3 }
  0x2d   : > { %220 = vst [vmem:[%s192_s26 + $0x20] sm:$0xff] %v219_v4  ;;  %222 = vst [vmem:[%s192_s26 + $0x28] sm:$0xff] %v221_v5 }
  0x2e PF: > { %228 = sbr.rel (!%p2055_p9) target bundleno = 117 (0x75), region = 43  ;;  %s230_s5 = sand.u32 (%p2055_p9), 1, %s1914_s18  }
  0x2f   : > { %s1628_s30 = smul.u32 (%p2055_p9), 192, %s1934_s23 }
  0x30   : > { %s1707_s6 = smul.u32 (%p2055_p9), 384, %s230_s5 }
  0x31   : > { %s235_s8 = sadd.s32 (%p2055_p9), %s1938_s24, %s1628_s30 }
  0x32   : > { %s1558_s9 = sshll.u32 (%p2055_p9), %s235_s8, 2  ;;  %s2099_s28 = scalar_lea.vmem (%p2055_p9), [#allocation4], %s1707_s6 }
  0x33   : > { %s2094_s27 = scalar_lea.vmem (%p2055_p9), %s2426_s1, %s1558_s9 }
  0x34   : > { %v253_v6 = vld [vmem:[%s2094_s27] sm:$0xf] (%p2055_p9)  ;;  %v255_v7 = vld [vmem:[%s2094_s27 + $0x8] sm:$0xf] (%p2055_p9)  ;;  %v257_v8 = vld [vmem:[%s2094_s27 + $0x10] sm:$0xf] (%p2055_p9) }
  0x35   : > { %254 = vst [vmem:[%s2099_s28] sm:$0xf] %v253_v6  ;;  %256 = vst [vmem:[%s2099_s28 + $0x4] sm:$0xf] %v255_v7  ;;  %v259_v9 = vld [vmem:[%s2094_s27 + $0x18] sm:$0xf] }
  0x36   : > { %258 = vst [vmem:[%s2099_s28 + $0x8] sm:$0xf] %v257_v8  ;;  %v261_v10 = vld [vmem:[%s2094_s27 + $0x20] sm:$0xf]  ;;  %v263_v11 = vld [vmem:[%s2094_s27 + $0x28] sm:$0xf] }
  0x37   : > { %260 = vst [vmem:[%s2099_s28 + $0xc] sm:$0xf] %v259_v9  ;;  %262 = vst [vmem:[%s2099_s28 + $0x10] sm:$0xf] %v261_v10  ;;  %v265_v12 = vld [vmem:[%s2094_s27 + $0x30] sm:$0xf] }
  0x38   : > { %264 = vst [vmem:[%s2099_s28 + $0x14] sm:$0xf] %v263_v11  ;;  %v267_v13 = vld [vmem:[%s2094_s27 + $0x38] sm:$0xf]  ;;  %v269_v14 = vld [vmem:[%s2094_s27 + $0x40] sm:$0xf] }
  0x39   : > { %266 = vst [vmem:[%s2099_s28 + $0x18] sm:$0xf] %v265_v12  ;;  %268 = vst [vmem:[%s2099_s28 + $0x1c] sm:$0xf] %v267_v13  ;;  %v271_v15 = vld [vmem:[%s2094_s27 + $0x48] sm:$0xf] }
  0x3a   : > { %270 = vst [vmem:[%s2099_s28 + $0x20] sm:$0xf] %v269_v14  ;;  %v273_v16 = vld [vmem:[%s2094_s27 + $0x50] sm:$0xf]  ;;  %v275_v17 = vld [vmem:[%s2094_s27 + $0x58] sm:$0xf] }
  0x3b   : > { %272 = vst [vmem:[%s2099_s28 + $0x24] sm:$0xf] %v271_v15  ;;  %274 = vst [vmem:[%s2099_s28 + $0x28] sm:$0xf] %v273_v16  ;;  %v277_v18 = vld [vmem:[%s2094_s27 + $0x60] sm:$0xf] }
  0x3c   : > { %276 = vst [vmem:[%s2099_s28 + $0x2c] sm:$0xf] %v275_v17  ;;  %v279_v19 = vld [vmem:[%s2094_s27 + $0x68] sm:$0xf]  ;;  %v281_v20 = vld [vmem:[%s2094_s27 + $0x70] sm:$0xf] }
  0x3d   : > { %278 = vst [vmem:[%s2099_s28 + $0x30] sm:$0xf] %v277_v18  ;;  %280 = vst [vmem:[%s2099_s28 + $0x34] sm:$0xf] %v279_v19  ;;  %v283_v21 = vld [vmem:[%s2094_s27 + $0x78] sm:$0xf] }
  0x3e   : > { %282 = vst [vmem:[%s2099_s28 + $0x38] sm:$0xf] %v281_v20  ;;  %v285_v22 = vld [vmem:[%s2094_s27 + $0x80] sm:$0xf]  ;;  %v287_v23 = vld [vmem:[%s2094_s27 + $0x88] sm:$0xf] }
  0x3f   : > { %284 = vst [vmem:[%s2099_s28 + $0x3c] sm:$0xf] %v283_v21  ;;  %286 = vst [vmem:[%s2099_s28 + $0x40] sm:$0xf] %v285_v22  ;;  %v289_v24 = vld [vmem:[%s2094_s27 + $0x90] sm:$0xf] }
  0x40   : > { %288 = vst [vmem:[%s2099_s28 + $0x44] sm:$0xf] %v287_v23  ;;  %v291_v25 = vld [vmem:[%s2094_s27 + $0x98] sm:$0xf]  ;;  %v293_v26 = vld [vmem:[%s2094_s27 + $0xa0] sm:$0xf] }
  0x41   : > { %290 = vst [vmem:[%s2099_s28 + $0x48] sm:$0xf] %v289_v24  ;;  %292 = vst [vmem:[%s2099_s28 + $0x4c] sm:$0xf] %v291_v25  ;;  %v295_v27 = vld [vmem:[%s2094_s27 + $0xa8] sm:$0xf] }
  0x42   : > { %294 = vst [vmem:[%s2099_s28 + $0x50] sm:$0xf] %v293_v26  ;;  %v297_v28 = vld [vmem:[%s2094_s27 + $0xb0] sm:$0xf]  ;;  %v299_v29 = vld [vmem:[%s2094_s27 + $0xb8] sm:$0xf] }
  0x43   : > { %296 = vst [vmem:[%s2099_s28 + $0x54] sm:$0xf] %v295_v27  ;;  %298 = vst [vmem:[%s2099_s28 + $0x58] sm:$0xf] %v297_v28  ;;  %v301_v30 = vld [vmem:[%s2094_s27 + $0xc0] sm:$0xf] }
  0x44   : > { %300 = vst [vmem:[%s2099_s28 + $0x5c] sm:$0xf] %v299_v29  ;;  %v303_v31 = vld [vmem:[%s2094_s27 + $0xc8] sm:$0xf]  ;;  %v305_v32 = vld [vmem:[%s2094_s27 + $0xd0] sm:$0xf] }
  0x45   : > { %302 = vst [vmem:[%s2099_s28 + $0x60] sm:$0xf] %v301_v30  ;;  %304 = vst [vmem:[%s2099_s28 + $0x64] sm:$0xf] %v303_v31  ;;  %v307_v33 = vld [vmem:[%s2094_s27 + $0xd8] sm:$0xf] }
  0x46   : > { %306 = vst [vmem:[%s2099_s28 + $0x68] sm:$0xf] %v305_v32  ;;  %v309_v34 = vld [vmem:[%s2094_s27 + $0xe0] sm:$0xf]  ;;  %v311_v35 = vld [vmem:[%s2094_s27 + $0xe8] sm:$0xf] }
  0x47   : > { %308 = vst [vmem:[%s2099_s28 + $0x6c] sm:$0xf] %v307_v33  ;;  %310 = vst [vmem:[%s2099_s28 + $0x70] sm:$0xf] %v309_v34  ;;  %v313_v36 = vld [vmem:[%s2094_s27 + $0xf0] sm:$0xf] }
  0x48   : > { %312 = vst [vmem:[%s2099_s28 + $0x74] sm:$0xf] %v311_v35  ;;  %v315_v37 = vld [vmem:[%s2094_s27 + $0xf8] sm:$0xf]  ;;  %v317_v38 = vld [vmem:[%s2094_s27 + $0x100] sm:$0xf] }
  0x49   : > { %314 = vst [vmem:[%s2099_s28 + $0x78] sm:$0xf] %v313_v36  ;;  %316 = vst [vmem:[%s2099_s28 + $0x7c] sm:$0xf] %v315_v37  ;;  %v319_v39 = vld [vmem:[%s2094_s27 + $0x108] sm:$0xf] }
  0x4a   : > { %318 = vst [vmem:[%s2099_s28 + $0x80] sm:$0xf] %v317_v38  ;;  %v321_v40 = vld [vmem:[%s2094_s27 + $0x110] sm:$0xf]  ;;  %v323_v41 = vld [vmem:[%s2094_s27 + $0x118] sm:$0xf] }
  0x4b   : > { %320 = vst [vmem:[%s2099_s28 + $0x84] sm:$0xf] %v319_v39  ;;  %322 = vst [vmem:[%s2099_s28 + $0x88] sm:$0xf] %v321_v40  ;;  %v325_v42 = vld [vmem:[%s2094_s27 + $0x120] sm:$0xf] }
  0x4c   : > { %324 = vst [vmem:[%s2099_s28 + $0x8c] sm:$0xf] %v323_v41  ;;  %v327_v43 = vld [vmem:[%s2094_s27 + $0x128] sm:$0xf]  ;;  %v329_v44 = vld [vmem:[%s2094_s27 + $0x130] sm:$0xf] }
  0x4d   : > { %326 = vst [vmem:[%s2099_s28 + $0x90] sm:$0xf] %v325_v42  ;;  %328 = vst [vmem:[%s2099_s28 + $0x94] sm:$0xf] %v327_v43  ;;  %v331_v45 = vld [vmem:[%s2094_s27 + $0x138] sm:$0xf] }
  0x4e   : > { %330 = vst [vmem:[%s2099_s28 + $0x98] sm:$0xf] %v329_v44  ;;  %v333_v46 = vld [vmem:[%s2094_s27 + $0x140] sm:$0xf]  ;;  %v335_v47 = vld [vmem:[%s2094_s27 + $0x148] sm:$0xf] }
  0x4f   : > { %332 = vst [vmem:[%s2099_s28 + $0x9c] sm:$0xf] %v331_v45  ;;  %334 = vst [vmem:[%s2099_s28 + $0xa0] sm:$0xf] %v333_v46  ;;  %v337_v48 = vld [vmem:[%s2094_s27 + $0x150] sm:$0xf] }
  0x50   : > { %336 = vst [vmem:[%s2099_s28 + $0xa4] sm:$0xf] %v335_v47  ;;  %v339_v49 = vld [vmem:[%s2094_s27 + $0x158] sm:$0xf]  ;;  %v341_v50 = vld [vmem:[%s2094_s27 + $0x160] sm:$0xf] }
  0x51   : > { %338 = vst [vmem:[%s2099_s28 + $0xa8] sm:$0xf] %v337_v48  ;;  %340 = vst [vmem:[%s2099_s28 + $0xac] sm:$0xf] %v339_v49  ;;  %v343_v51 = vld [vmem:[%s2094_s27 + $0x168] sm:$0xf] }
  0x52   : > { %342 = vst [vmem:[%s2099_s28 + $0xb0] sm:$0xf] %v341_v50  ;;  %v345_v52 = vld [vmem:[%s2094_s27 + $0x170] sm:$0xf]  ;;  %v347_v53 = vld [vmem:[%s2094_s27 + $0x178] sm:$0xf] }
  0x53   : > { %344 = vst [vmem:[%s2099_s28 + $0xb4] sm:$0xf] %v343_v51  ;;  %346 = vst [vmem:[%s2099_s28 + $0xb8] sm:$0xf] %v345_v52  ;;  %v349_v54 = vld [vmem:[%s2094_s27 + $0x180] sm:$0xf] }
  0x54   : > { %348 = vst [vmem:[%s2099_s28 + $0xbc] sm:$0xf] %v347_v53  ;;  %v351_v55 = vld [vmem:[%s2094_s27 + $0x188] sm:$0xf]  ;;  %v353_v56 = vld [vmem:[%s2094_s27 + $0x190] sm:$0xf] }
  0x55   : > { %350 = vst [vmem:[%s2099_s28 + $0xc0] sm:$0xf] %v349_v54  ;;  %352 = vst [vmem:[%s2099_s28 + $0xc4] sm:$0xf] %v351_v55  ;;  %v355_v57 = vld [vmem:[%s2094_s27 + $0x198] sm:$0xf] }
  0x56   : > { %354 = vst [vmem:[%s2099_s28 + $0xc8] sm:$0xf] %v353_v56  ;;  %v357_v58 = vld [vmem:[%s2094_s27 + $0x1a0] sm:$0xf]  ;;  %v359_v59 = vld [vmem:[%s2094_s27 + $0x1a8] sm:$0xf] }
  0x57   : > { %356 = vst [vmem:[%s2099_s28 + $0xcc] sm:$0xf] %v355_v57  ;;  %358 = vst [vmem:[%s2099_s28 + $0xd0] sm:$0xf] %v357_v58  ;;  %v361_v60 = vld [vmem:[%s2094_s27 + $0x1b0] sm:$0xf] }
  0x58   : > { %360 = vst [vmem:[%s2099_s28 + $0xd4] sm:$0xf] %v359_v59  ;;  %v363_v61 = vld [vmem:[%s2094_s27 + $0x1b8] sm:$0xf]  ;;  %v365_v62 = vld [vmem:[%s2094_s27 + $0x1c0] sm:$0xf] }
  0x59   : > { %362 = vst [vmem:[%s2099_s28 + $0xd8] sm:$0xf] %v361_v60  ;;  %364 = vst [vmem:[%s2099_s28 + $0xdc] sm:$0xf] %v363_v61  ;;  %v367_v63 = vld [vmem:[%s2094_s27 + $0x1c8] sm:$0xf] }
  0x5a   : > { %366 = vst [vmem:[%s2099_s28 + $0xe0] sm:$0xf] %v365_v62  ;;  %v369_v0 = vld [vmem:[%s2094_s27 + $0x1d0] sm:$0xf]  ;;  %v371_v1 = vld [vmem:[%s2094_s27 + $0x1d8] sm:$0xf] }
  0x5b   : > { %368 = vst [vmem:[%s2099_s28 + $0xe4] sm:$0xf] %v367_v63  ;;  %370 = vst [vmem:[%s2099_s28 + $0xe8] sm:$0xf] %v369_v0  ;;  %v373_v2 = vld [vmem:[%s2094_s27 + $0x1e0] sm:$0xf] }
  0x5c   : > { %372 = vst [vmem:[%s2099_s28 + $0xec] sm:$0xf] %v371_v1  ;;  %v375_v3 = vld [vmem:[%s2094_s27 + $0x1e8] sm:$0xf]  ;;  %v377_v4 = vld [vmem:[%s2094_s27 + $0x1f0] sm:$0xf] }
  0x5d   : > { %374 = vst [vmem:[%s2099_s28 + $0xf0] sm:$0xf] %v373_v2  ;;  %376 = vst [vmem:[%s2099_s28 + $0xf4] sm:$0xf] %v375_v3  ;;  %v379_v5 = vld [vmem:[%s2094_s27 + $0x1f8] sm:$0xf] }
  0x5e   : > { %378 = vst [vmem:[%s2099_s28 + $0xf8] sm:$0xf] %v377_v4  ;;  %v381_v6 = vld [vmem:[%s2094_s27 + $0x200] sm:$0xf]  ;;  %v383_v7 = vld [vmem:[%s2094_s27 + $0x208] sm:$0xf] }
  0x5f   : > { %380 = vst [vmem:[%s2099_s28 + $0xfc] sm:$0xf] %v379_v5  ;;  %382 = vst [vmem:[%s2099_s28 + $0x100] sm:$0xf] %v381_v6  ;;  %v385_v8 = vld [vmem:[%s2094_s27 + $0x210] sm:$0xf] }
  0x60   : > { %384 = vst [vmem:[%s2099_s28 + $0x104] sm:$0xf] %v383_v7  ;;  %v387_v9 = vld [vmem:[%s2094_s27 + $0x218] sm:$0xf]  ;;  %v389_v10 = vld [vmem:[%s2094_s27 + $0x220] sm:$0xf] }
  0x61   : > { %386 = vst [vmem:[%s2099_s28 + $0x108] sm:$0xf] %v385_v8  ;;  %388 = vst [vmem:[%s2099_s28 + $0x10c] sm:$0xf] %v387_v9  ;;  %v391_v11 = vld [vmem:[%s2094_s27 + $0x228] sm:$0xf] }
  0x62   : > { %390 = vst [vmem:[%s2099_s28 + $0x110] sm:$0xf] %v389_v10  ;;  %v393_v12 = vld [vmem:[%s2094_s27 + $0x230] sm:$0xf]  ;;  %v395_v13 = vld [vmem:[%s2094_s27 + $0x238] sm:$0xf] }
  0x63   : > { %392 = vst [vmem:[%s2099_s28 + $0x114] sm:$0xf] %v391_v11  ;;  %394 = vst [vmem:[%s2099_s28 + $0x118] sm:$0xf] %v393_v12  ;;  %v397_v14 = vld [vmem:[%s2094_s27 + $0x240] sm:$0xf] }
  0x64   : > { %396 = vst [vmem:[%s2099_s28 + $0x11c] sm:$0xf] %v395_v13  ;;  %v399_v15 = vld [vmem:[%s2094_s27 + $0x248] sm:$0xf]  ;;  %v401_v16 = vld [vmem:[%s2094_s27 + $0x250] sm:$0xf] }
  0x65   : > { %398 = vst [vmem:[%s2099_s28 + $0x120] sm:$0xf] %v397_v14  ;;  %400 = vst [vmem:[%s2099_s28 + $0x124] sm:$0xf] %v399_v15  ;;  %v403_v17 = vld [vmem:[%s2094_s27 + $0x258] sm:$0xf] }
  0x66   : > { %402 = vst [vmem:[%s2099_s28 + $0x128] sm:$0xf] %v401_v16  ;;  %v405_v18 = vld [vmem:[%s2094_s27 + $0x260] sm:$0xf]  ;;  %v407_v19 = vld [vmem:[%s2094_s27 + $0x268] sm:$0xf] }
  0x67   : > { %404 = vst [vmem:[%s2099_s28 + $0x12c] sm:$0xf] %v403_v17  ;;  %406 = vst [vmem:[%s2099_s28 + $0x130] sm:$0xf] %v405_v18  ;;  %v409_v20 = vld [vmem:[%s2094_s27 + $0x270] sm:$0xf] }
  0x68   : > { %408 = vst [vmem:[%s2099_s28 + $0x134] sm:$0xf] %v407_v19  ;;  %v411_v21 = vld [vmem:[%s2094_s27 + $0x278] sm:$0xf]  ;;  %v413_v22 = vld [vmem:[%s2094_s27 + $0x280] sm:$0xf] }
  0x69   : > { %410 = vst [vmem:[%s2099_s28 + $0x138] sm:$0xf] %v409_v20  ;;  %412 = vst [vmem:[%s2099_s28 + $0x13c] sm:$0xf] %v411_v21  ;;  %v415_v23 = vld [vmem:[%s2094_s27 + $0x288] sm:$0xf] }
  0x6a   : > { %414 = vst [vmem:[%s2099_s28 + $0x140] sm:$0xf] %v413_v22  ;;  %v417_v24 = vld [vmem:[%s2094_s27 + $0x290] sm:$0xf]  ;;  %v419_v25 = vld [vmem:[%s2094_s27 + $0x298] sm:$0xf] }
  0x6b   : > { %416 = vst [vmem:[%s2099_s28 + $0x144] sm:$0xf] %v415_v23  ;;  %418 = vst [vmem:[%s2099_s28 + $0x148] sm:$0xf] %v417_v24  ;;  %v421_v26 = vld [vmem:[%s2094_s27 + $0x2a0] sm:$0xf] }
  0x6c   : > { %420 = vst [vmem:[%s2099_s28 + $0x14c] sm:$0xf] %v419_v25  ;;  %v423_v27 = vld [vmem:[%s2094_s27 + $0x2a8] sm:$0xf]  ;;  %v425_v28 = vld [vmem:[%s2094_s27 + $0x2b0] sm:$0xf] }
  0x6d   : > { %422 = vst [vmem:[%s2099_s28 + $0x150] sm:$0xf] %v421_v26  ;;  %424 = vst [vmem:[%s2099_s28 + $0x154] sm:$0xf] %v423_v27  ;;  %v427_v29 = vld [vmem:[%s2094_s27 + $0x2b8] sm:$0xf] }
  0x6e   : > { %426 = vst [vmem:[%s2099_s28 + $0x158] sm:$0xf] %v425_v28  ;;  %v429_v30 = vld [vmem:[%s2094_s27 + $0x2c0] sm:$0xf]  ;;  %v431_v31 = vld [vmem:[%s2094_s27 + $0x2c8] sm:$0xf] }
  0x6f   : > { %428 = vst [vmem:[%s2099_s28 + $0x15c] sm:$0xf] %v427_v29  ;;  %430 = vst [vmem:[%s2099_s28 + $0x160] sm:$0xf] %v429_v30  ;;  %v433_v32 = vld [vmem:[%s2094_s27 + $0x2d0] sm:$0xf] }
  0x70   : > { %432 = vst [vmem:[%s2099_s28 + $0x164] sm:$0xf] %v431_v31  ;;  %v435_v33 = vld [vmem:[%s2094_s27 + $0x2d8] sm:$0xf]  ;;  %v437_v34 = vld [vmem:[%s2094_s27 + $0x2e0] sm:$0xf] }
  0x71   : > { %434 = vst [vmem:[%s2099_s28 + $0x168] sm:$0xf] %v433_v32  ;;  %436 = vst [vmem:[%s2099_s28 + $0x16c] sm:$0xf] %v435_v33  ;;  %v439_v35 = vld [vmem:[%s2094_s27 + $0x2e8] sm:$0xf] }
  0x72   : > { %438 = vst [vmem:[%s2099_s28 + $0x170] sm:$0xf] %v437_v34  ;;  %v441_v36 = vld [vmem:[%s2094_s27 + $0x2f0] sm:$0xf]  ;;  %v443_v37 = vld [vmem:[%s2094_s27 + $0x2f8] sm:$0xf] }
  0x73   : > { %440 = vst [vmem:[%s2099_s28 + $0x174] sm:$0xf] %v439_v35  ;;  %442 = vst [vmem:[%s2099_s28 + $0x178] sm:$0xf] %v441_v36 }
  0x74   : > { %444 = vst [vmem:[%s2099_s28 + $0x17c] sm:$0xf] %v443_v37 }
  0x75 PF: > { %665 = sbr.rel (!%p2070_p11) target bundleno = 124 (0x7c), region = 88  ;;  %s667_s0 = sand.u32 (%p2070_p11), 1, %s1906_s16  }
  0x76   : > { %s1560_s10 = sshll.u32 (%p2070_p11), %s1938_s24, 2  ;;  %s1559_s26 = sshll.u32 (%p2070_p11), %s667_s0, 3 }
  0x77   : > { %s674_s6 = scalar_lea.vmem (%p2070_p11), %s2428_s3, %s1560_s10  ;;  %s669_s8 = scalar_lea.vmem (%p2070_p11), [#allocation5], %s1559_s26 }
  0x78   : > { %v690_v38 = vld [vmem:[%s674_s6] sm:$0xf] (%p2070_p11)  ;;  %v692_v39 = vld [vmem:[%s674_s6 + $0x8] sm:$0xf] (%p2070_p11) }
  0x79   : > { %691 = vst [vmem:[%s669_s8] sm:$0xf] (%p2070_p11), %v690_v38  ;;  %693 = vst [vmem:[%s669_s8 + $0x4] sm:$0xf] (%p2070_p11), %v692_v39 }
  0x7c PF: > { %p1561_p1 = scmp.ge.s32.totalorder %s1942_s25, 1  ;;  %p719_p2 = scmp.lt.s32.totalorder %s1942_s25, 7 }
  0x7e   : > { %p720_p3 = pnand %p1561_p1, %p719_p2 }
  0x7f   : > { %s726_s27 = sand.u32 (!%p720_p3), 1, %s1918_s19   ;;  %s733_s14 = sand.u32 (!%p720_p3), 1, %s1910_s17  }
  0x80   : > { %723 = sbr.rel (%p720_p3) target bundleno = 455 (0x1c7), region = 129  ;;  %s740_s11 = sand.u32 (!%p720_p3), 1, %s1902_s15  }
  0x81   : > { %s1708_s9 = smul.u32 (!%p720_p3), 48, %s726_s27  ;;  %s2302_s0 = sshll.u32 (!%p720_p3), %s740_s11, 3 }
  0x82   : > { %s1709_s28 = smul.u32 (!%p720_p3), 384, %s733_s14  ;;  %p778_p4 = scmp.lt.s32.totalorder (!%p720_p3), %s1930_s22, 1 }
  0x83   : > { %s2312_s6 = scalar_lea.vmem (!%p720_p3), [#allocation3], %s1708_s9  ;;  %s742_s17 = scalar_lea.vmem (!%p720_p3), [#allocation5], %s2302_s0 }
  0x84   : > { %s2314_s8 = scalar_lea.vmem (!%p720_p3), [#allocation4], %s1709_s28  ;;  %s2318_s19 = scalar_lea.vmem (!%p720_p3), [#allocation6], %s2302_s0 }
  0x85   : > { %p1564_p5 = scmp.ne.s32.totalorder (!%p720_p3), %s1926_s21, 0 }
  0x87   : > { %s2306_s10 = scalar_select %p778_p4, %s1930_s22, 1 }
  0x88   : > { %787 = sbr.rel (%p1564_p5) target bundleno = 143 (0x8f), region = 145  ;;  %v1944_v40 = vmov (!%p1564_p5), 0.0  }
  0x89   : > { %s780_s30 = scalar_lea.vmem %s2427_s2, %s2306_s10  ;;  %788 = vst [vmem:[#allocation2] sm:$0xff] (!%p1564_p5), %v1944_v40  ;;  %789 = vst [vmem:[#allocation2 + $0x8] sm:$0xff] (!%p1564_p5), %v1944_v40 }
  0x8f PF: > { %v1799_v41 = vld [vmem:[%s2314_s8 + $0x40] sm:$0xff]   ;;  %v1803_v45 = vld [vmem:[%s2314_s8 + $0x48] sm:$0xff]   ;;  %v1807_v49 = vld [vmem:[%s2314_s8 + $0x50] sm:$0xff]   ;;  %p1619_p6 = scmp.ne.s32.totalorder %s1926_s21, 2 }
  0x90   : > { %v1800_v42 = vld [vmem:[%s2314_s8 + $0xc0] sm:$0xff]   ;;  %1640 = vmatprep.subr.bf16.mxu0 %v1799_v41  ;;  %v1804_v46 = vld [vmem:[%s2314_s8 + $0xc8] sm:$0xff]   ;;  %v1808_v50 = vld [vmem:[%s2314_s8 + $0xd0] sm:$0xff]  }
  0x91   : > { %v1801_v43 = vld [vmem:[%s2314_s8] sm:$0xff]   ;;  %1662 = vmatprep.subr.bf16.mxu1 %v1800_v42  ;;  %v1805_v47 = vld [vmem:[%s2314_s8 + $0x8] sm:$0xff]   ;;  %v1809_v51 = vld [vmem:[%s2314_s8 + $0x10] sm:$0xff]  }
  0x92   : > { %v1802_v44 = vld [vmem:[%s2314_s8 + $0x80] sm:$0xff]   ;;  %1641 = vmatpush3.bf16.msra.mxu0 %v1801_v43  ;;  %v1806_v48 = vld [vmem:[%s2314_s8 + $0x88] sm:$0xff]   ;;  %v1810_v52 = vld [vmem:[%s2314_s8 + $0x90] sm:$0xff]  }
  0x93   : > { %1663 = vmatpush3.bf16.msra.mxu1 %v1802_v44  ;;  %1642 = vmatprep.subr.bf16.mxu0 %v1803_v45  ;;  %v1811_v53 = vld [vmem:[%s2314_s8 + $0x58] sm:$0xff]   ;;  %v1815_v57 = vld [vmem:[%s2314_s8 + $0x60] sm:$0xff]   ;;  %v1819_v61 = vld [vmem:[%s2314_s8 + $0x68] sm:$0xff]  }
  0x94   : > { %1664 = vmatprep.subr.bf16.mxu1 %v1804_v46  ;;  %v1812_v54 = vld [vmem:[%s2314_s8 + $0xd8] sm:$0xff]   ;;  %v1816_v58 = vld [vmem:[%s2314_s8 + $0xe0] sm:$0xff]   ;;  %v1820_v62 = vld [vmem:[%s2314_s8 + $0xe8] sm:$0xff]  }
  0x95   : > { %v1813_v55 = vld [vmem:[%s2314_s8 + $0x18] sm:$0xff]   ;;  %v1817_v59 = vld [vmem:[%s2314_s8 + $0x20] sm:$0xff]   ;;  %v1821_v63 = vld [vmem:[%s2314_s8 + $0x28] sm:$0xff]  }
  0x96   : > { %1643 = vmatpush3.bf16.msra.mxu0 %v1805_v47  ;;  %v1814_v56 = vld [vmem:[%s2314_s8 + $0x98] sm:$0xff]   ;;  %v1818_v60 = vld [vmem:[%s2314_s8 + $0xa0] sm:$0xff]   ;;  %v1822_v0 = vld [vmem:[%s2314_s8 + $0xa8] sm:$0xff]  }
  0x97   : > { %1665 = vmatpush3.bf16.msra.mxu1 %v1806_v48  ;;  %1644 = vmatprep.subr.bf16.mxu0 %v1807_v49  ;;  %v1823_v1 = vld [vmem:[%s2314_s8 + $0x70] sm:$0xff]   ;;  %v1827_v5 = vld [vmem:[%s2314_s8 + $0x78] sm:$0xff]   ;;  %v1837_v13 = vld [vmem:[%s2314_s8 + $0x140] sm:$0xff]  }
  0x98   : > { %1666 = vmatprep.subr.bf16.mxu1 %v1808_v50  ;;  %v1824_v2 = vld [vmem:[%s2314_s8 + $0xf0] sm:$0xff]   ;;  %v1828_v6 = vld [vmem:[%s2314_s8 + $0xf8] sm:$0xff]   ;;  %v1838_v14 = vld [vmem:[%s2314_s8 + $0x100] sm:$0xff]  }
  0x99   : > { %v1825_v3 = vld [vmem:[%s2314_s8 + $0x30] sm:$0xff]   ;;  %v1829_v7 = vld [vmem:[%s2314_s8 + $0x38] sm:$0xff]   ;;  %v1839_v15 = vld [vmem:[%s2314_s8 + $0x148] sm:$0xff]  }
  0x9a   : > { %1645 = vmatpush3.bf16.msra.mxu0 %v1809_v51  ;;  %v1826_v4 = vld [vmem:[%s2314_s8 + $0xb0] sm:$0xff]   ;;  %v1830_v8 = vld [vmem:[%s2314_s8 + $0xb8] sm:$0xff]   ;;  %v1840_v16 = vld [vmem:[%s2314_s8 + $0x108] sm:$0xff]  }
  0x9b   : > { %1667 = vmatpush3.bf16.msra.mxu1 %v1810_v52  ;;  %1646 = vmatprep.subr.bf16.mxu0 %v1811_v53  ;;  %v1831_v9 = vld [vmem:[%s2312_s6] ss:$24 sps:$4 sm:$0xff]   ;;  %v1833_v10 = vld [vmem:[%s2312_s6 + $0x4] ss:$24 sps:$4 sm:$0xff]   ;;  %v1855_v24 = vld [vmem:[%s2312_s6 + $0x14] ss:$24 sps:$4 sm:$0xff]  }
  0x9c   : > { %1668 = vmatprep.subr.bf16.mxu1 %v1812_v54  ;;  %v1834_v11 = vld [vmem:[%s2312_s6 + $0x8] ss:$24 sps:$4 sm:$0xff]   ;;  %v1836_v12 = vld [vmem:[%s2312_s6 + $0xc] ss:$24 sps:$4 sm:$0xff]   ;;  %1244 = vmatprep.mubr.bf16.mxu0 %v1833_v10 }
  0x9d   : > { %1285 = vmatprep.mubr.bf16.mxu1 %v1836_v12  ;;  %v1841_v17 = vld [vmem:[%s2314_s8 + $0x150] sm:$0xff]   ;;  %v1843_v19 = vld [vmem:[%s2314_s8 + $0x158] sm:$0xff]   ;;  %v1845_v21 = vld [vmem:[%s2314_s8 + $0x160] sm:$0xff]  }
  0x9e   : > { %1647 = vmatpush3.bf16.msra.mxu0 %v1813_v55  ;;  %v1842_v18 = vld [vmem:[%s2314_s8 + $0x110] sm:$0xff]   ;;  %v1844_v20 = vld [vmem:[%s2314_s8 + $0x118] sm:$0xff]   ;;  %v1846_v22 = vld [vmem:[%s2314_s8 + $0x120] sm:$0xff]  }
  0x9f   : > { %1669 = vmatpush3.bf16.msra.mxu1 %v1814_v56  ;;  %1648 = vmatprep.subr.bf16.mxu0 %v1815_v57  ;;  %v1847_v23 = vld [vmem:[%s2314_s8 + $0x168] sm:$0xff]   ;;  %v1849_v26 = vld [vmem:[%s2314_s8 + $0x170] sm:$0xff]   ;;  %v1851_v28 = vld [vmem:[%s2314_s8 + $0x178] sm:$0xff]  }
  0xa0   : > { %1670 = vmatprep.subr.bf16.mxu1 %v1816_v58  ;;  %v1848_v25 = vld [vmem:[%s2314_s8 + $0x128] sm:$0xff]   ;;  %v1850_v27 = vld [vmem:[%s2314_s8 + $0x130] sm:$0xff]   ;;  %v1852_v29 = vld [vmem:[%s2314_s8 + $0x138] sm:$0xff]  }
  0xa1   : > { %v1853_v30 = vld [vmem:[%s2312_s6 + $0x10] ss:$24 sps:$4 sm:$0xff]  }
  0xa2   : > { %1649 = vmatpush3.bf16.msra.mxu0 %v1817_v59  ;;  %v790_v49 = vld [vmem:[#allocation2] sm:$0xff]  ;;  %v791_v53 = vld [vmem:[#allocation2 + $0x8] sm:$0xff] }
  0xa3   : > { %1671 = vmatpush3.bf16.msra.mxu1 %v1818_v60  ;;  %1650 = vmatprep.subr.bf16.mxu0 %v1819_v61  ;;  %v1620_v59 = vld [vmem:[%s780_s30] ss:$0 sm:$0xff] (!%p1619_p6) }
  0xa4   : > { %1672 = vmatprep.subr.bf16.mxu1 %v1820_v62  ;;  %v1632_v62 = vld [vmem:[%s742_s17] sm:$0xff] (!%p1619_p6)  }
  0xa6   : > { %1651 = vmatpush3.bf16.msra.mxu0 %v1821_v63  ;;  %v1633_v63 = vunpack.c.l.bf16 (!%p1619_p6), %v1632_v62 }
  0xa7   : > { %1673 = vmatpush3.bf16.msra.mxu1 %v1822_v0  ;;  %1652 = vmatprep.subr.bf16.mxu0 %v1823_v1  ;;  %v1634_v0 = vunpack.c.h.bf16 (!%p1619_p6), %v1632_v62 }
  0xa8   : > { %1674 = vmatprep.subr.bf16.mxu1 %v1824_v2 }
  0xaa   : > { %1653 = vmatpush3.bf16.msra.mxu0 %v1825_v3 }
  0xab   : > { %1675 = vmatpush3.bf16.msra.mxu1 %v1826_v4  ;;  %1654 = vmatprep.subr.bf16.mxu0 %v1827_v5 }
  0xac   : > { %1676 = vmatprep.subr.bf16.mxu1 %v1828_v6 }
  0xae   : > { %1655 = vmatpush3.bf16.msra.mxu0 %v1829_v7 }
  0xaf   : > { %1677 = vmatpush3.bf16.msra.mxu1 %v1830_v8  ;;  %1684 = vmatprep.subr.bf16.mxu0 %v1837_v13 }
  0xb1   : > { %1245 = vmatmul.mubr.bf16.vlgmr.msra.gmra.mrb[0].mxu0 %v1831_v9 }
  0xb2   : > { %1286 = vmatmul.mubr.bf16.vlgmr.msra.gmra.mrb[0].mxu1 %v1834_v11  ;;  %1685 = vmatpush3.bf16.msra.mxu0 %v1838_v14 }
  0xb3   : > { %1686 = vmatprep.subr.bf16.mxu0 %v1839_v15  ;;  %1326 = vmatprep.mubr.bf16.mxu0 %v1855_v24 }
  0xb6   : > { %1687 = vmatpush3.bf16.msra.mxu0 %v1840_v16 }
  0xb7   : > { %1688 = vmatprep.subr.bf16.mxu0 %v1841_v17 }
  0xba   : > { %1689 = vmatpush3.bf16.msra.mxu0 %v1842_v18 }
  0xbb   : > { %1690 = vmatprep.subr.bf16.mxu0 %v1843_v19 }
  0xbe   : > { %1691 = vmatpush3.bf16.msra.mxu0 %v1844_v20 }
  0xbf   : > { %1692 = vmatprep.subr.bf16.mxu0 %v1845_v21 }
  0xc2   : > { %1693 = vmatpush3.bf16.msra.mxu0 %v1846_v22 }
  0xc3   : > { %1694 = vmatprep.subr.bf16.mxu0 %v1847_v23 }
  0xc6   : > { %1695 = vmatpush3.bf16.msra.mxu0 %v1848_v25 }
  0xc7   : > { %1696 = vmatprep.subr.bf16.mxu0 %v1849_v26 }
  0xca   : > { %1697 = vmatpush3.bf16.msra.mxu0 %v1850_v27 }
  0xcb   : > { %1698 = vmatprep.subr.bf16.mxu0 %v1851_v28 }
  0xce   : > { %1699 = vmatpush3.bf16.msra.mxu0 %v1852_v29 }
  0xd1   : > { %1327 = vmatmul.mubr.bf16.vlgmr.msra.gmra.mrb[4].mxu0 %v1853_v30 }
 0x184   : > { %v1656_v31 = vpop.f32.mrb[0].mxu0 }
 0x185   : > { %v1678_v32 = vpop.f32.mrb[0].mxu1  ;;  %v1657_v33 = vpop.f32.mrb[1].mxu0 }
 0x186   : > { %v1658_v34 = vadd.f32 %v1657_v33, %v1656_v31  ;;  %v1679_v35 = vpop.f32.mrb[1].mxu1  ;;  %v1659_v36 = vpop.f32.mrb[2].mxu0 }
 0x187   : > { %v1680_v37 = vadd.f32 %v1679_v35, %v1678_v32  ;;  %v1681_v38 = vpop.f32.mrb[2].mxu1  ;;  %v1660_v39 = vpop.f32.mrb[3].mxu0 }
 0x188   : > { %v1661_v40 = vadd.f32 %v1660_v39, %v1659_v36  ;;  %v1682_v41 = vpop.f32.mrb[3].mxu1 }
 0x189   : > { %v1288_v42 = vadd.f32 %v1680_v37, %v1658_v34  ;;  %v1683_v43 = vadd.f32 %v1682_v41, %v1681_v38 }
 0x18b   : > { %v1291_v44 = vadd.f32 %v1683_v43, %v1661_v40 }
 0x1a4   : > { %v1700_v45 = vpop.f32.mrb[4].mxu0 }
 0x1a5   : > { %v1701_v46 = vpop.f32.mrb[5].mxu0 }
 0x1a6   : > { %v1702_v47 = vadd.f32 %v1701_v46, %v1700_v45  ;;  %v1703_v48 = vpop.f32.mrb[6].mxu0 }
 0x1a7   : > { %v1704_v50 = vpop.f32.mrb[7].mxu0 }
 0x1a8   : > { %v1329_v51 = vadd.f32 %v1702_v47, %v1288_v42  ;;  %v1705_v52 = vadd.f32 %v1704_v50, %v1703_v48  ;;  %1342 = sbr.rel (%p1619_p6) target bundleno = 447 (0x1bf), region = 149 }
 0x1aa   : > { %v1335_v54 = vadd.f32 %v1329_v51, %v790_v49  ;;  %v1332_v55 = vadd.f32 %v1705_v52, %v1291_v44 }
 0x1ac   : > { %1337 = vst [vmem:[#allocation2] sm:$0xff] %v1335_v54  ;;  %v1336_v56 = vadd.f32 %v1332_v55, %v791_v53 }
 0x1ae   : > { %1338 = vst [vmem:[#allocation2 + $0x8] sm:$0xff] %v1336_v56 }
 0x1b3   : > { %v1343_v57 = vld [vmem:[#allocation2] sm:$0xff] }
 0x1b4   : > { %v1352_v60 = vadd.f32 %v1620_v59, %v1343_v57 }
 0x1b5   : > { %v1344_v58 = vld [vmem:[#allocation2 + $0x8] sm:$0xff] }
 0x1b6   : > { %v1353_v61 = vadd.f32 %v1620_v59, %v1344_v58  ;;  %v1358_v1 = vadd.f32 %v1633_v63, %v1352_v60 }
 0x1b8   : > { %v1359_v2 = vadd.f32 %v1634_v0, %v1353_v61  ;;  %v1360_v3 = vmax.f32 %v1358_v1, 0.0 }
 0x1ba   : > { %v1361_v4 = vmax.f32 %v1359_v2, 0.0 }
 0x1bc   : > { %v1638_v5 = vpack.c.bf16 %v1361_v4, %v1360_v3 }
 0x1be   : > { %1639 = vst [vmem:[%s2318_s19] sm:$0xff] %v1638_v5  }
 0x1bf PF: > { %1378 = sbr.rel (!%p2074_p13) target bundleno = 455 (0x1c7), region = 153  ;;  %s1624_s21 = sshll.u32 (%p2074_p13), %s1930_s22, 2 }
 0x1c0   : > { %s1383_s11 = scalar_lea.vmem (%p2074_p13), %s2429_s4, %s1624_s21 }
 0x1c5   : > { %v1399_v6 = vld [vmem:[%s2318_s19] sm:$0xf] (%p2074_p13)  ;;  %v1401_v7 = vld [vmem:[%s2318_s19 + $0x4] sm:$0xf] (%p2074_p13) }
 0x1c6   : > { %1400 = vst [vmem:[%s1383_s11] sm:$0xf] %v1399_v6  ;;  %1402 = vst [vmem:[%s1383_s11 + $0x8] sm:$0xf] %v1401_v7 }
 0x1c7 PF: > { %s14_s25 = sadd.s32 1, %s1942_s25   ;;  %s2440_s29 = sld [smem:[#allocation7_spill]] }
 0x1c8   : > { %p11_p7 = scmp.ge.s32.totalorder %s14_s25, 8   ;;  %s2441_s28 = sld [smem:[#allocation8_spill]] }
 0x1c9   : > { %s2442_s15 = smov %s1906_s16  ;;  %s2443_s16 = smov %s2066_s13 }
 0x1ca   : > { %s2444_s17 = smov %s1914_s18  ;;  %s2445_s18 = smov %s2063_s12 }
 0x1cb   : > { %s2446_s19 = smov %s1922_s20  ;;  %s2447_s20 = smov %s2047_s7 }
 0x1cc   : > { %s2448_s21 = smov %s1934_s23  ;;  %s2449_s22 = smov %s1938_s24 }
 0x1cd   : > { %s2450_s23 = smov %s2440_s29  ;;  %13 = sbr.rel (!%p11_p7) target bundleno = 8 (0x8), region = 244 }
 0x1ce   : > { %s2451_s24 = smov %s2441_s28 }

// kernel: forward.55
= control target key start
LH: loop header
LB: loop body
LE: loop exit
PB: predicated region body
PF: predicated region fallthrough
CT: control target
= control target key end

     0   :  { %s2266_s0 = inlined_call_operand.vmem [shape: bf16[16,2304], index: 0, kind: input, shape index: {}]   ;;  %s2267_s1 = inlined_call_operand.vmem [shape: bf16[2304,256], index: 1, kind: input, shape index: {}]   ;;  %s2268_s2 = inlined_call_operand.vmem [shape: f32[1,256], index: 2, kind: input, shape index: {}]   ;;  %s2269_s3 = inlined_call_operand.vmem [shape: bf16[16,256], index: 3, kind: output, shape index: {}]  }
   0x1   :  { %2271 = sst [smem:[#allocation7_spill]] %s2266_s0 }
   0x2   :  { %2272 = sst [smem:[#allocation8_spill]] %s2267_s1 }
   0x3   :  { %s1834_s12 = smov 0   ;;  %s1836_s13 = smov 0  }
   0x4   :  { %s1838_s14 = smov 0   ;;  %s1840_s15 = smov 0  }
   0x5   :  { %s1842_s16 = smov 0   ;;  %s1844_s17 = smov 0  }
   0x6   :  { %s1846_s18 = smov 0   ;;  %s1848_s19 = smov 0  }
   0x7   :  { %s1850_s20 = smov 0   ;;  %s1852_s21 = smov 0  }
   0x8   :  { %s1854_s22 = smov 0  }
   0x9 LB: > { %s1428_s23 = sadd.s32 4294967295, %s1811_s22   ;;  %s25_s24 = sadd.s32 1, %s1803_s20  ;;  %s1811_s22 = sphi %s1854_s22, %s13_s22   ;;  %s1807_s21 = sphi %s1852_s21, %s2289_s21   ;;  %s1803_s20 = sphi %s1850_s20, %s2288_s20   ;;  %s1799_s19 = sphi %s1848_s19, %s2287_s19   ;;  %s1795_s18 = sphi %s1846_s18, %s2286_s18   ;;  %s1791_s17 = sphi %s1844_s17, %s2285_s17   ;;  %s1787_s16 = sphi %s1842_s16, %s2284_s16   ;;  %s1783_s15 = sphi %s1840_s15, %s2283_s15   ;;  %s1779_s14 = sphi %s1838_s14, %s2282_s14   ;;  %s1775_s13 = sphi %s1836_s13, %s2281_s13   ;;  %s1771_s12 = sphi %s1834_s12, %s2280_s12  }
   0xa   : > { %p26_p0 = scmp.ge.s32.totalorder %s25_s24, 3  ;;  %s28_s25 = sadd.s32 1, %s1807_s21 }
   0xb   : > { %s41_s26 = sadd.s32 1, %s1791_s17  ;;  %p48_p1 = scmp.ne.s32.totalorder %s1791_s17, %s1787_s16 }
   0xc   : > { %s2291_s24 = smov (%p26_p0, %s25_s24), 0  ;;  %s2293_s25 = smov (!%p26_p0, %s28_s25), %s1807_s21 }
   0xd   : > { %s37_s27 = ssub.s32 %s1803_s20, %s2291_s24  ;;  %p49_p2 = scmp.eq.s32.totalorder %s1811_s22, 0 }
   0xe   : > { %p30_p3 = scmp.ge.s32.totalorder %s2293_s25, 2  ;;  %p39_p4 = scmp.eq.s32.totalorder %s37_s27, 0 }
   0xf   : > { %p1901_p5 = por %p49_p2, %p48_p1  ;;  %s69_s29 = sadd.s32 1, %s1783_s15 }
  0x10   : > { %s2295_s25 = smov (%p30_p3, %s2293_s25), 0  ;;  %p76_p6 = scmp.ne.s32.totalorder %s1783_s15, %s1779_s14 }
  0x11   : > { %2274 = sst [smem:[#allocation6_spill]] %s2295_s25  ;;  %s65_s4 = ssub.s32 %s1807_s21, %s2295_s25 }
  0x12   : > { %s1909_s30 = scalar_select %p39_p4, %s1791_s17, %s41_s26  }
  0x13   : > { %s66_s5 = sor.u32 %s65_s4, %s37_s27  ;;  %p121_p7 = scmp.eq.s32.totalorder %s65_s4, 0 }
  0x14   : > { %p67_p8 = scmp.eq.s32.totalorder %s66_s5, 0  ;;  %p1915_p9 = por %p76_p6, %p49_p2 }
  0x15   : > { %s123_s7 = sadd.s32 1, %s1775_s13  ;;  %p133_p10 = scmp.ne.s32.totalorder %s1775_s13, %s1771_s12 }
  0x16   : > { %s1923_s8 = scalar_select %p67_p8, %s1783_s15, %s69_s29  }
  0x17   : > { %s1926_s9 = scalar_select %p121_p7, %s1775_s13, %s123_s7  }
  0x18   : > { %p134_p11 = scmp.eq.s32.totalorder %s1428_s23, 5  ;;  %p1431_p13 = scmp.ge.s32.totalorder %s1811_s22, 6 }
  0x1a   : > { %p1928_p12 = por %p134_p11, %p133_p10  ;;  %156 = sbr.rel (%p1431_p13) target bundleno = 118 (0x76), region = 16 }
  0x21   : > { %159 = sbr.rel (!%p1901_p5) target bundleno = 45 (0x2d), region = 20  ;;  %s161_s11 = sand.u32 (%p1901_p5), 1, %s1791_s17  }
  0x22   : > { %s1500_s26 = smul.u32 (%p1901_p5), 24, %s1803_s20  ;;  %s2277_s0 = sld [smem:[#allocation7_spill]] (%p1901_p5) }
  0x23   : > { %s1575_s27 = smul.u32 (%p1901_p5), 48, %s161_s11 }
  0x25   : > { %s163_s23 = scalar_lea.vmem (%p1901_p5), [#allocation3], %s1575_s27 }
  0x28   : > { %s169_s5 = scalar_lea.vmem %s2277_s0, %s1500_s26 }
  0x29   : > { %v182_v0 = vld [vmem:[%s169_s5] sm:$0xff]  ;;  %v184_v1 = vld [vmem:[%s169_s5 + $0x8] sm:$0xff]  ;;  %v186_v2 = vld [vmem:[%s169_s5 + $0x10] sm:$0xff] }
  0x2a   : > { %183 = vst [vmem:[%s163_s23] sm:$0xff] %v182_v0  ;;  %185 = vst [vmem:[%s163_s23 + $0x8] sm:$0xff] %v184_v1  ;;  %v188_v3 = vld [vmem:[%s169_s5 + $0x48] sm:$0xff]  ;;  %v190_v4 = vld [vmem:[%s169_s5 + $0x50] sm:$0xff] }
  0x2b   : > { %187 = vst [vmem:[%s163_s23 + $0x10] sm:$0xff] %v186_v2  ;;  %v192_v5 = vld [vmem:[%s169_s5 + $0x58] sm:$0xff]  ;;  %189 = vst [vmem:[%s163_s23 + $0x18] sm:$0xff] %v188_v3 }
  0x2c   : > { %191 = vst [vmem:[%s163_s23 + $0x20] sm:$0xff] %v190_v4  ;;  %193 = vst [vmem:[%s163_s23 + $0x28] sm:$0xff] %v192_v5 }
  0x2d PF: > { %199 = sbr.rel (!%p1915_p9) target bundleno = 118 (0x76), region = 43  ;;  %s201_s28 = sand.u32 (%p1915_p9), 1, %s1783_s15  }
  0x2e   : > { %s1501_s7 = smul.u32 (%p1915_p9), 192, %s1803_s20  ;;  %s2278_s1 = sld [smem:[#allocation8_spill]] (%p1915_p9) }
  0x2f   : > { %s1576_s11 = smul.u32 (%p1915_p9), 384, %s201_s28 }
  0x30   : > { %s206_s26 = sadd.s32 (%p1915_p9), %s1807_s21, %s1501_s7 }
  0x31   : > { %s1434_s27 = sshll.u32 (%p1915_p9), %s206_s26, 2  ;;  %s1953_s6 = scalar_lea.vmem (%p1915_p9), [#allocation4], %s1576_s11 }
  0x34   : > { %s1948_s0 = scalar_lea.vmem %s2278_s1, %s1434_s27 }
  0x35   : > { %v224_v6 = vld [vmem:[%s1948_s0] sm:$0xf]  ;;  %v226_v7 = vld [vmem:[%s1948_s0 + $0x8] sm:$0xf]  ;;  %v228_v8 = vld [vmem:[%s1948_s0 + $0x10] sm:$0xf] }
  0x36   : > { %225 = vst [vmem:[%s1953_s6] sm:$0xf] %v224_v6  ;;  %227 = vst [vmem:[%s1953_s6 + $0x4] sm:$0xf] %v226_v7  ;;  %v230_v9 = vld [vmem:[%s1948_s0 + $0x18] sm:$0xf] }
  0x37   : > { %229 = vst [vmem:[%s1953_s6 + $0x8] sm:$0xf] %v228_v8  ;;  %v232_v10 = vld [vmem:[%s1948_s0 + $0x20] sm:$0xf]  ;;  %v234_v11 = vld [vmem:[%s1948_s0 + $0x28] sm:$0xf] }
  0x38   : > { %231 = vst [vmem:[%s1953_s6 + $0xc] sm:$0xf] %v230_v9  ;;  %233 = vst [vmem:[%s1953_s6 + $0x10] sm:$0xf] %v232_v10  ;;  %v236_v12 = vld [vmem:[%s1948_s0 + $0x30] sm:$0xf] }
  0x39   : > { %235 = vst [vmem:[%s1953_s6 + $0x14] sm:$0xf] %v234_v11  ;;  %v238_v13 = vld [vmem:[%s1948_s0 + $0x38] sm:$0xf]  ;;  %v240_v14 = vld [vmem:[%s1948_s0 + $0x40] sm:$0xf] }
  0x3a   : > { %237 = vst [vmem:[%s1953_s6 + $0x18] sm:$0xf] %v236_v12  ;;  %239 = vst [vmem:[%s1953_s6 + $0x1c] sm:$0xf] %v238_v13  ;;  %v242_v15 = vld [vmem:[%s1948_s0 + $0x48] sm:$0xf] }
  0x3b   : > { %241 = vst [vmem:[%s1953_s6 + $0x20] sm:$0xf] %v240_v14  ;;  %v244_v16 = vld [vmem:[%s1948_s0 + $0x50] sm:$0xf]  ;;  %v246_v17 = vld [vmem:[%s1948_s0 + $0x58] sm:$0xf] }
  0x3c   : > { %243 = vst [vmem:[%s1953_s6 + $0x24] sm:$0xf] %v242_v15  ;;  %245 = vst [vmem:[%s1953_s6 + $0x28] sm:$0xf] %v244_v16  ;;  %v248_v18 = vld [vmem:[%s1948_s0 + $0x60] sm:$0xf] }
  0x3d   : > { %247 = vst [vmem:[%s1953_s6 + $0x2c] sm:$0xf] %v246_v17  ;;  %v250_v19 = vld [vmem:[%s1948_s0 + $0x68] sm:$0xf]  ;;  %v252_v20 = vld [vmem:[%s1948_s0 + $0x70] sm:$0xf] }
  0x3e   : > { %249 = vst [vmem:[%s1953_s6 + $0x30] sm:$0xf] %v248_v18  ;;  %251 = vst [vmem:[%s1953_s6 + $0x34] sm:$0xf] %v250_v19  ;;  %v254_v21 = vld [vmem:[%s1948_s0 + $0x78] sm:$0xf] }
  0x3f   : > { %253 = vst [vmem:[%s1953_s6 + $0x38] sm:$0xf] %v252_v20  ;;  %v256_v22 = vld [vmem:[%s1948_s0 + $0x80] sm:$0xf]  ;;  %v258_v23 = vld [vmem:[%s1948_s0 + $0x88] sm:$0xf] }
  0x40   : > { %255 = vst [vmem:[%s1953_s6 + $0x3c] sm:$0xf] %v254_v21  ;;  %257 = vst [vmem:[%s1953_s6 + $0x40] sm:$0xf] %v256_v22  ;;  %v260_v24 = vld [vmem:[%s1948_s0 + $0x90] sm:$0xf] }
  0x41   : > { %259 = vst [vmem:[%s1953_s6 + $0x44] sm:$0xf] %v258_v23  ;;  %v262_v25 = vld [vmem:[%s1948_s0 + $0x98] sm:$0xf]  ;;  %v264_v26 = vld [vmem:[%s1948_s0 + $0xa0] sm:$0xf] }
  0x42   : > { %261 = vst [vmem:[%s1953_s6 + $0x48] sm:$0xf] %v260_v24  ;;  %263 = vst [vmem:[%s1953_s6 + $0x4c] sm:$0xf] %v262_v25  ;;  %v266_v27 = vld [vmem:[%s1948_s0 + $0xa8] sm:$0xf] }
  0x43   : > { %265 = vst [vmem:[%s1953_s6 + $0x50] sm:$0xf] %v264_v26  ;;  %v268_v28 = vld [vmem:[%s1948_s0 + $0xb0] sm:$0xf]  ;;  %v270_v29 = vld [vmem:[%s1948_s0 + $0xb8] sm:$0xf] }
  0x44   : > { %267 = vst [vmem:[%s1953_s6 + $0x54] sm:$0xf] %v266_v27  ;;  %269 = vst [vmem:[%s1953_s6 + $0x58] sm:$0xf] %v268_v28  ;;  %v272_v30 = vld [vmem:[%s1948_s0 + $0xc0] sm:$0xf] }
  0x45   : > { %271 = vst [vmem:[%s1953_s6 + $0x5c] sm:$0xf] %v270_v29  ;;  %v274_v31 = vld [vmem:[%s1948_s0 + $0xc8] sm:$0xf]  ;;  %v276_v32 = vld [vmem:[%s1948_s0 + $0xd0] sm:$0xf] }
  0x46   : > { %273 = vst [vmem:[%s1953_s6 + $0x60] sm:$0xf] %v272_v30  ;;  %275 = vst [vmem:[%s1953_s6 + $0x64] sm:$0xf] %v274_v31  ;;  %v278_v33 = vld [vmem:[%s1948_s0 + $0xd8] sm:$0xf] }
  0x47   : > { %277 = vst [vmem:[%s1953_s6 + $0x68] sm:$0xf] %v276_v32  ;;  %v280_v34 = vld [vmem:[%s1948_s0 + $0xe0] sm:$0xf]  ;;  %v282_v35 = vld [vmem:[%s1948_s0 + $0xe8] sm:$0xf] }
  0x48   : > { %279 = vst [vmem:[%s1953_s6 + $0x6c] sm:$0xf] %v278_v33  ;;  %281 = vst [vmem:[%s1953_s6 + $0x70] sm:$0xf] %v280_v34  ;;  %v284_v36 = vld [vmem:[%s1948_s0 + $0xf0] sm:$0xf] }
  0x49   : > { %283 = vst [vmem:[%s1953_s6 + $0x74] sm:$0xf] %v282_v35  ;;  %v286_v37 = vld [vmem:[%s1948_s0 + $0xf8] sm:$0xf]  ;;  %v288_v38 = vld [vmem:[%s1948_s0 + $0x100] sm:$0xf] }
  0x4a   : > { %285 = vst [vmem:[%s1953_s6 + $0x78] sm:$0xf] %v284_v36  ;;  %287 = vst [vmem:[%s1953_s6 + $0x7c] sm:$0xf] %v286_v37  ;;  %v290_v39 = vld [vmem:[%s1948_s0 + $0x108] sm:$0xf] }
  0x4b   : > { %289 = vst [vmem:[%s1953_s6 + $0x80] sm:$0xf] %v288_v38  ;;  %v292_v40 = vld [vmem:[%s1948_s0 + $0x110] sm:$0xf]  ;;  %v294_v41 = vld [vmem:[%s1948_s0 + $0x118] sm:$0xf] }
  0x4c   : > { %291 = vst [vmem:[%s1953_s6 + $0x84] sm:$0xf] %v290_v39  ;;  %293 = vst [vmem:[%s1953_s6 + $0x88] sm:$0xf] %v292_v40  ;;  %v296_v42 = vld [vmem:[%s1948_s0 + $0x120] sm:$0xf] }
  0x4d   : > { %295 = vst [vmem:[%s1953_s6 + $0x8c] sm:$0xf] %v294_v41  ;;  %v298_v43 = vld [vmem:[%s1948_s0 + $0x128] sm:$0xf]  ;;  %v300_v44 = vld [vmem:[%s1948_s0 + $0x130] sm:$0xf] }
  0x4e   : > { %297 = vst [vmem:[%s1953_s6 + $0x90] sm:$0xf] %v296_v42  ;;  %299 = vst [vmem:[%s1953_s6 + $0x94] sm:$0xf] %v298_v43  ;;  %v302_v45 = vld [vmem:[%s1948_s0 + $0x138] sm:$0xf] }
  0x4f   : > { %301 = vst [vmem:[%s1953_s6 + $0x98] sm:$0xf] %v300_v44  ;;  %v304_v46 = vld [vmem:[%s1948_s0 + $0x140] sm:$0xf]  ;;  %v306_v47 = vld [vmem:[%s1948_s0 + $0x148] sm:$0xf] }
  0x50   : > { %303 = vst [vmem:[%s1953_s6 + $0x9c] sm:$0xf] %v302_v45  ;;  %305 = vst [vmem:[%s1953_s6 + $0xa0] sm:$0xf] %v304_v46  ;;  %v308_v48 = vld [vmem:[%s1948_s0 + $0x150] sm:$0xf] }
  0x51   : > { %307 = vst [vmem:[%s1953_s6 + $0xa4] sm:$0xf] %v306_v47  ;;  %v310_v49 = vld [vmem:[%s1948_s0 + $0x158] sm:$0xf]  ;;  %v312_v50 = vld [vmem:[%s1948_s0 + $0x160] sm:$0xf] }
  0x52   : > { %309 = vst [vmem:[%s1953_s6 + $0xa8] sm:$0xf] %v308_v48  ;;  %311 = vst [vmem:[%s1953_s6 + $0xac] sm:$0xf] %v310_v49  ;;  %v314_v51 = vld [vmem:[%s1948_s0 + $0x168] sm:$0xf] }
  0x53   : > { %313 = vst [vmem:[%s1953_s6 + $0xb0] sm:$0xf] %v312_v50  ;;  %v316_v52 = vld [vmem:[%s1948_s0 + $0x170] sm:$0xf]  ;;  %v318_v53 = vld [vmem:[%s1948_s0 + $0x178] sm:$0xf] }
  0x54   : > { %315 = vst [vmem:[%s1953_s6 + $0xb4] sm:$0xf] %v314_v51  ;;  %317 = vst [vmem:[%s1953_s6 + $0xb8] sm:$0xf] %v316_v52  ;;  %v320_v54 = vld [vmem:[%s1948_s0 + $0x180] sm:$0xf] }
  0x55   : > { %319 = vst [vmem:[%s1953_s6 + $0xbc] sm:$0xf] %v318_v53  ;;  %v322_v55 = vld [vmem:[%s1948_s0 + $0x188] sm:$0xf]  ;;  %v324_v56 = vld [vmem:[%s1948_s0 + $0x190] sm:$0xf] }
  0x56   : > { %321 = vst [vmem:[%s1953_s6 + $0xc0] sm:$0xf] %v320_v54  ;;  %323 = vst [vmem:[%s1953_s6 + $0xc4] sm:$0xf] %v322_v55  ;;  %v326_v57 = vld [vmem:[%s1948_s0 + $0x198] sm:$0xf] }
  0x57   : > { %325 = vst [vmem:[%s1953_s6 + $0xc8] sm:$0xf] %v324_v56  ;;  %v328_v58 = vld [vmem:[%s1948_s0 + $0x1a0] sm:$0xf]  ;;  %v330_v59 = vld [vmem:[%s1948_s0 + $0x1a8] sm:$0xf] }
  0x58   : > { %327 = vst [vmem:[%s1953_s6 + $0xcc] sm:$0xf] %v326_v57  ;;  %329 = vst [vmem:[%s1953_s6 + $0xd0] sm:$0xf] %v328_v58  ;;  %v332_v60 = vld [vmem:[%s1948_s0 + $0x1b0] sm:$0xf] }
  0x59   : > { %331 = vst [vmem:[%s1953_s6 + $0xd4] sm:$0xf] %v330_v59  ;;  %v334_v61 = vld [vmem:[%s1948_s0 + $0x1b8] sm:$0xf]  ;;  %v336_v62 = vld [vmem:[%s1948_s0 + $0x1c0] sm:$0xf] }
  0x5a   : > { %333 = vst [vmem:[%s1953_s6 + $0xd8] sm:$0xf] %v332_v60  ;;  %335 = vst [vmem:[%s1953_s6 + $0xdc] sm:$0xf] %v334_v61  ;;  %v338_v63 = vld [vmem:[%s1948_s0 + $0x1c8] sm:$0xf] }
  0x5b   : > { %337 = vst [vmem:[%s1953_s6 + $0xe0] sm:$0xf] %v336_v62  ;;  %v340_v0 = vld [vmem:[%s1948_s0 + $0x1d0] sm:$0xf]  ;;  %v342_v1 = vld [vmem:[%s1948_s0 + $0x1d8] sm:$0xf] }
  0x5c   : > { %339 = vst [vmem:[%s1953_s6 + $0xe4] sm:$0xf] %v338_v63  ;;  %341 = vst [vmem:[%s1953_s6 + $0xe8] sm:$0xf] %v340_v0  ;;  %v344_v2 = vld [vmem:[%s1948_s0 + $0x1e0] sm:$0xf] }
  0x5d   : > { %343 = vst [vmem:[%s1953_s6 + $0xec] sm:$0xf] %v342_v1  ;;  %v346_v3 = vld [vmem:[%s1948_s0 + $0x1e8] sm:$0xf]  ;;  %v348_v4 = vld [vmem:[%s1948_s0 + $0x1f0] sm:$0xf] }
  0x5e   : > { %345 = vst [vmem:[%s1953_s6 + $0xf0] sm:$0xf] %v344_v2  ;;  %347 = vst [vmem:[%s1953_s6 + $0xf4] sm:$0xf] %v346_v3  ;;  %v350_v5 = vld [vmem:[%s1948_s0 + $0x1f8] sm:$0xf] }
  0x5f   : > { %349 = vst [vmem:[%s1953_s6 + $0xf8] sm:$0xf] %v348_v4  ;;  %v352_v6 = vld [vmem:[%s1948_s0 + $0x200] sm:$0xf]  ;;  %v354_v7 = vld [vmem:[%s1948_s0 + $0x208] sm:$0xf] }
  0x60   : > { %351 = vst [vmem:[%s1953_s6 + $0xfc] sm:$0xf] %v350_v5  ;;  %353 = vst [vmem:[%s1953_s6 + $0x100] sm:$0xf] %v352_v6  ;;  %v356_v8 = vld [vmem:[%s1948_s0 + $0x210] sm:$0xf] }
  0x61   : > { %355 = vst [vmem:[%s1953_s6 + $0x104] sm:$0xf] %v354_v7  ;;  %v358_v9 = vld [vmem:[%s1948_s0 + $0x218] sm:$0xf]  ;;  %v360_v10 = vld [vmem:[%s1948_s0 + $0x220] sm:$0xf] }
  0x62   : > { %357 = vst [vmem:[%s1953_s6 + $0x108] sm:$0xf] %v356_v8  ;;  %359 = vst [vmem:[%s1953_s6 + $0x10c] sm:$0xf] %v358_v9  ;;  %v362_v11 = vld [vmem:[%s1948_s0 + $0x228] sm:$0xf] }
  0x63   : > { %361 = vst [vmem:[%s1953_s6 + $0x110] sm:$0xf] %v360_v10  ;;  %v364_v12 = vld [vmem:[%s1948_s0 + $0x230] sm:$0xf]  ;;  %v366_v13 = vld [vmem:[%s1948_s0 + $0x238] sm:$0xf] }
  0x64   : > { %363 = vst [vmem:[%s1953_s6 + $0x114] sm:$0xf] %v362_v11  ;;  %365 = vst [vmem:[%s1953_s6 + $0x118] sm:$0xf] %v364_v12  ;;  %v368_v14 = vld [vmem:[%s1948_s0 + $0x240] sm:$0xf] }
  0x65   : > { %367 = vst [vmem:[%s1953_s6 + $0x11c] sm:$0xf] %v366_v13  ;;  %v370_v15 = vld [vmem:[%s1948_s0 + $0x248] sm:$0xf]  ;;  %v372_v16 = vld [vmem:[%s1948_s0 + $0x250] sm:$0xf] }
  0x66   : > { %369 = vst [vmem:[%s1953_s6 + $0x120] sm:$0xf] %v368_v14  ;;  %371 = vst [vmem:[%s1953_s6 + $0x124] sm:$0xf] %v370_v15  ;;  %v374_v17 = vld [vmem:[%s1948_s0 + $0x258] sm:$0xf] }
  0x67   : > { %373 = vst [vmem:[%s1953_s6 + $0x128] sm:$0xf] %v372_v16  ;;  %v376_v18 = vld [vmem:[%s1948_s0 + $0x260] sm:$0xf]  ;;  %v378_v19 = vld [vmem:[%s1948_s0 + $0x268] sm:$0xf] }
  0x68   : > { %375 = vst [vmem:[%s1953_s6 + $0x12c] sm:$0xf] %v374_v17  ;;  %377 = vst [vmem:[%s1953_s6 + $0x130] sm:$0xf] %v376_v18  ;;  %v380_v20 = vld [vmem:[%s1948_s0 + $0x270] sm:$0xf] }
  0x69   : > { %379 = vst [vmem:[%s1953_s6 + $0x134] sm:$0xf] %v378_v19  ;;  %v382_v21 = vld [vmem:[%s1948_s0 + $0x278] sm:$0xf]  ;;  %v384_v22 = vld [vmem:[%s1948_s0 + $0x280] sm:$0xf] }
  0x6a   : > { %381 = vst [vmem:[%s1953_s6 + $0x138] sm:$0xf] %v380_v20  ;;  %383 = vst [vmem:[%s1953_s6 + $0x13c] sm:$0xf] %v382_v21  ;;  %v386_v23 = vld [vmem:[%s1948_s0 + $0x288] sm:$0xf] }
  0x6b   : > { %385 = vst [vmem:[%s1953_s6 + $0x140] sm:$0xf] %v384_v22  ;;  %v388_v24 = vld [vmem:[%s1948_s0 + $0x290] sm:$0xf]  ;;  %v390_v25 = vld [vmem:[%s1948_s0 + $0x298] sm:$0xf] }
  0x6c   : > { %387 = vst [vmem:[%s1953_s6 + $0x144] sm:$0xf] %v386_v23  ;;  %389 = vst [vmem:[%s1953_s6 + $0x148] sm:$0xf] %v388_v24  ;;  %v392_v26 = vld [vmem:[%s1948_s0 + $0x2a0] sm:$0xf] }
  0x6d   : > { %391 = vst [vmem:[%s1953_s6 + $0x14c] sm:$0xf] %v390_v25  ;;  %v394_v27 = vld [vmem:[%s1948_s0 + $0x2a8] sm:$0xf]  ;;  %v396_v28 = vld [vmem:[%s1948_s0 + $0x2b0] sm:$0xf] }
  0x6e   : > { %393 = vst [vmem:[%s1953_s6 + $0x150] sm:$0xf] %v392_v26  ;;  %395 = vst [vmem:[%s1953_s6 + $0x154] sm:$0xf] %v394_v27  ;;  %v398_v29 = vld [vmem:[%s1948_s0 + $0x2b8] sm:$0xf] }
  0x6f   : > { %397 = vst [vmem:[%s1953_s6 + $0x158] sm:$0xf] %v396_v28  ;;  %v400_v30 = vld [vmem:[%s1948_s0 + $0x2c0] sm:$0xf]  ;;  %v402_v31 = vld [vmem:[%s1948_s0 + $0x2c8] sm:$0xf] }
  0x70   : > { %399 = vst [vmem:[%s1953_s6 + $0x15c] sm:$0xf] %v398_v29  ;;  %401 = vst [vmem:[%s1953_s6 + $0x160] sm:$0xf] %v400_v30  ;;  %v404_v32 = vld [vmem:[%s1948_s0 + $0x2d0] sm:$0xf] }
  0x71   : > { %403 = vst [vmem:[%s1953_s6 + $0x164] sm:$0xf] %v402_v31  ;;  %v406_v33 = vld [vmem:[%s1948_s0 + $0x2d8] sm:$0xf]  ;;  %v408_v34 = vld [vmem:[%s1948_s0 + $0x2e0] sm:$0xf] }
  0x72   : > { %405 = vst [vmem:[%s1953_s6 + $0x168] sm:$0xf] %v404_v32  ;;  %407 = vst [vmem:[%s1953_s6 + $0x16c] sm:$0xf] %v406_v33  ;;  %v410_v35 = vld [vmem:[%s1948_s0 + $0x2e8] sm:$0xf] }
  0x73   : > { %409 = vst [vmem:[%s1953_s6 + $0x170] sm:$0xf] %v408_v34  ;;  %v412_v36 = vld [vmem:[%s1948_s0 + $0x2f0] sm:$0xf]  ;;  %v414_v37 = vld [vmem:[%s1948_s0 + $0x2f8] sm:$0xf] }
  0x74   : > { %411 = vst [vmem:[%s1953_s6 + $0x174] sm:$0xf] %v410_v35  ;;  %413 = vst [vmem:[%s1953_s6 + $0x178] sm:$0xf] %v412_v36 }
  0x75   : > { %415 = vst [vmem:[%s1953_s6 + $0x17c] sm:$0xf] %v414_v37 }
  0x76 PF: > { %p1435_p0 = scmp.ge.s32.totalorder %s1811_s22, 1  ;;  %p635_p1 = scmp.lt.s32.totalorder %s1811_s22, 7 }
  0x78   : > { %p636_p2 = pnand %p1435_p0, %p635_p1 }
  0x79   : > { %s642_s5 = sand.u32 (!%p636_p2), 1, %s1787_s16   ;;  %s649_s23 = sand.u32 (!%p636_p2), 1, %s1779_s14  }
  0x7a   : > { %639 = sbr.rel (%p636_p2) target bundleno = 447 (0x1bf), region = 88  ;;  %s675_s0 = sand.u32 (!%p636_p2), 1, %s1771_s12  }
  0x7b   : > { %s1577_s28 = smul.u32 (!%p636_p2), 48, %s642_s5  ;;  %s1436_s11 = sshll.u32 (!%p636_p2), %s675_s0, 3 }
  0x7c   : > { %s1578_s7 = smul.u32 (!%p636_p2), 384, %s649_s23  ;;  %p681_p3 = scmp.lt.s32.totalorder (!%p636_p2), %s1799_s19, 1 }
  0x7d   : > { %s2157_s6 = scalar_lea.vmem (!%p636_p2), [#allocation3], %s1577_s28  ;;  %s2161_s25 = scalar_lea.vmem (!%p636_p2), [#allocation5], %s1436_s11 }
  0x7e   : > { %s2159_s1 = scalar_lea.vmem (!%p636_p2), [#allocation4], %s1578_s7  ;;  %p1437_p4 = scmp.ne.s32.totalorder (!%p636_p2), %s1795_s18, 0 }
  0x81   : > { %s2151_s26 = scalar_select %p681_p3, %s1799_s19, 1 }
  0x82   : > { %689 = sbr.rel (%p1437_p4) target bundleno = 137 (0x89), region = 100  ;;  %v1813_v38 = vmov (!%p1437_p4), 0.0  }
  0x83   : > { %s683_s4 = scalar_lea.vmem %s2268_s2, %s2151_s26  ;;  %690 = vst [vmem:[#allocation2] sm:$0xff] (!%p1437_p4), %v1813_v38  ;;  %691 = vst [vmem:[#allocation2 + $0x8] sm:$0xff] (!%p1437_p4), %v1813_v38 }
  0x89 PF: > { %v1668_v39 = vld [vmem:[%s2159_s1 + $0x40] sm:$0xff]   ;;  %v1672_v43 = vld [vmem:[%s2159_s1 + $0x48] sm:$0xff]   ;;  %v1676_v47 = vld [vmem:[%s2159_s1 + $0x50] sm:$0xff]   ;;  %p1492_p5 = scmp.ne.s32.totalorder %s1795_s18, 2 }
  0x8a   : > { %v1669_v40 = vld [vmem:[%s2159_s1 + $0xc0] sm:$0xff]   ;;  %1509 = vmatprep.subr.bf16.mxu0 %v1668_v39  ;;  %v1673_v44 = vld [vmem:[%s2159_s1 + $0xc8] sm:$0xff]   ;;  %v1677_v48 = vld [vmem:[%s2159_s1 + $0xd0] sm:$0xff]  }
  0x8b   : > { %v1670_v41 = vld [vmem:[%s2159_s1] sm:$0xff]   ;;  %1531 = vmatprep.subr.bf16.mxu1 %v1669_v40  ;;  %v1674_v45 = vld [vmem:[%s2159_s1 + $0x8] sm:$0xff]   ;;  %v1678_v49 = vld [vmem:[%s2159_s1 + $0x10] sm:$0xff]  }
  0x8c   : > { %v1671_v42 = vld [vmem:[%s2159_s1 + $0x80] sm:$0xff]   ;;  %1510 = vmatpush3.bf16.msra.mxu0 %v1670_v41  ;;  %v1675_v46 = vld [vmem:[%s2159_s1 + $0x88] sm:$0xff]   ;;  %v1679_v50 = vld [vmem:[%s2159_s1 + $0x90] sm:$0xff]  }
  0x8d   : > { %1532 = vmatpush3.bf16.msra.mxu1 %v1671_v42  ;;  %1511 = vmatprep.subr.bf16.mxu0 %v1672_v43  ;;  %v1680_v51 = vld [vmem:[%s2159_s1 + $0x58] sm:$0xff]   ;;  %v1684_v55 = vld [vmem:[%s2159_s1 + $0x60] sm:$0xff]   ;;  %v1688_v59 = vld [vmem:[%s2159_s1 + $0x68] sm:$0xff]  }
  0x8e   : > { %1533 = vmatprep.subr.bf16.mxu1 %v1673_v44  ;;  %v1681_v52 = vld [vmem:[%s2159_s1 + $0xd8] sm:$0xff]   ;;  %v1685_v56 = vld [vmem:[%s2159_s1 + $0xe0] sm:$0xff]   ;;  %v1689_v60 = vld [vmem:[%s2159_s1 + $0xe8] sm:$0xff]  }
  0x8f   : > { %v1682_v53 = vld [vmem:[%s2159_s1 + $0x18] sm:$0xff]   ;;  %v1686_v57 = vld [vmem:[%s2159_s1 + $0x20] sm:$0xff]   ;;  %v1690_v61 = vld [vmem:[%s2159_s1 + $0x28] sm:$0xff]  }
  0x90   : > { %1512 = vmatpush3.bf16.msra.mxu0 %v1674_v45  ;;  %v1683_v54 = vld [vmem:[%s2159_s1 + $0x98] sm:$0xff]   ;;  %v1687_v58 = vld [vmem:[%s2159_s1 + $0xa0] sm:$0xff]   ;;  %v1691_v62 = vld [vmem:[%s2159_s1 + $0xa8] sm:$0xff]  }
  0x91   : > { %1534 = vmatpush3.bf16.msra.mxu1 %v1675_v46  ;;  %1513 = vmatprep.subr.bf16.mxu0 %v1676_v47  ;;  %v1692_v63 = vld [vmem:[%s2159_s1 + $0x70] sm:$0xff]   ;;  %v1696_v3 = vld [vmem:[%s2159_s1 + $0x78] sm:$0xff]   ;;  %v1706_v11 = vld [vmem:[%s2159_s1 + $0x140] sm:$0xff]  }
  0x92   : > { %1535 = vmatprep.subr.bf16.mxu1 %v1677_v48  ;;  %v1693_v0 = vld [vmem:[%s2159_s1 + $0xf0] sm:$0xff]   ;;  %v1697_v4 = vld [vmem:[%s2159_s1 + $0xf8] sm:$0xff]   ;;  %v1707_v12 = vld [vmem:[%s2159_s1 + $0x100] sm:$0xff]  }
  0x93   : > { %v1694_v1 = vld [vmem:[%s2159_s1 + $0x30] sm:$0xff]   ;;  %v1698_v5 = vld [vmem:[%s2159_s1 + $0x38] sm:$0xff]   ;;  %v1708_v13 = vld [vmem:[%s2159_s1 + $0x148] sm:$0xff]  }
  0x94   : > { %1514 = vmatpush3.bf16.msra.mxu0 %v1678_v49  ;;  %v1695_v2 = vld [vmem:[%s2159_s1 + $0xb0] sm:$0xff]   ;;  %v1699_v6 = vld [vmem:[%s2159_s1 + $0xb8] sm:$0xff]   ;;  %v1709_v14 = vld [vmem:[%s2159_s1 + $0x108] sm:$0xff]  }
  0x95   : > { %1536 = vmatpush3.bf16.msra.mxu1 %v1679_v50  ;;  %1515 = vmatprep.subr.bf16.mxu0 %v1680_v51  ;;  %v1700_v7 = vld [vmem:[%s2157_s6] ss:$24 sps:$4 sm:$0xff]   ;;  %v1702_v8 = vld [vmem:[%s2157_s6 + $0x4] ss:$24 sps:$4 sm:$0xff]   ;;  %v1724_v22 = vld [vmem:[%s2157_s6 + $0x14] ss:$24 sps:$4 sm:$0xff]  }
  0x96   : > { %1537 = vmatprep.subr.bf16.mxu1 %v1681_v52  ;;  %v1703_v9 = vld [vmem:[%s2157_s6 + $0x8] ss:$24 sps:$4 sm:$0xff]   ;;  %v1705_v10 = vld [vmem:[%s2157_s6 + $0xc] ss:$24 sps:$4 sm:$0xff]   ;;  %1146 = vmatprep.mubr.bf16.mxu0 %v1702_v8 }
  0x97   : > { %1187 = vmatprep.mubr.bf16.mxu1 %v1705_v10  ;;  %v1710_v15 = vld [vmem:[%s2159_s1 + $0x150] sm:$0xff]   ;;  %v1712_v17 = vld [vmem:[%s2159_s1 + $0x158] sm:$0xff]   ;;  %v1714_v19 = vld [vmem:[%s2159_s1 + $0x160] sm:$0xff]  }
  0x98   : > { %1516 = vmatpush3.bf16.msra.mxu0 %v1682_v53  ;;  %v1711_v16 = vld [vmem:[%s2159_s1 + $0x110] sm:$0xff]   ;;  %v1713_v18 = vld [vmem:[%s2159_s1 + $0x118] sm:$0xff]   ;;  %v1715_v20 = vld [vmem:[%s2159_s1 + $0x120] sm:$0xff]  }
  0x99   : > { %1538 = vmatpush3.bf16.msra.mxu1 %v1683_v54  ;;  %1517 = vmatprep.subr.bf16.mxu0 %v1684_v55  ;;  %v1716_v21 = vld [vmem:[%s2159_s1 + $0x168] sm:$0xff]   ;;  %v1718_v24 = vld [vmem:[%s2159_s1 + $0x170] sm:$0xff]   ;;  %v1720_v26 = vld [vmem:[%s2159_s1 + $0x178] sm:$0xff]  }
  0x9a   : > { %1539 = vmatprep.subr.bf16.mxu1 %v1685_v56  ;;  %v1717_v23 = vld [vmem:[%s2159_s1 + $0x128] sm:$0xff]   ;;  %v1719_v25 = vld [vmem:[%s2159_s1 + $0x130] sm:$0xff]   ;;  %v1721_v27 = vld [vmem:[%s2159_s1 + $0x138] sm:$0xff]  }
  0x9b   : > { %v1722_v28 = vld [vmem:[%s2157_s6 + $0x10] ss:$24 sps:$4 sm:$0xff]  }
  0x9c   : > { %1518 = vmatpush3.bf16.msra.mxu0 %v1686_v57  ;;  %v692_v47 = vld [vmem:[#allocation2] sm:$0xff]  ;;  %v693_v51 = vld [vmem:[#allocation2 + $0x8] sm:$0xff] }
  0x9d   : > { %1540 = vmatpush3.bf16.msra.mxu1 %v1687_v58  ;;  %1519 = vmatprep.subr.bf16.mxu0 %v1688_v59  ;;  %v1493_v57 = vld [vmem:[%s683_s4] ss:$0 sm:$0xff] (!%p1492_p5) }
  0x9e   : > { %1541 = vmatprep.subr.bf16.mxu1 %v1689_v60 }
  0xa0   : > { %1520 = vmatpush3.bf16.msra.mxu0 %v1690_v61 }
  0xa1   : > { %1542 = vmatpush3.bf16.msra.mxu1 %v1691_v62  ;;  %1521 = vmatprep.subr.bf16.mxu0 %v1692_v63 }
  0xa2   : > { %1543 = vmatprep.subr.bf16.mxu1 %v1693_v0 }
  0xa4   : > { %1522 = vmatpush3.bf16.msra.mxu0 %v1694_v1 }
  0xa5   : > { %1544 = vmatpush3.bf16.msra.mxu1 %v1695_v2  ;;  %1523 = vmatprep.subr.bf16.mxu0 %v1696_v3 }
  0xa6   : > { %1545 = vmatprep.subr.bf16.mxu1 %v1697_v4 }
  0xa8   : > { %1524 = vmatpush3.bf16.msra.mxu0 %v1698_v5 }
  0xa9   : > { %1546 = vmatpush3.bf16.msra.mxu1 %v1699_v6  ;;  %1553 = vmatprep.subr.bf16.mxu0 %v1706_v11 }
  0xab   : > { %1147 = vmatmul.mubr.bf16.vlgmr.msra.gmra.mrb[0].mxu0 %v1700_v7 }
  0xac   : > { %1188 = vmatmul.mubr.bf16.vlgmr.msra.gmra.mrb[0].mxu1 %v1703_v9  ;;  %1554 = vmatpush3.bf16.msra.mxu0 %v1707_v12 }
  0xad   : > { %1555 = vmatprep.subr.bf16.mxu0 %v1708_v13  ;;  %1228 = vmatprep.mubr.bf16.mxu0 %v1724_v22 }
  0xb0   : > { %1556 = vmatpush3.bf16.msra.mxu0 %v1709_v14 }
  0xb1   : > { %1557 = vmatprep.subr.bf16.mxu0 %v1710_v15 }
  0xb4   : > { %1558 = vmatpush3.bf16.msra.mxu0 %v1711_v16 }
  0xb5   : > { %1559 = vmatprep.subr.bf16.mxu0 %v1712_v17 }
  0xb8   : > { %1560 = vmatpush3.bf16.msra.mxu0 %v1713_v18 }
  0xb9   : > { %1561 = vmatprep.subr.bf16.mxu0 %v1714_v19 }
  0xbc   : > { %1562 = vmatpush3.bf16.msra.mxu0 %v1715_v20 }
  0xbd   : > { %1563 = vmatprep.subr.bf16.mxu0 %v1716_v21 }
  0xc0   : > { %1564 = vmatpush3.bf16.msra.mxu0 %v1717_v23 }
  0xc1   : > { %1565 = vmatprep.subr.bf16.mxu0 %v1718_v24 }
  0xc4   : > { %1566 = vmatpush3.bf16.msra.mxu0 %v1719_v25 }
  0xc5   : > { %1567 = vmatprep.subr.bf16.mxu0 %v1720_v26 }
  0xc8   : > { %1568 = vmatpush3.bf16.msra.mxu0 %v1721_v27 }
  0xcb   : > { %1229 = vmatmul.mubr.bf16.vlgmr.msra.gmra.mrb[4].mxu0 %v1722_v28 }
 0x17e   : > { %v1525_v29 = vpop.f32.mrb[0].mxu0 }
 0x17f   : > { %v1547_v30 = vpop.f32.mrb[0].mxu1  ;;  %v1526_v31 = vpop.f32.mrb[1].mxu0 }
 0x180   : > { %v1527_v32 = vadd.f32 %v1526_v31, %v1525_v29  ;;  %v1548_v33 = vpop.f32.mrb[1].mxu1  ;;  %v1528_v34 = vpop.f32.mrb[2].mxu0 }
 0x181   : > { %v1549_v35 = vadd.f32 %v1548_v33, %v1547_v30  ;;  %v1550_v36 = vpop.f32.mrb[2].mxu1  ;;  %v1529_v37 = vpop.f32.mrb[3].mxu0 }
 0x182   : > { %v1530_v38 = vadd.f32 %v1529_v37, %v1528_v34  ;;  %v1551_v39 = vpop.f32.mrb[3].mxu1 }
 0x183   : > { %v1190_v40 = vadd.f32 %v1549_v35, %v1527_v32  ;;  %v1552_v41 = vadd.f32 %v1551_v39, %v1550_v36 }
 0x185   : > { %v1193_v42 = vadd.f32 %v1552_v41, %v1530_v38 }
 0x19e   : > { %v1569_v43 = vpop.f32.mrb[4].mxu0 }
 0x19f   : > { %v1570_v44 = vpop.f32.mrb[5].mxu0 }
 0x1a0   : > { %v1571_v45 = vadd.f32 %v1570_v44, %v1569_v43  ;;  %v1572_v46 = vpop.f32.mrb[6].mxu0 }
 0x1a1   : > { %v1573_v48 = vpop.f32.mrb[7].mxu0 }
 0x1a2   : > { %v1231_v49 = vadd.f32 %v1571_v45, %v1190_v40  ;;  %v1574_v50 = vadd.f32 %v1573_v48, %v1572_v46  ;;  %1244 = sbr.rel (%p1492_p5) target bundleno = 439 (0x1b7), region = 104 }
 0x1a4   : > { %v1237_v52 = vadd.f32 %v1231_v49, %v692_v47  ;;  %v1234_v53 = vadd.f32 %v1574_v50, %v1193_v42 }
 0x1a6   : > { %1239 = vst [vmem:[#allocation2] sm:$0xff] %v1237_v52  ;;  %v1238_v54 = vadd.f32 %v1234_v53, %v693_v51 }
 0x1a8   : > { %1240 = vst [vmem:[#allocation2 + $0x8] sm:$0xff] %v1238_v54 }
 0x1ad   : > { %v1245_v55 = vld [vmem:[#allocation2] sm:$0xff] }
 0x1ae   : > { %v1254_v58 = vadd.f32 %v1493_v57, %v1245_v55 }
 0x1af   : > { %v1246_v56 = vld [vmem:[#allocation2 + $0x8] sm:$0xff] }
 0x1b0   : > { %v1255_v59 = vadd.f32 %v1493_v57, %v1246_v56  ;;  %v1256_v60 = vmax.f32 %v1254_v58, 0.0 }
 0x1b2   : > { %v1257_v61 = vmax.f32 %v1255_v59, 0.0 }
 0x1b4   : > { %v1507_v62 = vpack.c.bf16 %v1257_v61, %v1256_v60 }
 0x1b6   : > { %1508 = vst [vmem:[%s2161_s25] sm:$0xff] %v1507_v62  }
 0x1b7 PF: > { %1274 = sbr.rel (!%p1928_p12) target bundleno = 447 (0x1bf), region = 108  ;;  %s1497_s14 = sshll.u32 (%p1928_p12), %s1799_s19, 2 }
 0x1b8   : > { %s1279_s5 = scalar_lea.vmem (%p1928_p12), %s2269_s3, %s1497_s14 }
 0x1bd   : > { %v1295_v63 = vld [vmem:[%s2161_s25] sm:$0xf] (%p1928_p12)  ;;  %v1297_v0 = vld [vmem:[%s2161_s25 + $0x4] sm:$0xf] (%p1928_p12) }
 0x1be   : > { %1296 = vst [vmem:[%s1279_s5] sm:$0xf] %v1295_v63  ;;  %1298 = vst [vmem:[%s1279_s5 + $0x8] sm:$0xf] %v1297_v0 }
 0x1bf PF: > { %s13_s22 = sadd.s32 1, %s1811_s22   ;;  %s2279_s25 = sld [smem:[#allocation6_spill]] }
 0x1c0   : > { %p10_p6 = scmp.ge.s32.totalorder %s13_s22, 8   ;;  %s2280_s12 = smov %s1775_s13 }
 0x1c1   : > { %s2281_s13 = smov %s1926_s9  ;;  %s2282_s14 = smov %s1783_s15 }
 0x1c2   : > { %s2283_s15 = smov %s1923_s8  ;;  %s2284_s16 = smov %s1791_s17 }
 0x1c3   : > { %s2285_s17 = smov %s1909_s30  ;;  %s2286_s18 = smov %s1803_s20 }
 0x1c4   : > { %s2287_s19 = smov %s1807_s21  ;;  %s2288_s20 = smov %s2291_s24 }
 0x1c5   : > { %s2289_s21 = smov %s2279_s25  ;;  %12 = sbr.rel (!%p10_p6) target bundleno = 9 (0x9), region = 191 }

// kernel: forward.65
= control target key start
LH: loop header
LB: loop body
LE: loop exit
PB: predicated region body
PF: predicated region fallthrough
CT: control target
= control target key end

     0   :  { %s2615_s0 = inlined_call_operand.vmem [shape: bf16[16,2304], index: 0, kind: input, shape index: {}]   ;;  %s2616_s1 = inlined_call_operand.vmem [shape: bf16[2304,512], index: 1, kind: input, shape index: {}]   ;;  %s2617_s2 = inlined_call_operand.vmem [shape: f32[1,512], index: 2, kind: input, shape index: {}]   ;;  %s2618_s3 = inlined_call_operand.vmem [shape: bf16[16,512], index: 3, kind: output, shape index: {}]  }
   0x1   :  { %2620 = sst [smem:[#allocation7_spill]] %s2615_s0 }
   0x2   :  { %2621 = sst [smem:[#allocation8_spill]] %s2616_s1 }
   0x3   :  { %s2135_s12 = smov 0   ;;  %s2137_s13 = smov 0  }
   0x4   :  { %s2139_s14 = smov 0   ;;  %s2141_s15 = smov 0  }
   0x5   :  { %s2143_s16 = smov 0   ;;  %s2145_s17 = smov 0  }
   0x6   :  { %s2147_s18 = smov 0   ;;  %s2149_s19 = smov 0  }
   0x7   :  { %s2151_s20 = smov 0   ;;  %s2153_s21 = smov 0  }
   0x8   :  { %s2155_s22 = smov 0  }
   0x9 LB: > { %s1645_s23 = sadd.s32 4294967295, %s2112_s22   ;;  %s25_s24 = sadd.s32 1, %s2104_s20  ;;  %s2112_s22 = sphi %s2155_s22, %s13_s22   ;;  %s2108_s21 = sphi %s2153_s21, %s2638_s21   ;;  %s2104_s20 = sphi %s2151_s20, %s2637_s20   ;;  %s2100_s19 = sphi %s2149_s19, %s2636_s19   ;;  %s2096_s18 = sphi %s2147_s18, %s2635_s18   ;;  %s2092_s17 = sphi %s2145_s17, %s2634_s17   ;;  %s2088_s16 = sphi %s2143_s16, %s2633_s16   ;;  %s2084_s15 = sphi %s2141_s15, %s2632_s15   ;;  %s2080_s14 = sphi %s2139_s14, %s2631_s14   ;;  %s2076_s13 = sphi %s2137_s13, %s2630_s13   ;;  %s2072_s12 = sphi %s2135_s12, %s2629_s12  }
   0xa   : > { %p26_p0 = scmp.ge.s32.totalorder %s25_s24, 3  ;;  %s28_s25 = sadd.s32 1, %s2108_s21 }
   0xb   : > { %s41_s26 = sadd.s32 1, %s2092_s17  ;;  %p48_p1 = scmp.ne.s32.totalorder %s2092_s17, %s2088_s16 }
   0xc   : > { %s2640_s24 = smov (%p26_p0, %s25_s24), 0  ;;  %s2642_s25 = smov (!%p26_p0, %s28_s25), %s2108_s21 }
   0xd   : > { %s37_s27 = ssub.s32 %s2104_s20, %s2640_s24  ;;  %p49_p2 = scmp.eq.s32.totalorder %s2112_s22, 0 }
   0xe   : > { %p30_p3 = scmp.ge.s32.totalorder %s2642_s25, 2  ;;  %p39_p4 = scmp.eq.s32.totalorder %s37_s27, 0 }
   0xf   : > { %p2202_p5 = por %p49_p2, %p48_p1  ;;  %s69_s29 = sadd.s32 1, %s2084_s15 }
  0x10   : > { %s2644_s25 = smov (%p30_p3, %s2642_s25), 0  ;;  %p76_p6 = scmp.ne.s32.totalorder %s2084_s15, %s2080_s14 }
  0x11   : > { %2623 = sst [smem:[#allocation6_spill]] %s2644_s25  ;;  %s65_s4 = ssub.s32 %s2108_s21, %s2644_s25 }
  0x12   : > { %s2210_s30 = scalar_select %p39_p4, %s2092_s17, %s41_s26  }
  0x13   : > { %s66_s5 = sor.u32 %s65_s4, %s37_s27  ;;  %p121_p7 = scmp.eq.s32.totalorder %s65_s4, 0 }
  0x14   : > { %p67_p8 = scmp.eq.s32.totalorder %s66_s5, 0  ;;  %p2216_p9 = por %p76_p6, %p49_p2 }
  0x15   : > { %s123_s7 = sadd.s32 1, %s2076_s13  ;;  %p133_p10 = scmp.ne.s32.totalorder %s2076_s13, %s2072_s12 }
  0x16   : > { %s2224_s8 = scalar_select %p67_p8, %s2084_s15, %s69_s29  }
  0x17   : > { %s2227_s9 = scalar_select %p121_p7, %s2076_s13, %s123_s7  }
  0x18   : > { %p134_p11 = scmp.eq.s32.totalorder %s1645_s23, 5  ;;  %p1648_p13 = scmp.ge.s32.totalorder %s2112_s22, 6 }
  0x1a   : > { %p2229_p12 = por %p134_p11, %p133_p10  ;;  %156 = sbr.rel (%p1648_p13) target bundleno = 103 (0x67), region = 16 }
  0x21   : > { %159 = sbr.rel (!%p2202_p5) target bundleno = 45 (0x2d), region = 20  ;;  %s161_s11 = sand.u32 (%p2202_p5), 1, %s2092_s17  }
  0x22   : > { %s1767_s26 = smul.u32 (%p2202_p5), 24, %s2104_s20  ;;  %s2626_s0 = sld [smem:[#allocation7_spill]] (%p2202_p5) }
  0x23   : > { %s1780_s27 = smul.u32 (%p2202_p5), 48, %s161_s11 }
  0x25   : > { %s163_s23 = scalar_lea.vmem (%p2202_p5), [#allocation3], %s1780_s27 }
  0x28   : > { %s169_s5 = scalar_lea.vmem %s2626_s0, %s1767_s26 }
  0x29   : > { %v182_v0 = vld [vmem:[%s169_s5] sm:$0xff]  ;;  %v184_v1 = vld [vmem:[%s169_s5 + $0x8] sm:$0xff]  ;;  %v186_v2 = vld [vmem:[%s169_s5 + $0x10] sm:$0xff] }
  0x2a   : > { %183 = vst [vmem:[%s163_s23] sm:$0xff] %v182_v0  ;;  %185 = vst [vmem:[%s163_s23 + $0x8] sm:$0xff] %v184_v1  ;;  %v188_v3 = vld [vmem:[%s169_s5 + $0x48] sm:$0xff]  ;;  %v190_v4 = vld [vmem:[%s169_s5 + $0x50] sm:$0xff] }
  0x2b   : > { %187 = vst [vmem:[%s163_s23 + $0x10] sm:$0xff] %v186_v2  ;;  %v192_v5 = vld [vmem:[%s169_s5 + $0x58] sm:$0xff]  ;;  %189 = vst [vmem:[%s163_s23 + $0x18] sm:$0xff] %v188_v3 }
  0x2c   : > { %191 = vst [vmem:[%s163_s23 + $0x20] sm:$0xff] %v190_v4  ;;  %193 = vst [vmem:[%s163_s23 + $0x28] sm:$0xff] %v192_v5 }
  0x2d PF: > { %199 = sbr.rel (!%p2216_p9) target bundleno = 103 (0x67), region = 43  ;;  %s201_s28 = sand.u32 (%p2216_p9), 1, %s2084_s15  }
  0x2e   : > { %s1781_s7 = smul.u32 (%p2216_p9), 768, %s201_s28  ;;  %s1650_s11 = sshll.u32 (%p2216_p9), %s2108_s21, 1 }
  0x2f   : > { %s1768_s26 = smul.u32 (%p2216_p9), 384, %s2104_s20  ;;  %s2627_s1 = sld [smem:[#allocation8_spill]] (%p2216_p9) }
  0x30   : > { %s2254_s6 = scalar_lea.vmem (%p2216_p9), [#allocation4], %s1781_s7 }
  0x31   : > { %s207_s27 = sadd.s32 (%p2216_p9), %s1768_s26, %s1650_s11 }
  0x32   : > { %s1652_s29 = sshll.u32 (%p2216_p9), %s207_s27, 2 }
  0x35   : > { %s2249_s5 = scalar_lea.vmem %s2627_s1, %s1652_s29 }
  0x36   : > { %v427_v6 = vld [vmem:[%s2249_s5] sm:$0xff]  ;;  %v429_v7 = vld [vmem:[%s2249_s5 + $0x10] sm:$0xff] }
  0x37   : > { %v431_v8 = vld [vmem:[%s2249_s5 + $0x20] sm:$0xff]  ;;  %428 = vst [vmem:[%s2254_s6] sm:$0xff] %v427_v6  ;;  %430 = vst [vmem:[%s2254_s6 + $0x8] sm:$0xff] %v429_v7  ;;  %v433_v9 = vld [vmem:[%s2249_s5 + $0x30] sm:$0xff] }
  0x38   : > { %432 = vst [vmem:[%s2254_s6 + $0x10] sm:$0xff] %v431_v8  ;;  %v435_v10 = vld [vmem:[%s2249_s5 + $0x40] sm:$0xff]  ;;  %v437_v11 = vld [vmem:[%s2249_s5 + $0x50] sm:$0xff]  ;;  %434 = vst [vmem:[%s2254_s6 + $0x18] sm:$0xff] %v433_v9 }
  0x39   : > { %436 = vst [vmem:[%s2254_s6 + $0x20] sm:$0xff] %v435_v10  ;;  %438 = vst [vmem:[%s2254_s6 + $0x28] sm:$0xff] %v437_v11  ;;  %v439_v12 = vld [vmem:[%s2249_s5 + $0x60] sm:$0xff]  ;;  %v441_v13 = vld [vmem:[%s2249_s5 + $0x70] sm:$0xff] }
  0x3a   : > { %v443_v14 = vld [vmem:[%s2249_s5 + $0x80] sm:$0xff]  ;;  %440 = vst [vmem:[%s2254_s6 + $0x30] sm:$0xff] %v439_v12  ;;  %442 = vst [vmem:[%s2254_s6 + $0x38] sm:$0xff] %v441_v13  ;;  %v445_v15 = vld [vmem:[%s2249_s5 + $0x90] sm:$0xff] }
  0x3b   : > { %444 = vst [vmem:[%s2254_s6 + $0x40] sm:$0xff] %v443_v14  ;;  %v447_v16 = vld [vmem:[%s2249_s5 + $0xa0] sm:$0xff]  ;;  %v449_v17 = vld [vmem:[%s2249_s5 + $0xb0] sm:$0xff]  ;;  %446 = vst [vmem:[%s2254_s6 + $0x48] sm:$0xff] %v445_v15 }
  0x3c   : > { %448 = vst [vmem:[%s2254_s6 + $0x50] sm:$0xff] %v447_v16  ;;  %450 = vst [vmem:[%s2254_s6 + $0x58] sm:$0xff] %v449_v17  ;;  %v451_v18 = vld [vmem:[%s2249_s5 + $0xc0] sm:$0xff]  ;;  %v453_v19 = vld [vmem:[%s2249_s5 + $0xd0] sm:$0xff] }
  0x3d   : > { %v455_v20 = vld [vmem:[%s2249_s5 + $0xe0] sm:$0xff]  ;;  %452 = vst [vmem:[%s2254_s6 + $0x60] sm:$0xff] %v451_v18  ;;  %454 = vst [vmem:[%s2254_s6 + $0x68] sm:$0xff] %v453_v19  ;;  %v457_v21 = vld [vmem:[%s2249_s5 + $0xf0] sm:$0xff] }
  0x3e   : > { %456 = vst [vmem:[%s2254_s6 + $0x70] sm:$0xff] %v455_v20  ;;  %v459_v22 = vld [vmem:[%s2249_s5 + $0x100] sm:$0xff]  ;;  %v461_v23 = vld [vmem:[%s2249_s5 + $0x110] sm:$0xff]  ;;  %458 = vst [vmem:[%s2254_s6 + $0x78] sm:$0xff] %v457_v21 }
  0x3f   : > { %460 = vst [vmem:[%s2254_s6 + $0x80] sm:$0xff] %v459_v22  ;;  %462 = vst [vmem:[%s2254_s6 + $0x88] sm:$0xff] %v461_v23  ;;  %v463_v24 = vld [vmem:[%s2249_s5 + $0x120] sm:$0xff]  ;;  %v465_v25 = vld [vmem:[%s2249_s5 + $0x130] sm:$0xff] }
  0x40   : > { %v467_v26 = vld [vmem:[%s2249_s5 + $0x140] sm:$0xff]  ;;  %464 = vst [vmem:[%s2254_s6 + $0x90] sm:$0xff] %v463_v24  ;;  %466 = vst [vmem:[%s2254_s6 + $0x98] sm:$0xff] %v465_v25  ;;  %v469_v27 = vld [vmem:[%s2249_s5 + $0x150] sm:$0xff] }
  0x41   : > { %468 = vst [vmem:[%s2254_s6 + $0xa0] sm:$0xff] %v467_v26  ;;  %v471_v28 = vld [vmem:[%s2249_s5 + $0x160] sm:$0xff]  ;;  %v473_v29 = vld [vmem:[%s2249_s5 + $0x170] sm:$0xff]  ;;  %470 = vst [vmem:[%s2254_s6 + $0xa8] sm:$0xff] %v469_v27 }
  0x42   : > { %472 = vst [vmem:[%s2254_s6 + $0xb0] sm:$0xff] %v471_v28  ;;  %474 = vst [vmem:[%s2254_s6 + $0xb8] sm:$0xff] %v473_v29  ;;  %v475_v30 = vld [vmem:[%s2249_s5 + $0x180] sm:$0xff]  ;;  %v477_v31 = vld [vmem:[%s2249_s5 + $0x190] sm:$0xff] }
  0x43   : > { %v479_v32 = vld [vmem:[%s2249_s5 + $0x1a0] sm:$0xff]  ;;  %476 = vst [vmem:[%s2254_s6 + $0xc0] sm:$0xff] %v475_v30  ;;  %478 = vst [vmem:[%s2254_s6 + $0xc8] sm:$0xff] %v477_v31  ;;  %v481_v33 = vld [vmem:[%s2249_s5 + $0x1b0] sm:$0xff] }
  0x44   : > { %480 = vst [vmem:[%s2254_s6 + $0xd0] sm:$0xff] %v479_v32  ;;  %v483_v34 = vld [vmem:[%s2249_s5 + $0x1c0] sm:$0xff]  ;;  %v485_v35 = vld [vmem:[%s2249_s5 + $0x1d0] sm:$0xff]  ;;  %482 = vst [vmem:[%s2254_s6 + $0xd8] sm:$0xff] %v481_v33 }
  0x45   : > { %484 = vst [vmem:[%s2254_s6 + $0xe0] sm:$0xff] %v483_v34  ;;  %486 = vst [vmem:[%s2254_s6 + $0xe8] sm:$0xff] %v485_v35  ;;  %v487_v36 = vld [vmem:[%s2249_s5 + $0x1e0] sm:$0xff]  ;;  %v489_v37 = vld [vmem:[%s2249_s5 + $0x1f0] sm:$0xff] }
  0x46   : > { %v491_v38 = vld [vmem:[%s2249_s5 + $0x200] sm:$0xff]  ;;  %488 = vst [vmem:[%s2254_s6 + $0xf0] sm:$0xff] %v487_v36  ;;  %490 = vst [vmem:[%s2254_s6 + $0xf8] sm:$0xff] %v489_v37  ;;  %v493_v39 = vld [vmem:[%s2249_s5 + $0x210] sm:$0xff] }
  0x47   : > { %492 = vst [vmem:[%s2254_s6 + $0x100] sm:$0xff] %v491_v38  ;;  %v495_v40 = vld [vmem:[%s2249_s5 + $0x220] sm:$0xff]  ;;  %v497_v41 = vld [vmem:[%s2249_s5 + $0x230] sm:$0xff]  ;;  %494 = vst [vmem:[%s2254_s6 + $0x108] sm:$0xff] %v493_v39 }
  0x48   : > { %496 = vst [vmem:[%s2254_s6 + $0x110] sm:$0xff] %v495_v40  ;;  %498 = vst [vmem:[%s2254_s6 + $0x118] sm:$0xff] %v497_v41  ;;  %v499_v42 = vld [vmem:[%s2249_s5 + $0x240] sm:$0xff]  ;;  %v501_v43 = vld [vmem:[%s2249_s5 + $0x250] sm:$0xff] }
  0x49   : > { %v503_v44 = vld [vmem:[%s2249_s5 + $0x260] sm:$0xff]  ;;  %500 = vst [vmem:[%s2254_s6 + $0x120] sm:$0xff] %v499_v42  ;;  %502 = vst [vmem:[%s2254_s6 + $0x128] sm:$0xff] %v501_v43  ;;  %v505_v45 = vld [vmem:[%s2249_s5 + $0x270] sm:$0xff] }
  0x4a   : > { %504 = vst [vmem:[%s2254_s6 + $0x130] sm:$0xff] %v503_v44  ;;  %v507_v46 = vld [vmem:[%s2249_s5 + $0x280] sm:$0xff]  ;;  %v509_v47 = vld [vmem:[%s2249_s5 + $0x290] sm:$0xff]  ;;  %506 = vst [vmem:[%s2254_s6 + $0x138] sm:$0xff] %v505_v45 }
  0x4b   : > { %508 = vst [vmem:[%s2254_s6 + $0x140] sm:$0xff] %v507_v46  ;;  %510 = vst [vmem:[%s2254_s6 + $0x148] sm:$0xff] %v509_v47  ;;  %v511_v48 = vld [vmem:[%s2249_s5 + $0x2a0] sm:$0xff]  ;;  %v513_v49 = vld [vmem:[%s2249_s5 + $0x2b0] sm:$0xff] }
  0x4c   : > { %v515_v50 = vld [vmem:[%s2249_s5 + $0x2c0] sm:$0xff]  ;;  %512 = vst [vmem:[%s2254_s6 + $0x150] sm:$0xff] %v511_v48  ;;  %514 = vst [vmem:[%s2254_s6 + $0x158] sm:$0xff] %v513_v49  ;;  %v517_v51 = vld [vmem:[%s2249_s5 + $0x2d0] sm:$0xff] }
  0x4d   : > { %516 = vst [vmem:[%s2254_s6 + $0x160] sm:$0xff] %v515_v50  ;;  %v519_v52 = vld [vmem:[%s2249_s5 + $0x2e0] sm:$0xff]  ;;  %v521_v53 = vld [vmem:[%s2249_s5 + $0x2f0] sm:$0xff]  ;;  %518 = vst [vmem:[%s2254_s6 + $0x168] sm:$0xff] %v517_v51 }
  0x4e   : > { %520 = vst [vmem:[%s2254_s6 + $0x170] sm:$0xff] %v519_v52  ;;  %522 = vst [vmem:[%s2254_s6 + $0x178] sm:$0xff] %v521_v53  ;;  %v523_v54 = vld [vmem:[%s2249_s5 + $0x300] sm:$0xff]  ;;  %v525_v55 = vld [vmem:[%s2249_s5 + $0x310] sm:$0xff] }
  0x4f   : > { %v527_v56 = vld [vmem:[%s2249_s5 + $0x320] sm:$0xff]  ;;  %524 = vst [vmem:[%s2254_s6 + $0x180] sm:$0xff] %v523_v54  ;;  %526 = vst [vmem:[%s2254_s6 + $0x188] sm:$0xff] %v525_v55  ;;  %v529_v57 = vld [vmem:[%s2249_s5 + $0x330] sm:$0xff] }
  0x50   : > { %528 = vst [vmem:[%s2254_s6 + $0x190] sm:$0xff] %v527_v56  ;;  %v531_v58 = vld [vmem:[%s2249_s5 + $0x340] sm:$0xff]  ;;  %v533_v59 = vld [vmem:[%s2249_s5 + $0x350] sm:$0xff]  ;;  %530 = vst [vmem:[%s2254_s6 + $0x198] sm:$0xff] %v529_v57 }
  0x51   : > { %532 = vst [vmem:[%s2254_s6 + $0x1a0] sm:$0xff] %v531_v58  ;;  %534 = vst [vmem:[%s2254_s6 + $0x1a8] sm:$0xff] %v533_v59  ;;  %v535_v60 = vld [vmem:[%s2249_s5 + $0x360] sm:$0xff]  ;;  %v537_v61 = vld [vmem:[%s2249_s5 + $0x370] sm:$0xff] }
  0x52   : > { %v539_v62 = vld [vmem:[%s2249_s5 + $0x380] sm:$0xff]  ;;  %536 = vst [vmem:[%s2254_s6 + $0x1b0] sm:$0xff] %v535_v60  ;;  %538 = vst [vmem:[%s2254_s6 + $0x1b8] sm:$0xff] %v537_v61  ;;  %v541_v63 = vld [vmem:[%s2249_s5 + $0x390] sm:$0xff] }
  0x53   : > { %540 = vst [vmem:[%s2254_s6 + $0x1c0] sm:$0xff] %v539_v62  ;;  %v543_v0 = vld [vmem:[%s2249_s5 + $0x3a0] sm:$0xff]  ;;  %v545_v1 = vld [vmem:[%s2249_s5 + $0x3b0] sm:$0xff]  ;;  %542 = vst [vmem:[%s2254_s6 + $0x1c8] sm:$0xff] %v541_v63 }
  0x54   : > { %544 = vst [vmem:[%s2254_s6 + $0x1d0] sm:$0xff] %v543_v0  ;;  %546 = vst [vmem:[%s2254_s6 + $0x1d8] sm:$0xff] %v545_v1  ;;  %v547_v2 = vld [vmem:[%s2249_s5 + $0x3c0] sm:$0xff]  ;;  %v549_v3 = vld [vmem:[%s2249_s5 + $0x3d0] sm:$0xff] }
  0x55   : > { %v551_v4 = vld [vmem:[%s2249_s5 + $0x3e0] sm:$0xff]  ;;  %548 = vst [vmem:[%s2254_s6 + $0x1e0] sm:$0xff] %v547_v2  ;;  %550 = vst [vmem:[%s2254_s6 + $0x1e8] sm:$0xff] %v549_v3  ;;  %v553_v5 = vld [vmem:[%s2249_s5 + $0x3f0] sm:$0xff] }
  0x56   : > { %552 = vst [vmem:[%s2254_s6 + $0x1f0] sm:$0xff] %v551_v4  ;;  %v555_v6 = vld [vmem:[%s2249_s5 + $0x400] sm:$0xff]  ;;  %v557_v7 = vld [vmem:[%s2249_s5 + $0x410] sm:$0xff]  ;;  %554 = vst [vmem:[%s2254_s6 + $0x1f8] sm:$0xff] %v553_v5 }
  0x57   : > { %556 = vst [vmem:[%s2254_s6 + $0x200] sm:$0xff] %v555_v6  ;;  %558 = vst [vmem:[%s2254_s6 + $0x208] sm:$0xff] %v557_v7  ;;  %v559_v8 = vld [vmem:[%s2249_s5 + $0x420] sm:$0xff]  ;;  %v561_v9 = vld [vmem:[%s2249_s5 + $0x430] sm:$0xff] }
  0x58   : > { %v563_v10 = vld [vmem:[%s2249_s5 + $0x440] sm:$0xff]  ;;  %560 = vst [vmem:[%s2254_s6 + $0x210] sm:$0xff] %v559_v8  ;;  %562 = vst [vmem:[%s2254_s6 + $0x218] sm:$0xff] %v561_v9  ;;  %v565_v11 = vld [vmem:[%s2249_s5 + $0x450] sm:$0xff] }
  0x59   : > { %564 = vst [vmem:[%s2254_s6 + $0x220] sm:$0xff] %v563_v10  ;;  %v567_v12 = vld [vmem:[%s2249_s5 + $0x460] sm:$0xff]  ;;  %v569_v13 = vld [vmem:[%s2249_s5 + $0x470] sm:$0xff]  ;;  %566 = vst [vmem:[%s2254_s6 + $0x228] sm:$0xff] %v565_v11 }
  0x5a   : > { %568 = vst [vmem:[%s2254_s6 + $0x230] sm:$0xff] %v567_v12  ;;  %570 = vst [vmem:[%s2254_s6 + $0x238] sm:$0xff] %v569_v13  ;;  %v571_v14 = vld [vmem:[%s2249_s5 + $0x480] sm:$0xff]  ;;  %v573_v15 = vld [vmem:[%s2249_s5 + $0x490] sm:$0xff] }
  0x5b   : > { %v575_v16 = vld [vmem:[%s2249_s5 + $0x4a0] sm:$0xff]  ;;  %572 = vst [vmem:[%s2254_s6 + $0x240] sm:$0xff] %v571_v14  ;;  %574 = vst [vmem:[%s2254_s6 + $0x248] sm:$0xff] %v573_v15  ;;  %v577_v17 = vld [vmem:[%s2249_s5 + $0x4b0] sm:$0xff] }
  0x5c   : > { %576 = vst [vmem:[%s2254_s6 + $0x250] sm:$0xff] %v575_v16  ;;  %v579_v18 = vld [vmem:[%s2249_s5 + $0x4c0] sm:$0xff]  ;;  %v581_v19 = vld [vmem:[%s2249_s5 + $0x4d0] sm:$0xff]  ;;  %578 = vst [vmem:[%s2254_s6 + $0x258] sm:$0xff] %v577_v17 }
  0x5d   : > { %580 = vst [vmem:[%s2254_s6 + $0x260] sm:$0xff] %v579_v18  ;;  %582 = vst [vmem:[%s2254_s6 + $0x268] sm:$0xff] %v581_v19  ;;  %v583_v20 = vld [vmem:[%s2249_s5 + $0x4e0] sm:$0xff]  ;;  %v585_v21 = vld [vmem:[%s2249_s5 + $0x4f0] sm:$0xff] }
  0x5e   : > { %v587_v22 = vld [vmem:[%s2249_s5 + $0x500] sm:$0xff]  ;;  %584 = vst [vmem:[%s2254_s6 + $0x270] sm:$0xff] %v583_v20  ;;  %586 = vst [vmem:[%s2254_s6 + $0x278] sm:$0xff] %v585_v21  ;;  %v589_v23 = vld [vmem:[%s2249_s5 + $0x510] sm:$0xff] }
  0x5f   : > { %588 = vst [vmem:[%s2254_s6 + $0x280] sm:$0xff] %v587_v22  ;;  %v591_v24 = vld [vmem:[%s2249_s5 + $0x520] sm:$0xff]  ;;  %v593_v25 = vld [vmem:[%s2249_s5 + $0x530] sm:$0xff]  ;;  %590 = vst [vmem:[%s2254_s6 + $0x288] sm:$0xff] %v589_v23 }
  0x60   : > { %592 = vst [vmem:[%s2254_s6 + $0x290] sm:$0xff] %v591_v24  ;;  %594 = vst [vmem:[%s2254_s6 + $0x298] sm:$0xff] %v593_v25  ;;  %v595_v26 = vld [vmem:[%s2249_s5 + $0x540] sm:$0xff]  ;;  %v597_v27 = vld [vmem:[%s2249_s5 + $0x550] sm:$0xff] }
  0x61   : > { %v599_v28 = vld [vmem:[%s2249_s5 + $0x560] sm:$0xff]  ;;  %596 = vst [vmem:[%s2254_s6 + $0x2a0] sm:$0xff] %v595_v26  ;;  %598 = vst [vmem:[%s2254_s6 + $0x2a8] sm:$0xff] %v597_v27  ;;  %v601_v29 = vld [vmem:[%s2249_s5 + $0x570] sm:$0xff] }
  0x62   : > { %600 = vst [vmem:[%s2254_s6 + $0x2b0] sm:$0xff] %v599_v28  ;;  %v603_v30 = vld [vmem:[%s2249_s5 + $0x580] sm:$0xff]  ;;  %v605_v31 = vld [vmem:[%s2249_s5 + $0x590] sm:$0xff]  ;;  %602 = vst [vmem:[%s2254_s6 + $0x2b8] sm:$0xff] %v601_v29 }
  0x63   : > { %604 = vst [vmem:[%s2254_s6 + $0x2c0] sm:$0xff] %v603_v30  ;;  %606 = vst [vmem:[%s2254_s6 + $0x2c8] sm:$0xff] %v605_v31  ;;  %v607_v32 = vld [vmem:[%s2249_s5 + $0x5a0] sm:$0xff]  ;;  %v609_v33 = vld [vmem:[%s2249_s5 + $0x5b0] sm:$0xff] }
  0x64   : > { %v611_v34 = vld [vmem:[%s2249_s5 + $0x5c0] sm:$0xff]  ;;  %608 = vst [vmem:[%s2254_s6 + $0x2d0] sm:$0xff] %v607_v32  ;;  %610 = vst [vmem:[%s2254_s6 + $0x2d8] sm:$0xff] %v609_v33  ;;  %v613_v35 = vld [vmem:[%s2249_s5 + $0x5d0] sm:$0xff] }
  0x65   : > { %612 = vst [vmem:[%s2254_s6 + $0x2e0] sm:$0xff] %v611_v34  ;;  %v615_v36 = vld [vmem:[%s2249_s5 + $0x5e0] sm:$0xff]  ;;  %v617_v37 = vld [vmem:[%s2249_s5 + $0x5f0] sm:$0xff]  ;;  %614 = vst [vmem:[%s2254_s6 + $0x2e8] sm:$0xff] %v613_v35 }
  0x66   : > { %616 = vst [vmem:[%s2254_s6 + $0x2f0] sm:$0xff] %v615_v36  ;;  %618 = vst [vmem:[%s2254_s6 + $0x2f8] sm:$0xff] %v617_v37 }
  0x67 PF: > { %p1653_p0 = scmp.ge.s32.totalorder %s2112_s22, 1  ;;  %p631_p1 = scmp.lt.s32.totalorder %s2112_s22, 7 }
  0x69   : > { %p632_p2 = pnand %p1653_p0, %p631_p1 }
  0x6a   : > { %s638_s0 = sand.u32 (!%p632_p2), 1, %s2088_s16   ;;  %s645_s23 = sand.u32 (!%p632_p2), 1, %s2080_s14  }
  0x6b   : > { %635 = sbr.rel (%p632_p2) target bundleno = 492 (0x1ec), region = 85  ;;  %s672_s7 = sand.u32 (!%p632_p2), 1, %s2072_s12  }
  0x6c   : > { %s1782_s28 = smul.u32 (!%p632_p2), 48, %s638_s0  ;;  %s1654_s26 = sshll.u32 (!%p632_p2), %s672_s7, 4 }
  0x6d   : > { %s1783_s11 = smul.u32 (!%p632_p2), 768, %s645_s23  ;;  %s1655_s27 = sshll.u32 (!%p632_p2), %s2100_s19, 1 }
  0x6e   : > { %p680_p3 = scmp.lt.s32.totalorder (!%p632_p2), %s1655_s27, 3  ;;  %s2457_s6 = scalar_lea.vmem (!%p632_p2), [#allocation3], %s1782_s28 }
  0x6f   : > { %s2459_s1 = scalar_lea.vmem (!%p632_p2), [#allocation4], %s1783_s11  ;;  %s2461_s25 = scalar_lea.vmem (!%p632_p2), [#allocation5], %s1654_s26 }
  0x70   : > { %p1656_p4 = scmp.ne.s32.totalorder (!%p632_p2), %s2096_s18, 0 }
  0x72   : > { %s2646_s27 = smov (!%p680_p3, %s1655_s27), 3  ;;  %689 = sbr.rel (%p1656_p4) target bundleno = 121 (0x79), region = 97 }
  0x73   : > { %s682_s5 = scalar_lea.vmem %s2617_s2, %s2646_s27  ;;  %v2114_v38 = vmov (!%p1656_p4), 0.0  }
  0x74   : > { %690 = vst [vmem:[#allocation2] sm:$0xff] (!%p1656_p4), %v2114_v38  ;;  %691 = vst [vmem:[#allocation2 + $0x8] sm:$0xff] (!%p1656_p4), %v2114_v38 }
  0x75   : > { %692 = vst [vmem:[#allocation2 + $0x10] sm:$0xff] (!%p1656_p4), %v2114_v38  ;;  %693 = vst [vmem:[#allocation2 + $0x18] sm:$0xff] (!%p1656_p4), %v2114_v38 }
  0x79 PF: > { %v1873_v39 = vld [vmem:[%s2459_s1 + $0x104] ss:$8 sps:$4 sm:$0xff]   ;;  %v1875_v40 = vld [vmem:[%s2459_s1 + $0x100] ss:$8 sps:$4 sm:$0xff]   ;;  %v1876_v41 = vld [vmem:[%s2459_s1 + $0x114] ss:$8 sps:$4 sm:$0xff]  }
  0x7a   : > { %1353 = vmatprep.subr.bf16.mxu0 %v1873_v39  ;;  %v1878_v42 = vld [vmem:[%s2459_s1 + $0x110] ss:$8 sps:$4 sm:$0xff]   ;;  %v1879_v43 = vld [vmem:[%s2459_s1 + $0x124] ss:$8 sps:$4 sm:$0xff]   ;;  %v1881_v44 = vld [vmem:[%s2459_s1 + $0x120] ss:$8 sps:$4 sm:$0xff]  }
  0x7b   : > { %1354 = vmatpush1.bf16.msra.mxu0 %v1875_v40  ;;  %v1882_v45 = vld [vmem:[%s2459_s1 + $0x134] ss:$8 sps:$4 sm:$0xff]   ;;  %v1884_v46 = vld [vmem:[%s2459_s1 + $0x130] ss:$8 sps:$4 sm:$0xff]   ;;  %v1885_v47 = vld [vmem:[%s2459_s1 + $0x144] ss:$8 sps:$4 sm:$0xff]  }
  0x7c   : > { %1355 = vmatprep.subr.bf16.mxu0 %v1876_v41  ;;  %v1887_v48 = vld [vmem:[%s2459_s1 + $0x140] ss:$8 sps:$4 sm:$0xff]   ;;  %v1888_v49 = vld [vmem:[%s2459_s1 + $0x154] ss:$8 sps:$4 sm:$0xff]   ;;  %v1890_v50 = vld [vmem:[%s2459_s1 + $0x150] ss:$8 sps:$4 sm:$0xff]  }
  0x7d   : > { %v1891_v51 = vld [vmem:[%s2459_s1 + $0x164] ss:$8 sps:$4 sm:$0xff]   ;;  %v1923_v53 = vld [vmem:[%s2459_s1] ss:$8 sps:$4 sm:$0xff]   ;;  %v1894_v56 = vld [vmem:[%s2459_s1 + $0x174] ss:$8 sps:$4 sm:$0xff]  }
  0x7e   : > { %v1920_v52 = vld [vmem:[%s2459_s1 + $0x4] ss:$8 sps:$4 sm:$0xff]   ;;  %v1893_v54 = vld [vmem:[%s2459_s1 + $0x160] ss:$8 sps:$4 sm:$0xff]   ;;  %v1930_v57 = vld [vmem:[%s2459_s1 + $0x14] ss:$8 sps:$4 sm:$0xff]  }
  0x7f   : > { %1356 = vmatpush1.bf16.msra.mxu0 %v1878_v42  ;;  %1310 = vmatprep.subr.bf16.mxu1 %v1920_v52  ;;  %v1926_v55 = vld [vmem:[%s2457_s6 + $0xc] ss:$24 sps:$4 sm:$0xff]   ;;  %v1932_v58 = vld [vmem:[%s2459_s1 + $0x10] ss:$8 sps:$4 sm:$0xff]   ;;  %v1938_v62 = vld [vmem:[%s2459_s1 + $0x20] ss:$8 sps:$4 sm:$0xff]  }
  0x80   : > { %1357 = vmatprep.subr.bf16.mxu0 %v1879_v43  ;;  %1311 = vmatpush1.bf16.msra.mxu1 %v1923_v53  ;;  %v1896_v59 = vld [vmem:[%s2459_s1 + $0x170] ss:$8 sps:$4 sm:$0xff]   ;;  %v1897_v60 = vld [vmem:[%s2459_s1 + $0x184] ss:$8 sps:$4 sm:$0xff]   ;;  %v1899_v63 = vld [vmem:[%s2459_s1 + $0x180] ss:$8 sps:$4 sm:$0xff]  }
  0x81   : > { %1385 = vmatprep.mubr.bf16.mxu0 %v1926_v55  ;;  %1312 = vmatprep.subr.bf16.mxu1 %v1930_v57  ;;  %v1936_v61 = vld [vmem:[%s2459_s1 + $0x24] ss:$8 sps:$4 sm:$0xff]   ;;  %v1942_v0 = vld [vmem:[%s2459_s1 + $0x34] ss:$8 sps:$4 sm:$0xff]   ;;  %v1944_v2 = vld [vmem:[%s2459_s1 + $0x30] ss:$8 sps:$4 sm:$0xff]  }
  0x82   : > { %v1900_v1 = vld [vmem:[%s2459_s1 + $0x194] ss:$8 sps:$4 sm:$0xff]   ;;  %v1948_v3 = vld [vmem:[%s2459_s1 + $0x44] ss:$8 sps:$4 sm:$0xff]   ;;  %v1902_v4 = vld [vmem:[%s2459_s1 + $0x190] ss:$8 sps:$4 sm:$0xff]  }
  0x83   : > { %1358 = vmatpush1.bf16.msra.mxu0 %v1881_v44  ;;  %v1903_v5 = vld [vmem:[%s2459_s1 + $0x1a4] ss:$8 sps:$4 sm:$0xff]   ;;  %v1950_v6 = vld [vmem:[%s2459_s1 + $0x40] ss:$8 sps:$4 sm:$0xff]   ;;  %v1954_v7 = vld [vmem:[%s2459_s1 + $0x54] ss:$8 sps:$4 sm:$0xff]  }
  0x84   : > { %1359 = vmatprep.subr.bf16.mxu0 %v1882_v45  ;;  %1313 = vmatpush1.bf16.msra.mxu1 %v1932_v58  ;;  %v1905_v8 = vld [vmem:[%s2459_s1 + $0x1a0] ss:$8 sps:$4 sm:$0xff]   ;;  %v1906_v9 = vld [vmem:[%s2459_s1 + $0x1b4] ss:$8 sps:$4 sm:$0xff]   ;;  %v1956_v10 = vld [vmem:[%s2459_s1 + $0x50] ss:$8 sps:$4 sm:$0xff]  }
  0x85   : > { %1314 = vmatprep.subr.bf16.mxu1 %v1936_v61  ;;  %v1960_v11 = vld [vmem:[%s2459_s1 + $0x64] ss:$8 sps:$4 sm:$0xff]   ;;  %v1908_v12 = vld [vmem:[%s2459_s1 + $0x1b0] ss:$8 sps:$4 sm:$0xff]   ;;  %v1962_v14 = vld [vmem:[%s2459_s1 + $0x60] ss:$8 sps:$4 sm:$0xff]  }
  0x86   : > { %v1909_v13 = vld [vmem:[%s2459_s1 + $0x1c4] ss:$8 sps:$4 sm:$0xff]   ;;  %v1966_v15 = vld [vmem:[%s2459_s1 + $0x74] ss:$8 sps:$4 sm:$0xff]   ;;  %v1911_v16 = vld [vmem:[%s2459_s1 + $0x1c0] ss:$8 sps:$4 sm:$0xff]  }
  0x87   : > { %1360 = vmatpush1.bf16.msra.mxu0 %v1884_v46  ;;  %v1912_v17 = vld [vmem:[%s2459_s1 + $0x1d4] ss:$8 sps:$4 sm:$0xff]   ;;  %v1968_v18 = vld [vmem:[%s2459_s1 + $0x70] ss:$8 sps:$4 sm:$0xff]   ;;  %v1972_v19 = vld [vmem:[%s2459_s1 + $0x84] ss:$8 sps:$4 sm:$0xff]  }
  0x88   : > { %1361 = vmatprep.subr.bf16.mxu0 %v1885_v47  ;;  %1315 = vmatpush1.bf16.msra.mxu1 %v1938_v62  ;;  %v1914_v20 = vld [vmem:[%s2459_s1 + $0x1d0] ss:$8 sps:$4 sm:$0xff]   ;;  %v1915_v21 = vld [vmem:[%s2459_s1 + $0x1e4] ss:$8 sps:$4 sm:$0xff]   ;;  %v1974_v22 = vld [vmem:[%s2459_s1 + $0x80] ss:$8 sps:$4 sm:$0xff]  }
  0x89   : > { %1316 = vmatprep.subr.bf16.mxu1 %v1942_v0  ;;  %v1978_v23 = vld [vmem:[%s2459_s1 + $0x94] ss:$8 sps:$4 sm:$0xff]   ;;  %v1917_v24 = vld [vmem:[%s2459_s1 + $0x1e0] ss:$8 sps:$4 sm:$0xff]   ;;  %v1980_v26 = vld [vmem:[%s2459_s1 + $0x90] ss:$8 sps:$4 sm:$0xff]  }
  0x8a   : > { %v1918_v25 = vld [vmem:[%s2459_s1 + $0x1f4] ss:$8 sps:$4 sm:$0xff]   ;;  %v1984_v27 = vld [vmem:[%s2459_s1 + $0xa4] ss:$8 sps:$4 sm:$0xff]   ;;  %v1922_v28 = vld [vmem:[%s2459_s1 + $0x1f0] ss:$8 sps:$4 sm:$0xff]  }
  0x8b   : > { %1362 = vmatpush1.bf16.msra.mxu0 %v1887_v48  ;;  %v1929_v29 = vld [vmem:[%s2459_s1 + $0x204] ss:$8 sps:$4 sm:$0xff]   ;;  %v1986_v30 = vld [vmem:[%s2459_s1 + $0xa0] ss:$8 sps:$4 sm:$0xff]   ;;  %v1990_v32 = vld [vmem:[%s2459_s1 + $0xb4] ss:$8 sps:$4 sm:$0xff]  }
  0x8c   : > { %1363 = vmatprep.subr.bf16.mxu0 %v1888_v49  ;;  %1317 = vmatpush1.bf16.msra.mxu1 %v1944_v2  ;;  %v1924_v31 = vld [vmem:[%s2457_s6 + $0x8] ss:$24 sps:$4 sm:$0xff]   ;;  %v1935_v34 = vld [vmem:[%s2459_s1 + $0x214] ss:$8 sps:$4 sm:$0xff]   ;;  %v1996_v37 = vld [vmem:[%s2459_s1 + $0xc4] ss:$8 sps:$4 sm:$0xff]  }
  0x8d   : > { %1318 = vmatprep.subr.bf16.mxu1 %v1948_v3  ;;  %v1927_v33 = vld [vmem:[%s2459_s1 + $0x200] ss:$8 sps:$4 sm:$0xff]   ;;  %v1992_v35 = vld [vmem:[%s2459_s1 + $0xb0] ss:$8 sps:$4 sm:$0xff]   ;;  %v2019_v36 = vld [vmem:[%s2457_s6 + $0x4] ss:$24 sps:$4 sm:$0xff]  }
  0x8e   : > { %v1933_v38 = vld [vmem:[%s2459_s1 + $0x210] ss:$8 sps:$4 sm:$0xff]   ;;  %1342 = vmatprep.mubr.bf16.mxu1 %v2019_v36  ;;  %v2025_v39 = vld [vmem:[%s2457_s6 + $0x14] ss:$24 sps:$4 sm:$0xff]   ;;  %v1998_v41 = vld [vmem:[%s2459_s1 + $0xc0] ss:$8 sps:$4 sm:$0xff]  }
  0x8f   : > { %1364 = vmatpush1.bf16.msra.mxu0 %v1890_v50  ;;  %v1941_v40 = vld [vmem:[%s2459_s1 + $0x224] ss:$8 sps:$4 sm:$0xff]   ;;  %v2002_v42 = vld [vmem:[%s2459_s1 + $0xd4] ss:$8 sps:$4 sm:$0xff]   ;;  %v1939_v43 = vld [vmem:[%s2459_s1 + $0x220] ss:$8 sps:$4 sm:$0xff]  }
  0x90   : > { %1365 = vmatprep.subr.bf16.mxu0 %v1891_v51  ;;  %1319 = vmatpush1.bf16.msra.mxu1 %v1950_v6  ;;  %v1947_v44 = vld [vmem:[%s2459_s1 + $0x234] ss:$8 sps:$4 sm:$0xff]   ;;  %v2004_v45 = vld [vmem:[%s2459_s1 + $0xd0] ss:$8 sps:$4 sm:$0xff]   ;;  %v2008_v46 = vld [vmem:[%s2459_s1 + $0xe4] ss:$8 sps:$4 sm:$0xff]  }
  0x91   : > { %1320 = vmatprep.subr.bf16.mxu1 %v1954_v7  ;;  %v1945_v47 = vld [vmem:[%s2459_s1 + $0x230] ss:$8 sps:$4 sm:$0xff]   ;;  %v1953_v48 = vld [vmem:[%s2459_s1 + $0x244] ss:$8 sps:$4 sm:$0xff]   ;;  %v2010_v49 = vld [vmem:[%s2459_s1 + $0xe0] ss:$8 sps:$4 sm:$0xff]  }
  0x92   : > { %v2014_v50 = vld [vmem:[%s2459_s1 + $0xf4] ss:$8 sps:$4 sm:$0xff]   ;;  %v1951_v51 = vld [vmem:[%s2459_s1 + $0x240] ss:$8 sps:$4 sm:$0xff]   ;;  %v2016_v53 = vld [vmem:[%s2459_s1 + $0xf0] ss:$8 sps:$4 sm:$0xff]  }
  0x93   : > { %1366 = vmatpush1.bf16.msra.mxu0 %v1893_v54  ;;  %v1959_v52 = vld [vmem:[%s2459_s1 + $0x254] ss:$8 sps:$4 sm:$0xff]   ;;  %v1957_v54 = vld [vmem:[%s2459_s1 + $0x250] ss:$8 sps:$4 sm:$0xff]   ;;  %v1965_v55 = vld [vmem:[%s2459_s1 + $0x264] ss:$8 sps:$4 sm:$0xff]  }
  0x94   : > { %1367 = vmatprep.subr.bf16.mxu0 %v1894_v56  ;;  %1321 = vmatpush1.bf16.msra.mxu1 %v1956_v10  ;;  %v2017_v56 = vld [vmem:[%s2457_s6] ss:$24 sps:$4 sm:$0xff]   ;;  %v1971_v58 = vld [vmem:[%s2459_s1 + $0x274] ss:$8 sps:$4 sm:$0xff]   ;;  %v1989_v0 = vld [vmem:[%s2459_s1 + $0x2a4] ss:$8 sps:$4 sm:$0xff]  }
  0x95   : > { %1322 = vmatprep.subr.bf16.mxu1 %v1960_v11  ;;  %v1963_v57 = vld [vmem:[%s2459_s1 + $0x260] ss:$8 sps:$4 sm:$0xff]   ;;  %v1983_v62 = vld [vmem:[%s2459_s1 + $0x294] ss:$8 sps:$4 sm:$0xff]   ;;  %v1993_v3 = vld [vmem:[%s2459_s1 + $0x2b0] ss:$8 sps:$4 sm:$0xff]  }
  0x96   : > { %v1975_v61 = vld [vmem:[%s2459_s1 + $0x280] ss:$8 sps:$4 sm:$0xff]   ;;  %v1995_v2 = vld [vmem:[%s2459_s1 + $0x2b4] ss:$8 sps:$4 sm:$0xff]   ;;  %v2005_v7 = vld [vmem:[%s2459_s1 + $0x2d0] ss:$8 sps:$4 sm:$0xff]  }
  0x97   : > { %1368 = vmatpush1.bf16.msra.mxu0 %v1896_v59  ;;  %v1969_v59 = vld [vmem:[%s2459_s1 + $0x270] ss:$8 sps:$4 sm:$0xff]   ;;  %v2007_v6 = vld [vmem:[%s2459_s1 + $0x2d4] ss:$8 sps:$4 sm:$0xff]   ;;  %p1759_p5 = scmp.ne.s32.totalorder %s2096_s18, 2 }
  0x98   : > { %1369 = vmatprep.subr.bf16.mxu0 %v1897_v60  ;;  %1323 = vmatpush1.bf16.msra.mxu1 %v1962_v14  ;;  %v1977_v60 = vld [vmem:[%s2459_s1 + $0x284] ss:$8 sps:$4 sm:$0xff]   ;;  %v2022_v10 = vld [vmem:[%s2459_s1 + $0x2f4] ss:$8 sps:$4 sm:$0xff]   ;;  %v2020_v11 = vld [vmem:[%s2459_s1 + $0x2f0] ss:$8 sps:$4 sm:$0xff]  }
  0x99   : > { %1324 = vmatprep.subr.bf16.mxu1 %v1966_v15 }
  0x9b   : > { %1370 = vmatpush1.bf16.msra.mxu0 %v1899_v63  ;;  %v1981_v63 = vld [vmem:[%s2459_s1 + $0x290] ss:$8 sps:$4 sm:$0xff]  }
  0x9c   : > { %1371 = vmatprep.subr.bf16.mxu0 %v1900_v1  ;;  %1325 = vmatpush1.bf16.msra.mxu1 %v1968_v18  ;;  %v1987_v1 = vld [vmem:[%s2459_s1 + $0x2a0] ss:$8 sps:$4 sm:$0xff]  }
  0x9d   : > { %1326 = vmatprep.subr.bf16.mxu1 %v1972_v19 }
  0x9f   : > { %1372 = vmatpush1.bf16.msra.mxu0 %v1902_v4  ;;  %v2001_v4 = vld [vmem:[%s2459_s1 + $0x2c4] ss:$8 sps:$4 sm:$0xff]  }
  0xa0   : > { %1373 = vmatprep.subr.bf16.mxu0 %v1903_v5  ;;  %1327 = vmatpush1.bf16.msra.mxu1 %v1974_v22  ;;  %v1999_v5 = vld [vmem:[%s2459_s1 + $0x2c0] ss:$8 sps:$4 sm:$0xff]  }
  0xa1   : > { %1328 = vmatprep.subr.bf16.mxu1 %v1978_v23  ;;  %v696_v23 = vld [vmem:[#allocation2 + $0x10] sm:$0xff] }
  0xa3   : > { %1374 = vmatpush1.bf16.msra.mxu0 %v1905_v8  ;;  %v2013_v8 = vld [vmem:[%s2459_s1 + $0x2e4] ss:$8 sps:$4 sm:$0xff]  }
  0xa4   : > { %1375 = vmatprep.subr.bf16.mxu0 %v1906_v9  ;;  %1329 = vmatpush1.bf16.msra.mxu1 %v1980_v26  ;;  %v2011_v9 = vld [vmem:[%s2459_s1 + $0x2e0] ss:$8 sps:$4 sm:$0xff]  }
  0xa5   : > { %1330 = vmatprep.subr.bf16.mxu1 %v1984_v27  ;;  %v697_v27 = vld [vmem:[#allocation2 + $0x18] sm:$0xff] }
  0xa7   : > { %1376 = vmatpush1.bf16.msra.mxu0 %v1908_v12  ;;  %v2023_v12 = vld [vmem:[%s2457_s6 + $0x10] ss:$24 sps:$4 sm:$0xff]  }
  0xa8   : > { %1377 = vmatprep.subr.bf16.mxu0 %v1909_v13  ;;  %1331 = vmatpush1.bf16.msra.mxu1 %v1986_v30 }
  0xa9   : > { %1332 = vmatprep.subr.bf16.mxu1 %v1990_v32 }
  0xab   : > { %1378 = vmatpush1.bf16.msra.mxu0 %v1911_v16 }
  0xac   : > { %1379 = vmatprep.subr.bf16.mxu0 %v1912_v17  ;;  %1333 = vmatpush1.bf16.msra.mxu1 %v1992_v35  ;;  %v694_v17 = vld [vmem:[#allocation2] sm:$0xff] }
  0xad   : > { %1334 = vmatprep.subr.bf16.mxu1 %v1996_v37  ;;  %v1455_v35 = vld [vmem:[%s682_s5] sm:$0x3] (!%p1759_p5) }
  0xaf   : > { %1380 = vmatpush1.bf16.msra.mxu0 %v1914_v20  ;;  %v695_v20 = vld [vmem:[#allocation2 + $0x8] sm:$0xff] }
  0xb0   : > { %1381 = vmatprep.subr.bf16.mxu0 %v1915_v21  ;;  %1335 = vmatpush1.bf16.msra.mxu1 %v1998_v41 }
  0xb1   : > { %1336 = vmatprep.subr.bf16.mxu1 %v2002_v42 }
  0xb3   : > { %1382 = vmatpush1.bf16.msra.mxu0 %v1917_v24 }
  0xb4   : > { %1383 = vmatprep.subr.bf16.mxu0 %v1918_v25  ;;  %1337 = vmatpush1.bf16.msra.mxu1 %v2004_v45 }
  0xb5   : > { %1338 = vmatprep.subr.bf16.mxu1 %v2008_v46 }
  0xb7   : > { %1384 = vmatpush1.bf16.msra.mxu0 %v1922_v28 }
  0xb8   : > { %1396 = vmatprep.subr.bf16.mxu0 %v1929_v29  ;;  %1339 = vmatpush1.bf16.msra.mxu1 %v2010_v49 }
  0xb9   : > { %1340 = vmatprep.subr.bf16.mxu1 %v2014_v50 }
  0xba   : > { %1386 = vmatmul.mubr.bf16.vlgmr.msra.gmra.mrb[0].mxu0 %v1924_v31 }
  0xbb   : > { %1397 = vmatpush1.bf16.msra.mxu0 %v1927_v33  ;;  %1428 = vmatprep.mubr.bf16.mxu0 %v2025_v39  ;;  %v1457_v33 = vlaneseq (!%p1759_p5) }
  0xbc   : > { %1398 = vmatprep.subr.bf16.mxu0 %v1935_v34  ;;  %1341 = vmatpush1.bf16.msra.mxu1 %v2016_v53 }
  0xbd   : > { %v1458_v34 = vshrl.u32 (!%p1759_p5), %v1457_v33, 7 }
  0xbf   : > { %1399 = vmatpush1.bf16.msra.mxu0 %v1933_v38  ;;  %1343 = vmatmul.mubr.bf16.vlgmr.msra.gmra.mrb[0].mxu1 %v2017_v56  ;;  %v1459_v37 = vsub.s32 (!%p1759_p5), 0, %v1458_v34  ;;  %v1463_v38 = vsub.s32 (!%p1759_p5), 1, %v1458_v34 }
  0xc0   : > { %1400 = vmatprep.subr.bf16.mxu0 %v1941_v40 }
  0xc1   : > { %v1460_v42 = vrot.slane (!%p1759_p5), %v1455_v35, %v1459_v37 }
  0xc3   : > { %1401 = vmatpush1.bf16.msra.mxu0 %v1939_v43  ;;  %v1464_v43 = vrot.slane (!%p1759_p5), %v1455_v35, %v1463_v38 }
  0xc4   : > { %1402 = vmatprep.subr.bf16.mxu0 %v1947_v44 }
  0xc7   : > { %1403 = vmatpush1.bf16.msra.mxu0 %v1945_v47 }
  0xc8   : > { %1404 = vmatprep.subr.bf16.mxu0 %v1953_v48 }
  0xcb   : > { %1405 = vmatpush1.bf16.msra.mxu0 %v1951_v51 }
  0xcc   : > { %1406 = vmatprep.subr.bf16.mxu0 %v1959_v52 }
  0xcf   : > { %1407 = vmatpush1.bf16.msra.mxu0 %v1957_v54 }
  0xd0   : > { %1408 = vmatprep.subr.bf16.mxu0 %v1965_v55 }
  0xd3   : > { %1409 = vmatpush1.bf16.msra.mxu0 %v1963_v57 }
  0xd4   : > { %1410 = vmatprep.subr.bf16.mxu0 %v1971_v58 }
  0xd7   : > { %1411 = vmatpush1.bf16.msra.mxu0 %v1969_v59 }
  0xd8   : > { %1412 = vmatprep.subr.bf16.mxu0 %v1977_v60 }
  0xdb   : > { %1413 = vmatpush1.bf16.msra.mxu0 %v1975_v61 }
  0xdc   : > { %1414 = vmatprep.subr.bf16.mxu0 %v1983_v62 }
  0xdf   : > { %1415 = vmatpush1.bf16.msra.mxu0 %v1981_v63 }
  0xe0   : > { %1416 = vmatprep.subr.bf16.mxu0 %v1989_v0 }
  0xe3   : > { %1417 = vmatpush1.bf16.msra.mxu0 %v1987_v1 }
  0xe4   : > { %1418 = vmatprep.subr.bf16.mxu0 %v1995_v2 }
  0xe7   : > { %1419 = vmatpush1.bf16.msra.mxu0 %v1993_v3 }
  0xe8   : > { %1420 = vmatprep.subr.bf16.mxu0 %v2001_v4 }
  0xeb   : > { %1421 = vmatpush1.bf16.msra.mxu0 %v1999_v5 }
  0xec   : > { %1422 = vmatprep.subr.bf16.mxu0 %v2007_v6 }
  0xef   : > { %1423 = vmatpush1.bf16.msra.mxu0 %v2005_v7 }
  0xf0   : > { %1424 = vmatprep.subr.bf16.mxu0 %v2013_v8 }
  0xf3   : > { %1425 = vmatpush1.bf16.msra.mxu0 %v2011_v9 }
  0xf4   : > { %1426 = vmatprep.subr.bf16.mxu0 %v2022_v10 }
  0xf7   : > { %1427 = vmatpush1.bf16.msra.mxu0 %v2020_v11 }
  0xfa   : > { %1429 = vmatmul.mubr.bf16.vlgmr.msra.gmra.mrb[0].mxu0 %v2023_v12 }
 0x192   : > { %v1344_v13 = vpop.f32.mrb[0].mxu1 }
 0x193   : > { %v1346_v14 = vpop.f32.mrb[1].mxu1 }
 0x194   : > { %v1348_v15 = vpop.f32.mrb[2].mxu1 }
 0x195   : > { %v1350_v16 = vpop.f32.mrb[3].mxu1 }
 0x1cd   : > { %v1430_v18 = vpop.f32.mrb[0].mxu0 }
 0x1ce   : > { %v1772_v19 = vadd.f32 %v1430_v18, %v1344_v13  ;;  %v1432_v21 = vpop.f32.mrb[1].mxu0 }
 0x1cf   : > { %v1773_v22 = vadd.f32 %v1432_v21, %v1346_v14  ;;  %v1434_v24 = vpop.f32.mrb[2].mxu0  ;;  %1450 = sbr.rel (%p1759_p5) target bundleno = 484 (0x1e4), region = 101 }
 0x1d0   : > { %v1439_v25 = vadd.f32 %v1772_v19, %v694_v17  ;;  %v1774_v26 = vadd.f32 %v1434_v24, %v1348_v15  ;;  %v1436_v28 = vpop.f32.mrb[3].mxu0 }
 0x1d1   : > { %v1440_v29 = vadd.f32 %v1773_v22, %v695_v20  ;;  %v1775_v30 = vadd.f32 %v1436_v28, %v1350_v16 }
 0x1d2   : > { %1443 = vst [vmem:[#allocation2] sm:$0xff] %v1439_v25  ;;  %v1441_v31 = vadd.f32 %v1774_v26, %v696_v23 }
 0x1d3   : > { %1444 = vst [vmem:[#allocation2 + $0x8] sm:$0xff] %v1440_v29  ;;  %v1442_v32 = vadd.f32 %v1775_v30, %v697_v27 }
 0x1d4   : > { %1445 = vst [vmem:[#allocation2 + $0x10] sm:$0xff] %v1441_v31 }
 0x1d5   : > { %1446 = vst [vmem:[#allocation2 + $0x18] sm:$0xff] %v1442_v32 }
 0x1d9   : > { %v1451_v36 = vld [vmem:[#allocation2] sm:$0xff] }
 0x1da   : > { %v1452_v39 = vld [vmem:[#allocation2 + $0x8] sm:$0xff]  ;;  %v1467_v44 = vadd.f32 %v1460_v42, %v1451_v36 }
 0x1db   : > { %v1453_v40 = vld [vmem:[#allocation2 + $0x10] sm:$0xff]  ;;  %v1468_v45 = vadd.f32 %v1464_v43, %v1452_v39 }
 0x1dc   : > { %v1454_v41 = vld [vmem:[#allocation2 + $0x18] sm:$0xff]  ;;  %v1469_v46 = vadd.f32 %v1460_v42, %v1453_v40  ;;  %v1471_v48 = vmax.f32 %v1467_v44, 0.0 }
 0x1dd   : > { %v1470_v47 = vadd.f32 %v1464_v43, %v1454_v41  ;;  %v1472_v49 = vmax.f32 %v1468_v45, 0.0 }
 0x1de   : > { %v1473_v50 = vmax.f32 %v1469_v46, 0.0 }
 0x1df   : > { %v1474_v51 = vmax.f32 %v1470_v47, 0.0  ;;  %v1769_v52 = vpack.c.bf16 %v1472_v49, %v1471_v48 }
 0x1e1   : > { %v1770_v53 = vpack.c.bf16 %v1474_v51, %v1473_v50  ;;  %1487 = vst [vmem:[%s2461_s25] sm:$0xff] %v1769_v52 }
 0x1e3   : > { %1488 = vst [vmem:[%s2461_s25 + $0x8] sm:$0xff] %v1770_v53 }
 0x1e4 PF: > { %1495 = sbr.rel (!%p2229_p12) target bundleno = 492 (0x1ec), region = 105  ;;  %s1771_s14 = sshll.u32 (%p2229_p12), %s2100_s19, 3 }
 0x1e5   : > { %s1501_s0 = scalar_lea.vmem (%p2229_p12), %s2618_s3, %s1771_s14 }
 0x1e8   : > { %v1531_v54 = vld [vmem:[%s2461_s25] sm:$0xff] (%p2229_p12) }
 0x1e9   : > { %1532 = vst [vmem:[%s1501_s0] sm:$0xff] (%p2229_p12), %v1531_v54 }
 0x1ea   : > { %v1533_v55 = vld [vmem:[%s2461_s25 + $0x8] sm:$0xff] (%p2229_p12) }
 0x1eb   : > { %1534 = vst [vmem:[%s1501_s0 + $0x10] sm:$0xff] %v1533_v55 }
 0x1ec PF: > { %s13_s22 = sadd.s32 1, %s2112_s22   ;;  %s2628_s25 = sld [smem:[#allocation6_spill]] }
 0x1ed   : > { %p10_p6 = scmp.ge.s32.totalorder %s13_s22, 8   ;;  %s2629_s12 = smov %s2076_s13 }
 0x1ee   : > { %s2630_s13 = smov %s2227_s9  ;;  %s2631_s14 = smov %s2084_s15 }
 0x1ef   : > { %s2632_s15 = smov %s2224_s8  ;;  %s2633_s16 = smov %s2092_s17 }
 0x1f0   : > { %s2634_s17 = smov %s2210_s30  ;;  %s2635_s18 = smov %s2104_s20 }
 0x1f1   : > { %s2636_s19 = smov %s2108_s21  ;;  %s2637_s20 = smov %s2640_s24 }
 0x1f2   : > { %s2638_s21 = smov %s2628_s25  ;;  %12 = sbr.rel (!%p10_p6) target bundleno = 9 (0x9), region = 185 }

// kernel: forward.66
= control target key start
LH: loop header
LB: loop body
LE: loop exit
PB: predicated region body
PF: predicated region fallthrough
CT: control target
= control target key end

     0   :  { %s1079_s12 = smov 0   ;;  %s1081_s13 = smov 0   ;;  %s1267_s0 = inlined_call_operand.vmem [shape: bf16[16,256], index: 0, kind: input, shape index: {}]   ;;  %s1268_s1 = inlined_call_operand.vmem [shape: bf16[256,512], index: 1, kind: input, shape index: {}]   ;;  %s1269_s2 = inlined_call_operand.vmem [shape: f32[1,512], index: 2, kind: input, shape index: {}]   ;;  %s1270_s3 = inlined_call_operand.vmem [shape: bf16[16,512], index: 3, kind: output, shape index: {}]  }
   0x1   :  { %s1083_s14 = smov 0   ;;  %s1085_s15 = smov 0  }
   0x2   :  { %s1087_s16 = smov 0  }
   0x3 LB: > { %s28_s17 = sadd.s32 1, %s1053_s15  ;;  %s871_s18 = sadd.s32 4294967295, %s1057_s16   ;;  %s1057_s16 = sphi %s1087_s16, %s13_s16   ;;  %s1053_s15 = sphi %s1085_s15, %s1275_s15   ;;  %s1049_s14 = sphi %s1083_s14, %s1274_s14   ;;  %s1045_s13 = sphi %s1081_s13, %s1273_s13   ;;  %s1041_s12 = sphi %s1079_s12, %s1272_s12  }
   0x4   : > { %p30_p0 = scmp.ge.s32.totalorder %s28_s17, 2  ;;  %p76_p1 = scmp.ne.s32.totalorder %s1045_s13, %s1041_s12 }
   0x5   : > { %p77_p2 = scmp.eq.s32.totalorder %s1057_s16, 0  ;;  %p134_p4 = scmp.eq.s32.totalorder %s871_s18, 1 }
   0x6   : > { %s1277_s17 = smov (%p30_p0, %s28_s17), 0  ;;  %s69_s20 = sadd.s32 1, %s1045_s13 }
   0x7   : > { %p78_p3 = por %p77_p2, %p76_p1  ;;  %s65_s19 = ssub.s32 %s1053_s15, %s1277_s17 }
   0x8   : > { %p67_p5 = scmp.eq.s32.totalorder %s65_s19, 0  ;;  %p1114_p6 = por %p134_p4, %p76_p1 }
   0x9   : > { %p875_p7 = scmp.ge.s32.totalorder %s1057_s16, 2 }
   0xa   : > { %s1119_s22 = scalar_select %p67_p5, %s1045_s13, %s69_s20  }
   0xb   : > { %171 = sbr.rel (%p875_p7) target bundleno = 38 (0x26), region = 20 }
  0x12   : > { %174 = sbr.rel (!%p78_p3) target bundleno = 38 (0x26), region = 24  ;;  %s176_s23 = sand.u32 (%p78_p3), 1, %s1045_s13  }
  0x13   : > { %s924_s24 = sshll.u32 (%p78_p3), %s1053_s15, 3  ;;  %s876_s25 = sshll.u32 (%p78_p3), %s176_s23, 8 }
  0x14   : > { %s1127_s28 = scalar_lea.vmem (%p78_p3), %s1268_s1, %s924_s24  ;;  %s1132_s29 = scalar_lea.vmem (%p78_p3), [#allocation3], %s876_s25 }
  0x15   : > { %v274_v0 = vld [vmem:[%s1127_s28] sm:$0xff] (%p78_p3)  ;;  %v276_v1 = vld [vmem:[%s1127_s28 + $0x10] sm:$0xff] (%p78_p3) }
  0x16   : > { %v278_v2 = vld [vmem:[%s1127_s28 + $0x20] sm:$0xff] (%p78_p3)  ;;  %275 = vst [vmem:[%s1132_s29] sm:$0xff] (%p78_p3), %v274_v0  ;;  %277 = vst [vmem:[%s1132_s29 + $0x8] sm:$0xff] (%p78_p3), %v276_v1  ;;  %v280_v3 = vld [vmem:[%s1127_s28 + $0x30] sm:$0xff] (%p78_p3) }
  0x17   : > { %279 = vst [vmem:[%s1132_s29 + $0x10] sm:$0xff] (%p78_p3), %v278_v2  ;;  %v282_v4 = vld [vmem:[%s1127_s28 + $0x40] sm:$0xff] (%p78_p3)  ;;  %v284_v5 = vld [vmem:[%s1127_s28 + $0x50] sm:$0xff] (%p78_p3)  ;;  %281 = vst [vmem:[%s1132_s29 + $0x18] sm:$0xff] (%p78_p3), %v280_v3 }
  0x18   : > { %283 = vst [vmem:[%s1132_s29 + $0x20] sm:$0xff] (%p78_p3), %v282_v4  ;;  %285 = vst [vmem:[%s1132_s29 + $0x28] sm:$0xff] (%p78_p3), %v284_v5  ;;  %v286_v6 = vld [vmem:[%s1127_s28 + $0x60] sm:$0xff] (%p78_p3)  ;;  %v288_v7 = vld [vmem:[%s1127_s28 + $0x70] sm:$0xff] (%p78_p3) }
  0x19   : > { %v290_v8 = vld [vmem:[%s1127_s28 + $0x80] sm:$0xff]  ;;  %287 = vst [vmem:[%s1132_s29 + $0x30] sm:$0xff] %v286_v6  ;;  %289 = vst [vmem:[%s1132_s29 + $0x38] sm:$0xff] %v288_v7  ;;  %v292_v9 = vld [vmem:[%s1127_s28 + $0x90] sm:$0xff] }
  0x1a   : > { %291 = vst [vmem:[%s1132_s29 + $0x40] sm:$0xff] %v290_v8  ;;  %v294_v10 = vld [vmem:[%s1127_s28 + $0xa0] sm:$0xff]  ;;  %v296_v11 = vld [vmem:[%s1127_s28 + $0xb0] sm:$0xff]  ;;  %293 = vst [vmem:[%s1132_s29 + $0x48] sm:$0xff] %v292_v9 }
  0x1b   : > { %295 = vst [vmem:[%s1132_s29 + $0x50] sm:$0xff] %v294_v10  ;;  %297 = vst [vmem:[%s1132_s29 + $0x58] sm:$0xff] %v296_v11  ;;  %v298_v12 = vld [vmem:[%s1127_s28 + $0xc0] sm:$0xff]  ;;  %v300_v13 = vld [vmem:[%s1127_s28 + $0xd0] sm:$0xff] }
  0x1c   : > { %v302_v14 = vld [vmem:[%s1127_s28 + $0xe0] sm:$0xff]  ;;  %299 = vst [vmem:[%s1132_s29 + $0x60] sm:$0xff] %v298_v12  ;;  %301 = vst [vmem:[%s1132_s29 + $0x68] sm:$0xff] %v300_v13  ;;  %v304_v15 = vld [vmem:[%s1127_s28 + $0xf0] sm:$0xff] }
  0x1d   : > { %303 = vst [vmem:[%s1132_s29 + $0x70] sm:$0xff] %v302_v14  ;;  %v306_v16 = vld [vmem:[%s1127_s28 + $0x100] sm:$0xff]  ;;  %v308_v17 = vld [vmem:[%s1127_s28 + $0x110] sm:$0xff]  ;;  %305 = vst [vmem:[%s1132_s29 + $0x78] sm:$0xff] %v304_v15 }
  0x1e   : > { %307 = vst [vmem:[%s1132_s29 + $0x80] sm:$0xff] %v306_v16  ;;  %309 = vst [vmem:[%s1132_s29 + $0x88] sm:$0xff] %v308_v17  ;;  %v310_v18 = vld [vmem:[%s1127_s28 + $0x120] sm:$0xff]  ;;  %v312_v19 = vld [vmem:[%s1127_s28 + $0x130] sm:$0xff] }
  0x1f   : > { %v314_v20 = vld [vmem:[%s1127_s28 + $0x140] sm:$0xff]  ;;  %311 = vst [vmem:[%s1132_s29 + $0x90] sm:$0xff] %v310_v18  ;;  %313 = vst [vmem:[%s1132_s29 + $0x98] sm:$0xff] %v312_v19  ;;  %v316_v21 = vld [vmem:[%s1127_s28 + $0x150] sm:$0xff] }
  0x20   : > { %315 = vst [vmem:[%s1132_s29 + $0xa0] sm:$0xff] %v314_v20  ;;  %v318_v22 = vld [vmem:[%s1127_s28 + $0x160] sm:$0xff]  ;;  %v320_v23 = vld [vmem:[%s1127_s28 + $0x170] sm:$0xff]  ;;  %317 = vst [vmem:[%s1132_s29 + $0xa8] sm:$0xff] %v316_v21 }
  0x21   : > { %319 = vst [vmem:[%s1132_s29 + $0xb0] sm:$0xff] %v318_v22  ;;  %321 = vst [vmem:[%s1132_s29 + $0xb8] sm:$0xff] %v320_v23  ;;  %v322_v24 = vld [vmem:[%s1127_s28 + $0x180] sm:$0xff]  ;;  %v324_v25 = vld [vmem:[%s1127_s28 + $0x190] sm:$0xff] }
  0x22   : > { %v326_v26 = vld [vmem:[%s1127_s28 + $0x1a0] sm:$0xff]  ;;  %323 = vst [vmem:[%s1132_s29 + $0xc0] sm:$0xff] %v322_v24  ;;  %325 = vst [vmem:[%s1132_s29 + $0xc8] sm:$0xff] %v324_v25  ;;  %v328_v27 = vld [vmem:[%s1127_s28 + $0x1b0] sm:$0xff] }
  0x23   : > { %327 = vst [vmem:[%s1132_s29 + $0xd0] sm:$0xff] %v326_v26  ;;  %v330_v28 = vld [vmem:[%s1127_s28 + $0x1c0] sm:$0xff]  ;;  %v332_v29 = vld [vmem:[%s1127_s28 + $0x1d0] sm:$0xff]  ;;  %329 = vst [vmem:[%s1132_s29 + $0xd8] sm:$0xff] %v328_v27 }
  0x24   : > { %331 = vst [vmem:[%s1132_s29 + $0xe0] sm:$0xff] %v330_v28  ;;  %333 = vst [vmem:[%s1132_s29 + $0xe8] sm:$0xff] %v332_v29  ;;  %v334_v30 = vld [vmem:[%s1127_s28 + $0x1e0] sm:$0xff]  ;;  %v336_v31 = vld [vmem:[%s1127_s28 + $0x1f0] sm:$0xff] }
  0x25   : > { %335 = vst [vmem:[%s1132_s29 + $0xf0] sm:$0xff] %v334_v30  ;;  %337 = vst [vmem:[%s1132_s29 + $0xf8] sm:$0xff] %v336_v31 }
  0x26 PF: > { %p879_p8 = scmp.ge.s32.totalorder %s1057_s16, 1  ;;  %p350_p9 = scmp.lt.s32.totalorder %s1057_s16, 3 }
  0x28   : > { %p351_p10 = pnand %p879_p8, %p350_p9 }
  0x29   : > { %s357_s30 = sand.u32 (!%p351_p10), 1, %s1041_s12   ;;  %v1018_v32 = vld [vmem:[%s1267_s0 + $0x4] ss:$8 sps:$4 sm:$0xff] (!%p351_p10)   ;;  %v1016_v1 = vld [vmem:[%s1267_s0] ss:$8 sps:$4 sm:$0xff] (!%p351_p10)   ;;  %s882_s10 = sshll.u32 (!%p351_p10), %s1049_s14, 1  ;;  %v690_v2 = vlaneseq (!%p351_p10) }
  0x2a   : > { %354 = sbr.rel (%p351_p10) target bundleno = 337 (0x151), region = 66  ;;  %s880_s4 = sshll.u32 (!%p351_p10), %s357_s30, 8  ;;  %662 = vmatprep.mubr.bf16.mxu0 (!%p351_p10), %v1018_v32 }
  0x2b   : > { %s1203_s7 = scalar_lea.vmem (!%p351_p10), [#allocation3], %s880_s4  ;;  %p408_p11 = scmp.lt.s32.totalorder (!%p351_p10), %s882_s10, 3  ;;  %v691_v3 = vshrl.u32 (!%p351_p10), %v690_v2, 7 }
  0x2c   : > { %v968_v33 = vld [vmem:[%s1203_s7 + $0x4] ss:$8 sps:$4 sm:$0xff] (!%p351_p10)   ;;  %v970_v34 = vld [vmem:[%s1203_s7] ss:$8 sps:$4 sm:$0xff] (!%p351_p10)   ;;  %v971_v35 = vld [vmem:[%s1203_s7 + $0x14] ss:$8 sps:$4 sm:$0xff] (!%p351_p10)  }
  0x2d   : > { %630 = vmatprep.subr.bf16.mxu0 (!%p351_p10), %v968_v33  ;;  %v973_v36 = vld [vmem:[%s1203_s7 + $0x10] ss:$8 sps:$4 sm:$0xff] (!%p351_p10)   ;;  %v974_v37 = vld [vmem:[%s1203_s7 + $0x24] ss:$8 sps:$4 sm:$0xff] (!%p351_p10)   ;;  %v976_v38 = vld [vmem:[%s1203_s7 + $0x20] ss:$8 sps:$4 sm:$0xff] (!%p351_p10)  }
  0x2e   : > { %631 = vmatpush1.bf16.msra.mxu0 (!%p351_p10), %v970_v34  ;;  %v977_v39 = vld [vmem:[%s1203_s7 + $0x34] ss:$8 sps:$4 sm:$0xff] (!%p351_p10)   ;;  %v979_v40 = vld [vmem:[%s1203_s7 + $0x30] ss:$8 sps:$4 sm:$0xff] (!%p351_p10)   ;;  %v980_v41 = vld [vmem:[%s1203_s7 + $0x44] ss:$8 sps:$4 sm:$0xff] (!%p351_p10)  }
  0x2f   : > { %632 = vmatprep.subr.bf16.mxu0 (!%p351_p10), %v971_v35  ;;  %v982_v42 = vld [vmem:[%s1203_s7 + $0x40] ss:$8 sps:$4 sm:$0xff] (!%p351_p10)   ;;  %v983_v43 = vld [vmem:[%s1203_s7 + $0x54] ss:$8 sps:$4 sm:$0xff] (!%p351_p10)   ;;  %v985_v44 = vld [vmem:[%s1203_s7 + $0x50] ss:$8 sps:$4 sm:$0xff] (!%p351_p10)  }
  0x30   : > { %v986_v45 = vld [vmem:[%s1203_s7 + $0x64] ss:$8 sps:$4 sm:$0xff] (!%p351_p10)   ;;  %v988_v46 = vld [vmem:[%s1203_s7 + $0x60] ss:$8 sps:$4 sm:$0xff] (!%p351_p10)   ;;  %v989_v47 = vld [vmem:[%s1203_s7 + $0x74] ss:$8 sps:$4 sm:$0xff] (!%p351_p10)  }
  0x31   : > { %v991_v48 = vld [vmem:[%s1203_s7 + $0x70] ss:$8 sps:$4 sm:$0xff]   ;;  %v992_v49 = vld [vmem:[%s1203_s7 + $0x84] ss:$8 sps:$4 sm:$0xff]   ;;  %v994_v50 = vld [vmem:[%s1203_s7 + $0x80] ss:$8 sps:$4 sm:$0xff]  }
  0x32   : > { %633 = vmatpush1.bf16.msra.mxu0 %v973_v36  ;;  %v995_v51 = vld [vmem:[%s1203_s7 + $0x94] ss:$8 sps:$4 sm:$0xff]   ;;  %v997_v52 = vld [vmem:[%s1203_s7 + $0x90] ss:$8 sps:$4 sm:$0xff]   ;;  %v998_v53 = vld [vmem:[%s1203_s7 + $0xa4] ss:$8 sps:$4 sm:$0xff]  }
  0x33   : > { %634 = vmatprep.subr.bf16.mxu0 %v974_v37  ;;  %v1000_v54 = vld [vmem:[%s1203_s7 + $0xa0] ss:$8 sps:$4 sm:$0xff]   ;;  %v1001_v55 = vld [vmem:[%s1203_s7 + $0xb4] ss:$8 sps:$4 sm:$0xff]   ;;  %v1003_v56 = vld [vmem:[%s1203_s7 + $0xb0] ss:$8 sps:$4 sm:$0xff]  }
  0x34   : > { %v1004_v57 = vld [vmem:[%s1203_s7 + $0xc4] ss:$8 sps:$4 sm:$0xff]   ;;  %v1006_v58 = vld [vmem:[%s1203_s7 + $0xc0] ss:$8 sps:$4 sm:$0xff]   ;;  %v1007_v59 = vld [vmem:[%s1203_s7 + $0xd4] ss:$8 sps:$4 sm:$0xff]  }
  0x35   : > { %v1009_v60 = vld [vmem:[%s1203_s7 + $0xd0] ss:$8 sps:$4 sm:$0xff]   ;;  %v1010_v61 = vld [vmem:[%s1203_s7 + $0xe4] ss:$8 sps:$4 sm:$0xff]   ;;  %v1012_v62 = vld [vmem:[%s1203_s7 + $0xe0] ss:$8 sps:$4 sm:$0xff]  }
  0x36   : > { %635 = vmatpush1.bf16.msra.mxu0 %v976_v38  ;;  %v1013_v63 = vld [vmem:[%s1203_s7 + $0xf4] ss:$8 sps:$4 sm:$0xff]   ;;  %v1015_v0 = vld [vmem:[%s1203_s7 + $0xf0] ss:$8 sps:$4 sm:$0xff]   ;;  %s1279_s10 = smov (!%p408_p11, %s882_s10), 3  ;;  %v692_v4 = vsub.s32 0, %v691_v3 }
  0x37   : > { %636 = vmatprep.subr.bf16.mxu0 %v977_v39  ;;  %s410_s19 = scalar_lea.vmem %s1269_s2, %s1279_s10  ;;  %v696_v6 = vsub.s32 1, %v691_v3  ;;  %s881_s20 = sshll.u32 %s357_s30, 4 }
  0x38   : > { %v688_v5 = vld [vmem:[%s410_s19] sm:$0x3]  ;;  %s392_s23 = scalar_lea.vmem [#allocation4], %s881_s20  ;;  %s927_s24 = sshll.u32 (%p1114_p6), %s1049_s14, 3 }
  0x39   : > { %v693_v7 = vrot.slane %v688_v5, %v692_v4  ;;  %v697_v8 = vrot.slane %v688_v5, %v696_v6  ;;  %s730_s26 = scalar_lea.vmem (%p1114_p6), %s1270_s3, %s927_s24 }
  0x3a   : > { %637 = vmatpush1.bf16.msra.mxu0 %v979_v40 }
  0x3b   : > { %638 = vmatprep.subr.bf16.mxu0 %v980_v41 }
  0x3e   : > { %639 = vmatpush1.bf16.msra.mxu0 %v982_v42 }
  0x3f   : > { %640 = vmatprep.subr.bf16.mxu0 %v983_v43 }
  0x42   : > { %641 = vmatpush1.bf16.msra.mxu0 %v985_v44 }
  0x43   : > { %642 = vmatprep.subr.bf16.mxu0 %v986_v45 }
  0x46   : > { %643 = vmatpush1.bf16.msra.mxu0 %v988_v46 }
  0x47   : > { %644 = vmatprep.subr.bf16.mxu0 %v989_v47 }
  0x4a   : > { %645 = vmatpush1.bf16.msra.mxu0 %v991_v48 }
  0x4b   : > { %646 = vmatprep.subr.bf16.mxu0 %v992_v49 }
  0x4e   : > { %647 = vmatpush1.bf16.msra.mxu0 %v994_v50 }
  0x4f   : > { %648 = vmatprep.subr.bf16.mxu0 %v995_v51 }
  0x52   : > { %649 = vmatpush1.bf16.msra.mxu0 %v997_v52 }
  0x53   : > { %650 = vmatprep.subr.bf16.mxu0 %v998_v53 }
  0x56   : > { %651 = vmatpush1.bf16.msra.mxu0 %v1000_v54 }
  0x57   : > { %652 = vmatprep.subr.bf16.mxu0 %v1001_v55 }
  0x5a   : > { %653 = vmatpush1.bf16.msra.mxu0 %v1003_v56 }
  0x5b   : > { %654 = vmatprep.subr.bf16.mxu0 %v1004_v57 }
  0x5e   : > { %655 = vmatpush1.bf16.msra.mxu0 %v1006_v58 }
  0x5f   : > { %656 = vmatprep.subr.bf16.mxu0 %v1007_v59 }
  0x62   : > { %657 = vmatpush1.bf16.msra.mxu0 %v1009_v60 }
  0x63   : > { %658 = vmatprep.subr.bf16.mxu0 %v1010_v61 }
  0x66   : > { %659 = vmatpush1.bf16.msra.mxu0 %v1012_v62 }
  0x67   : > { %660 = vmatprep.subr.bf16.mxu0 %v1013_v63 }
  0x6a   : > { %661 = vmatpush1.bf16.msra.mxu0 %v1015_v0 }
  0x6d   : > { %663 = vmatmul.mubr.bf16.vlgmr.msra.gmra.mrb[0].mxu0 %v1016_v1 }
 0x140   : > { %v664_v9 = vpop.f32.mrb[0].mxu0 }
 0x141   : > { %v700_v10 = vadd.f32 %v693_v7, %v664_v9  ;;  %v666_v11 = vpop.f32.mrb[1].mxu0 }
 0x142   : > { %v701_v12 = vadd.f32 %v697_v8, %v666_v11  ;;  %v668_v13 = vpop.f32.mrb[2].mxu0  ;;  %724 = sbr.rel (!%p1114_p6) target bundleno = 337 (0x151), region = 82 }
 0x143   : > { %v702_v14 = vadd.f32 %v693_v7, %v668_v13  ;;  %v670_v15 = vpop.f32.mrb[3].mxu0 }
 0x144   : > { %v925_v16 = vpack.c.bf16 %v701_v12, %v700_v10  ;;  %v703_v17 = vadd.f32 %v697_v8, %v670_v15 }
 0x146   : > { %716 = vst [vmem:[%s392_s23] sm:$0xff] %v925_v16  ;;  %v926_v18 = vpack.c.bf16 %v703_v17, %v702_v14 }
 0x148   : > { %717 = vst [vmem:[%s392_s23 + $0x8] sm:$0xff] %v926_v18 }
 0x14d   : > { %v760_v19 = vld [vmem:[%s392_s23] sm:$0xff] }
 0x14e   : > { %761 = vst [vmem:[%s730_s26] sm:$0xff] %v760_v19 }
 0x14f   : > { %v762_v20 = vld [vmem:[%s392_s23 + $0x8] sm:$0xff] }
 0x150   : > { %763 = vst [vmem:[%s730_s26 + $0x10] sm:$0xff] %v762_v20 }
 0x151 PF: > { %s13_s16 = sadd.s32 1, %s1057_s16   ;;  %s1272_s12 = smov %s1045_s13 }
 0x152   : > { %p10_p12 = scmp.ge.s32.totalorder %s13_s16, 4   ;;  %s1273_s13 = smov %s1119_s22 }
 0x153   : > { %s1274_s14 = smov %s1053_s15  ;;  %s1275_s15 = smov %s1277_s17 }
 0x154   :  { %12 = sbr.rel (!%p10_p12) target bundleno = 3 (0x3), region = 157 }

// kernel: forward.67
= control target key start
LH: loop header
LB: loop body
LE: loop exit
PB: predicated region body
PF: predicated region fallthrough
CT: control target
= control target key end

     0   :  { %s2774_s0 = inlined_call_operand.vmem [shape: bf16[16,4608], index: 0, kind: input, shape index: {}]   ;;  %s2775_s1 = inlined_call_operand.vmem [shape: bf16[4608,512], index: 1, kind: input, shape index: {}]   ;;  %s2776_s2 = inlined_call_operand.vmem [shape: f32[1,512], index: 2, kind: input, shape index: {}]   ;;  %s2777_s3 = inlined_call_operand.vmem [shape: bf16[16,512], index: 3, kind: input, shape index: {}]   ;;  %s2778_s4 = inlined_call_operand.vmem [shape: bf16[16,512], index: 4, kind: output, shape index: {}]  }
   0x1   :  { %2781 = sst [smem:[#allocation9_spill]] %s2774_s0 }
   0x2   :  { %s2269_s15 = smov 0   ;;  %s2271_s16 = smov 0  }
   0x3   :  { %s2273_s17 = smov 0   ;;  %s2275_s18 = smov 0  }
   0x4   :  { %s2277_s19 = smov 0   ;;  %s2279_s20 = smov 0  }
   0x5   :  { %s2281_s21 = smov 0   ;;  %s2283_s22 = smov 0  }
   0x6   :  { %s2285_s23 = smov 0   ;;  %s2287_s24 = smov 0  }
   0x7   :  { %s2289_s25 = smov 0  }
   0x8 LB: > { %s1769_s26 = sadd.s32 4294967295, %s2241_s25   ;;  %s26_s27 = sadd.s32 1, %s2233_s23  ;;  %s2241_s25 = sphi %s2289_s25, %s14_s25   ;;  %s2237_s24 = sphi %s2287_s24, %s2800_s24   ;;  %s2233_s23 = sphi %s2285_s23, %s2799_s23   ;;  %s2229_s22 = sphi %s2283_s22, %s2798_s22   ;;  %s2225_s21 = sphi %s2281_s21, %s2797_s21   ;;  %s2221_s20 = sphi %s2279_s20, %s2796_s20   ;;  %s2217_s19 = sphi %s2277_s19, %s2795_s19   ;;  %s2213_s18 = sphi %s2275_s18, %s2794_s18   ;;  %s2209_s17 = sphi %s2273_s17, %s2793_s17   ;;  %s2205_s16 = sphi %s2271_s16, %s2792_s16   ;;  %s2201_s15 = sphi %s2269_s15, %s2791_s15  }
   0x9   : > { %p27_p0 = scmp.ge.s32.totalorder %s26_s27, 6  ;;  %s29_s28 = sadd.s32 1, %s2237_s24 }
   0xa   : > { %s42_s29 = sadd.s32 1, %s2221_s20  ;;  %p49_p1 = scmp.ne.s32.totalorder %s2221_s20, %s2217_s19 }
   0xb   : > { %s2802_s27 = smov (%p27_p0, %s26_s27), 0  ;;  %s2804_s28 = smov (!%p27_p0, %s29_s28), %s2237_s24 }
   0xc   : > { %2782 = sst [smem:[#allocation7_spill]] %s2802_s27  ;;  %s38_s30 = ssub.s32 %s2233_s23, %s2802_s27 }
   0xd   : > { %p50_p2 = scmp.eq.s32.totalorder %s2241_s25, 0  ;;  %p31_p3 = scmp.ge.s32.totalorder %s2804_s28, 2 }
   0xe   : > { %p40_p4 = scmp.eq.s32.totalorder %s38_s30, 0  ;;  %s70_s6 = sadd.s32 1, %s2213_s18 }
   0xf   : > { %p2338_p5 = por %p50_p2, %p49_p1  ;;  %s2806_s28 = smov (%p31_p3, %s2804_s28), 0 }
  0x10   : > { %2784 = sst [smem:[#allocation8_spill]] %s2806_s28  ;;  %s66_s8 = ssub.s32 %s2237_s24, %s2806_s28 }
  0x11   : > { %s2346_s7 = scalar_select %p40_p4, %s2221_s20, %s42_s29  }
  0x12   : > { %p77_p6 = scmp.ne.s32.totalorder %s2213_s18, %s2209_s17  ;;  %s67_s9 = sor.u32 %s66_s8, %s38_s30 }
  0x13   : > { %p122_p7 = scmp.eq.s32.totalorder %s66_s8, 0  ;;  %p68_p8 = scmp.eq.s32.totalorder %s67_s9, 0 }
  0x14   : > { %p2354_p9 = por %p77_p6, %p50_p2  ;;  %s124_s11 = sadd.s32 1, %s2205_s16 }
  0x15   : > { %p131_p10 = scmp.ne.s32.totalorder %s2205_s16, %s2201_s15  ;;  %p163_p12 = scmp.eq.s32.totalorder %s1769_s26, 11 }
  0x16   : > { %s2362_s12 = scalar_select %p68_p8, %s2213_s18, %s70_s6  }
  0x17   : > { %s2365_s13 = scalar_select %p122_p7, %s2205_s16, %s124_s11  }
  0x18   : > { %p2369_p11 = por %p131_p10, %p50_p2  ;;  %p2373_p13 = por %p163_p12, %p131_p10 }
  0x19   : > { %p1772_p0 = scmp.ge.s32.totalorder %s2241_s25, 12 }
  0x1b   : > { %185 = sbr.rel (%p1772_p0) target bundleno = 109 (0x6d), region = 16 }
  0x22   : > { %188 = sbr.rel (!%p2338_p5) target bundleno = 46 (0x2e), region = 20  ;;  %s190_s30 = sand.u32 (%p2338_p5), 1, %s2221_s20  }
  0x23   : > { %s1895_s6 = smul.u32 (%p2338_p5), 24, %s2233_s23  ;;  %s2788_s0 = sld [smem:[#allocation9_spill]] (%p2338_p5) }
  0x24   : > { %s1909_s8 = smul.u32 (%p2338_p5), 48, %s190_s30 }
  0x26   : > { %s192_s26 = scalar_lea.vmem (%p2338_p5), [#allocation3], %s1909_s8 }
  0x29   : > { %s198_s28 = scalar_lea.vmem %s2788_s0, %s1895_s6 }
  0x2a   : > { %v211_v0 = vld [vmem:[%s198_s28] sm:$0xff]  ;;  %v213_v1 = vld [vmem:[%s198_s28 + $0x8] sm:$0xff]  ;;  %v215_v2 = vld [vmem:[%s198_s28 + $0x10] sm:$0xff] }
  0x2b   : > { %212 = vst [vmem:[%s192_s26] sm:$0xff] %v211_v0  ;;  %214 = vst [vmem:[%s192_s26 + $0x8] sm:$0xff] %v213_v1  ;;  %v217_v3 = vld [vmem:[%s198_s28 + $0x90] sm:$0xff]  ;;  %v219_v4 = vld [vmem:[%s198_s28 + $0x98] sm:$0xff] }
  0x2c   : > { %216 = vst [vmem:[%s192_s26 + $0x10] sm:$0xff] %v215_v2  ;;  %v221_v5 = vld [vmem:[%s198_s28 + $0xa0] sm:$0xff]  ;;  %218 = vst [vmem:[%s192_s26 + $0x18] sm:$0xff] %v217_v3 }
  0x2d   : > { %220 = vst [vmem:[%s192_s26 + $0x20] sm:$0xff] %v219_v4  ;;  %222 = vst [vmem:[%s192_s26 + $0x28] sm:$0xff] %v221_v5 }
  0x2e PF: > { %228 = sbr.rel (!%p2354_p9) target bundleno = 102 (0x66), region = 43  ;;  %s230_s5 = sand.u32 (%p2354_p9), 1, %s2213_s18  }
  0x2f   : > { %s1910_s30 = smul.u32 (%p2354_p9), 768, %s230_s5  ;;  %s1774_s6 = sshll.u32 (%p2354_p9), %s2237_s24, 1 }
  0x30   : > { %s1896_s8 = smul.u32 (%p2354_p9), 384, %s2233_s23 }
  0x31   : > { %s2398_s10 = scalar_lea.vmem (%p2354_p9), [#allocation4], %s1910_s30 }
  0x32   : > { %s236_s9 = sadd.s32 (%p2354_p9), %s1896_s8, %s1774_s6 }
  0x33   : > { %s1776_s11 = sshll.u32 (%p2354_p9), %s236_s9, 2 }
  0x34   : > { %s2393_s28 = scalar_lea.vmem (%p2354_p9), %s2775_s1, %s1776_s11 }
  0x35   : > { %v456_v6 = vld [vmem:[%s2393_s28] sm:$0xff]  ;;  %v458_v7 = vld [vmem:[%s2393_s28 + $0x10] sm:$0xff] }
  0x36   : > { %v460_v8 = vld [vmem:[%s2393_s28 + $0x20] sm:$0xff]  ;;  %457 = vst [vmem:[%s2398_s10] sm:$0xff] %v456_v6  ;;  %459 = vst [vmem:[%s2398_s10 + $0x8] sm:$0xff] %v458_v7  ;;  %v462_v9 = vld [vmem:[%s2393_s28 + $0x30] sm:$0xff] }
  0x37   : > { %461 = vst [vmem:[%s2398_s10 + $0x10] sm:$0xff] %v460_v8  ;;  %v464_v10 = vld [vmem:[%s2393_s28 + $0x40] sm:$0xff]  ;;  %v466_v11 = vld [vmem:[%s2393_s28 + $0x50] sm:$0xff]  ;;  %463 = vst [vmem:[%s2398_s10 + $0x18] sm:$0xff] %v462_v9 }
  0x38   : > { %465 = vst [vmem:[%s2398_s10 + $0x20] sm:$0xff] %v464_v10  ;;  %467 = vst [vmem:[%s2398_s10 + $0x28] sm:$0xff] %v466_v11  ;;  %v468_v12 = vld [vmem:[%s2393_s28 + $0x60] sm:$0xff]  ;;  %v470_v13 = vld [vmem:[%s2393_s28 + $0x70] sm:$0xff] }
  0x39   : > { %v472_v14 = vld [vmem:[%s2393_s28 + $0x80] sm:$0xff]  ;;  %469 = vst [vmem:[%s2398_s10 + $0x30] sm:$0xff] %v468_v12  ;;  %471 = vst [vmem:[%s2398_s10 + $0x38] sm:$0xff] %v470_v13  ;;  %v474_v15 = vld [vmem:[%s2393_s28 + $0x90] sm:$0xff] }
  0x3a   : > { %473 = vst [vmem:[%s2398_s10 + $0x40] sm:$0xff] %v472_v14  ;;  %v476_v16 = vld [vmem:[%s2393_s28 + $0xa0] sm:$0xff]  ;;  %v478_v17 = vld [vmem:[%s2393_s28 + $0xb0] sm:$0xff]  ;;  %475 = vst [vmem:[%s2398_s10 + $0x48] sm:$0xff] %v474_v15 }
  0x3b   : > { %477 = vst [vmem:[%s2398_s10 + $0x50] sm:$0xff] %v476_v16  ;;  %479 = vst [vmem:[%s2398_s10 + $0x58] sm:$0xff] %v478_v17  ;;  %v480_v18 = vld [vmem:[%s2393_s28 + $0xc0] sm:$0xff]  ;;  %v482_v19 = vld [vmem:[%s2393_s28 + $0xd0] sm:$0xff] }
  0x3c   : > { %v484_v20 = vld [vmem:[%s2393_s28 + $0xe0] sm:$0xff]  ;;  %481 = vst [vmem:[%s2398_s10 + $0x60] sm:$0xff] %v480_v18  ;;  %483 = vst [vmem:[%s2398_s10 + $0x68] sm:$0xff] %v482_v19  ;;  %v486_v21 = vld [vmem:[%s2393_s28 + $0xf0] sm:$0xff] }
  0x3d   : > { %485 = vst [vmem:[%s2398_s10 + $0x70] sm:$0xff] %v484_v20  ;;  %v488_v22 = vld [vmem:[%s2393_s28 + $0x100] sm:$0xff]  ;;  %v490_v23 = vld [vmem:[%s2393_s28 + $0x110] sm:$0xff]  ;;  %487 = vst [vmem:[%s2398_s10 + $0x78] sm:$0xff] %v486_v21 }
  0x3e   : > { %489 = vst [vmem:[%s2398_s10 + $0x80] sm:$0xff] %v488_v22  ;;  %491 = vst [vmem:[%s2398_s10 + $0x88] sm:$0xff] %v490_v23  ;;  %v492_v24 = vld [vmem:[%s2393_s28 + $0x120] sm:$0xff]  ;;  %v494_v25 = vld [vmem:[%s2393_s28 + $0x130] sm:$0xff] }
  0x3f   : > { %v496_v26 = vld [vmem:[%s2393_s28 + $0x140] sm:$0xff]  ;;  %493 = vst [vmem:[%s2398_s10 + $0x90] sm:$0xff] %v492_v24  ;;  %495 = vst [vmem:[%s2398_s10 + $0x98] sm:$0xff] %v494_v25  ;;  %v498_v27 = vld [vmem:[%s2393_s28 + $0x150] sm:$0xff] }
  0x40   : > { %497 = vst [vmem:[%s2398_s10 + $0xa0] sm:$0xff] %v496_v26  ;;  %v500_v28 = vld [vmem:[%s2393_s28 + $0x160] sm:$0xff]  ;;  %v502_v29 = vld [vmem:[%s2393_s28 + $0x170] sm:$0xff]  ;;  %499 = vst [vmem:[%s2398_s10 + $0xa8] sm:$0xff] %v498_v27 }
  0x41   : > { %501 = vst [vmem:[%s2398_s10 + $0xb0] sm:$0xff] %v500_v28  ;;  %503 = vst [vmem:[%s2398_s10 + $0xb8] sm:$0xff] %v502_v29  ;;  %v504_v30 = vld [vmem:[%s2393_s28 + $0x180] sm:$0xff]  ;;  %v506_v31 = vld [vmem:[%s2393_s28 + $0x190] sm:$0xff] }
  0x42   : > { %v508_v32 = vld [vmem:[%s2393_s28 + $0x1a0] sm:$0xff]  ;;  %505 = vst [vmem:[%s2398_s10 + $0xc0] sm:$0xff] %v504_v30  ;;  %507 = vst [vmem:[%s2398_s10 + $0xc8] sm:$0xff] %v506_v31  ;;  %v510_v33 = vld [vmem:[%s2393_s28 + $0x1b0] sm:$0xff] }
  0x43   : > { %509 = vst [vmem:[%s2398_s10 + $0xd0] sm:$0xff] %v508_v32  ;;  %v512_v34 = vld [vmem:[%s2393_s28 + $0x1c0] sm:$0xff]  ;;  %v514_v35 = vld [vmem:[%s2393_s28 + $0x1d0] sm:$0xff]  ;;  %511 = vst [vmem:[%s2398_s10 + $0xd8] sm:$0xff] %v510_v33 }
  0x44   : > { %513 = vst [vmem:[%s2398_s10 + $0xe0] sm:$0xff] %v512_v34  ;;  %515 = vst [vmem:[%s2398_s10 + $0xe8] sm:$0xff] %v514_v35  ;;  %v516_v36 = vld [vmem:[%s2393_s28 + $0x1e0] sm:$0xff]  ;;  %v518_v37 = vld [vmem:[%s2393_s28 + $0x1f0] sm:$0xff] }
  0x45   : > { %v520_v38 = vld [vmem:[%s2393_s28 + $0x200] sm:$0xff]  ;;  %517 = vst [vmem:[%s2398_s10 + $0xf0] sm:$0xff] %v516_v36  ;;  %519 = vst [vmem:[%s2398_s10 + $0xf8] sm:$0xff] %v518_v37  ;;  %v522_v39 = vld [vmem:[%s2393_s28 + $0x210] sm:$0xff] }
  0x46   : > { %521 = vst [vmem:[%s2398_s10 + $0x100] sm:$0xff] %v520_v38  ;;  %v524_v40 = vld [vmem:[%s2393_s28 + $0x220] sm:$0xff]  ;;  %v526_v41 = vld [vmem:[%s2393_s28 + $0x230] sm:$0xff]  ;;  %523 = vst [vmem:[%s2398_s10 + $0x108] sm:$0xff] %v522_v39 }
  0x47   : > { %525 = vst [vmem:[%s2398_s10 + $0x110] sm:$0xff] %v524_v40  ;;  %527 = vst [vmem:[%s2398_s10 + $0x118] sm:$0xff] %v526_v41  ;;  %v528_v42 = vld [vmem:[%s2393_s28 + $0x240] sm:$0xff]  ;;  %v530_v43 = vld [vmem:[%s2393_s28 + $0x250] sm:$0xff] }
  0x48   : > { %v532_v44 = vld [vmem:[%s2393_s28 + $0x260] sm:$0xff]  ;;  %529 = vst [vmem:[%s2398_s10 + $0x120] sm:$0xff] %v528_v42  ;;  %531 = vst [vmem:[%s2398_s10 + $0x128] sm:$0xff] %v530_v43  ;;  %v534_v45 = vld [vmem:[%s2393_s28 + $0x270] sm:$0xff] }
  0x49   : > { %533 = vst [vmem:[%s2398_s10 + $0x130] sm:$0xff] %v532_v44  ;;  %v536_v46 = vld [vmem:[%s2393_s28 + $0x280] sm:$0xff]  ;;  %v538_v47 = vld [vmem:[%s2393_s28 + $0x290] sm:$0xff]  ;;  %535 = vst [vmem:[%s2398_s10 + $0x138] sm:$0xff] %v534_v45 }
  0x4a   : > { %537 = vst [vmem:[%s2398_s10 + $0x140] sm:$0xff] %v536_v46  ;;  %539 = vst [vmem:[%s2398_s10 + $0x148] sm:$0xff] %v538_v47  ;;  %v540_v48 = vld [vmem:[%s2393_s28 + $0x2a0] sm:$0xff]  ;;  %v542_v49 = vld [vmem:[%s2393_s28 + $0x2b0] sm:$0xff] }
  0x4b   : > { %v544_v50 = vld [vmem:[%s2393_s28 + $0x2c0] sm:$0xff]  ;;  %541 = vst [vmem:[%s2398_s10 + $0x150] sm:$0xff] %v540_v48  ;;  %543 = vst [vmem:[%s2398_s10 + $0x158] sm:$0xff] %v542_v49  ;;  %v546_v51 = vld [vmem:[%s2393_s28 + $0x2d0] sm:$0xff] }
  0x4c   : > { %545 = vst [vmem:[%s2398_s10 + $0x160] sm:$0xff] %v544_v50  ;;  %v548_v52 = vld [vmem:[%s2393_s28 + $0x2e0] sm:$0xff]  ;;  %v550_v53 = vld [vmem:[%s2393_s28 + $0x2f0] sm:$0xff]  ;;  %547 = vst [vmem:[%s2398_s10 + $0x168] sm:$0xff] %v546_v51 }
  0x4d   : > { %549 = vst [vmem:[%s2398_s10 + $0x170] sm:$0xff] %v548_v52  ;;  %551 = vst [vmem:[%s2398_s10 + $0x178] sm:$0xff] %v550_v53  ;;  %v552_v54 = vld [vmem:[%s2393_s28 + $0x300] sm:$0xff]  ;;  %v554_v55 = vld [vmem:[%s2393_s28 + $0x310] sm:$0xff] }
  0x4e   : > { %v556_v56 = vld [vmem:[%s2393_s28 + $0x320] sm:$0xff]  ;;  %553 = vst [vmem:[%s2398_s10 + $0x180] sm:$0xff] %v552_v54  ;;  %555 = vst [vmem:[%s2398_s10 + $0x188] sm:$0xff] %v554_v55  ;;  %v558_v57 = vld [vmem:[%s2393_s28 + $0x330] sm:$0xff] }
  0x4f   : > { %557 = vst [vmem:[%s2398_s10 + $0x190] sm:$0xff] %v556_v56  ;;  %v560_v58 = vld [vmem:[%s2393_s28 + $0x340] sm:$0xff]  ;;  %v562_v59 = vld [vmem:[%s2393_s28 + $0x350] sm:$0xff]  ;;  %559 = vst [vmem:[%s2398_s10 + $0x198] sm:$0xff] %v558_v57 }
  0x50   : > { %561 = vst [vmem:[%s2398_s10 + $0x1a0] sm:$0xff] %v560_v58  ;;  %563 = vst [vmem:[%s2398_s10 + $0x1a8] sm:$0xff] %v562_v59  ;;  %v564_v60 = vld [vmem:[%s2393_s28 + $0x360] sm:$0xff]  ;;  %v566_v61 = vld [vmem:[%s2393_s28 + $0x370] sm:$0xff] }
  0x51   : > { %v568_v62 = vld [vmem:[%s2393_s28 + $0x380] sm:$0xff]  ;;  %565 = vst [vmem:[%s2398_s10 + $0x1b0] sm:$0xff] %v564_v60  ;;  %567 = vst [vmem:[%s2398_s10 + $0x1b8] sm:$0xff] %v566_v61  ;;  %v570_v63 = vld [vmem:[%s2393_s28 + $0x390] sm:$0xff] }
  0x52   : > { %569 = vst [vmem:[%s2398_s10 + $0x1c0] sm:$0xff] %v568_v62  ;;  %v572_v0 = vld [vmem:[%s2393_s28 + $0x3a0] sm:$0xff]  ;;  %v574_v1 = vld [vmem:[%s2393_s28 + $0x3b0] sm:$0xff]  ;;  %571 = vst [vmem:[%s2398_s10 + $0x1c8] sm:$0xff] %v570_v63 }
  0x53   : > { %573 = vst [vmem:[%s2398_s10 + $0x1d0] sm:$0xff] %v572_v0  ;;  %575 = vst [vmem:[%s2398_s10 + $0x1d8] sm:$0xff] %v574_v1  ;;  %v576_v2 = vld [vmem:[%s2393_s28 + $0x3c0] sm:$0xff]  ;;  %v578_v3 = vld [vmem:[%s2393_s28 + $0x3d0] sm:$0xff] }
  0x54   : > { %v580_v4 = vld [vmem:[%s2393_s28 + $0x3e0] sm:$0xff]  ;;  %577 = vst [vmem:[%s2398_s10 + $0x1e0] sm:$0xff] %v576_v2  ;;  %579 = vst [vmem:[%s2398_s10 + $0x1e8] sm:$0xff] %v578_v3  ;;  %v582_v5 = vld [vmem:[%s2393_s28 + $0x3f0] sm:$0xff] }
  0x55   : > { %581 = vst [vmem:[%s2398_s10 + $0x1f0] sm:$0xff] %v580_v4  ;;  %v584_v6 = vld [vmem:[%s2393_s28 + $0x400] sm:$0xff]  ;;  %v586_v7 = vld [vmem:[%s2393_s28 + $0x410] sm:$0xff]  ;;  %583 = vst [vmem:[%s2398_s10 + $0x1f8] sm:$0xff] %v582_v5 }
  0x56   : > { %585 = vst [vmem:[%s2398_s10 + $0x200] sm:$0xff] %v584_v6  ;;  %587 = vst [vmem:[%s2398_s10 + $0x208] sm:$0xff] %v586_v7  ;;  %v588_v8 = vld [vmem:[%s2393_s28 + $0x420] sm:$0xff]  ;;  %v590_v9 = vld [vmem:[%s2393_s28 + $0x430] sm:$0xff] }
  0x57   : > { %v592_v10 = vld [vmem:[%s2393_s28 + $0x440] sm:$0xff]  ;;  %589 = vst [vmem:[%s2398_s10 + $0x210] sm:$0xff] %v588_v8  ;;  %591 = vst [vmem:[%s2398_s10 + $0x218] sm:$0xff] %v590_v9  ;;  %v594_v11 = vld [vmem:[%s2393_s28 + $0x450] sm:$0xff] }
  0x58   : > { %593 = vst [vmem:[%s2398_s10 + $0x220] sm:$0xff] %v592_v10  ;;  %v596_v12 = vld [vmem:[%s2393_s28 + $0x460] sm:$0xff]  ;;  %v598_v13 = vld [vmem:[%s2393_s28 + $0x470] sm:$0xff]  ;;  %595 = vst [vmem:[%s2398_s10 + $0x228] sm:$0xff] %v594_v11 }
  0x59   : > { %597 = vst [vmem:[%s2398_s10 + $0x230] sm:$0xff] %v596_v12  ;;  %599 = vst [vmem:[%s2398_s10 + $0x238] sm:$0xff] %v598_v13  ;;  %v600_v14 = vld [vmem:[%s2393_s28 + $0x480] sm:$0xff]  ;;  %v602_v15 = vld [vmem:[%s2393_s28 + $0x490] sm:$0xff] }
  0x5a   : > { %v604_v16 = vld [vmem:[%s2393_s28 + $0x4a0] sm:$0xff]  ;;  %601 = vst [vmem:[%s2398_s10 + $0x240] sm:$0xff] %v600_v14  ;;  %603 = vst [vmem:[%s2398_s10 + $0x248] sm:$0xff] %v602_v15  ;;  %v606_v17 = vld [vmem:[%s2393_s28 + $0x4b0] sm:$0xff] }
  0x5b   : > { %605 = vst [vmem:[%s2398_s10 + $0x250] sm:$0xff] %v604_v16  ;;  %v608_v18 = vld [vmem:[%s2393_s28 + $0x4c0] sm:$0xff]  ;;  %v610_v19 = vld [vmem:[%s2393_s28 + $0x4d0] sm:$0xff]  ;;  %607 = vst [vmem:[%s2398_s10 + $0x258] sm:$0xff] %v606_v17 }
  0x5c   : > { %609 = vst [vmem:[%s2398_s10 + $0x260] sm:$0xff] %v608_v18  ;;  %611 = vst [vmem:[%s2398_s10 + $0x268] sm:$0xff] %v610_v19  ;;  %v612_v20 = vld [vmem:[%s2393_s28 + $0x4e0] sm:$0xff]  ;;  %v614_v21 = vld [vmem:[%s2393_s28 + $0x4f0] sm:$0xff] }
  0x5d   : > { %v616_v22 = vld [vmem:[%s2393_s28 + $0x500] sm:$0xff]  ;;  %613 = vst [vmem:[%s2398_s10 + $0x270] sm:$0xff] %v612_v20  ;;  %615 = vst [vmem:[%s2398_s10 + $0x278] sm:$0xff] %v614_v21  ;;  %v618_v23 = vld [vmem:[%s2393_s28 + $0x510] sm:$0xff] }
  0x5e   : > { %617 = vst [vmem:[%s2398_s10 + $0x280] sm:$0xff] %v616_v22  ;;  %v620_v24 = vld [vmem:[%s2393_s28 + $0x520] sm:$0xff]  ;;  %v622_v25 = vld [vmem:[%s2393_s28 + $0x530] sm:$0xff]  ;;  %619 = vst [vmem:[%s2398_s10 + $0x288] sm:$0xff] %v618_v23 }
  0x5f   : > { %621 = vst [vmem:[%s2398_s10 + $0x290] sm:$0xff] %v620_v24  ;;  %623 = vst [vmem:[%s2398_s10 + $0x298] sm:$0xff] %v622_v25  ;;  %v624_v26 = vld [vmem:[%s2393_s28 + $0x540] sm:$0xff]  ;;  %v626_v27 = vld [vmem:[%s2393_s28 + $0x550] sm:$0xff] }
  0x60   : > { %v628_v28 = vld [vmem:[%s2393_s28 + $0x560] sm:$0xff]  ;;  %625 = vst [vmem:[%s2398_s10 + $0x2a0] sm:$0xff] %v624_v26  ;;  %627 = vst [vmem:[%s2398_s10 + $0x2a8] sm:$0xff] %v626_v27  ;;  %v630_v29 = vld [vmem:[%s2393_s28 + $0x570] sm:$0xff] }
  0x61   : > { %629 = vst [vmem:[%s2398_s10 + $0x2b0] sm:$0xff] %v628_v28  ;;  %v632_v30 = vld [vmem:[%s2393_s28 + $0x580] sm:$0xff]  ;;  %v634_v31 = vld [vmem:[%s2393_s28 + $0x590] sm:$0xff]  ;;  %631 = vst [vmem:[%s2398_s10 + $0x2b8] sm:$0xff] %v630_v29 }
  0x62   : > { %633 = vst [vmem:[%s2398_s10 + $0x2c0] sm:$0xff] %v632_v30  ;;  %635 = vst [vmem:[%s2398_s10 + $0x2c8] sm:$0xff] %v634_v31  ;;  %v636_v32 = vld [vmem:[%s2393_s28 + $0x5a0] sm:$0xff]  ;;  %v638_v33 = vld [vmem:[%s2393_s28 + $0x5b0] sm:$0xff] }
  0x63   : > { %v640_v34 = vld [vmem:[%s2393_s28 + $0x5c0] sm:$0xff]  ;;  %637 = vst [vmem:[%s2398_s10 + $0x2d0] sm:$0xff] %v636_v32  ;;  %639 = vst [vmem:[%s2398_s10 + $0x2d8] sm:$0xff] %v638_v33  ;;  %v642_v35 = vld [vmem:[%s2393_s28 + $0x5d0] sm:$0xff] }
  0x64   : > { %641 = vst [vmem:[%s2398_s10 + $0x2e0] sm:$0xff] %v640_v34  ;;  %v644_v36 = vld [vmem:[%s2393_s28 + $0x5e0] sm:$0xff]  ;;  %v646_v37 = vld [vmem:[%s2393_s28 + $0x5f0] sm:$0xff]  ;;  %643 = vst [vmem:[%s2398_s10 + $0x2e8] sm:$0xff] %v642_v35 }
  0x65   : > { %645 = vst [vmem:[%s2398_s10 + $0x2f0] sm:$0xff] %v644_v36  ;;  %647 = vst [vmem:[%s2398_s10 + $0x2f8] sm:$0xff] %v646_v37 }
  0x66 PF: > { %661 = sbr.rel (!%p2369_p11) target bundleno = 109 (0x6d), region = 85  ;;  %s663_s0 = sand.u32 (%p2369_p11), 1, %s2205_s16  }
  0x67   : > { %s1897_s27 = sshll.u32 (%p2369_p11), %s2237_s24, 3  ;;  %s1777_s26 = sshll.u32 (%p2369_p11), %s663_s0, 4 }
  0x68   : > { %s671_s6 = scalar_lea.vmem (%p2369_p11), %s2777_s3, %s1897_s27  ;;  %s665_s8 = scalar_lea.vmem (%p2369_p11), [#allocation5], %s1777_s26 }
  0x69   : > { %v701_v38 = vld [vmem:[%s671_s6] sm:$0xff] (%p2369_p11)  ;;  %v703_v39 = vld [vmem:[%s671_s6 + $0x10] sm:$0xff] (%p2369_p11) }
  0x6a   : > { %702 = vst [vmem:[%s665_s8] sm:$0xff] (%p2369_p11), %v701_v38  ;;  %704 = vst [vmem:[%s665_s8 + $0x8] sm:$0xff] (%p2369_p11), %v703_v39 }
  0x6d PF: > { %p1780_p1 = scmp.ge.s32.totalorder %s2241_s25, 1  ;;  %p709_p2 = scmp.lt.s32.totalorder %s2241_s25, 13 }
  0x6f   : > { %p710_p3 = pnand %p1780_p1, %p709_p2 }
  0x70   : > { %s716_s14 = sand.u32 (!%p710_p3), 1, %s2217_s19   ;;  %s723_s9 = sand.u32 (!%p710_p3), 1, %s2209_s17  }
  0x71   : > { %713 = sbr.rel (%p710_p3) target bundleno = 500 (0x1f4), region = 123  ;;  %s730_s28 = sand.u32 (!%p710_p3), 1, %s2201_s15  }
  0x72   : > { %s1911_s11 = smul.u32 (!%p710_p3), 48, %s716_s14  ;;  %s2601_s0 = sshll.u32 (!%p710_p3), %s730_s28, 4 }
  0x73   : > { %s1912_s10 = smul.u32 (!%p710_p3), 768, %s723_s9  ;;  %s1783_s27 = sshll.u32 (!%p710_p3), %s2229_s22, 1 }
  0x74   : > { %p771_p4 = scmp.lt.s32.totalorder (!%p710_p3), %s1783_s27, 3  ;;  %s2610_s6 = scalar_lea.vmem (!%p710_p3), [#allocation3], %s1911_s11 }
  0x75   : > { %s2612_s19 = scalar_lea.vmem (!%p710_p3), [#allocation4], %s1912_s10  ;;  %s732_s17 = scalar_lea.vmem (!%p710_p3), [#allocation5], %s2601_s0 }
  0x76   : > { %s2616_s15 = scalar_lea.vmem (!%p710_p3), [#allocation6], %s2601_s0  ;;  %p1784_p5 = scmp.ne.s32.totalorder (!%p710_p3), %s2225_s21, 0 }
  0x78   : > { %s2808_s27 = smov (!%p771_p4, %s1783_s27), 3  ;;  %782 = sbr.rel (%p1784_p5) target bundleno = 127 (0x7f), region = 139 }
  0x79   : > { %s773_s30 = scalar_lea.vmem %s2776_s2, %s2808_s27  ;;  %v2243_v40 = vmov (!%p1784_p5), 0.0  }
  0x7a   : > { %783 = vst [vmem:[#allocation2] sm:$0xff] (!%p1784_p5), %v2243_v40  ;;  %784 = vst [vmem:[#allocation2 + $0x8] sm:$0xff] (!%p1784_p5), %v2243_v40 }
  0x7b   : > { %785 = vst [vmem:[#allocation2 + $0x10] sm:$0xff] (!%p1784_p5), %v2243_v40  ;;  %786 = vst [vmem:[#allocation2 + $0x18] sm:$0xff] (!%p1784_p5), %v2243_v40 }
  0x7f PF: > { %v2002_v41 = vld [vmem:[%s2612_s19 + $0x104] ss:$8 sps:$4 sm:$0xff]   ;;  %v2004_v42 = vld [vmem:[%s2612_s19 + $0x100] ss:$8 sps:$4 sm:$0xff]   ;;  %v2005_v43 = vld [vmem:[%s2612_s19 + $0x114] ss:$8 sps:$4 sm:$0xff]  }
  0x80   : > { %1446 = vmatprep.subr.bf16.mxu0 %v2002_v41  ;;  %v2007_v44 = vld [vmem:[%s2612_s19 + $0x110] ss:$8 sps:$4 sm:$0xff]   ;;  %v2008_v45 = vld [vmem:[%s2612_s19 + $0x124] ss:$8 sps:$4 sm:$0xff]   ;;  %v2010_v46 = vld [vmem:[%s2612_s19 + $0x120] ss:$8 sps:$4 sm:$0xff]  }
  0x81   : > { %1447 = vmatpush1.bf16.msra.mxu0 %v2004_v42  ;;  %v2011_v47 = vld [vmem:[%s2612_s19 + $0x134] ss:$8 sps:$4 sm:$0xff]   ;;  %v2013_v48 = vld [vmem:[%s2612_s19 + $0x130] ss:$8 sps:$4 sm:$0xff]   ;;  %v2014_v49 = vld [vmem:[%s2612_s19 + $0x144] ss:$8 sps:$4 sm:$0xff]  }
  0x82   : > { %1448 = vmatprep.subr.bf16.mxu0 %v2005_v43  ;;  %v2016_v50 = vld [vmem:[%s2612_s19 + $0x140] ss:$8 sps:$4 sm:$0xff]   ;;  %v2017_v51 = vld [vmem:[%s2612_s19 + $0x154] ss:$8 sps:$4 sm:$0xff]   ;;  %v2019_v52 = vld [vmem:[%s2612_s19 + $0x150] ss:$8 sps:$4 sm:$0xff]  }
  0x83   : > { %v2020_v53 = vld [vmem:[%s2612_s19 + $0x164] ss:$8 sps:$4 sm:$0xff]   ;;  %v2052_v55 = vld [vmem:[%s2612_s19] ss:$8 sps:$4 sm:$0xff]   ;;  %v2023_v58 = vld [vmem:[%s2612_s19 + $0x174] ss:$8 sps:$4 sm:$0xff]  }
  0x84   : > { %v2049_v54 = vld [vmem:[%s2612_s19 + $0x4] ss:$8 sps:$4 sm:$0xff]   ;;  %v2022_v56 = vld [vmem:[%s2612_s19 + $0x160] ss:$8 sps:$4 sm:$0xff]   ;;  %v2059_v59 = vld [vmem:[%s2612_s19 + $0x14] ss:$8 sps:$4 sm:$0xff]  }
  0x85   : > { %1449 = vmatpush1.bf16.msra.mxu0 %v2007_v44  ;;  %1403 = vmatprep.subr.bf16.mxu1 %v2049_v54  ;;  %v2055_v57 = vld [vmem:[%s2610_s6 + $0xc] ss:$24 sps:$4 sm:$0xff]   ;;  %v2061_v60 = vld [vmem:[%s2612_s19 + $0x10] ss:$8 sps:$4 sm:$0xff]   ;;  %v2067_v0 = vld [vmem:[%s2612_s19 + $0x20] ss:$8 sps:$4 sm:$0xff]  }
  0x86   : > { %1450 = vmatprep.subr.bf16.mxu0 %v2008_v45  ;;  %1404 = vmatpush1.bf16.msra.mxu1 %v2052_v55  ;;  %v2025_v61 = vld [vmem:[%s2612_s19 + $0x170] ss:$8 sps:$4 sm:$0xff]   ;;  %v2026_v62 = vld [vmem:[%s2612_s19 + $0x184] ss:$8 sps:$4 sm:$0xff]   ;;  %v2028_v1 = vld [vmem:[%s2612_s19 + $0x180] ss:$8 sps:$4 sm:$0xff]  }
  0x87   : > { %1478 = vmatprep.mubr.bf16.mxu0 %v2055_v57  ;;  %1405 = vmatprep.subr.bf16.mxu1 %v2059_v59  ;;  %v2065_v63 = vld [vmem:[%s2612_s19 + $0x24] ss:$8 sps:$4 sm:$0xff]   ;;  %v2071_v2 = vld [vmem:[%s2612_s19 + $0x34] ss:$8 sps:$4 sm:$0xff]   ;;  %v2073_v4 = vld [vmem:[%s2612_s19 + $0x30] ss:$8 sps:$4 sm:$0xff]  }
  0x88   : > { %v2029_v3 = vld [vmem:[%s2612_s19 + $0x194] ss:$8 sps:$4 sm:$0xff]   ;;  %v2077_v5 = vld [vmem:[%s2612_s19 + $0x44] ss:$8 sps:$4 sm:$0xff]   ;;  %v2031_v6 = vld [vmem:[%s2612_s19 + $0x190] ss:$8 sps:$4 sm:$0xff]  }
  0x89   : > { %1451 = vmatpush1.bf16.msra.mxu0 %v2010_v46  ;;  %v2032_v7 = vld [vmem:[%s2612_s19 + $0x1a4] ss:$8 sps:$4 sm:$0xff]   ;;  %v2079_v8 = vld [vmem:[%s2612_s19 + $0x40] ss:$8 sps:$4 sm:$0xff]   ;;  %v2083_v9 = vld [vmem:[%s2612_s19 + $0x54] ss:$8 sps:$4 sm:$0xff]  }
  0x8a   : > { %1452 = vmatprep.subr.bf16.mxu0 %v2011_v47  ;;  %1406 = vmatpush1.bf16.msra.mxu1 %v2061_v60  ;;  %v2034_v10 = vld [vmem:[%s2612_s19 + $0x1a0] ss:$8 sps:$4 sm:$0xff]   ;;  %v2035_v11 = vld [vmem:[%s2612_s19 + $0x1b4] ss:$8 sps:$4 sm:$0xff]   ;;  %v2085_v12 = vld [vmem:[%s2612_s19 + $0x50] ss:$8 sps:$4 sm:$0xff]  }
  0x8b   : > { %1407 = vmatprep.subr.bf16.mxu1 %v2065_v63  ;;  %v2089_v13 = vld [vmem:[%s2612_s19 + $0x64] ss:$8 sps:$4 sm:$0xff]   ;;  %v2037_v14 = vld [vmem:[%s2612_s19 + $0x1b0] ss:$8 sps:$4 sm:$0xff]   ;;  %v2091_v16 = vld [vmem:[%s2612_s19 + $0x60] ss:$8 sps:$4 sm:$0xff]  }
  0x8c   : > { %v2038_v15 = vld [vmem:[%s2612_s19 + $0x1c4] ss:$8 sps:$4 sm:$0xff]   ;;  %v2095_v17 = vld [vmem:[%s2612_s19 + $0x74] ss:$8 sps:$4 sm:$0xff]   ;;  %v2040_v18 = vld [vmem:[%s2612_s19 + $0x1c0] ss:$8 sps:$4 sm:$0xff]  }
  0x8d   : > { %1453 = vmatpush1.bf16.msra.mxu0 %v2013_v48  ;;  %v2041_v19 = vld [vmem:[%s2612_s19 + $0x1d4] ss:$8 sps:$4 sm:$0xff]   ;;  %v2097_v20 = vld [vmem:[%s2612_s19 + $0x70] ss:$8 sps:$4 sm:$0xff]   ;;  %v2101_v21 = vld [vmem:[%s2612_s19 + $0x84] ss:$8 sps:$4 sm:$0xff]  }
  0x8e   : > { %1454 = vmatprep.subr.bf16.mxu0 %v2014_v49  ;;  %1408 = vmatpush1.bf16.msra.mxu1 %v2067_v0  ;;  %v2043_v22 = vld [vmem:[%s2612_s19 + $0x1d0] ss:$8 sps:$4 sm:$0xff]   ;;  %v2044_v23 = vld [vmem:[%s2612_s19 + $0x1e4] ss:$8 sps:$4 sm:$0xff]   ;;  %v2103_v24 = vld [vmem:[%s2612_s19 + $0x80] ss:$8 sps:$4 sm:$0xff]  }
  0x8f   : > { %1409 = vmatprep.subr.bf16.mxu1 %v2071_v2  ;;  %v2107_v25 = vld [vmem:[%s2612_s19 + $0x94] ss:$8 sps:$4 sm:$0xff]   ;;  %v2046_v26 = vld [vmem:[%s2612_s19 + $0x1e0] ss:$8 sps:$4 sm:$0xff]   ;;  %v2109_v28 = vld [vmem:[%s2612_s19 + $0x90] ss:$8 sps:$4 sm:$0xff]  }
  0x90   : > { %v2047_v27 = vld [vmem:[%s2612_s19 + $0x1f4] ss:$8 sps:$4 sm:$0xff]   ;;  %v2113_v29 = vld [vmem:[%s2612_s19 + $0xa4] ss:$8 sps:$4 sm:$0xff]   ;;  %v2051_v30 = vld [vmem:[%s2612_s19 + $0x1f0] ss:$8 sps:$4 sm:$0xff]  }
  0x91   : > { %1455 = vmatpush1.bf16.msra.mxu0 %v2016_v50  ;;  %v2058_v31 = vld [vmem:[%s2612_s19 + $0x204] ss:$8 sps:$4 sm:$0xff]   ;;  %v2115_v32 = vld [vmem:[%s2612_s19 + $0xa0] ss:$8 sps:$4 sm:$0xff]   ;;  %v2119_v34 = vld [vmem:[%s2612_s19 + $0xb4] ss:$8 sps:$4 sm:$0xff]  }
  0x92   : > { %1456 = vmatprep.subr.bf16.mxu0 %v2017_v51  ;;  %1410 = vmatpush1.bf16.msra.mxu1 %v2073_v4  ;;  %v2053_v33 = vld [vmem:[%s2610_s6 + $0x8] ss:$24 sps:$4 sm:$0xff]   ;;  %v2064_v36 = vld [vmem:[%s2612_s19 + $0x214] ss:$8 sps:$4 sm:$0xff]   ;;  %v2125_v39 = vld [vmem:[%s2612_s19 + $0xc4] ss:$8 sps:$4 sm:$0xff]  }
  0x93   : > { %1411 = vmatprep.subr.bf16.mxu1 %v2077_v5  ;;  %v2056_v35 = vld [vmem:[%s2612_s19 + $0x200] ss:$8 sps:$4 sm:$0xff]   ;;  %v2121_v37 = vld [vmem:[%s2612_s19 + $0xb0] ss:$8 sps:$4 sm:$0xff]   ;;  %v2148_v38 = vld [vmem:[%s2610_s6 + $0x4] ss:$24 sps:$4 sm:$0xff]  }
  0x94   : > { %v2062_v40 = vld [vmem:[%s2612_s19 + $0x210] ss:$8 sps:$4 sm:$0xff]   ;;  %1435 = vmatprep.mubr.bf16.mxu1 %v2148_v38  ;;  %v2154_v41 = vld [vmem:[%s2610_s6 + $0x14] ss:$24 sps:$4 sm:$0xff]   ;;  %v2127_v43 = vld [vmem:[%s2612_s19 + $0xc0] ss:$8 sps:$4 sm:$0xff]  }
  0x95   : > { %1457 = vmatpush1.bf16.msra.mxu0 %v2019_v52  ;;  %v2070_v42 = vld [vmem:[%s2612_s19 + $0x224] ss:$8 sps:$4 sm:$0xff]   ;;  %v2131_v44 = vld [vmem:[%s2612_s19 + $0xd4] ss:$8 sps:$4 sm:$0xff]   ;;  %v2068_v45 = vld [vmem:[%s2612_s19 + $0x220] ss:$8 sps:$4 sm:$0xff]  }
  0x96   : > { %1458 = vmatprep.subr.bf16.mxu0 %v2020_v53  ;;  %1412 = vmatpush1.bf16.msra.mxu1 %v2079_v8  ;;  %v2076_v46 = vld [vmem:[%s2612_s19 + $0x234] ss:$8 sps:$4 sm:$0xff]   ;;  %v2133_v47 = vld [vmem:[%s2612_s19 + $0xd0] ss:$8 sps:$4 sm:$0xff]   ;;  %v2137_v48 = vld [vmem:[%s2612_s19 + $0xe4] ss:$8 sps:$4 sm:$0xff]  }
  0x97   : > { %1413 = vmatprep.subr.bf16.mxu1 %v2083_v9  ;;  %v2074_v49 = vld [vmem:[%s2612_s19 + $0x230] ss:$8 sps:$4 sm:$0xff]   ;;  %v2082_v50 = vld [vmem:[%s2612_s19 + $0x244] ss:$8 sps:$4 sm:$0xff]   ;;  %v2139_v51 = vld [vmem:[%s2612_s19 + $0xe0] ss:$8 sps:$4 sm:$0xff]  }
  0x98   : > { %v2143_v52 = vld [vmem:[%s2612_s19 + $0xf4] ss:$8 sps:$4 sm:$0xff]   ;;  %v2080_v53 = vld [vmem:[%s2612_s19 + $0x240] ss:$8 sps:$4 sm:$0xff]   ;;  %v2145_v55 = vld [vmem:[%s2612_s19 + $0xf0] ss:$8 sps:$4 sm:$0xff]  }
  0x99   : > { %1459 = vmatpush1.bf16.msra.mxu0 %v2022_v56  ;;  %v2088_v54 = vld [vmem:[%s2612_s19 + $0x254] ss:$8 sps:$4 sm:$0xff]   ;;  %v2086_v56 = vld [vmem:[%s2612_s19 + $0x250] ss:$8 sps:$4 sm:$0xff]   ;;  %v2094_v57 = vld [vmem:[%s2612_s19 + $0x264] ss:$8 sps:$4 sm:$0xff]  }
  0x9a   : > { %1460 = vmatprep.subr.bf16.mxu0 %v2023_v58  ;;  %1414 = vmatpush1.bf16.msra.mxu1 %v2085_v12  ;;  %v2146_v58 = vld [vmem:[%s2610_s6] ss:$24 sps:$4 sm:$0xff]   ;;  %v2100_v60 = vld [vmem:[%s2612_s19 + $0x274] ss:$8 sps:$4 sm:$0xff]   ;;  %v2118_v2 = vld [vmem:[%s2612_s19 + $0x2a4] ss:$8 sps:$4 sm:$0xff]  }
  0x9b   : > { %1415 = vmatprep.subr.bf16.mxu1 %v2089_v13  ;;  %v2092_v59 = vld [vmem:[%s2612_s19 + $0x260] ss:$8 sps:$4 sm:$0xff]   ;;  %v2112_v0 = vld [vmem:[%s2612_s19 + $0x294] ss:$8 sps:$4 sm:$0xff]   ;;  %v2122_v5 = vld [vmem:[%s2612_s19 + $0x2b0] ss:$8 sps:$4 sm:$0xff]  }
  0x9c   : > { %v2104_v63 = vld [vmem:[%s2612_s19 + $0x280] ss:$8 sps:$4 sm:$0xff]   ;;  %v2124_v4 = vld [vmem:[%s2612_s19 + $0x2b4] ss:$8 sps:$4 sm:$0xff]   ;;  %v2134_v9 = vld [vmem:[%s2612_s19 + $0x2d0] ss:$8 sps:$4 sm:$0xff]  }
  0x9d   : > { %1461 = vmatpush1.bf16.msra.mxu0 %v2025_v61  ;;  %v2098_v61 = vld [vmem:[%s2612_s19 + $0x270] ss:$8 sps:$4 sm:$0xff]   ;;  %v2136_v8 = vld [vmem:[%s2612_s19 + $0x2d4] ss:$8 sps:$4 sm:$0xff]   ;;  %p1887_p6 = scmp.ne.s32.totalorder %s2225_s21, 5 }
  0x9e   : > { %1462 = vmatprep.subr.bf16.mxu0 %v2026_v62  ;;  %1416 = vmatpush1.bf16.msra.mxu1 %v2091_v16  ;;  %v2106_v62 = vld [vmem:[%s2612_s19 + $0x284] ss:$8 sps:$4 sm:$0xff]   ;;  %v2151_v12 = vld [vmem:[%s2612_s19 + $0x2f4] ss:$8 sps:$4 sm:$0xff]   ;;  %v2149_v13 = vld [vmem:[%s2612_s19 + $0x2f0] ss:$8 sps:$4 sm:$0xff]  }
  0x9f   : > { %1417 = vmatprep.subr.bf16.mxu1 %v2095_v17  ;;  %v1548_v38 = vld [vmem:[%s773_s30] sm:$0x3] (!%p1887_p6) }
  0xa1   : > { %1463 = vmatpush1.bf16.msra.mxu0 %v2028_v1  ;;  %v2110_v1 = vld [vmem:[%s2612_s19 + $0x290] ss:$8 sps:$4 sm:$0xff]  }
  0xa2   : > { %1464 = vmatprep.subr.bf16.mxu0 %v2029_v3  ;;  %1418 = vmatpush1.bf16.msra.mxu1 %v2097_v20  ;;  %v2116_v3 = vld [vmem:[%s2612_s19 + $0x2a0] ss:$8 sps:$4 sm:$0xff]  }
  0xa3   : > { %1419 = vmatprep.subr.bf16.mxu1 %v2101_v21 }
  0xa5   : > { %1465 = vmatpush1.bf16.msra.mxu0 %v2031_v6  ;;  %v2130_v6 = vld [vmem:[%s2612_s19 + $0x2c4] ss:$8 sps:$4 sm:$0xff]  }
  0xa6   : > { %1466 = vmatprep.subr.bf16.mxu0 %v2032_v7  ;;  %1420 = vmatpush1.bf16.msra.mxu1 %v2103_v24  ;;  %v2128_v7 = vld [vmem:[%s2612_s19 + $0x2c0] ss:$8 sps:$4 sm:$0xff]  }
  0xa7   : > { %1421 = vmatprep.subr.bf16.mxu1 %v2107_v25  ;;  %v789_v25 = vld [vmem:[#allocation2 + $0x10] sm:$0xff] }
  0xa9   : > { %1467 = vmatpush1.bf16.msra.mxu0 %v2034_v10  ;;  %v2142_v10 = vld [vmem:[%s2612_s19 + $0x2e4] ss:$8 sps:$4 sm:$0xff]  }
  0xaa   : > { %1468 = vmatprep.subr.bf16.mxu0 %v2035_v11  ;;  %1422 = vmatpush1.bf16.msra.mxu1 %v2109_v28  ;;  %v2140_v11 = vld [vmem:[%s2612_s19 + $0x2e0] ss:$8 sps:$4 sm:$0xff]  }
  0xab   : > { %1423 = vmatprep.subr.bf16.mxu1 %v2113_v29  ;;  %v790_v29 = vld [vmem:[#allocation2 + $0x18] sm:$0xff] }
  0xad   : > { %1469 = vmatpush1.bf16.msra.mxu0 %v2037_v14  ;;  %v2152_v14 = vld [vmem:[%s2610_s6 + $0x10] ss:$24 sps:$4 sm:$0xff]  }
  0xae   : > { %1470 = vmatprep.subr.bf16.mxu0 %v2038_v15  ;;  %1424 = vmatpush1.bf16.msra.mxu1 %v2115_v32 }
  0xaf   : > { %1425 = vmatprep.subr.bf16.mxu1 %v2119_v34 }
  0xb1   : > { %1471 = vmatpush1.bf16.msra.mxu0 %v2040_v18 }
  0xb2   : > { %1472 = vmatprep.subr.bf16.mxu0 %v2041_v19  ;;  %1426 = vmatpush1.bf16.msra.mxu1 %v2121_v37  ;;  %v787_v19 = vld [vmem:[#allocation2] sm:$0xff] }
  0xb3   : > { %1427 = vmatprep.subr.bf16.mxu1 %v2125_v39  ;;  %v1564_v37 = vld [vmem:[%s732_s17] sm:$0xff] (!%p1887_p6)  ;;  %v1565_v39 = vld [vmem:[%s732_s17 + $0x8] sm:$0xff] (!%p1887_p6) }
  0xb5   : > { %1473 = vmatpush1.bf16.msra.mxu0 %v2043_v22  ;;  %v788_v22 = vld [vmem:[#allocation2 + $0x8] sm:$0xff] }
  0xb6   : > { %1474 = vmatprep.subr.bf16.mxu0 %v2044_v23  ;;  %1428 = vmatpush1.bf16.msra.mxu1 %v2127_v43 }
  0xb7   : > { %1429 = vmatprep.subr.bf16.mxu1 %v2131_v44  ;;  %v1566_v44 = vunpack.c.l.bf16 (!%p1887_p6), %v1564_v37 }
  0xb9   : > { %1475 = vmatpush1.bf16.msra.mxu0 %v2046_v26 }
  0xba   : > { %1476 = vmatprep.subr.bf16.mxu0 %v2047_v27  ;;  %1430 = vmatpush1.bf16.msra.mxu1 %v2133_v47 }
  0xbb   : > { %1431 = vmatprep.subr.bf16.mxu1 %v2137_v48 }
  0xbd   : > { %1477 = vmatpush1.bf16.msra.mxu0 %v2051_v30 }
  0xbe   : > { %1489 = vmatprep.subr.bf16.mxu0 %v2058_v31  ;;  %1432 = vmatpush1.bf16.msra.mxu1 %v2139_v51  ;;  %v1569_v51 = vunpack.c.h.bf16 (!%p1887_p6), %v1565_v39 }
  0xbf   : > { %1433 = vmatprep.subr.bf16.mxu1 %v2143_v52 }
  0xc0   : > { %1479 = vmatmul.mubr.bf16.vlgmr.msra.gmra.mrb[0].mxu0 %v2053_v33 }
  0xc1   : > { %1490 = vmatpush1.bf16.msra.mxu0 %v2056_v35  ;;  %1521 = vmatprep.mubr.bf16.mxu0 %v2154_v41  ;;  %v1550_v35 = vlaneseq (!%p1887_p6) }
  0xc2   : > { %1491 = vmatprep.subr.bf16.mxu0 %v2064_v36  ;;  %1434 = vmatpush1.bf16.msra.mxu1 %v2145_v55 }
  0xc3   : > { %v1551_v36 = vshrl.u32 (!%p1887_p6), %v1550_v35, 7 }
  0xc5   : > { %1492 = vmatpush1.bf16.msra.mxu0 %v2062_v40  ;;  %1436 = vmatmul.mubr.bf16.vlgmr.msra.gmra.mrb[0].mxu1 %v2146_v58  ;;  %v1552_v41 = vsub.s32 (!%p1887_p6), 0, %v1551_v36 }
  0xc6   : > { %1493 = vmatprep.subr.bf16.mxu0 %v2070_v42  ;;  %v1556_v42 = vsub.s32 (!%p1887_p6), 1, %v1551_v36 }
  0xc7   : > { %v1553_v48 = vrot.slane (!%p1887_p6), %v1548_v38, %v1552_v41 }
  0xc9   : > { %1494 = vmatpush1.bf16.msra.mxu0 %v2068_v45  ;;  %v1567_v45 = vunpack.c.h.bf16 (!%p1887_p6), %v1564_v37 }
  0xca   : > { %1495 = vmatprep.subr.bf16.mxu0 %v2076_v46 }
  0xcd   : > { %1496 = vmatpush1.bf16.msra.mxu0 %v2074_v49  ;;  %v1557_v49 = vrot.slane (!%p1887_p6), %v1548_v38, %v1556_v42 }
  0xce   : > { %1497 = vmatprep.subr.bf16.mxu0 %v2082_v50  ;;  %v1568_v50 = vunpack.c.l.bf16 (!%p1887_p6), %v1565_v39 }
  0xd1   : > { %1498 = vmatpush1.bf16.msra.mxu0 %v2080_v53 }
  0xd2   : > { %1499 = vmatprep.subr.bf16.mxu0 %v2088_v54 }
  0xd5   : > { %1500 = vmatpush1.bf16.msra.mxu0 %v2086_v56 }
  0xd6   : > { %1501 = vmatprep.subr.bf16.mxu0 %v2094_v57 }
  0xd9   : > { %1502 = vmatpush1.bf16.msra.mxu0 %v2092_v59 }
  0xda   : > { %1503 = vmatprep.subr.bf16.mxu0 %v2100_v60 }
  0xdd   : > { %1504 = vmatpush1.bf16.msra.mxu0 %v2098_v61 }
  0xde   : > { %1505 = vmatprep.subr.bf16.mxu0 %v2106_v62 }
  0xe1   : > { %1506 = vmatpush1.bf16.msra.mxu0 %v2104_v63 }
  0xe2   : > { %1507 = vmatprep.subr.bf16.mxu0 %v2112_v0 }
  0xe5   : > { %1508 = vmatpush1.bf16.msra.mxu0 %v2110_v1 }
  0xe6   : > { %1509 = vmatprep.subr.bf16.mxu0 %v2118_v2 }
  0xe9   : > { %1510 = vmatpush1.bf16.msra.mxu0 %v2116_v3 }
  0xea   : > { %1511 = vmatprep.subr.bf16.mxu0 %v2124_v4 }
  0xed   : > { %1512 = vmatpush1.bf16.msra.mxu0 %v2122_v5 }
  0xee   : > { %1513 = vmatprep.subr.bf16.mxu0 %v2130_v6 }
  0xf1   : > { %1514 = vmatpush1.bf16.msra.mxu0 %v2128_v7 }
  0xf2   : > { %1515 = vmatprep.subr.bf16.mxu0 %v2136_v8 }
  0xf5   : > { %1516 = vmatpush1.bf16.msra.mxu0 %v2134_v9 }
  0xf6   : > { %1517 = vmatprep.subr.bf16.mxu0 %v2142_v10 }
  0xf9   : > { %1518 = vmatpush1.bf16.msra.mxu0 %v2140_v11 }
  0xfa   : > { %1519 = vmatprep.subr.bf16.mxu0 %v2151_v12 }
  0xfd   : > { %1520 = vmatpush1.bf16.msra.mxu0 %v2149_v13 }
 0x100   : > { %1522 = vmatmul.mubr.bf16.vlgmr.msra.gmra.mrb[0].mxu0 %v2152_v14 }
 0x198   : > { %v1437_v15 = vpop.f32.mrb[0].mxu1 }
 0x199   : > { %v1439_v16 = vpop.f32.mrb[1].mxu1 }
 0x19a   : > { %v1441_v17 = vpop.f32.mrb[2].mxu1 }
 0x19b   : > { %v1443_v18 = vpop.f32.mrb[3].mxu1 }
 0x1d3   : > { %v1523_v20 = vpop.f32.mrb[0].mxu0 }
 0x1d4   : > { %v1901_v21 = vadd.f32 %v1523_v20, %v1437_v15  ;;  %v1525_v23 = vpop.f32.mrb[1].mxu0 }
 0x1d5   : > { %v1902_v24 = vadd.f32 %v1525_v23, %v1439_v16  ;;  %v1527_v26 = vpop.f32.mrb[2].mxu0  ;;  %1543 = sbr.rel (%p1887_p6) target bundleno = 492 (0x1ec), region = 143 }
 0x1d6   : > { %v1532_v27 = vadd.f32 %v1901_v21, %v787_v19  ;;  %v1903_v28 = vadd.f32 %v1527_v26, %v1441_v17  ;;  %v1529_v30 = vpop.f32.mrb[3].mxu0 }
 0x1d7   : > { %v1533_v31 = vadd.f32 %v1902_v24, %v788_v22  ;;  %v1904_v32 = vadd.f32 %v1529_v30, %v1443_v18 }
 0x1d8   : > { %1536 = vst [vmem:[#allocation2] sm:$0xff] %v1532_v27  ;;  %v1534_v33 = vadd.f32 %v1903_v28, %v789_v25 }
 0x1d9   : > { %1537 = vst [vmem:[#allocation2 + $0x8] sm:$0xff] %v1533_v31  ;;  %v1535_v34 = vadd.f32 %v1904_v32, %v790_v29 }
 0x1da   : > { %1538 = vst [vmem:[#allocation2 + $0x10] sm:$0xff] %v1534_v33 }
 0x1db   : > { %1539 = vst [vmem:[#allocation2 + $0x18] sm:$0xff] %v1535_v34 }
 0x1df   : > { %v1544_v40 = vld [vmem:[#allocation2] sm:$0xff] }
 0x1e0   : > { %v1545_v43 = vld [vmem:[#allocation2 + $0x8] sm:$0xff]  ;;  %v1560_v52 = vadd.f32 %v1553_v48, %v1544_v40 }
 0x1e1   : > { %v1546_v46 = vld [vmem:[#allocation2 + $0x10] sm:$0xff]  ;;  %v1561_v53 = vadd.f32 %v1557_v49, %v1545_v43 }
 0x1e2   : > { %v1547_v47 = vld [vmem:[#allocation2 + $0x18] sm:$0xff]  ;;  %v1562_v54 = vadd.f32 %v1553_v48, %v1546_v46  ;;  %v1570_v56 = vadd.f32 %v1566_v44, %v1560_v52 }
 0x1e3   : > { %v1563_v55 = vadd.f32 %v1557_v49, %v1547_v47  ;;  %v1571_v57 = vadd.f32 %v1567_v45, %v1561_v53 }
 0x1e4   : > { %v1572_v58 = vadd.f32 %v1568_v50, %v1562_v54  ;;  %v1574_v60 = vmax.f32 %v1570_v56, 0.0 }
 0x1e5   : > { %v1573_v59 = vadd.f32 %v1569_v51, %v1563_v55  ;;  %v1575_v61 = vmax.f32 %v1571_v57, 0.0 }
 0x1e6   : > { %v1576_v62 = vmax.f32 %v1572_v58, 0.0 }
 0x1e7   : > { %v1577_v63 = vmax.f32 %v1573_v59, 0.0  ;;  %v1898_v0 = vpack.c.bf16 %v1575_v61, %v1574_v60 }
 0x1e9   : > { %v1899_v1 = vpack.c.bf16 %v1577_v63, %v1576_v62  ;;  %1590 = vst [vmem:[%s2616_s15] sm:$0xff] %v1898_v0 }
 0x1eb   : > { %1591 = vst [vmem:[%s2616_s15 + $0x8] sm:$0xff] %v1899_v1 }
 0x1ec PF: > { %1598 = sbr.rel (!%p2373_p13) target bundleno = 500 (0x1f4), region = 147  ;;  %s1900_s21 = sshll.u32 (%p2373_p13), %s2229_s22, 3 }
 0x1ed   : > { %s1604_s28 = scalar_lea.vmem (%p2373_p13), %s2778_s4, %s1900_s21 }
 0x1f0   : > { %v1634_v2 = vld [vmem:[%s2616_s15] sm:$0xff] (%p2373_p13) }
 0x1f1   : > { %1635 = vst [vmem:[%s1604_s28] sm:$0xff] (%p2373_p13), %v1634_v2 }
 0x1f2   : > { %v1636_v3 = vld [vmem:[%s2616_s15 + $0x8] sm:$0xff] (%p2373_p13) }
 0x1f3   : > { %1637 = vst [vmem:[%s1604_s28 + $0x10] sm:$0xff] %v1636_v3 }
 0x1f4 PF: > { %s14_s25 = sadd.s32 1, %s2241_s25   ;;  %s2789_s29 = sld [smem:[#allocation7_spill]] }
 0x1f5   : > { %p11_p7 = scmp.ge.s32.totalorder %s14_s25, 14   ;;  %s2790_s10 = sld [smem:[#allocation8_spill]] }
 0x1f6   : > { %s2791_s15 = smov %s2205_s16  ;;  %s2792_s16 = smov %s2365_s13 }
 0x1f7   : > { %s2793_s17 = smov %s2213_s18  ;;  %s2794_s18 = smov %s2362_s12 }
 0x1f8   : > { %s2795_s19 = smov %s2221_s20  ;;  %s2796_s20 = smov %s2346_s7 }
 0x1f9   : > { %s2797_s21 = smov %s2233_s23  ;;  %s2798_s22 = smov %s2237_s24 }
 0x1fa   : > { %s2799_s23 = smov %s2789_s29  ;;  %13 = sbr.rel (!%p11_p7) target bundleno = 8 (0x8), region = 235 }
 0x1fb   : > { %s2800_s24 = smov %s2790_s10 }

// kernel: forward.68
= control target key start
LH: loop header
LB: loop body
LE: loop exit
PB: predicated region body
PF: predicated region fallthrough
CT: control target
= control target key end

     0   :  { %s2615_s0 = inlined_call_operand.vmem [shape: bf16[16,4608], index: 0, kind: input, shape index: {}]   ;;  %s2616_s1 = inlined_call_operand.vmem [shape: bf16[4608,512], index: 1, kind: input, shape index: {}]   ;;  %s2617_s2 = inlined_call_operand.vmem [shape: f32[1,512], index: 2, kind: input, shape index: {}]   ;;  %s2618_s3 = inlined_call_operand.vmem [shape: bf16[16,512], index: 3, kind: output, shape index: {}]  }
   0x1   :  { %2620 = sst [smem:[#allocation7_spill]] %s2615_s0 }
   0x2   :  { %2621 = sst [smem:[#allocation8_spill]] %s2616_s1 }
   0x3   :  { %s2135_s12 = smov 0   ;;  %s2137_s13 = smov 0  }
   0x4   :  { %s2139_s14 = smov 0   ;;  %s2141_s15 = smov 0  }
   0x5   :  { %s2143_s16 = smov 0   ;;  %s2145_s17 = smov 0  }
   0x6   :  { %s2147_s18 = smov 0   ;;  %s2149_s19 = smov 0  }
   0x7   :  { %s2151_s20 = smov 0   ;;  %s2153_s21 = smov 0  }
   0x8   :  { %s2155_s22 = smov 0  }
   0x9 LB: > { %s1645_s23 = sadd.s32 4294967295, %s2112_s22   ;;  %s25_s24 = sadd.s32 1, %s2104_s20  ;;  %s2112_s22 = sphi %s2155_s22, %s13_s22   ;;  %s2108_s21 = sphi %s2153_s21, %s2638_s21   ;;  %s2104_s20 = sphi %s2151_s20, %s2637_s20   ;;  %s2100_s19 = sphi %s2149_s19, %s2636_s19   ;;  %s2096_s18 = sphi %s2147_s18, %s2635_s18   ;;  %s2092_s17 = sphi %s2145_s17, %s2634_s17   ;;  %s2088_s16 = sphi %s2143_s16, %s2633_s16   ;;  %s2084_s15 = sphi %s2141_s15, %s2632_s15   ;;  %s2080_s14 = sphi %s2139_s14, %s2631_s14   ;;  %s2076_s13 = sphi %s2137_s13, %s2630_s13   ;;  %s2072_s12 = sphi %s2135_s12, %s2629_s12  }
   0xa   : > { %p26_p0 = scmp.ge.s32.totalorder %s25_s24, 6  ;;  %s28_s25 = sadd.s32 1, %s2108_s21 }
   0xb   : > { %s41_s26 = sadd.s32 1, %s2092_s17  ;;  %p48_p1 = scmp.ne.s32.totalorder %s2092_s17, %s2088_s16 }
   0xc   : > { %s2640_s24 = smov (%p26_p0, %s25_s24), 0  ;;  %s2642_s25 = smov (!%p26_p0, %s28_s25), %s2108_s21 }
   0xd   : > { %s37_s27 = ssub.s32 %s2104_s20, %s2640_s24  ;;  %p49_p2 = scmp.eq.s32.totalorder %s2112_s22, 0 }
   0xe   : > { %p30_p3 = scmp.ge.s32.totalorder %s2642_s25, 2  ;;  %p39_p4 = scmp.eq.s32.totalorder %s37_s27, 0 }
   0xf   : > { %p2202_p5 = por %p49_p2, %p48_p1  ;;  %s69_s29 = sadd.s32 1, %s2084_s15 }
  0x10   : > { %s2644_s25 = smov (%p30_p3, %s2642_s25), 0  ;;  %p76_p6 = scmp.ne.s32.totalorder %s2084_s15, %s2080_s14 }
  0x11   : > { %2623 = sst [smem:[#allocation6_spill]] %s2644_s25  ;;  %s65_s4 = ssub.s32 %s2108_s21, %s2644_s25 }
  0x12   : > { %s2210_s30 = scalar_select %p39_p4, %s2092_s17, %s41_s26  }
  0x13   : > { %s66_s5 = sor.u32 %s65_s4, %s37_s27  ;;  %p121_p7 = scmp.eq.s32.totalorder %s65_s4, 0 }
  0x14   : > { %p67_p8 = scmp.eq.s32.totalorder %s66_s5, 0  ;;  %p2216_p9 = por %p76_p6, %p49_p2 }
  0x15   : > { %s123_s7 = sadd.s32 1, %s2076_s13  ;;  %p133_p10 = scmp.ne.s32.totalorder %s2076_s13, %s2072_s12 }
  0x16   : > { %s2224_s8 = scalar_select %p67_p8, %s2084_s15, %s69_s29  }
  0x17   : > { %s2227_s9 = scalar_select %p121_p7, %s2076_s13, %s123_s7  }
  0x18   : > { %p134_p11 = scmp.eq.s32.totalorder %s1645_s23, 11  ;;  %p1648_p13 = scmp.ge.s32.totalorder %s2112_s22, 12 }
  0x1a   : > { %p2229_p12 = por %p134_p11, %p133_p10  ;;  %156 = sbr.rel (%p1648_p13) target bundleno = 103 (0x67), region = 16 }
  0x21   : > { %159 = sbr.rel (!%p2202_p5) target bundleno = 45 (0x2d), region = 20  ;;  %s161_s11 = sand.u32 (%p2202_p5), 1, %s2092_s17  }
  0x22   : > { %s1767_s26 = smul.u32 (%p2202_p5), 24, %s2104_s20  ;;  %s2626_s0 = sld [smem:[#allocation7_spill]] (%p2202_p5) }
  0x23   : > { %s1780_s27 = smul.u32 (%p2202_p5), 48, %s161_s11 }
  0x25   : > { %s163_s23 = scalar_lea.vmem (%p2202_p5), [#allocation3], %s1780_s27 }
  0x28   : > { %s169_s5 = scalar_lea.vmem %s2626_s0, %s1767_s26 }
  0x29   : > { %v182_v0 = vld [vmem:[%s169_s5] sm:$0xff]  ;;  %v184_v1 = vld [vmem:[%s169_s5 + $0x8] sm:$0xff]  ;;  %v186_v2 = vld [vmem:[%s169_s5 + $0x10] sm:$0xff] }
  0x2a   : > { %183 = vst [vmem:[%s163_s23] sm:$0xff] %v182_v0  ;;  %185 = vst [vmem:[%s163_s23 + $0x8] sm:$0xff] %v184_v1  ;;  %v188_v3 = vld [vmem:[%s169_s5 + $0x90] sm:$0xff]  ;;  %v190_v4 = vld [vmem:[%s169_s5 + $0x98] sm:$0xff] }
  0x2b   : > { %187 = vst [vmem:[%s163_s23 + $0x10] sm:$0xff] %v186_v2  ;;  %v192_v5 = vld [vmem:[%s169_s5 + $0xa0] sm:$0xff]  ;;  %189 = vst [vmem:[%s163_s23 + $0x18] sm:$0xff] %v188_v3 }
  0x2c   : > { %191 = vst [vmem:[%s163_s23 + $0x20] sm:$0xff] %v190_v4  ;;  %193 = vst [vmem:[%s163_s23 + $0x28] sm:$0xff] %v192_v5 }
  0x2d PF: > { %199 = sbr.rel (!%p2216_p9) target bundleno = 103 (0x67), region = 43  ;;  %s201_s28 = sand.u32 (%p2216_p9), 1, %s2084_s15  }
  0x2e   : > { %s1781_s7 = smul.u32 (%p2216_p9), 768, %s201_s28  ;;  %s1650_s11 = sshll.u32 (%p2216_p9), %s2108_s21, 1 }
  0x2f   : > { %s1768_s26 = smul.u32 (%p2216_p9), 384, %s2104_s20  ;;  %s2627_s1 = sld [smem:[#allocation8_spill]] (%p2216_p9) }
  0x30   : > { %s2254_s6 = scalar_lea.vmem (%p2216_p9), [#allocation4], %s1781_s7 }
  0x31   : > { %s207_s27 = sadd.s32 (%p2216_p9), %s1768_s26, %s1650_s11 }
  0x32   : > { %s1652_s29 = sshll.u32 (%p2216_p9), %s207_s27, 2 }
  0x35   : > { %s2249_s5 = scalar_lea.vmem %s2627_s1, %s1652_s29 }
  0x36   : > { %v427_v6 = vld [vmem:[%s2249_s5] sm:$0xff]  ;;  %v429_v7 = vld [vmem:[%s2249_s5 + $0x10] sm:$0xff] }
  0x37   : > { %v431_v8 = vld [vmem:[%s2249_s5 + $0x20] sm:$0xff]  ;;  %428 = vst [vmem:[%s2254_s6] sm:$0xff] %v427_v6  ;;  %430 = vst [vmem:[%s2254_s6 + $0x8] sm:$0xff] %v429_v7  ;;  %v433_v9 = vld [vmem:[%s2249_s5 + $0x30] sm:$0xff] }
  0x38   : > { %432 = vst [vmem:[%s2254_s6 + $0x10] sm:$0xff] %v431_v8  ;;  %v435_v10 = vld [vmem:[%s2249_s5 + $0x40] sm:$0xff]  ;;  %v437_v11 = vld [vmem:[%s2249_s5 + $0x50] sm:$0xff]  ;;  %434 = vst [vmem:[%s2254_s6 + $0x18] sm:$0xff] %v433_v9 }
  0x39   : > { %436 = vst [vmem:[%s2254_s6 + $0x20] sm:$0xff] %v435_v10  ;;  %438 = vst [vmem:[%s2254_s6 + $0x28] sm:$0xff] %v437_v11  ;;  %v439_v12 = vld [vmem:[%s2249_s5 + $0x60] sm:$0xff]  ;;  %v441_v13 = vld [vmem:[%s2249_s5 + $0x70] sm:$0xff] }
  0x3a   : > { %v443_v14 = vld [vmem:[%s2249_s5 + $0x80] sm:$0xff]  ;;  %440 = vst [vmem:[%s2254_s6 + $0x30] sm:$0xff] %v439_v12  ;;  %442 = vst [vmem:[%s2254_s6 + $0x38] sm:$0xff] %v441_v13  ;;  %v445_v15 = vld [vmem:[%s2249_s5 + $0x90] sm:$0xff] }
  0x3b   : > { %444 = vst [vmem:[%s2254_s6 + $0x40] sm:$0xff] %v443_v14  ;;  %v447_v16 = vld [vmem:[%s2249_s5 + $0xa0] sm:$0xff]  ;;  %v449_v17 = vld [vmem:[%s2249_s5 + $0xb0] sm:$0xff]  ;;  %446 = vst [vmem:[%s2254_s6 + $0x48] sm:$0xff] %v445_v15 }
  0x3c   : > { %448 = vst [vmem:[%s2254_s6 + $0x50] sm:$0xff] %v447_v16  ;;  %450 = vst [vmem:[%s2254_s6 + $0x58] sm:$0xff] %v449_v17  ;;  %v451_v18 = vld [vmem:[%s2249_s5 + $0xc0] sm:$0xff]  ;;  %v453_v19 = vld [vmem:[%s2249_s5 + $0xd0] sm:$0xff] }
  0x3d   : > { %v455_v20 = vld [vmem:[%s2249_s5 + $0xe0] sm:$0xff]  ;;  %452 = vst [vmem:[%s2254_s6 + $0x60] sm:$0xff] %v451_v18  ;;  %454 = vst [vmem:[%s2254_s6 + $0x68] sm:$0xff] %v453_v19  ;;  %v457_v21 = vld [vmem:[%s2249_s5 + $0xf0] sm:$0xff] }
  0x3e   : > { %456 = vst [vmem:[%s2254_s6 + $0x70] sm:$0xff] %v455_v20  ;;  %v459_v22 = vld [vmem:[%s2249_s5 + $0x100] sm:$0xff]  ;;  %v461_v23 = vld [vmem:[%s2249_s5 + $0x110] sm:$0xff]  ;;  %458 = vst [vmem:[%s2254_s6 + $0x78] sm:$0xff] %v457_v21 }
  0x3f   : > { %460 = vst [vmem:[%s2254_s6 + $0x80] sm:$0xff] %v459_v22  ;;  %462 = vst [vmem:[%s2254_s6 + $0x88] sm:$0xff] %v461_v23  ;;  %v463_v24 = vld [vmem:[%s2249_s5 + $0x120] sm:$0xff]  ;;  %v465_v25 = vld [vmem:[%s2249_s5 + $0x130] sm:$0xff] }
  0x40   : > { %v467_v26 = vld [vmem:[%s2249_s5 + $0x140] sm:$0xff]  ;;  %464 = vst [vmem:[%s2254_s6 + $0x90] sm:$0xff] %v463_v24  ;;  %466 = vst [vmem:[%s2254_s6 + $0x98] sm:$0xff] %v465_v25  ;;  %v469_v27 = vld [vmem:[%s2249_s5 + $0x150] sm:$0xff] }
  0x41   : > { %468 = vst [vmem:[%s2254_s6 + $0xa0] sm:$0xff] %v467_v26  ;;  %v471_v28 = vld [vmem:[%s2249_s5 + $0x160] sm:$0xff]  ;;  %v473_v29 = vld [vmem:[%s2249_s5 + $0x170] sm:$0xff]  ;;  %470 = vst [vmem:[%s2254_s6 + $0xa8] sm:$0xff] %v469_v27 }
  0x42   : > { %472 = vst [vmem:[%s2254_s6 + $0xb0] sm:$0xff] %v471_v28  ;;  %474 = vst [vmem:[%s2254_s6 + $0xb8] sm:$0xff] %v473_v29  ;;  %v475_v30 = vld [vmem:[%s2249_s5 + $0x180] sm:$0xff]  ;;  %v477_v31 = vld [vmem:[%s2249_s5 + $0x190] sm:$0xff] }
  0x43   : > { %v479_v32 = vld [vmem:[%s2249_s5 + $0x1a0] sm:$0xff]  ;;  %476 = vst [vmem:[%s2254_s6 + $0xc0] sm:$0xff] %v475_v30  ;;  %478 = vst [vmem:[%s2254_s6 + $0xc8] sm:$0xff] %v477_v31  ;;  %v481_v33 = vld [vmem:[%s2249_s5 + $0x1b0] sm:$0xff] }
  0x44   : > { %480 = vst [vmem:[%s2254_s6 + $0xd0] sm:$0xff] %v479_v32  ;;  %v483_v34 = vld [vmem:[%s2249_s5 + $0x1c0] sm:$0xff]  ;;  %v485_v35 = vld [vmem:[%s2249_s5 + $0x1d0] sm:$0xff]  ;;  %482 = vst [vmem:[%s2254_s6 + $0xd8] sm:$0xff] %v481_v33 }
  0x45   : > { %484 = vst [vmem:[%s2254_s6 + $0xe0] sm:$0xff] %v483_v34  ;;  %486 = vst [vmem:[%s2254_s6 + $0xe8] sm:$0xff] %v485_v35  ;;  %v487_v36 = vld [vmem:[%s2249_s5 + $0x1e0] sm:$0xff]  ;;  %v489_v37 = vld [vmem:[%s2249_s5 + $0x1f0] sm:$0xff] }
  0x46   : > { %v491_v38 = vld [vmem:[%s2249_s5 + $0x200] sm:$0xff]  ;;  %488 = vst [vmem:[%s2254_s6 + $0xf0] sm:$0xff] %v487_v36  ;;  %490 = vst [vmem:[%s2254_s6 + $0xf8] sm:$0xff] %v489_v37  ;;  %v493_v39 = vld [vmem:[%s2249_s5 + $0x210] sm:$0xff] }
  0x47   : > { %492 = vst [vmem:[%s2254_s6 + $0x100] sm:$0xff] %v491_v38  ;;  %v495_v40 = vld [vmem:[%s2249_s5 + $0x220] sm:$0xff]  ;;  %v497_v41 = vld [vmem:[%s2249_s5 + $0x230] sm:$0xff]  ;;  %494 = vst [vmem:[%s2254_s6 + $0x108] sm:$0xff] %v493_v39 }
  0x48   : > { %496 = vst [vmem:[%s2254_s6 + $0x110] sm:$0xff] %v495_v40  ;;  %498 = vst [vmem:[%s2254_s6 + $0x118] sm:$0xff] %v497_v41  ;;  %v499_v42 = vld [vmem:[%s2249_s5 + $0x240] sm:$0xff]  ;;  %v501_v43 = vld [vmem:[%s2249_s5 + $0x250] sm:$0xff] }
  0x49   : > { %v503_v44 = vld [vmem:[%s2249_s5 + $0x260] sm:$0xff]  ;;  %500 = vst [vmem:[%s2254_s6 + $0x120] sm:$0xff] %v499_v42  ;;  %502 = vst [vmem:[%s2254_s6 + $0x128] sm:$0xff] %v501_v43  ;;  %v505_v45 = vld [vmem:[%s2249_s5 + $0x270] sm:$0xff] }
  0x4a   : > { %504 = vst [vmem:[%s2254_s6 + $0x130] sm:$0xff] %v503_v44  ;;  %v507_v46 = vld [vmem:[%s2249_s5 + $0x280] sm:$0xff]  ;;  %v509_v47 = vld [vmem:[%s2249_s5 + $0x290] sm:$0xff]  ;;  %506 = vst [vmem:[%s2254_s6 + $0x138] sm:$0xff] %v505_v45 }
  0x4b   : > { %508 = vst [vmem:[%s2254_s6 + $0x140] sm:$0xff] %v507_v46  ;;  %510 = vst [vmem:[%s2254_s6 + $0x148] sm:$0xff] %v509_v47  ;;  %v511_v48 = vld [vmem:[%s2249_s5 + $0x2a0] sm:$0xff]  ;;  %v513_v49 = vld [vmem:[%s2249_s5 + $0x2b0] sm:$0xff] }
  0x4c   : > { %v515_v50 = vld [vmem:[%s2249_s5 + $0x2c0] sm:$0xff]  ;;  %512 = vst [vmem:[%s2254_s6 + $0x150] sm:$0xff] %v511_v48  ;;  %514 = vst [vmem:[%s2254_s6 + $0x158] sm:$0xff] %v513_v49  ;;  %v517_v51 = vld [vmem:[%s2249_s5 + $0x2d0] sm:$0xff] }
  0x4d   : > { %516 = vst [vmem:[%s2254_s6 + $0x160] sm:$0xff] %v515_v50  ;;  %v519_v52 = vld [vmem:[%s2249_s5 + $0x2e0] sm:$0xff]  ;;  %v521_v53 = vld [vmem:[%s2249_s5 + $0x2f0] sm:$0xff]  ;;  %518 = vst [vmem:[%s2254_s6 + $0x168] sm:$0xff] %v517_v51 }
  0x4e   : > { %520 = vst [vmem:[%s2254_s6 + $0x170] sm:$0xff] %v519_v52  ;;  %522 = vst [vmem:[%s2254_s6 + $0x178] sm:$0xff] %v521_v53  ;;  %v523_v54 = vld [vmem:[%s2249_s5 + $0x300] sm:$0xff]  ;;  %v525_v55 = vld [vmem:[%s2249_s5 + $0x310] sm:$0xff] }
  0x4f   : > { %v527_v56 = vld [vmem:[%s2249_s5 + $0x320] sm:$0xff]  ;;  %524 = vst [vmem:[%s2254_s6 + $0x180] sm:$0xff] %v523_v54  ;;  %526 = vst [vmem:[%s2254_s6 + $0x188] sm:$0xff] %v525_v55  ;;  %v529_v57 = vld [vmem:[%s2249_s5 + $0x330] sm:$0xff] }
  0x50   : > { %528 = vst [vmem:[%s2254_s6 + $0x190] sm:$0xff] %v527_v56  ;;  %v531_v58 = vld [vmem:[%s2249_s5 + $0x340] sm:$0xff]  ;;  %v533_v59 = vld [vmem:[%s2249_s5 + $0x350] sm:$0xff]  ;;  %530 = vst [vmem:[%s2254_s6 + $0x198] sm:$0xff] %v529_v57 }
  0x51   : > { %532 = vst [vmem:[%s2254_s6 + $0x1a0] sm:$0xff] %v531_v58  ;;  %534 = vst [vmem:[%s2254_s6 + $0x1a8] sm:$0xff] %v533_v59  ;;  %v535_v60 = vld [vmem:[%s2249_s5 + $0x360] sm:$0xff]  ;;  %v537_v61 = vld [vmem:[%s2249_s5 + $0x370] sm:$0xff] }
  0x52   : > { %v539_v62 = vld [vmem:[%s2249_s5 + $0x380] sm:$0xff]  ;;  %536 = vst [vmem:[%s2254_s6 + $0x1b0] sm:$0xff] %v535_v60  ;;  %538 = vst [vmem:[%s2254_s6 + $0x1b8] sm:$0xff] %v537_v61  ;;  %v541_v63 = vld [vmem:[%s2249_s5 + $0x390] sm:$0xff] }
  0x53   : > { %540 = vst [vmem:[%s2254_s6 + $0x1c0] sm:$0xff] %v539_v62  ;;  %v543_v0 = vld [vmem:[%s2249_s5 + $0x3a0] sm:$0xff]  ;;  %v545_v1 = vld [vmem:[%s2249_s5 + $0x3b0] sm:$0xff]  ;;  %542 = vst [vmem:[%s2254_s6 + $0x1c8] sm:$0xff] %v541_v63 }
  0x54   : > { %544 = vst [vmem:[%s2254_s6 + $0x1d0] sm:$0xff] %v543_v0  ;;  %546 = vst [vmem:[%s2254_s6 + $0x1d8] sm:$0xff] %v545_v1  ;;  %v547_v2 = vld [vmem:[%s2249_s5 + $0x3c0] sm:$0xff]  ;;  %v549_v3 = vld [vmem:[%s2249_s5 + $0x3d0] sm:$0xff] }
  0x55   : > { %v551_v4 = vld [vmem:[%s2249_s5 + $0x3e0] sm:$0xff]  ;;  %548 = vst [vmem:[%s2254_s6 + $0x1e0] sm:$0xff] %v547_v2  ;;  %550 = vst [vmem:[%s2254_s6 + $0x1e8] sm:$0xff] %v549_v3  ;;  %v553_v5 = vld [vmem:[%s2249_s5 + $0x3f0] sm:$0xff] }
  0x56   : > { %552 = vst [vmem:[%s2254_s6 + $0x1f0] sm:$0xff] %v551_v4  ;;  %v555_v6 = vld [vmem:[%s2249_s5 + $0x400] sm:$0xff]  ;;  %v557_v7 = vld [vmem:[%s2249_s5 + $0x410] sm:$0xff]  ;;  %554 = vst [vmem:[%s2254_s6 + $0x1f8] sm:$0xff] %v553_v5 }
  0x57   : > { %556 = vst [vmem:[%s2254_s6 + $0x200] sm:$0xff] %v555_v6  ;;  %558 = vst [vmem:[%s2254_s6 + $0x208] sm:$0xff] %v557_v7  ;;  %v559_v8 = vld [vmem:[%s2249_s5 + $0x420] sm:$0xff]  ;;  %v561_v9 = vld [vmem:[%s2249_s5 + $0x430] sm:$0xff] }
  0x58   : > { %v563_v10 = vld [vmem:[%s2249_s5 + $0x440] sm:$0xff]  ;;  %560 = vst [vmem:[%s2254_s6 + $0x210] sm:$0xff] %v559_v8  ;;  %562 = vst [vmem:[%s2254_s6 + $0x218] sm:$0xff] %v561_v9  ;;  %v565_v11 = vld [vmem:[%s2249_s5 + $0x450] sm:$0xff] }
  0x59   : > { %564 = vst [vmem:[%s2254_s6 + $0x220] sm:$0xff] %v563_v10  ;;  %v567_v12 = vld [vmem:[%s2249_s5 + $0x460] sm:$0xff]  ;;  %v569_v13 = vld [vmem:[%s2249_s5 + $0x470] sm:$0xff]  ;;  %566 = vst [vmem:[%s2254_s6 + $0x228] sm:$0xff] %v565_v11 }
  0x5a   : > { %568 = vst [vmem:[%s2254_s6 + $0x230] sm:$0xff] %v567_v12  ;;  %570 = vst [vmem:[%s2254_s6 + $0x238] sm:$0xff] %v569_v13  ;;  %v571_v14 = vld [vmem:[%s2249_s5 + $0x480] sm:$0xff]  ;;  %v573_v15 = vld [vmem:[%s2249_s5 + $0x490] sm:$0xff] }
  0x5b   : > { %v575_v16 = vld [vmem:[%s2249_s5 + $0x4a0] sm:$0xff]  ;;  %572 = vst [vmem:[%s2254_s6 + $0x240] sm:$0xff] %v571_v14  ;;  %574 = vst [vmem:[%s2254_s6 + $0x248] sm:$0xff] %v573_v15  ;;  %v577_v17 = vld [vmem:[%s2249_s5 + $0x4b0] sm:$0xff] }
  0x5c   : > { %576 = vst [vmem:[%s2254_s6 + $0x250] sm:$0xff] %v575_v16  ;;  %v579_v18 = vld [vmem:[%s2249_s5 + $0x4c0] sm:$0xff]  ;;  %v581_v19 = vld [vmem:[%s2249_s5 + $0x4d0] sm:$0xff]  ;;  %578 = vst [vmem:[%s2254_s6 + $0x258] sm:$0xff] %v577_v17 }
  0x5d   : > { %580 = vst [vmem:[%s2254_s6 + $0x260] sm:$0xff] %v579_v18  ;;  %582 = vst [vmem:[%s2254_s6 + $0x268] sm:$0xff] %v581_v19  ;;  %v583_v20 = vld [vmem:[%s2249_s5 + $0x4e0] sm:$0xff]  ;;  %v585_v21 = vld [vmem:[%s2249_s5 + $0x4f0] sm:$0xff] }
  0x5e   : > { %v587_v22 = vld [vmem:[%s2249_s5 + $0x500] sm:$0xff]  ;;  %584 = vst [vmem:[%s2254_s6 + $0x270] sm:$0xff] %v583_v20  ;;  %586 = vst [vmem:[%s2254_s6 + $0x278] sm:$0xff] %v585_v21  ;;  %v589_v23 = vld [vmem:[%s2249_s5 + $0x510] sm:$0xff] }
  0x5f   : > { %588 = vst [vmem:[%s2254_s6 + $0x280] sm:$0xff] %v587_v22  ;;  %v591_v24 = vld [vmem:[%s2249_s5 + $0x520] sm:$0xff]  ;;  %v593_v25 = vld [vmem:[%s2249_s5 + $0x530] sm:$0xff]  ;;  %590 = vst [vmem:[%s2254_s6 + $0x288] sm:$0xff] %v589_v23 }
  0x60   : > { %592 = vst [vmem:[%s2254_s6 + $0x290] sm:$0xff] %v591_v24  ;;  %594 = vst [vmem:[%s2254_s6 + $0x298] sm:$0xff] %v593_v25  ;;  %v595_v26 = vld [vmem:[%s2249_s5 + $0x540] sm:$0xff]  ;;  %v597_v27 = vld [vmem:[%s2249_s5 + $0x550] sm:$0xff] }
  0x61   : > { %v599_v28 = vld [vmem:[%s2249_s5 + $0x560] sm:$0xff]  ;;  %596 = vst [vmem:[%s2254_s6 + $0x2a0] sm:$0xff] %v595_v26  ;;  %598 = vst [vmem:[%s2254_s6 + $0x2a8] sm:$0xff] %v597_v27  ;;  %v601_v29 = vld [vmem:[%s2249_s5 + $0x570] sm:$0xff] }
  0x62   : > { %600 = vst [vmem:[%s2254_s6 + $0x2b0] sm:$0xff] %v599_v28  ;;  %v603_v30 = vld [vmem:[%s2249_s5 + $0x580] sm:$0xff]  ;;  %v605_v31 = vld [vmem:[%s2249_s5 + $0x590] sm:$0xff]  ;;  %602 = vst [vmem:[%s2254_s6 + $0x2b8] sm:$0xff] %v601_v29 }
  0x63   : > { %604 = vst [vmem:[%s2254_s6 + $0x2c0] sm:$0xff] %v603_v30  ;;  %606 = vst [vmem:[%s2254_s6 + $0x2c8] sm:$0xff] %v605_v31  ;;  %v607_v32 = vld [vmem:[%s2249_s5 + $0x5a0] sm:$0xff]  ;;  %v609_v33 = vld [vmem:[%s2249_s5 + $0x5b0] sm:$0xff] }
  0x64   : > { %v611_v34 = vld [vmem:[%s2249_s5 + $0x5c0] sm:$0xff]  ;;  %608 = vst [vmem:[%s2254_s6 + $0x2d0] sm:$0xff] %v607_v32  ;;  %610 = vst [vmem:[%s2254_s6 + $0x2d8] sm:$0xff] %v609_v33  ;;  %v613_v35 = vld [vmem:[%s2249_s5 + $0x5d0] sm:$0xff] }
  0x65   : > { %612 = vst [vmem:[%s2254_s6 + $0x2e0] sm:$0xff] %v611_v34  ;;  %v615_v36 = vld [vmem:[%s2249_s5 + $0x5e0] sm:$0xff]  ;;  %v617_v37 = vld [vmem:[%s2249_s5 + $0x5f0] sm:$0xff]  ;;  %614 = vst [vmem:[%s2254_s6 + $0x2e8] sm:$0xff] %v613_v35 }
  0x66   : > { %616 = vst [vmem:[%s2254_s6 + $0x2f0] sm:$0xff] %v615_v36  ;;  %618 = vst [vmem:[%s2254_s6 + $0x2f8] sm:$0xff] %v617_v37 }
  0x67 PF: > { %p1653_p0 = scmp.ge.s32.totalorder %s2112_s22, 1  ;;  %p631_p1 = scmp.lt.s32.totalorder %s2112_s22, 13 }
  0x69   : > { %p632_p2 = pnand %p1653_p0, %p631_p1 }
  0x6a   : > { %s638_s0 = sand.u32 (!%p632_p2), 1, %s2088_s16   ;;  %s645_s23 = sand.u32 (!%p632_p2), 1, %s2080_s14  }
  0x6b   : > { %635 = sbr.rel (%p632_p2) target bundleno = 492 (0x1ec), region = 85  ;;  %s672_s7 = sand.u32 (!%p632_p2), 1, %s2072_s12  }
  0x6c   : > { %s1782_s28 = smul.u32 (!%p632_p2), 48, %s638_s0  ;;  %s1654_s26 = sshll.u32 (!%p632_p2), %s672_s7, 4 }
  0x6d   : > { %s1783_s11 = smul.u32 (!%p632_p2), 768, %s645_s23  ;;  %s1655_s27 = sshll.u32 (!%p632_p2), %s2100_s19, 1 }
  0x6e   : > { %p680_p3 = scmp.lt.s32.totalorder (!%p632_p2), %s1655_s27, 3  ;;  %s2457_s6 = scalar_lea.vmem (!%p632_p2), [#allocation3], %s1782_s28 }
  0x6f   : > { %s2459_s1 = scalar_lea.vmem (!%p632_p2), [#allocation4], %s1783_s11  ;;  %s2461_s25 = scalar_lea.vmem (!%p632_p2), [#allocation5], %s1654_s26 }
  0x70   : > { %p1656_p4 = scmp.ne.s32.totalorder (!%p632_p2), %s2096_s18, 0 }
  0x72   : > { %s2646_s27 = smov (!%p680_p3, %s1655_s27), 3  ;;  %689 = sbr.rel (%p1656_p4) target bundleno = 121 (0x79), region = 97 }
  0x73   : > { %s682_s5 = scalar_lea.vmem %s2617_s2, %s2646_s27  ;;  %v2114_v38 = vmov (!%p1656_p4), 0.0  }
  0x74   : > { %690 = vst [vmem:[#allocation2] sm:$0xff] (!%p1656_p4), %v2114_v38  ;;  %691 = vst [vmem:[#allocation2 + $0x8] sm:$0xff] (!%p1656_p4), %v2114_v38 }
  0x75   : > { %692 = vst [vmem:[#allocation2 + $0x10] sm:$0xff] (!%p1656_p4), %v2114_v38  ;;  %693 = vst [vmem:[#allocation2 + $0x18] sm:$0xff] (!%p1656_p4), %v2114_v38 }
  0x79 PF: > { %v1873_v39 = vld [vmem:[%s2459_s1 + $0x104] ss:$8 sps:$4 sm:$0xff]   ;;  %v1875_v40 = vld [vmem:[%s2459_s1 + $0x100] ss:$8 sps:$4 sm:$0xff]   ;;  %v1876_v41 = vld [vmem:[%s2459_s1 + $0x114] ss:$8 sps:$4 sm:$0xff]  }
  0x7a   : > { %1353 = vmatprep.subr.bf16.mxu0 %v1873_v39  ;;  %v1878_v42 = vld [vmem:[%s2459_s1 + $0x110] ss:$8 sps:$4 sm:$0xff]   ;;  %v1879_v43 = vld [vmem:[%s2459_s1 + $0x124] ss:$8 sps:$4 sm:$0xff]   ;;  %v1881_v44 = vld [vmem:[%s2459_s1 + $0x120] ss:$8 sps:$4 sm:$0xff]  }
  0x7b   : > { %1354 = vmatpush1.bf16.msra.mxu0 %v1875_v40  ;;  %v1882_v45 = vld [vmem:[%s2459_s1 + $0x134] ss:$8 sps:$4 sm:$0xff]   ;;  %v1884_v46 = vld [vmem:[%s2459_s1 + $0x130] ss:$8 sps:$4 sm:$0xff]   ;;  %v1885_v47 = vld [vmem:[%s2459_s1 + $0x144] ss:$8 sps:$4 sm:$0xff]  }
  0x7c   : > { %1355 = vmatprep.subr.bf16.mxu0 %v1876_v41  ;;  %v1887_v48 = vld [vmem:[%s2459_s1 + $0x140] ss:$8 sps:$4 sm:$0xff]   ;;  %v1888_v49 = vld [vmem:[%s2459_s1 + $0x154] ss:$8 sps:$4 sm:$0xff]   ;;  %v1890_v50 = vld [vmem:[%s2459_s1 + $0x150] ss:$8 sps:$4 sm:$0xff]  }
  0x7d   : > { %v1891_v51 = vld [vmem:[%s2459_s1 + $0x164] ss:$8 sps:$4 sm:$0xff]   ;;  %v1923_v53 = vld [vmem:[%s2459_s1] ss:$8 sps:$4 sm:$0xff]   ;;  %v1894_v56 = vld [vmem:[%s2459_s1 + $0x174] ss:$8 sps:$4 sm:$0xff]  }
  0x7e   : > { %v1920_v52 = vld [vmem:[%s2459_s1 + $0x4] ss:$8 sps:$4 sm:$0xff]   ;;  %v1893_v54 = vld [vmem:[%s2459_s1 + $0x160] ss:$8 sps:$4 sm:$0xff]   ;;  %v1930_v57 = vld [vmem:[%s2459_s1 + $0x14] ss:$8 sps:$4 sm:$0xff]  }
  0x7f   : > { %1356 = vmatpush1.bf16.msra.mxu0 %v1878_v42  ;;  %1310 = vmatprep.subr.bf16.mxu1 %v1920_v52  ;;  %v1926_v55 = vld [vmem:[%s2457_s6 + $0xc] ss:$24 sps:$4 sm:$0xff]   ;;  %v1932_v58 = vld [vmem:[%s2459_s1 + $0x10] ss:$8 sps:$4 sm:$0xff]   ;;  %v1938_v62 = vld [vmem:[%s2459_s1 + $0x20] ss:$8 sps:$4 sm:$0xff]  }
  0x80   : > { %1357 = vmatprep.subr.bf16.mxu0 %v1879_v43  ;;  %1311 = vmatpush1.bf16.msra.mxu1 %v1923_v53  ;;  %v1896_v59 = vld [vmem:[%s2459_s1 + $0x170] ss:$8 sps:$4 sm:$0xff]   ;;  %v1897_v60 = vld [vmem:[%s2459_s1 + $0x184] ss:$8 sps:$4 sm:$0xff]   ;;  %v1899_v63 = vld [vmem:[%s2459_s1 + $0x180] ss:$8 sps:$4 sm:$0xff]  }
  0x81   : > { %1385 = vmatprep.mubr.bf16.mxu0 %v1926_v55  ;;  %1312 = vmatprep.subr.bf16.mxu1 %v1930_v57  ;;  %v1936_v61 = vld [vmem:[%s2459_s1 + $0x24] ss:$8 sps:$4 sm:$0xff]   ;;  %v1942_v0 = vld [vmem:[%s2459_s1 + $0x34] ss:$8 sps:$4 sm:$0xff]   ;;  %v1944_v2 = vld [vmem:[%s2459_s1 + $0x30] ss:$8 sps:$4 sm:$0xff]  }
  0x82   : > { %v1900_v1 = vld [vmem:[%s2459_s1 + $0x194] ss:$8 sps:$4 sm:$0xff]   ;;  %v1948_v3 = vld [vmem:[%s2459_s1 + $0x44] ss:$8 sps:$4 sm:$0xff]   ;;  %v1902_v4 = vld [vmem:[%s2459_s1 + $0x190] ss:$8 sps:$4 sm:$0xff]  }
  0x83   : > { %1358 = vmatpush1.bf16.msra.mxu0 %v1881_v44  ;;  %v1903_v5 = vld [vmem:[%s2459_s1 + $0x1a4] ss:$8 sps:$4 sm:$0xff]   ;;  %v1950_v6 = vld [vmem:[%s2459_s1 + $0x40] ss:$8 sps:$4 sm:$0xff]   ;;  %v1954_v7 = vld [vmem:[%s2459_s1 + $0x54] ss:$8 sps:$4 sm:$0xff]  }
  0x84   : > { %1359 = vmatprep.subr.bf16.mxu0 %v1882_v45  ;;  %1313 = vmatpush1.bf16.msra.mxu1 %v1932_v58  ;;  %v1905_v8 = vld [vmem:[%s2459_s1 + $0x1a0] ss:$8 sps:$4 sm:$0xff]   ;;  %v1906_v9 = vld [vmem:[%s2459_s1 + $0x1b4] ss:$8 sps:$4 sm:$0xff]   ;;  %v1956_v10 = vld [vmem:[%s2459_s1 + $0x50] ss:$8 sps:$4 sm:$0xff]  }
  0x85   : > { %1314 = vmatprep.subr.bf16.mxu1 %v1936_v61  ;;  %v1960_v11 = vld [vmem:[%s2459_s1 + $0x64] ss:$8 sps:$4 sm:$0xff]   ;;  %v1908_v12 = vld [vmem:[%s2459_s1 + $0x1b0] ss:$8 sps:$4 sm:$0xff]   ;;  %v1962_v14 = vld [vmem:[%s2459_s1 + $0x60] ss:$8 sps:$4 sm:$0xff]  }
  0x86   : > { %v1909_v13 = vld [vmem:[%s2459_s1 + $0x1c4] ss:$8 sps:$4 sm:$0xff]   ;;  %v1966_v15 = vld [vmem:[%s2459_s1 + $0x74] ss:$8 sps:$4 sm:$0xff]   ;;  %v1911_v16 = vld [vmem:[%s2459_s1 + $0x1c0] ss:$8 sps:$4 sm:$0xff]  }
  0x87   : > { %1360 = vmatpush1.bf16.msra.mxu0 %v1884_v46  ;;  %v1912_v17 = vld [vmem:[%s2459_s1 + $0x1d4] ss:$8 sps:$4 sm:$0xff]   ;;  %v1968_v18 = vld [vmem:[%s2459_s1 + $0x70] ss:$8 sps:$4 sm:$0xff]   ;;  %v1972_v19 = vld [vmem:[%s2459_s1 + $0x84] ss:$8 sps:$4 sm:$0xff]  }
  0x88   : > { %1361 = vmatprep.subr.bf16.mxu0 %v1885_v47  ;;  %1315 = vmatpush1.bf16.msra.mxu1 %v1938_v62  ;;  %v1914_v20 = vld [vmem:[%s2459_s1 + $0x1d0] ss:$8 sps:$4 sm:$0xff]   ;;  %v1915_v21 = vld [vmem:[%s2459_s1 + $0x1e4] ss:$8 sps:$4 sm:$0xff]   ;;  %v1974_v22 = vld [vmem:[%s2459_s1 + $0x80] ss:$8 sps:$4 sm:$0xff]  }
  0x89   : > { %1316 = vmatprep.subr.bf16.mxu1 %v1942_v0  ;;  %v1978_v23 = vld [vmem:[%s2459_s1 + $0x94] ss:$8 sps:$4 sm:$0xff]   ;;  %v1917_v24 = vld [vmem:[%s2459_s1 + $0x1e0] ss:$8 sps:$4 sm:$0xff]   ;;  %v1980_v26 = vld [vmem:[%s2459_s1 + $0x90] ss:$8 sps:$4 sm:$0xff]  }
  0x8a   : > { %v1918_v25 = vld [vmem:[%s2459_s1 + $0x1f4] ss:$8 sps:$4 sm:$0xff]   ;;  %v1984_v27 = vld [vmem:[%s2459_s1 + $0xa4] ss:$8 sps:$4 sm:$0xff]   ;;  %v1922_v28 = vld [vmem:[%s2459_s1 + $0x1f0] ss:$8 sps:$4 sm:$0xff]  }
  0x8b   : > { %1362 = vmatpush1.bf16.msra.mxu0 %v1887_v48  ;;  %v1929_v29 = vld [vmem:[%s2459_s1 + $0x204] ss:$8 sps:$4 sm:$0xff]   ;;  %v1986_v30 = vld [vmem:[%s2459_s1 + $0xa0] ss:$8 sps:$4 sm:$0xff]   ;;  %v1990_v32 = vld [vmem:[%s2459_s1 + $0xb4] ss:$8 sps:$4 sm:$0xff]  }
  0x8c   : > { %1363 = vmatprep.subr.bf16.mxu0 %v1888_v49  ;;  %1317 = vmatpush1.bf16.msra.mxu1 %v1944_v2  ;;  %v1924_v31 = vld [vmem:[%s2457_s6 + $0x8] ss:$24 sps:$4 sm:$0xff]   ;;  %v1935_v34 = vld [vmem:[%s2459_s1 + $0x214] ss:$8 sps:$4 sm:$0xff]   ;;  %v1996_v37 = vld [vmem:[%s2459_s1 + $0xc4] ss:$8 sps:$4 sm:$0xff]  }
  0x8d   : > { %1318 = vmatprep.subr.bf16.mxu1 %v1948_v3  ;;  %v1927_v33 = vld [vmem:[%s2459_s1 + $0x200] ss:$8 sps:$4 sm:$0xff]   ;;  %v1992_v35 = vld [vmem:[%s2459_s1 + $0xb0] ss:$8 sps:$4 sm:$0xff]   ;;  %v2019_v36 = vld [vmem:[%s2457_s6 + $0x4] ss:$24 sps:$4 sm:$0xff]  }
  0x8e   : > { %v1933_v38 = vld [vmem:[%s2459_s1 + $0x210] ss:$8 sps:$4 sm:$0xff]   ;;  %1342 = vmatprep.mubr.bf16.mxu1 %v2019_v36  ;;  %v2025_v39 = vld [vmem:[%s2457_s6 + $0x14] ss:$24 sps:$4 sm:$0xff]   ;;  %v1998_v41 = vld [vmem:[%s2459_s1 + $0xc0] ss:$8 sps:$4 sm:$0xff]  }
  0x8f   : > { %1364 = vmatpush1.bf16.msra.mxu0 %v1890_v50  ;;  %v1941_v40 = vld [vmem:[%s2459_s1 + $0x224] ss:$8 sps:$4 sm:$0xff]   ;;  %v2002_v42 = vld [vmem:[%s2459_s1 + $0xd4] ss:$8 sps:$4 sm:$0xff]   ;;  %v1939_v43 = vld [vmem:[%s2459_s1 + $0x220] ss:$8 sps:$4 sm:$0xff]  }
  0x90   : > { %1365 = vmatprep.subr.bf16.mxu0 %v1891_v51  ;;  %1319 = vmatpush1.bf16.msra.mxu1 %v1950_v6  ;;  %v1947_v44 = vld [vmem:[%s2459_s1 + $0x234] ss:$8 sps:$4 sm:$0xff]   ;;  %v2004_v45 = vld [vmem:[%s2459_s1 + $0xd0] ss:$8 sps:$4 sm:$0xff]   ;;  %v2008_v46 = vld [vmem:[%s2459_s1 + $0xe4] ss:$8 sps:$4 sm:$0xff]  }
  0x91   : > { %1320 = vmatprep.subr.bf16.mxu1 %v1954_v7  ;;  %v1945_v47 = vld [vmem:[%s2459_s1 + $0x230] ss:$8 sps:$4 sm:$0xff]   ;;  %v1953_v48 = vld [vmem:[%s2459_s1 + $0x244] ss:$8 sps:$4 sm:$0xff]   ;;  %v2010_v49 = vld [vmem:[%s2459_s1 + $0xe0] ss:$8 sps:$4 sm:$0xff]  }
  0x92   : > { %v2014_v50 = vld [vmem:[%s2459_s1 + $0xf4] ss:$8 sps:$4 sm:$0xff]   ;;  %v1951_v51 = vld [vmem:[%s2459_s1 + $0x240] ss:$8 sps:$4 sm:$0xff]   ;;  %v2016_v53 = vld [vmem:[%s2459_s1 + $0xf0] ss:$8 sps:$4 sm:$0xff]  }
  0x93   : > { %1366 = vmatpush1.bf16.msra.mxu0 %v1893_v54  ;;  %v1959_v52 = vld [vmem:[%s2459_s1 + $0x254] ss:$8 sps:$4 sm:$0xff]   ;;  %v1957_v54 = vld [vmem:[%s2459_s1 + $0x250] ss:$8 sps:$4 sm:$0xff]   ;;  %v1965_v55 = vld [vmem:[%s2459_s1 + $0x264] ss:$8 sps:$4 sm:$0xff]  }
  0x94   : > { %1367 = vmatprep.subr.bf16.mxu0 %v1894_v56  ;;  %1321 = vmatpush1.bf16.msra.mxu1 %v1956_v10  ;;  %v2017_v56 = vld [vmem:[%s2457_s6] ss:$24 sps:$4 sm:$0xff]   ;;  %v1971_v58 = vld [vmem:[%s2459_s1 + $0x274] ss:$8 sps:$4 sm:$0xff]   ;;  %v1989_v0 = vld [vmem:[%s2459_s1 + $0x2a4] ss:$8 sps:$4 sm:$0xff]  }
  0x95   : > { %1322 = vmatprep.subr.bf16.mxu1 %v1960_v11  ;;  %v1963_v57 = vld [vmem:[%s2459_s1 + $0x260] ss:$8 sps:$4 sm:$0xff]   ;;  %v1983_v62 = vld [vmem:[%s2459_s1 + $0x294] ss:$8 sps:$4 sm:$0xff]   ;;  %v1993_v3 = vld [vmem:[%s2459_s1 + $0x2b0] ss:$8 sps:$4 sm:$0xff]  }
  0x96   : > { %v1975_v61 = vld [vmem:[%s2459_s1 + $0x280] ss:$8 sps:$4 sm:$0xff]   ;;  %v1995_v2 = vld [vmem:[%s2459_s1 + $0x2b4] ss:$8 sps:$4 sm:$0xff]   ;;  %v2005_v7 = vld [vmem:[%s2459_s1 + $0x2d0] ss:$8 sps:$4 sm:$0xff]  }
  0x97   : > { %1368 = vmatpush1.bf16.msra.mxu0 %v1896_v59  ;;  %v1969_v59 = vld [vmem:[%s2459_s1 + $0x270] ss:$8 sps:$4 sm:$0xff]   ;;  %v2007_v6 = vld [vmem:[%s2459_s1 + $0x2d4] ss:$8 sps:$4 sm:$0xff]   ;;  %p1759_p5 = scmp.ne.s32.totalorder %s2096_s18, 5 }
  0x98   : > { %1369 = vmatprep.subr.bf16.mxu0 %v1897_v60  ;;  %1323 = vmatpush1.bf16.msra.mxu1 %v1962_v14  ;;  %v1977_v60 = vld [vmem:[%s2459_s1 + $0x284] ss:$8 sps:$4 sm:$0xff]   ;;  %v2022_v10 = vld [vmem:[%s2459_s1 + $0x2f4] ss:$8 sps:$4 sm:$0xff]   ;;  %v2020_v11 = vld [vmem:[%s2459_s1 + $0x2f0] ss:$8 sps:$4 sm:$0xff]  }
  0x99   : > { %1324 = vmatprep.subr.bf16.mxu1 %v1966_v15 }
  0x9b   : > { %1370 = vmatpush1.bf16.msra.mxu0 %v1899_v63  ;;  %v1981_v63 = vld [vmem:[%s2459_s1 + $0x290] ss:$8 sps:$4 sm:$0xff]  }
  0x9c   : > { %1371 = vmatprep.subr.bf16.mxu0 %v1900_v1  ;;  %1325 = vmatpush1.bf16.msra.mxu1 %v1968_v18  ;;  %v1987_v1 = vld [vmem:[%s2459_s1 + $0x2a0] ss:$8 sps:$4 sm:$0xff]  }
  0x9d   : > { %1326 = vmatprep.subr.bf16.mxu1 %v1972_v19 }
  0x9f   : > { %1372 = vmatpush1.bf16.msra.mxu0 %v1902_v4  ;;  %v2001_v4 = vld [vmem:[%s2459_s1 + $0x2c4] ss:$8 sps:$4 sm:$0xff]  }
  0xa0   : > { %1373 = vmatprep.subr.bf16.mxu0 %v1903_v5  ;;  %1327 = vmatpush1.bf16.msra.mxu1 %v1974_v22  ;;  %v1999_v5 = vld [vmem:[%s2459_s1 + $0x2c0] ss:$8 sps:$4 sm:$0xff]  }
  0xa1   : > { %1328 = vmatprep.subr.bf16.mxu1 %v1978_v23  ;;  %v696_v23 = vld [vmem:[#allocation2 + $0x10] sm:$0xff] }
  0xa3   : > { %1374 = vmatpush1.bf16.msra.mxu0 %v1905_v8  ;;  %v2013_v8 = vld [vmem:[%s2459_s1 + $0x2e4] ss:$8 sps:$4 sm:$0xff]  }
  0xa4   : > { %1375 = vmatprep.subr.bf16.mxu0 %v1906_v9  ;;  %1329 = vmatpush1.bf16.msra.mxu1 %v1980_v26  ;;  %v2011_v9 = vld [vmem:[%s2459_s1 + $0x2e0] ss:$8 sps:$4 sm:$0xff]  }
  0xa5   : > { %1330 = vmatprep.subr.bf16.mxu1 %v1984_v27  ;;  %v697_v27 = vld [vmem:[#allocation2 + $0x18] sm:$0xff] }
  0xa7   : > { %1376 = vmatpush1.bf16.msra.mxu0 %v1908_v12  ;;  %v2023_v12 = vld [vmem:[%s2457_s6 + $0x10] ss:$24 sps:$4 sm:$0xff]  }
  0xa8   : > { %1377 = vmatprep.subr.bf16.mxu0 %v1909_v13  ;;  %1331 = vmatpush1.bf16.msra.mxu1 %v1986_v30 }
  0xa9   : > { %1332 = vmatprep.subr.bf16.mxu1 %v1990_v32 }
  0xab   : > { %1378 = vmatpush1.bf16.msra.mxu0 %v1911_v16 }
  0xac   : > { %1379 = vmatprep.subr.bf16.mxu0 %v1912_v17  ;;  %1333 = vmatpush1.bf16.msra.mxu1 %v1992_v35  ;;  %v694_v17 = vld [vmem:[#allocation2] sm:$0xff] }
  0xad   : > { %1334 = vmatprep.subr.bf16.mxu1 %v1996_v37  ;;  %v1455_v35 = vld [vmem:[%s682_s5] sm:$0x3] (!%p1759_p5) }
  0xaf   : > { %1380 = vmatpush1.bf16.msra.mxu0 %v1914_v20  ;;  %v695_v20 = vld [vmem:[#allocation2 + $0x8] sm:$0xff] }
  0xb0   : > { %1381 = vmatprep.subr.bf16.mxu0 %v1915_v21  ;;  %1335 = vmatpush1.bf16.msra.mxu1 %v1998_v41 }
  0xb1   : > { %1336 = vmatprep.subr.bf16.mxu1 %v2002_v42 }
  0xb3   : > { %1382 = vmatpush1.bf16.msra.mxu0 %v1917_v24 }
  0xb4   : > { %1383 = vmatprep.subr.bf16.mxu0 %v1918_v25  ;;  %1337 = vmatpush1.bf16.msra.mxu1 %v2004_v45 }
  0xb5   : > { %1338 = vmatprep.subr.bf16.mxu1 %v2008_v46 }
  0xb7   : > { %1384 = vmatpush1.bf16.msra.mxu0 %v1922_v28 }
  0xb8   : > { %1396 = vmatprep.subr.bf16.mxu0 %v1929_v29  ;;  %1339 = vmatpush1.bf16.msra.mxu1 %v2010_v49 }
  0xb9   : > { %1340 = vmatprep.subr.bf16.mxu1 %v2014_v50 }
  0xba   : > { %1386 = vmatmul.mubr.bf16.vlgmr.msra.gmra.mrb[0].mxu0 %v1924_v31 }
  0xbb   : > { %1397 = vmatpush1.bf16.msra.mxu0 %v1927_v33  ;;  %1428 = vmatprep.mubr.bf16.mxu0 %v2025_v39  ;;  %v1457_v33 = vlaneseq (!%p1759_p5) }
  0xbc   : > { %1398 = vmatprep.subr.bf16.mxu0 %v1935_v34  ;;  %1341 = vmatpush1.bf16.msra.mxu1 %v2016_v53 }
  0xbd   : > { %v1458_v34 = vshrl.u32 (!%p1759_p5), %v1457_v33, 7 }
  0xbf   : > { %1399 = vmatpush1.bf16.msra.mxu0 %v1933_v38  ;;  %1343 = vmatmul.mubr.bf16.vlgmr.msra.gmra.mrb[0].mxu1 %v2017_v56  ;;  %v1459_v37 = vsub.s32 (!%p1759_p5), 0, %v1458_v34  ;;  %v1463_v38 = vsub.s32 (!%p1759_p5), 1, %v1458_v34 }
  0xc0   : > { %1400 = vmatprep.subr.bf16.mxu0 %v1941_v40 }
  0xc1   : > { %v1460_v42 = vrot.slane (!%p1759_p5), %v1455_v35, %v1459_v37 }
  0xc3   : > { %1401 = vmatpush1.bf16.msra.mxu0 %v1939_v43  ;;  %v1464_v43 = vrot.slane (!%p1759_p5), %v1455_v35, %v1463_v38 }
  0xc4   : > { %1402 = vmatprep.subr.bf16.mxu0 %v1947_v44 }
  0xc7   : > { %1403 = vmatpush1.bf16.msra.mxu0 %v1945_v47 }
  0xc8   : > { %1404 = vmatprep.subr.bf16.mxu0 %v1953_v48 }
  0xcb   : > { %1405 = vmatpush1.bf16.msra.mxu0 %v1951_v51 }
  0xcc   : > { %1406 = vmatprep.subr.bf16.mxu0 %v1959_v52 }
  0xcf   : > { %1407 = vmatpush1.bf16.msra.mxu0 %v1957_v54 }
  0xd0   : > { %1408 = vmatprep.subr.bf16.mxu0 %v1965_v55 }
  0xd3   : > { %1409 = vmatpush1.bf16.msra.mxu0 %v1963_v57 }
  0xd4   : > { %1410 = vmatprep.subr.bf16.mxu0 %v1971_v58 }
  0xd7   : > { %1411 = vmatpush1.bf16.msra.mxu0 %v1969_v59 }
  0xd8   : > { %1412 = vmatprep.subr.bf16.mxu0 %v1977_v60 }
  0xdb   : > { %1413 = vmatpush1.bf16.msra.mxu0 %v1975_v61 }
  0xdc   : > { %1414 = vmatprep.subr.bf16.mxu0 %v1983_v62 }
  0xdf   : > { %1415 = vmatpush1.bf16.msra.mxu0 %v1981_v63 }
  0xe0   : > { %1416 = vmatprep.subr.bf16.mxu0 %v1989_v0 }
  0xe3   : > { %1417 = vmatpush1.bf16.msra.mxu0 %v1987_v1 }
  0xe4   : > { %1418 = vmatprep.subr.bf16.mxu0 %v1995_v2 }
  0xe7   : > { %1419 = vmatpush1.bf16.msra.mxu0 %v1993_v3 }
  0xe8   : > { %1420 = vmatprep.subr.bf16.mxu0 %v2001_v4 }
  0xeb   : > { %1421 = vmatpush1.bf16.msra.mxu0 %v1999_v5 }
  0xec   : > { %1422 = vmatprep.subr.bf16.mxu0 %v2007_v6 }
  0xef   : > { %1423 = vmatpush1.bf16.msra.mxu0 %v2005_v7 }
  0xf0   : > { %1424 = vmatprep.subr.bf16.mxu0 %v2013_v8 }
  0xf3   : > { %1425 = vmatpush1.bf16.msra.mxu0 %v2011_v9 }
  0xf4   : > { %1426 = vmatprep.subr.bf16.mxu0 %v2022_v10 }
  0xf7   : > { %1427 = vmatpush1.bf16.msra.mxu0 %v2020_v11 }
  0xfa   : > { %1429 = vmatmul.mubr.bf16.vlgmr.msra.gmra.mrb[0].mxu0 %v2023_v12 }
 0x192   : > { %v1344_v13 = vpop.f32.mrb[0].mxu1 }
 0x193   : > { %v1346_v14 = vpop.f32.mrb[1].mxu1 }
 0x194   : > { %v1348_v15 = vpop.f32.mrb[2].mxu1 }
 0x195   : > { %v1350_v16 = vpop.f32.mrb[3].mxu1 }
 0x1cd   : > { %v1430_v18 = vpop.f32.mrb[0].mxu0 }
 0x1ce   : > { %v1772_v19 = vadd.f32 %v1430_v18, %v1344_v13  ;;  %v1432_v21 = vpop.f32.mrb[1].mxu0 }
 0x1cf   : > { %v1773_v22 = vadd.f32 %v1432_v21, %v1346_v14  ;;  %v1434_v24 = vpop.f32.mrb[2].mxu0  ;;  %1450 = sbr.rel (%p1759_p5) target bundleno = 484 (0x1e4), region = 101 }
 0x1d0   : > { %v1439_v25 = vadd.f32 %v1772_v19, %v694_v17  ;;  %v1774_v26 = vadd.f32 %v1434_v24, %v1348_v15  ;;  %v1436_v28 = vpop.f32.mrb[3].mxu0 }
 0x1d1   : > { %v1440_v29 = vadd.f32 %v1773_v22, %v695_v20  ;;  %v1775_v30 = vadd.f32 %v1436_v28, %v1350_v16 }
 0x1d2   : > { %1443 = vst [vmem:[#allocation2] sm:$0xff] %v1439_v25  ;;  %v1441_v31 = vadd.f32 %v1774_v26, %v696_v23 }
 0x1d3   : > { %1444 = vst [vmem:[#allocation2 + $0x8] sm:$0xff] %v1440_v29  ;;  %v1442_v32 = vadd.f32 %v1775_v30, %v697_v27 }
 0x1d4   : > { %1445 = vst [vmem:[#allocation2 + $0x10] sm:$0xff] %v1441_v31 }
 0x1d5   : > { %1446 = vst [vmem:[#allocation2 + $0x18] sm:$0xff] %v1442_v32 }
 0x1d9   : > { %v1451_v36 = vld [vmem:[#allocation2] sm:$0xff] }
 0x1da   : > { %v1452_v39 = vld [vmem:[#allocation2 + $0x8] sm:$0xff]  ;;  %v1467_v44 = vadd.f32 %v1460_v42, %v1451_v36 }
 0x1db   : > { %v1453_v40 = vld [vmem:[#allocation2 + $0x10] sm:$0xff]  ;;  %v1468_v45 = vadd.f32 %v1464_v43, %v1452_v39 }
 0x1dc   : > { %v1454_v41 = vld [vmem:[#allocation2 + $0x18] sm:$0xff]  ;;  %v1469_v46 = vadd.f32 %v1460_v42, %v1453_v40  ;;  %v1471_v48 = vmax.f32 %v1467_v44, 0.0 }
 0x1dd   : > { %v1470_v47 = vadd.f32 %v1464_v43, %v1454_v41  ;;  %v1472_v49 = vmax.f32 %v1468_v45, 0.0 }
 0x1de   : > { %v1473_v50 = vmax.f32 %v1469_v46, 0.0 }
 0x1df   : > { %v1474_v51 = vmax.f32 %v1470_v47, 0.0  ;;  %v1769_v52 = vpack.c.bf16 %v1472_v49, %v1471_v48 }
 0x1e1   : > { %v1770_v53 = vpack.c.bf16 %v1474_v51, %v1473_v50  ;;  %1487 = vst [vmem:[%s2461_s25] sm:$0xff] %v1769_v52 }
 0x1e3   : > { %1488 = vst [vmem:[%s2461_s25 + $0x8] sm:$0xff] %v1770_v53 }
 0x1e4 PF: > { %1495 = sbr.rel (!%p2229_p12) target bundleno = 492 (0x1ec), region = 105  ;;  %s1771_s14 = sshll.u32 (%p2229_p12), %s2100_s19, 3 }
 0x1e5   : > { %s1501_s0 = scalar_lea.vmem (%p2229_p12), %s2618_s3, %s1771_s14 }
 0x1e8   : > { %v1531_v54 = vld [vmem:[%s2461_s25] sm:$0xff] (%p2229_p12) }
 0x1e9   : > { %1532 = vst [vmem:[%s1501_s0] sm:$0xff] (%p2229_p12), %v1531_v54 }
 0x1ea   : > { %v1533_v55 = vld [vmem:[%s2461_s25 + $0x8] sm:$0xff] (%p2229_p12) }
 0x1eb   : > { %1534 = vst [vmem:[%s1501_s0 + $0x10] sm:$0xff] %v1533_v55 }
 0x1ec PF: > { %s13_s22 = sadd.s32 1, %s2112_s22   ;;  %s2628_s25 = sld [smem:[#allocation6_spill]] }
 0x1ed   : > { %p10_p6 = scmp.ge.s32.totalorder %s13_s22, 14   ;;  %s2629_s12 = smov %s2076_s13 }
 0x1ee   : > { %s2630_s13 = smov %s2227_s9  ;;  %s2631_s14 = smov %s2084_s15 }
 0x1ef   : > { %s2632_s15 = smov %s2224_s8  ;;  %s2633_s16 = smov %s2092_s17 }
 0x1f0   : > { %s2634_s17 = smov %s2210_s30  ;;  %s2635_s18 = smov %s2104_s20 }
 0x1f1   : > { %s2636_s19 = smov %s2108_s21  ;;  %s2637_s20 = smov %s2640_s24 }
 0x1f2   : > { %s2638_s21 = smov %s2628_s25  ;;  %12 = sbr.rel (!%p10_p6) target bundleno = 9 (0x9), region = 185 }

// kernel: forward.70
= control target key start
LH: loop header
LB: loop body
LE: loop exit
PB: predicated region body
PF: predicated region fallthrough
CT: control target
= control target key end

     0   :  { %s2134_s0 = inlined_call_operand.vmem [shape: bf16[16,4608], index: 0, kind: input, shape index: {}]   ;;  %s2135_s1 = inlined_call_operand.hbm [shape: bf16[4608,512], index: 1, kind: input, shape index: {}]   ;;  %s2136_s2 = inlined_call_operand.vmem [shape: f32[1,512], index: 2, kind: input, shape index: {}]   ;;  %s2137_s3 = inlined_call_operand.vmem [shape: bf16[16,512], index: 3, kind: output, shape index: {}]  }
   0x1   :  { %2141 = sst [smem:[#allocation12_spill]] %s2134_s0 }
   0x2   :  { %8 = vsyncpa [#allocation5], 0 }
   0x3   :  { %10 = vsyncpa [#allocation5 + $0x1], 0  ;;  %s1802_s12 = smov 0   ;;  %s1804_s13 = smov 0  }
   0x4   :  { %s1806_s14 = smov 0   ;;  %s1808_s15 = smov 0  }
   0x5   :  { %s1810_s16 = smov 0   ;;  %s1812_s17 = smov 0  }
   0x6   :  { %s1814_s18 = smov 0   ;;  %s1816_s19 = smov 0  }
   0x7   :  { %s1818_s20 = smov 0   ;;  %s1820_s21 = smov 0  }
   0x8   :  { %s1822_s22 = smov 0   ;;  %s1824_s23 = smov 0  }
   0x9 LB: > { %2142 = sst [smem:[#allocation8_spill]] %s1771_s22  ;;  %s1255_s24 = sadd.s32 4294967295, %s1775_s23   ;;  %s1775_s23 = sphi %s1824_s23, %s16_s23   ;;  %s1771_s22 = sphi %s1822_s22, %s2155_s22   ;;  %s1767_s21 = sphi %s1820_s21, %s2165_s21   ;;  %s1763_s20 = sphi %s1818_s20, %s2164_s20   ;;  %s1759_s19 = sphi %s1816_s19, %s2163_s19   ;;  %s1755_s18 = sphi %s1814_s18, %s2162_s18   ;;  %s1751_s17 = sphi %s1812_s17, %s2161_s17   ;;  %s1747_s16 = sphi %s1810_s16, %s2160_s16   ;;  %s1743_s15 = sphi %s1808_s15, %s2159_s15   ;;  %s1739_s14 = sphi %s1806_s14, %s2158_s14   ;;  %s1735_s13 = sphi %s1804_s13, %s2157_s13   ;;  %s1731_s12 = sphi %s1802_s12, %s2156_s12  }
   0xa   : > { %s28_s25 = sadd.s32 1, %s1767_s21  ;;  %s31_s26 = sadd.s32 1, %s1771_s22 }
   0xb   : > { %p29_p0 = scmp.ge.s32.totalorder %s28_s25, 6  ;;  %s44_s27 = sadd.s32 1, %s1755_s18 }
   0xc   : > { %p51_p1 = scmp.ne.s32.totalorder %s1755_s18, %s1751_s17  ;;  %p52_p2 = scmp.eq.s32.totalorder %s1775_s23, 0 }
   0xd   : > { %s2167_s25 = smov (%p29_p0, %s28_s25), 0  ;;  %s2169_s26 = smov (!%p29_p0, %s31_s26), %s1771_s22 }
   0xe   : > { %2143 = sst [smem:[#allocation9_spill]] %s2167_s25  ;;  %s40_s28 = ssub.s32 %s1767_s21, %s2167_s25 }
   0xf   : > { %p33_p3 = scmp.ge.s32.totalorder %s2169_s26, 2  ;;  %p42_p4 = scmp.eq.s32.totalorder %s40_s28, 0 }
  0x10   : > { %p1874_p5 = por %p52_p2, %p51_p1  ;;  %s72_s30 = sadd.s32 1, %s1747_s16 }
  0x11   : > { %s2171_s26 = smov (%p33_p3, %s2169_s26), 0  ;;  %p79_p6 = scmp.ne.s32.totalorder %s1747_s16, %s1743_s15 }
  0x12   : > { %2145 = sst [smem:[#allocation10_spill]] %s2171_s26  ;;  %s68_s5 = ssub.s32 %s1771_s22, %s2171_s26 }
  0x13   : > { %s1882_s4 = scalar_select %p42_p4, %s1755_s18, %s44_s27  }
  0x14   : > { %s69_s6 = sor.u32 %s68_s5, %s40_s28  ;;  %p85_p7 = scmp.ne.s32.totalorder %s1743_s15, %s1739_s14 }
  0x15   : > { %2146 = sst [smem:[#allocation11_spill]] %s1882_s4  ;;  %p70_p8 = scmp.eq.s32.totalorder %s69_s6, 0 }
  0x16   : > { %p1890_p9 = por %p79_p6, %p52_p2  ;;  %p86_p10 = scmp.eq.s32.totalorder %s1255_s24, 0 }
  0x17   : > { %p124_p11 = scmp.eq.s32.totalorder %s68_s5, 0  ;;  %s126_s10 = sadd.s32 1, %s1735_s13 }
  0x18   : > { %s1897_s8 = scalar_select %p70_p8, %s1747_s16, %s72_s30  }
  0x19   : > { %p1899_p12 = por %p86_p10, %p85_p7  ;;  %p136_p13 = scmp.ne.s32.totalorder %s1735_s13, %s1731_s12 }
  0x1a   : > { %s1905_s11 = scalar_select %p124_p11, %s1735_s13, %s126_s10  }
  0x1b   : > { %p137_p0 = scmp.eq.s32.totalorder %s1255_s24, 11  ;;  %p1258_p2 = scmp.ge.s32.totalorder %s1775_s23, 12 }
  0x1d   : > { %p1911_p1 = por %p137_p0, %p136_p13  ;;  %159 = sbr.rel (%p1258_p2) target bundleno = 78 (0x4e), region = 16 }
  0x1f   : > { %s2149_s14 = scalar_select %p1911_p1, 1, 0 }
  0x24   : > { %162 = sbr.rel (!%p1874_p5) target bundleno = 48 (0x30), region = 20  ;;  %s164_s27 = sand.u32 (%p1874_p5), 1, %s1755_s18  }
  0x25   : > { %s1377_s28 = smul.u32 (%p1874_p5), 24, %s1767_s21  ;;  %s2150_s0 = sld [smem:[#allocation12_spill]] (%p1874_p5) }
  0x26   : > { %s1390_s30 = smul.u32 (%p1874_p5), 48, %s164_s27 }
  0x28   : > { %s166_s24 = scalar_lea.vmem (%p1874_p5), [#allocation3], %s1390_s30 }
  0x2b   : > { %s172_s10 = scalar_lea.vmem %s2150_s0, %s1377_s28 }
  0x2c   : > { %v185_v0 = vld [vmem:[%s172_s10] sm:$0xff]  ;;  %v187_v1 = vld [vmem:[%s172_s10 + $0x8] sm:$0xff]  ;;  %v189_v2 = vld [vmem:[%s172_s10 + $0x10] sm:$0xff] }
  0x2d   : > { %186 = vst [vmem:[%s166_s24] sm:$0xff] %v185_v0  ;;  %188 = vst [vmem:[%s166_s24 + $0x8] sm:$0xff] %v187_v1  ;;  %v191_v3 = vld [vmem:[%s172_s10 + $0x90] sm:$0xff]  ;;  %v193_v4 = vld [vmem:[%s172_s10 + $0x98] sm:$0xff] }
  0x2e   : > { %190 = vst [vmem:[%s166_s24 + $0x10] sm:$0xff] %v189_v2  ;;  %v195_v5 = vld [vmem:[%s172_s10 + $0xa0] sm:$0xff]  ;;  %192 = vst [vmem:[%s166_s24 + $0x18] sm:$0xff] %v191_v3 }
  0x2f   : > { %194 = vst [vmem:[%s166_s24 + $0x20] sm:$0xff] %v193_v4  ;;  %196 = vst [vmem:[%s166_s24 + $0x28] sm:$0xff] %v195_v5 }
  0x30 PF: > { %s203_s29 = sand.u32 1, %s1747_s16   ;;  %s1260_s27 = sshll.u32 %s1771_s22, 1 }
  0x31   : > { %s1391_s28 = smul.u32 768, %s203_s29  ;;  %s1933_s24 = scalar_lea.sflag [#allocation5], %s203_s29 }
  0x32   : > { %s1378_s5 = smul.u32 384, %s1767_s21 }
  0x33   : > { %s207_s30 = scalar_lea.vmem [#allocation4], %s1391_s28 }
  0x34   : > { %s214_s6 = sadd.s32 %s1378_s5, %s1260_s27  ;;  %s217_s0 = sshll.u32 %s207_s30, 4  ;;  %s1926_s0 = int_to_ptr.vmem [resolvable:$true] %s217_s0 }
  0x35   : > { %s1262_s26 = sshll.u32 %s214_s6, 6  ;;  %s1653_s5 = scalar_lea.hbm %s2135_s1, 147456 }
  0x36   : > { %s1931_s4 = scalar_lea.hbm %s2135_s1, %s1262_s26 }
  0x37   : > { %s1649_s22 = scalar_lea.hbm %s1931_s4, 12288  ;;  %p1654_p6 = scmp.lt.u32.totalorder %s1931_s4, %s2135_s1 }
  0x38   : > { %p1650_p3 = scmp.ne.s32.totalorder %s1931_s4, %s1649_s22  ;;  %p1655_p7 = scmp.lt.u32.totalorder %s1653_s5, %s1649_s22 }
  0x39   : > { %p1657_p10 = scmp.lt.u32.totalorder %s1649_s22, %s1931_s4 }
  0x3a   : > { %p1651_p4 = pnand %p1650_p3, %p1890_p9  ;;  %p1656_p8 = por %p1655_p7, %p1654_p6 }
  0x3c   : > { %p1652_p5 = pneg %p1651_p4  ;;  %p1658_p11 = por %p1657_p10, %p1656_p8 }
  0x3e   : > { %p1659_p13 = pnand %p1658_p11, %p1652_p5 }
  0x40   : > { %1662 = shalt.err (!%p1659_p13)
}
  0x41   : > { %s1663_s25 = scalar_lea.vmem %s1926_s0, 12288  ;;  %s1777_s26 = smov [#allocation4]  }
  0x42   : > { %p1664_p0 = scmp.ne.s32.totalorder %s1926_s0, %s1663_s25  ;;  %s1667_s29 = sshll.u32 %s1777_s26, 4  ;;  %s1668_s29 = int_to_ptr.vmem [resolvable:$false] %s1667_s29 }
  0x43   : > { %s1669_s10 = scalar_lea.vmem %s1668_s29, 24576  ;;  %p1670_p4 = scmp.lt.s32.totalorder %s1926_s0, %s1668_s29 }
  0x44   : > { %p1665_p2 = pnand %p1664_p0, %p1890_p9  ;;  %p1671_p1 = scmp.lt.s32.totalorder %s1669_s10, %s1663_s25 }
  0x46   : > { %p1666_p3 = pneg %p1665_p2  ;;  %p1672_p6 = por %p1671_p1, %p1670_p4 }
  0x48   : > { %p1673_p7 = pnand %p1672_p6, %p1666_p3 }
  0x4a   : > { %1676 = shalt.err (!%p1673_p7)
}
  0x4b   : > { %s1778_s22 = smov 256   ;;  %s1779_s27 = smov 128  }
  0x4c   : > { %s1780_s28 = smov 8  }
  0x4d   : > { %1394 = dma.hbm_to_vmem [thread:$0]  (%p1890_p9), %s1931_s4, 12288, %s1926_s0, %s1933_s24, %s1778_s22, %s1779_s27, %s1780_s28  }
  0x4e PF: > { %p1263_p5 = scmp.ge.s32.totalorder %s1775_s23, 1  ;;  %p233_p8 = scmp.lt.s32.totalorder %s1775_s23, 13 }
  0x50   : > { %p234_p10 = pnand %p1263_p5, %p233_p8 }
  0x51   : > { %s240_s5 = sand.u32 (!%p234_p10), 1, %s1751_s17   ;;  %s246_s6 = sand.u32 (!%p234_p10), 1, %s1743_s15  }
  0x52   : > { %237 = sbr.rel (%p234_p10) target bundleno = 473 (0x1d9), region = 51  ;;  %s247_s29 = scalar_lea.sflag (!%p234_p10), [#allocation5], %s246_s6 }
  0x53   : > { %s1392_s30 = smul.u32 (!%p234_p10), 48, %s240_s5 }
  0x54   : > { %s1393_s25 = smul.u32 (!%p234_p10), 768, %s246_s6 }
  0x55   : > { %s1961_s26 = scalar_lea.vmem (!%p234_p10), [#allocation3], %s1392_s30 }
  0x56   : > { %s1963_s10 = scalar_lea.vmem (!%p234_p10), [#allocation4], %s1393_s25 }
  0x59   : > { %1726 = dma.done.wait (%p1899_p12), %s247_s29, 12288  }
  0x5a   : > { %1728 = vsyncadd (%p1899_p12), %s247_s29, 4294955008  ;;  %s277_s0 = sand.u32 1, %s1731_s12   ;;  %s1265_s4 = sshll.u32 %s1763_s20, 1 }
  0x5b   : > { %s1264_s7 = sshll.u32 %s277_s0, 4  ;;  %p285_p9 = scmp.lt.s32.totalorder %s1265_s4, 3 }
  0x5c   : > { %s1977_s27 = scalar_lea.vmem [#allocation6], %s1264_s7  ;;  %p1266_p1 = scmp.ne.s32.totalorder %s1759_s19, 0 }
  0x5d   : > { %s2173_s4 = smov (!%p285_p9, %s1265_s4), 3  ;;  %v1781_v6 = vmov (!%p1266_p1), 0.0  }
  0x5e   : > { %s287_s22 = scalar_lea.vmem %s2136_s2, %s2173_s4  ;;  %294 = sbr.rel (%p1266_p1) target bundleno = 101 (0x65), region = 63  ;;  %295 = vst [vmem:[#allocation2] sm:$0xff] (!%p1266_p1), %v1781_v6  ;;  %296 = vst [vmem:[#allocation2 + $0x8] sm:$0xff] (!%p1266_p1), %v1781_v6 }
  0x5f   : > { %297 = vst [vmem:[#allocation2 + $0x10] sm:$0xff] (!%p1266_p1), %v1781_v6  ;;  %298 = vst [vmem:[#allocation2 + $0x18] sm:$0xff] (!%p1266_p1), %v1781_v6 }
  0x65 PF: > { %v1496_v7 = vld [vmem:[%s1963_s10 + $0x104] ss:$8 sps:$4 sm:$0xff]   ;;  %v1498_v8 = vld [vmem:[%s1963_s10 + $0x100] ss:$8 sps:$4 sm:$0xff]   ;;  %v1499_v9 = vld [vmem:[%s1963_s10 + $0x114] ss:$8 sps:$4 sm:$0xff]  }
  0x66   : > { %958 = vmatprep.subr.bf16.mxu0 %v1496_v7  ;;  %v1501_v10 = vld [vmem:[%s1963_s10 + $0x110] ss:$8 sps:$4 sm:$0xff]   ;;  %v1502_v11 = vld [vmem:[%s1963_s10 + $0x124] ss:$8 sps:$4 sm:$0xff]   ;;  %v1504_v12 = vld [vmem:[%s1963_s10 + $0x120] ss:$8 sps:$4 sm:$0xff]  }
  0x67   : > { %959 = vmatpush1.bf16.msra.mxu0 %v1498_v8  ;;  %v1505_v13 = vld [vmem:[%s1963_s10 + $0x134] ss:$8 sps:$4 sm:$0xff]   ;;  %v1507_v14 = vld [vmem:[%s1963_s10 + $0x130] ss:$8 sps:$4 sm:$0xff]   ;;  %v1508_v15 = vld [vmem:[%s1963_s10 + $0x144] ss:$8 sps:$4 sm:$0xff]  }
  0x68   : > { %960 = vmatprep.subr.bf16.mxu0 %v1499_v9  ;;  %v1510_v16 = vld [vmem:[%s1963_s10 + $0x140] ss:$8 sps:$4 sm:$0xff]   ;;  %v1511_v17 = vld [vmem:[%s1963_s10 + $0x154] ss:$8 sps:$4 sm:$0xff]   ;;  %v1513_v18 = vld [vmem:[%s1963_s10 + $0x150] ss:$8 sps:$4 sm:$0xff]  }
  0x69   : > { %v1514_v19 = vld [vmem:[%s1963_s10 + $0x164] ss:$8 sps:$4 sm:$0xff]   ;;  %v1546_v21 = vld [vmem:[%s1963_s10] ss:$8 sps:$4 sm:$0xff]   ;;  %v1517_v24 = vld [vmem:[%s1963_s10 + $0x174] ss:$8 sps:$4 sm:$0xff]  }
  0x6a   : > { %v1543_v20 = vld [vmem:[%s1963_s10 + $0x4] ss:$8 sps:$4 sm:$0xff]   ;;  %v1516_v22 = vld [vmem:[%s1963_s10 + $0x160] ss:$8 sps:$4 sm:$0xff]   ;;  %v1553_v25 = vld [vmem:[%s1963_s10 + $0x14] ss:$8 sps:$4 sm:$0xff]  }
  0x6b   : > { %961 = vmatpush1.bf16.msra.mxu0 %v1501_v10  ;;  %915 = vmatprep.subr.bf16.mxu1 %v1543_v20  ;;  %v1549_v23 = vld [vmem:[%s1961_s26 + $0xc] ss:$24 sps:$4 sm:$0xff]   ;;  %v1555_v26 = vld [vmem:[%s1963_s10 + $0x10] ss:$8 sps:$4 sm:$0xff]   ;;  %v1561_v30 = vld [vmem:[%s1963_s10 + $0x20] ss:$8 sps:$4 sm:$0xff]  }
  0x6c   : > { %962 = vmatprep.subr.bf16.mxu0 %v1502_v11  ;;  %916 = vmatpush1.bf16.msra.mxu1 %v1546_v21  ;;  %v1519_v27 = vld [vmem:[%s1963_s10 + $0x170] ss:$8 sps:$4 sm:$0xff]   ;;  %v1520_v28 = vld [vmem:[%s1963_s10 + $0x184] ss:$8 sps:$4 sm:$0xff]   ;;  %v1522_v31 = vld [vmem:[%s1963_s10 + $0x180] ss:$8 sps:$4 sm:$0xff]  }
  0x6d   : > { %990 = vmatprep.mubr.bf16.mxu0 %v1549_v23  ;;  %917 = vmatprep.subr.bf16.mxu1 %v1553_v25  ;;  %v1559_v29 = vld [vmem:[%s1963_s10 + $0x24] ss:$8 sps:$4 sm:$0xff]   ;;  %v1565_v32 = vld [vmem:[%s1963_s10 + $0x34] ss:$8 sps:$4 sm:$0xff]   ;;  %v1567_v34 = vld [vmem:[%s1963_s10 + $0x30] ss:$8 sps:$4 sm:$0xff]  }
  0x6e   : > { %v1523_v33 = vld [vmem:[%s1963_s10 + $0x194] ss:$8 sps:$4 sm:$0xff]   ;;  %v1571_v35 = vld [vmem:[%s1963_s10 + $0x44] ss:$8 sps:$4 sm:$0xff]   ;;  %v1525_v36 = vld [vmem:[%s1963_s10 + $0x190] ss:$8 sps:$4 sm:$0xff]  }
  0x6f   : > { %963 = vmatpush1.bf16.msra.mxu0 %v1504_v12  ;;  %v1526_v37 = vld [vmem:[%s1963_s10 + $0x1a4] ss:$8 sps:$4 sm:$0xff]   ;;  %v1573_v38 = vld [vmem:[%s1963_s10 + $0x40] ss:$8 sps:$4 sm:$0xff]   ;;  %v1577_v39 = vld [vmem:[%s1963_s10 + $0x54] ss:$8 sps:$4 sm:$0xff]  }
  0x70   : > { %964 = vmatprep.subr.bf16.mxu0 %v1505_v13  ;;  %918 = vmatpush1.bf16.msra.mxu1 %v1555_v26  ;;  %v1528_v40 = vld [vmem:[%s1963_s10 + $0x1a0] ss:$8 sps:$4 sm:$0xff]   ;;  %v1529_v41 = vld [vmem:[%s1963_s10 + $0x1b4] ss:$8 sps:$4 sm:$0xff]   ;;  %v1579_v42 = vld [vmem:[%s1963_s10 + $0x50] ss:$8 sps:$4 sm:$0xff]  }
  0x71   : > { %919 = vmatprep.subr.bf16.mxu1 %v1559_v29  ;;  %v1583_v43 = vld [vmem:[%s1963_s10 + $0x64] ss:$8 sps:$4 sm:$0xff]   ;;  %v1531_v44 = vld [vmem:[%s1963_s10 + $0x1b0] ss:$8 sps:$4 sm:$0xff]   ;;  %v1585_v46 = vld [vmem:[%s1963_s10 + $0x60] ss:$8 sps:$4 sm:$0xff]  }
  0x72   : > { %v1532_v45 = vld [vmem:[%s1963_s10 + $0x1c4] ss:$8 sps:$4 sm:$0xff]   ;;  %v1589_v47 = vld [vmem:[%s1963_s10 + $0x74] ss:$8 sps:$4 sm:$0xff]   ;;  %v1534_v48 = vld [vmem:[%s1963_s10 + $0x1c0] ss:$8 sps:$4 sm:$0xff]  }
  0x73   : > { %965 = vmatpush1.bf16.msra.mxu0 %v1507_v14  ;;  %v1535_v49 = vld [vmem:[%s1963_s10 + $0x1d4] ss:$8 sps:$4 sm:$0xff]   ;;  %v1591_v50 = vld [vmem:[%s1963_s10 + $0x70] ss:$8 sps:$4 sm:$0xff]   ;;  %v1595_v51 = vld [vmem:[%s1963_s10 + $0x84] ss:$8 sps:$4 sm:$0xff]  }
  0x74   : > { %966 = vmatprep.subr.bf16.mxu0 %v1508_v15  ;;  %920 = vmatpush1.bf16.msra.mxu1 %v1561_v30  ;;  %v1537_v52 = vld [vmem:[%s1963_s10 + $0x1d0] ss:$8 sps:$4 sm:$0xff]   ;;  %v1538_v53 = vld [vmem:[%s1963_s10 + $0x1e4] ss:$8 sps:$4 sm:$0xff]   ;;  %v1597_v54 = vld [vmem:[%s1963_s10 + $0x80] ss:$8 sps:$4 sm:$0xff]  }
  0x75   : > { %921 = vmatprep.subr.bf16.mxu1 %v1565_v32  ;;  %v1601_v55 = vld [vmem:[%s1963_s10 + $0x94] ss:$8 sps:$4 sm:$0xff]   ;;  %v1540_v56 = vld [vmem:[%s1963_s10 + $0x1e0] ss:$8 sps:$4 sm:$0xff]   ;;  %v1603_v58 = vld [vmem:[%s1963_s10 + $0x90] ss:$8 sps:$4 sm:$0xff]  }
  0x76   : > { %v1541_v57 = vld [vmem:[%s1963_s10 + $0x1f4] ss:$8 sps:$4 sm:$0xff]   ;;  %v1607_v59 = vld [vmem:[%s1963_s10 + $0xa4] ss:$8 sps:$4 sm:$0xff]   ;;  %v1545_v60 = vld [vmem:[%s1963_s10 + $0x1f0] ss:$8 sps:$4 sm:$0xff]  }
  0x77   : > { %967 = vmatpush1.bf16.msra.mxu0 %v1510_v16  ;;  %v1552_v61 = vld [vmem:[%s1963_s10 + $0x204] ss:$8 sps:$4 sm:$0xff]   ;;  %v1609_v62 = vld [vmem:[%s1963_s10 + $0xa0] ss:$8 sps:$4 sm:$0xff]   ;;  %v1613_v0 = vld [vmem:[%s1963_s10 + $0xb4] ss:$8 sps:$4 sm:$0xff]  }
  0x78   : > { %968 = vmatprep.subr.bf16.mxu0 %v1511_v17  ;;  %922 = vmatpush1.bf16.msra.mxu1 %v1567_v34  ;;  %v1547_v63 = vld [vmem:[%s1961_s26 + $0x8] ss:$24 sps:$4 sm:$0xff]   ;;  %v1558_v2 = vld [vmem:[%s1963_s10 + $0x214] ss:$8 sps:$4 sm:$0xff]   ;;  %v1619_v5 = vld [vmem:[%s1963_s10 + $0xc4] ss:$8 sps:$4 sm:$0xff]  }
  0x79   : > { %923 = vmatprep.subr.bf16.mxu1 %v1571_v35  ;;  %v1550_v1 = vld [vmem:[%s1963_s10 + $0x200] ss:$8 sps:$4 sm:$0xff]   ;;  %v1615_v3 = vld [vmem:[%s1963_s10 + $0xb0] ss:$8 sps:$4 sm:$0xff]   ;;  %v1642_v4 = vld [vmem:[%s1961_s26 + $0x4] ss:$24 sps:$4 sm:$0xff]  }
  0x7a   : > { %v1556_v6 = vld [vmem:[%s1963_s10 + $0x210] ss:$8 sps:$4 sm:$0xff]   ;;  %947 = vmatprep.mubr.bf16.mxu1 %v1642_v4  ;;  %v1648_v7 = vld [vmem:[%s1961_s26 + $0x14] ss:$24 sps:$4 sm:$0xff]   ;;  %v1621_v9 = vld [vmem:[%s1963_s10 + $0xc0] ss:$8 sps:$4 sm:$0xff]  }
  0x7b   : > { %969 = vmatpush1.bf16.msra.mxu0 %v1513_v18  ;;  %v1564_v8 = vld [vmem:[%s1963_s10 + $0x224] ss:$8 sps:$4 sm:$0xff]   ;;  %v1625_v10 = vld [vmem:[%s1963_s10 + $0xd4] ss:$8 sps:$4 sm:$0xff]   ;;  %v1562_v11 = vld [vmem:[%s1963_s10 + $0x220] ss:$8 sps:$4 sm:$0xff]  }
  0x7c   : > { %970 = vmatprep.subr.bf16.mxu0 %v1514_v19  ;;  %924 = vmatpush1.bf16.msra.mxu1 %v1573_v38  ;;  %v1570_v12 = vld [vmem:[%s1963_s10 + $0x234] ss:$8 sps:$4 sm:$0xff]   ;;  %v1627_v13 = vld [vmem:[%s1963_s10 + $0xd0] ss:$8 sps:$4 sm:$0xff]   ;;  %v1631_v14 = vld [vmem:[%s1963_s10 + $0xe4] ss:$8 sps:$4 sm:$0xff]  }
  0x7d   : > { %925 = vmatprep.subr.bf16.mxu1 %v1577_v39  ;;  %v1568_v15 = vld [vmem:[%s1963_s10 + $0x230] ss:$8 sps:$4 sm:$0xff]   ;;  %v1576_v16 = vld [vmem:[%s1963_s10 + $0x244] ss:$8 sps:$4 sm:$0xff]   ;;  %v1633_v17 = vld [vmem:[%s1963_s10 + $0xe0] ss:$8 sps:$4 sm:$0xff]  }
  0x7e   : > { %v1637_v18 = vld [vmem:[%s1963_s10 + $0xf4] ss:$8 sps:$4 sm:$0xff]   ;;  %v1574_v19 = vld [vmem:[%s1963_s10 + $0x240] ss:$8 sps:$4 sm:$0xff]   ;;  %v1639_v21 = vld [vmem:[%s1963_s10 + $0xf0] ss:$8 sps:$4 sm:$0xff]  }
  0x7f   : > { %971 = vmatpush1.bf16.msra.mxu0 %v1516_v22  ;;  %v1582_v20 = vld [vmem:[%s1963_s10 + $0x254] ss:$8 sps:$4 sm:$0xff]   ;;  %v1580_v22 = vld [vmem:[%s1963_s10 + $0x250] ss:$8 sps:$4 sm:$0xff]   ;;  %v1588_v23 = vld [vmem:[%s1963_s10 + $0x264] ss:$8 sps:$4 sm:$0xff]  }
  0x80   : > { %972 = vmatprep.subr.bf16.mxu0 %v1517_v24  ;;  %926 = vmatpush1.bf16.msra.mxu1 %v1579_v42  ;;  %v1640_v24 = vld [vmem:[%s1961_s26] ss:$24 sps:$4 sm:$0xff]   ;;  %v1594_v26 = vld [vmem:[%s1963_s10 + $0x274] ss:$8 sps:$4 sm:$0xff]   ;;  %v1612_v32 = vld [vmem:[%s1963_s10 + $0x2a4] ss:$8 sps:$4 sm:$0xff]  }
  0x81   : > { %927 = vmatprep.subr.bf16.mxu1 %v1583_v43  ;;  %v1586_v25 = vld [vmem:[%s1963_s10 + $0x260] ss:$8 sps:$4 sm:$0xff]   ;;  %v1606_v30 = vld [vmem:[%s1963_s10 + $0x294] ss:$8 sps:$4 sm:$0xff]   ;;  %v1616_v35 = vld [vmem:[%s1963_s10 + $0x2b0] ss:$8 sps:$4 sm:$0xff]  }
  0x82   : > { %v1598_v29 = vld [vmem:[%s1963_s10 + $0x280] ss:$8 sps:$4 sm:$0xff]   ;;  %v1618_v34 = vld [vmem:[%s1963_s10 + $0x2b4] ss:$8 sps:$4 sm:$0xff]   ;;  %v1628_v39 = vld [vmem:[%s1963_s10 + $0x2d0] ss:$8 sps:$4 sm:$0xff]  }
  0x83   : > { %973 = vmatpush1.bf16.msra.mxu0 %v1519_v27  ;;  %v1592_v27 = vld [vmem:[%s1963_s10 + $0x270] ss:$8 sps:$4 sm:$0xff]   ;;  %v1630_v38 = vld [vmem:[%s1963_s10 + $0x2d4] ss:$8 sps:$4 sm:$0xff]   ;;  %p1369_p12 = scmp.ne.s32.totalorder %s1759_s19, 5 }
  0x84   : > { %974 = vmatprep.subr.bf16.mxu0 %v1520_v28  ;;  %928 = vmatpush1.bf16.msra.mxu1 %v1585_v46  ;;  %v1600_v28 = vld [vmem:[%s1963_s10 + $0x284] ss:$8 sps:$4 sm:$0xff]   ;;  %v1645_v42 = vld [vmem:[%s1963_s10 + $0x2f4] ss:$8 sps:$4 sm:$0xff]   ;;  %v1643_v43 = vld [vmem:[%s1963_s10 + $0x2f0] ss:$8 sps:$4 sm:$0xff]  }
  0x85   : > { %929 = vmatprep.subr.bf16.mxu1 %v1589_v47 }
  0x87   : > { %975 = vmatpush1.bf16.msra.mxu0 %v1522_v31  ;;  %v1604_v31 = vld [vmem:[%s1963_s10 + $0x290] ss:$8 sps:$4 sm:$0xff]  }
  0x88   : > { %976 = vmatprep.subr.bf16.mxu0 %v1523_v33  ;;  %930 = vmatpush1.bf16.msra.mxu1 %v1591_v50  ;;  %v1610_v33 = vld [vmem:[%s1963_s10 + $0x2a0] ss:$8 sps:$4 sm:$0xff]  }
  0x89   : > { %931 = vmatprep.subr.bf16.mxu1 %v1595_v51 }
  0x8b   : > { %977 = vmatpush1.bf16.msra.mxu0 %v1525_v36  ;;  %v1624_v36 = vld [vmem:[%s1963_s10 + $0x2c4] ss:$8 sps:$4 sm:$0xff]  }
  0x8c   : > { %978 = vmatprep.subr.bf16.mxu0 %v1526_v37  ;;  %932 = vmatpush1.bf16.msra.mxu1 %v1597_v54  ;;  %v1622_v37 = vld [vmem:[%s1963_s10 + $0x2c0] ss:$8 sps:$4 sm:$0xff]  }
  0x8d   : > { %933 = vmatprep.subr.bf16.mxu1 %v1601_v55  ;;  %v301_v55 = vld [vmem:[#allocation2 + $0x10] sm:$0xff] }
  0x8f   : > { %979 = vmatpush1.bf16.msra.mxu0 %v1528_v40  ;;  %v1636_v40 = vld [vmem:[%s1963_s10 + $0x2e4] ss:$8 sps:$4 sm:$0xff]  }
  0x90   : > { %980 = vmatprep.subr.bf16.mxu0 %v1529_v41  ;;  %934 = vmatpush1.bf16.msra.mxu1 %v1603_v58  ;;  %v1634_v41 = vld [vmem:[%s1963_s10 + $0x2e0] ss:$8 sps:$4 sm:$0xff]  }
  0x91   : > { %935 = vmatprep.subr.bf16.mxu1 %v1607_v59  ;;  %v302_v59 = vld [vmem:[#allocation2 + $0x18] sm:$0xff] }
  0x93   : > { %981 = vmatpush1.bf16.msra.mxu0 %v1531_v44  ;;  %v1646_v44 = vld [vmem:[%s1961_s26 + $0x10] ss:$24 sps:$4 sm:$0xff]  }
  0x94   : > { %982 = vmatprep.subr.bf16.mxu0 %v1532_v45  ;;  %936 = vmatpush1.bf16.msra.mxu1 %v1609_v62 }
  0x95   : > { %937 = vmatprep.subr.bf16.mxu1 %v1613_v0 }
  0x97   : > { %983 = vmatpush1.bf16.msra.mxu0 %v1534_v48 }
  0x98   : > { %984 = vmatprep.subr.bf16.mxu0 %v1535_v49  ;;  %938 = vmatpush1.bf16.msra.mxu1 %v1615_v3  ;;  %v299_v49 = vld [vmem:[#allocation2] sm:$0xff] }
  0x99   : > { %939 = vmatprep.subr.bf16.mxu1 %v1619_v5  ;;  %v1060_v3 = vld [vmem:[%s287_s22] sm:$0x3] (!%p1369_p12) }
  0x9b   : > { %985 = vmatpush1.bf16.msra.mxu0 %v1537_v52  ;;  %v300_v52 = vld [vmem:[#allocation2 + $0x8] sm:$0xff] }
  0x9c   : > { %986 = vmatprep.subr.bf16.mxu0 %v1538_v53  ;;  %940 = vmatpush1.bf16.msra.mxu1 %v1621_v9 }
  0x9d   : > { %941 = vmatprep.subr.bf16.mxu1 %v1625_v10 }
  0x9f   : > { %987 = vmatpush1.bf16.msra.mxu0 %v1540_v56 }
  0xa0   : > { %988 = vmatprep.subr.bf16.mxu0 %v1541_v57  ;;  %942 = vmatpush1.bf16.msra.mxu1 %v1627_v13 }
  0xa1   : > { %943 = vmatprep.subr.bf16.mxu1 %v1631_v14 }
  0xa3   : > { %989 = vmatpush1.bf16.msra.mxu0 %v1545_v60 }
  0xa4   : > { %1001 = vmatprep.subr.bf16.mxu0 %v1552_v61  ;;  %944 = vmatpush1.bf16.msra.mxu1 %v1633_v17 }
  0xa5   : > { %945 = vmatprep.subr.bf16.mxu1 %v1637_v18 }
  0xa6   : > { %991 = vmatmul.mubr.bf16.vlgmr.msra.gmra.mrb[0].mxu0 %v1547_v63 }
  0xa7   : > { %1002 = vmatpush1.bf16.msra.mxu0 %v1550_v1  ;;  %1033 = vmatprep.mubr.bf16.mxu0 %v1648_v7  ;;  %v1062_v1 = vlaneseq (!%p1369_p12) }
  0xa8   : > { %1003 = vmatprep.subr.bf16.mxu0 %v1558_v2  ;;  %946 = vmatpush1.bf16.msra.mxu1 %v1639_v21 }
  0xa9   : > { %v1063_v2 = vshrl.u32 (!%p1369_p12), %v1062_v1, 7 }
  0xab   : > { %1004 = vmatpush1.bf16.msra.mxu0 %v1556_v6  ;;  %948 = vmatmul.mubr.bf16.vlgmr.msra.gmra.mrb[0].mxu1 %v1640_v24  ;;  %v1064_v5 = vsub.s32 (!%p1369_p12), 0, %v1063_v2  ;;  %v1068_v6 = vsub.s32 (!%p1369_p12), 1, %v1063_v2 }
  0xac   : > { %1005 = vmatprep.subr.bf16.mxu0 %v1564_v8 }
  0xad   : > { %v1065_v10 = vrot.slane (!%p1369_p12), %v1060_v3, %v1064_v5 }
  0xaf   : > { %1006 = vmatpush1.bf16.msra.mxu0 %v1562_v11  ;;  %v1069_v11 = vrot.slane (!%p1369_p12), %v1060_v3, %v1068_v6 }
  0xb0   : > { %1007 = vmatprep.subr.bf16.mxu0 %v1570_v12 }
  0xb3   : > { %1008 = vmatpush1.bf16.msra.mxu0 %v1568_v15 }
  0xb4   : > { %1009 = vmatprep.subr.bf16.mxu0 %v1576_v16 }
  0xb7   : > { %1010 = vmatpush1.bf16.msra.mxu0 %v1574_v19 }
  0xb8   : > { %1011 = vmatprep.subr.bf16.mxu0 %v1582_v20 }
  0xbb   : > { %1012 = vmatpush1.bf16.msra.mxu0 %v1580_v22 }
  0xbc   : > { %1013 = vmatprep.subr.bf16.mxu0 %v1588_v23 }
  0xbf   : > { %1014 = vmatpush1.bf16.msra.mxu0 %v1586_v25 }
  0xc0   : > { %1015 = vmatprep.subr.bf16.mxu0 %v1594_v26 }
  0xc3   : > { %1016 = vmatpush1.bf16.msra.mxu0 %v1592_v27 }
  0xc4   : > { %1017 = vmatprep.subr.bf16.mxu0 %v1600_v28 }
  0xc7   : > { %1018 = vmatpush1.bf16.msra.mxu0 %v1598_v29 }
  0xc8   : > { %1019 = vmatprep.subr.bf16.mxu0 %v1606_v30 }
  0xcb   : > { %1020 = vmatpush1.bf16.msra.mxu0 %v1604_v31 }
  0xcc   : > { %1021 = vmatprep.subr.bf16.mxu0 %v1612_v32 }
  0xcf   : > { %1022 = vmatpush1.bf16.msra.mxu0 %v1610_v33 }
  0xd0   : > { %1023 = vmatprep.subr.bf16.mxu0 %v1618_v34 }
  0xd3   : > { %1024 = vmatpush1.bf16.msra.mxu0 %v1616_v35 }
  0xd4   : > { %1025 = vmatprep.subr.bf16.mxu0 %v1624_v36 }
  0xd7   : > { %1026 = vmatpush1.bf16.msra.mxu0 %v1622_v37 }
  0xd8   : > { %1027 = vmatprep.subr.bf16.mxu0 %v1630_v38 }
  0xdb   : > { %1028 = vmatpush1.bf16.msra.mxu0 %v1628_v39 }
  0xdc   : > { %1029 = vmatprep.subr.bf16.mxu0 %v1636_v40 }
  0xdf   : > { %1030 = vmatpush1.bf16.msra.mxu0 %v1634_v41 }
  0xe0   : > { %1031 = vmatprep.subr.bf16.mxu0 %v1645_v42 }
  0xe3   : > { %1032 = vmatpush1.bf16.msra.mxu0 %v1643_v43 }
  0xe6   : > { %1034 = vmatmul.mubr.bf16.vlgmr.msra.gmra.mrb[0].mxu0 %v1646_v44 }
 0x17e   : > { %v949_v45 = vpop.f32.mrb[0].mxu1 }
 0x17f   : > { %v951_v46 = vpop.f32.mrb[1].mxu1 }
 0x180   : > { %v953_v47 = vpop.f32.mrb[2].mxu1 }
 0x181   : > { %v955_v48 = vpop.f32.mrb[3].mxu1 }
 0x1b9   : > { %v1035_v50 = vpop.f32.mrb[0].mxu0 }
 0x1ba   : > { %v1382_v51 = vadd.f32 %v1035_v50, %v949_v45  ;;  %v1037_v53 = vpop.f32.mrb[1].mxu0 }
 0x1bb   : > { %v1383_v54 = vadd.f32 %v1037_v53, %v951_v46  ;;  %v1039_v56 = vpop.f32.mrb[2].mxu0  ;;  %1055 = sbr.rel (%p1369_p12) target bundleno = 464 (0x1d0), region = 67 }
 0x1bc   : > { %v1044_v57 = vadd.f32 %v1382_v51, %v299_v49  ;;  %v1384_v58 = vadd.f32 %v1039_v56, %v953_v47  ;;  %v1041_v60 = vpop.f32.mrb[3].mxu0 }
 0x1bd   : > { %v1045_v61 = vadd.f32 %v1383_v54, %v300_v52  ;;  %v1385_v62 = vadd.f32 %v1041_v60, %v955_v48 }
 0x1be   : > { %1048 = vst [vmem:[#allocation2] sm:$0xff] %v1044_v57  ;;  %v1046_v63 = vadd.f32 %v1384_v58, %v301_v55 }
 0x1bf   : > { %1049 = vst [vmem:[#allocation2 + $0x8] sm:$0xff] %v1045_v61  ;;  %v1047_v0 = vadd.f32 %v1385_v62, %v302_v59 }
 0x1c0   : > { %1050 = vst [vmem:[#allocation2 + $0x10] sm:$0xff] %v1046_v63 }
 0x1c1   : > { %1051 = vst [vmem:[#allocation2 + $0x18] sm:$0xff] %v1047_v0 }
 0x1c5   : > { %v1056_v4 = vld [vmem:[#allocation2] sm:$0xff] }
 0x1c6   : > { %v1057_v7 = vld [vmem:[#allocation2 + $0x8] sm:$0xff]  ;;  %v1072_v12 = vadd.f32 %v1065_v10, %v1056_v4 }
 0x1c7   : > { %v1058_v8 = vld [vmem:[#allocation2 + $0x10] sm:$0xff]  ;;  %v1073_v13 = vadd.f32 %v1069_v11, %v1057_v7 }
 0x1c8   : > { %v1059_v9 = vld [vmem:[#allocation2 + $0x18] sm:$0xff]  ;;  %v1074_v14 = vadd.f32 %v1065_v10, %v1058_v8  ;;  %v1076_v16 = vmax.f32 %v1072_v12, 0.0 }
 0x1c9   : > { %v1075_v15 = vadd.f32 %v1069_v11, %v1059_v9  ;;  %v1077_v17 = vmax.f32 %v1073_v13, 0.0 }
 0x1ca   : > { %v1078_v18 = vmax.f32 %v1074_v14, 0.0 }
 0x1cb   : > { %v1079_v19 = vmax.f32 %v1075_v15, 0.0  ;;  %v1379_v20 = vpack.c.bf16 %v1077_v17, %v1076_v16 }
 0x1cd   : > { %v1380_v21 = vpack.c.bf16 %v1079_v19, %v1078_v18  ;;  %1092 = vst [vmem:[%s1977_s27] sm:$0xff] %v1379_v20 }
 0x1cf   : > { %1093 = vst [vmem:[%s1977_s27 + $0x8] sm:$0xff] %v1380_v21 }
 0x1d0 PF: > { %p2151_p11 = scmp.ne.s32.totalorder %s2149_s14, 0 }
 0x1d1   : > { %s1381_s19 = sshll.u32 (%p2151_p11), %s1763_s20, 3 }
 0x1d2   : > { %1100 = sbr.rel (!%p2151_p11) target bundleno = 473 (0x1d9), region = 71  ;;  %s1106_s6 = scalar_lea.vmem (%p2151_p11), %s2137_s3, %s1381_s19 }
 0x1d4   : > { %v1136_v22 = vld [vmem:[%s1977_s27] sm:$0xff] (%p2151_p11) }
 0x1d5   : > { %1137 = vst [vmem:[%s1106_s6] sm:$0xff] (%p2151_p11), %v1136_v22 }
 0x1d6   : > { %v1138_v23 = vld [vmem:[%s1977_s27 + $0x8] sm:$0xff] (%p2151_p11) }
 0x1d7   : > { %1139 = vst [vmem:[%s1106_s6 + $0x10] sm:$0xff] (%p2151_p11), %v1138_v23 }
 0x1d9 PF: > { %s16_s23 = sadd.s32 1, %s1775_s23   ;;  %s2152_s20 = sld [smem:[#allocation11_spill]] }
 0x1da   : > { %p13_p13 = scmp.ge.s32.totalorder %s16_s23, 14   ;;  %s2153_s30 = sld [smem:[#allocation8_spill]] }
 0x1db   : > { %s2154_s25 = sld [smem:[#allocation9_spill]]  ;;  %s2155_s22 = sld [smem:[#allocation10_spill]] }
 0x1dc   : > { %s2156_s12 = smov %s1735_s13  ;;  %s2157_s13 = smov %s1905_s11 }
 0x1dd   : > { %s2158_s14 = smov %s1743_s15  ;;  %s2159_s15 = smov %s1747_s16 }
 0x1de   : > { %s2160_s16 = smov %s1897_s8  ;;  %s2161_s17 = smov %s1755_s18 }
 0x1df   : > { %s2162_s18 = smov %s2152_s20  ;;  %s2163_s19 = smov %s1767_s21 }
 0x1e0   : > { %s2164_s20 = smov %s2153_s30  ;;  %15 = sbr.rel (!%p13_p13) target bundleno = 9 (0x9), region = 152 }
 0x1e1   : > { %s2165_s21 = smov %s2154_s25 }
 0x1e7   :  { %1155 = vsyncpa [#allocation5], 1 }
 0x1e8   :  { %1157 = vsyncpa [#allocation5 + $0x1], 1 }

</bundles_post_ra>
